<compile_context>
chip_gen: v6e
topology: v6e:2x2x1
jax: 0.10.0
libtpu: 0.0.40
codegen_flags: <defaults>
</compile_context>

<pallas_src>
import jax
import jax.numpy as jnp
from jax import lax
from jax.experimental import pallas as pl
from jax.experimental.pallas import tpu as pltpu

INPUT_SIZE = 28
HIDDEN_SIZE = 128
NUM_CLASSES = 10
NUM_LAYERS = 2          # kernel hard-codes the 2-layer stacked LSTM
CLASS_PAD = 128         # lane-dense output width (sliced back to NUM_CLASSES)


def lstm_fc_kernel(x_ref, wih1_ref, whh1_ref, b1_ref, w2_ref, b2_ref,
                   wfc_ref, bfc_ref, out_ref):
    """2-layer LSTM over time + Linear on the last hidden state.

    x_ref:    (T, B, I)   f32   (B already padded to a sublane multiple)
    wih1_ref: (I, 4H)     f32   gate columns permuted to (i, f, o, g)
    whh1_ref: (H, 4H)     f32   "
    b1_ref:   (1, 4H)     f32   b_ih + b_hh, permuted
    w2_ref:   (2H, 4H)    f32   stacked [wih2; whh2], permuted
    b2_ref:   (1, 4H)     f32
    wfc_ref:  (H, CLASS_PAD), bfc_ref: (1, CLASS_PAD)   zero-padded past NUM_CLASSES
    out_ref:  (B, CLASS_PAD)
    """
    T, B, I = x_ref.shape
    H = HIDDEN_SIZE

    wih1 = wih1_ref[...]
    whh1 = whh1_ref[...]
    w2 = w2_ref[...]

    # --- Hoisted layer-1 input projection: one big matmul, bias folded once. ---
    # Reshape (T, B, I) -> (T*B, I) only collapses leading dims (layout-free).
    x2d = x_ref[...].reshape(T * B, I)
    xg1 = jnp.dot(x2d, wih1, preferred_element_type=jnp.float32) + b1_ref[...]

    # Hoist the layer-2 bias broadcast out of the recurrence.
    b2b = jnp.broadcast_to(b2_ref[...], (B, 4 * H))

    def gates_to_hc(gates, c):
        # Gate columns are (i, f, o, g): one sigmoid slab + one tanh slab per cell.
        s = jax.nn.sigmoid(gates[:, :3 * H])
        i = s[:, 0 * H:1 * H]
        f = s[:, 1 * H:2 * H]
        o = s[:, 2 * H:3 * H]
        g = jnp.tanh(gates[:, 3 * H:4 * H])
        c_new = f * c + i * g
        h_new = o * jnp.tanh(c_new)
        return h_new, c_new

    zeros = jnp.zeros((B, H), jnp.float32)
    h1, c1, h2, c2 = zeros, zeros, zeros, zeros

    # Fully unrolled static time loop (== fori_loop(..., unroll=True) for static T):
    # all slices are static and the scheduler sees across iterations.
    for t in range(T):
        g1 = xg1[t * B:(t + 1) * B, :] + jnp.dot(
            h1, whh1, preferred_element_type=jnp.float32)
        h1, c1 = gates_to_hc(g1, c1)

        h12 = jnp.concatenate([h1, h2], axis=1)            # (B, 2H) -> single K=2H dot
        g2 = jnp.dot(h12, w2, preferred_element_type=jnp.float32) + b2b
        h2, c2 = gates_to_hc(g2, c2)

    out_ref[...] = (jnp.dot(h2, wfc_ref[...], preferred_element_type=jnp.float32)
                    + bfc_ref[...])


def init_params(key, input_size=INPUT_SIZE, hidden_size=HIDDEN_SIZE,
                num_classes=NUM_CLASSES):
    """Deterministic params mirroring PyTorch's U(-1/sqrt(H), 1/sqrt(H)) init.
    Weights stored transposed (in_dim, 4H) for right-multiplication; gate order
    is PyTorch's (i, f, g, o) -- the kernel-layout permutation happens in
    pack_params()."""
    H = hidden_size
    k = 1.0 / jnp.sqrt(jnp.float32(H))
    keys = jax.random.split(key, 10)

    def u(key, shape):
        return jax.random.uniform(key, shape, jnp.float32, -k, k)

    return dict(
        wih1=u(keys[0], (input_size, 4 * H)),
        whh1=u(keys[1], (H, 4 * H)),
        b1=u(keys[2], (1, 4 * H)) + u(keys[3], (1, 4 * H)),   # b_ih + b_hh
        wih2=u(keys[4], (H, 4 * H)),
        whh2=u(keys[5], (H, 4 * H)),
        b2=u(keys[6], (1, 4 * H)) + u(keys[7], (1, 4 * H)),
        wfc=u(keys[8], (H, num_classes)),
        bfc=u(keys[9], (1, num_classes)),
    )


def pack_params(params, hidden_size=HIDDEN_SIZE, num_classes=NUM_CLASSES):
    """Offline repack: permute gates (i,f,g,o)->(i,f,o,g), stack layer-2 weights,
    and pad the FC to a lane-dense 128-wide output."""
    H = hidden_size
    perm = jnp.concatenate([jnp.arange(0, H),            # i
                            jnp.arange(H, 2 * H),        # f
                            jnp.arange(3 * H, 4 * H),    # o
                            jnp.arange(2 * H, 3 * H)])   # g

    def reord(w):
        return w[..., perm]

    wfc_pad = jnp.zeros((H, CLASS_PAD), jnp.float32).at[:, :num_classes].set(
        params["wfc"])
    bfc_pad = jnp.zeros((1, CLASS_PAD), jnp.float32).at[:, :num_classes].set(
        params["bfc"])

    return dict(
        wih1=reord(params["wih1"]),
        whh1=reord(params["whh1"]),
        b1=reord(params["b1"]),
        w2=jnp.concatenate([reord(params["wih2"]), reord(params["whh2"])], axis=0),
        b2=reord(params["b2"]),
        wfc=wfc_pad,
        bfc=bfc_pad,
    )


def rnn_forward(x, params):
    """x: (batch, seq, input_size) f32 -> logits (batch, num_classes)."""
    B, T, I = x.shape
    B_pad = max(8, ((B + 7) // 8) * 8)      # sublane multiple

    pk = pack_params(params)

    # (batch, seq, in) -> (seq, batch, in), pad batch with zeros (sliced off below).
    x_tbi = jnp.transpose(x, (1, 0, 2))
    x_pad = jnp.zeros((T, B_pad, I), jnp.float32).at[:, :B, :].set(x_tbi)

    vmem_spec = pl.BlockSpec(memory_space=pltpu.MemorySpace.VMEM)
    args = (x_pad, pk["wih1"], pk["whh1"], pk["b1"],
            pk["w2"], pk["b2"], pk["wfc"], pk["bfc"])

    out = pl.pallas_call(
        lstm_fc_kernel,
        out_shape=jax.ShapeDtypeStruct((B_pad, CLASS_PAD), jnp.float32),
        in_specs=[vmem_spec] * len(args),
        out_specs=vmem_spec,
    )(*args)
    return out[:B, :NUM_CLASSES]


def rnn_reference(x, params):
    """Pure-JAX reference (PyTorch gate order, unfused) for the sanity check."""
    B, T, I = x.shape
    H = HIDDEN_SIZE

    def cell(x_t, h, c, wih, whh, b):
        gates = x_t @ wih + h @ whh + b
        i = jax.nn.sigmoid(gates[:, 0 * H:1 * H])
        f = jax.nn.sigmoid(gates[:, 1 * H:2 * H])
        g = jnp.tanh(gates[:, 2 * H:3 * H])
        o = jax.nn.sigmoid(gates[:, 3 * H:4 * H])
        c = f * c + i * g
        return o * jnp.tanh(c), c

    h1 = c1 = h2 = c2 = jnp.zeros((B, H), jnp.float32)
    for t in range(T):
        h1, c1 = cell(x[:, t, :], h1, c1, params["wih1"], params["whh1"], params["b1"])
        h2, c2 = cell(h1, h2, c2, params["wih2"], params["whh2"], params["b2"])
    return h2 @ params["wfc"] + params["bfc"]


if __name__ == "__main__":
    key = jax.random.PRNGKey(0)
    k_param, k_x = jax.random.split(key)

    batch, seq = 2, 8
    x = jax.random.normal(k_x, (batch, seq, INPUT_SIZE), jnp.float32)
    params = init_params(k_param)

    out = rnn_forward(x, params)
    out = jax.block_until_ready(out)

    ref = rnn_reference(x, params)
    assert out.shape == (batch, NUM_CLASSES)
    assert jnp.allclose(out, ref, atol=1e-4, rtol=1e-4)

    print("KERNEL_OK")
</pallas_src>

<mosaic_0001>
module attributes {stable_mosaic.version = 11 : i64} {
  func.func @lstm_fc_kernel(%arg0: memref<8x8x28xf32, #tpu.memory_space<vmem>>, %arg1: memref<28x512xf32, #tpu.memory_space<vmem>>, %arg2: memref<128x512xf32, #tpu.memory_space<vmem>>, %arg3: memref<1x512xf32, #tpu.memory_space<vmem>>, %arg4: memref<256x512xf32, #tpu.memory_space<vmem>>, %arg5: memref<1x512xf32, #tpu.memory_space<vmem>>, %arg6: memref<128x128xf32, #tpu.memory_space<vmem>>, %arg7: memref<1x128xf32, #tpu.memory_space<vmem>>, %arg8: memref<8x128xf32, #tpu.memory_space<vmem>>) attributes {dimension_semantics = [], scalar_prefetch = 0 : i64, scratch_operands = 0 : i64, tpu.core_type = #tpu.core_type<tc>} {
    %c0 = arith.constant 0 : index
    %c0_0 = arith.constant 0 : index
    %0 = vector.load %arg1[%c0, %c0_0] : memref<28x512xf32, #tpu.memory_space<vmem>>, vector<28x512xf32>
    %c0_1 = arith.constant 0 : index
    %c0_2 = arith.constant 0 : index
    %1 = vector.load %arg2[%c0_1, %c0_2] : memref<128x512xf32, #tpu.memory_space<vmem>>, vector<128x512xf32>
    %c0_3 = arith.constant 0 : index
    %c0_4 = arith.constant 0 : index
    %2 = vector.load %arg4[%c0_3, %c0_4] : memref<256x512xf32, #tpu.memory_space<vmem>>, vector<256x512xf32>
    %c0_5 = arith.constant 0 : index
    %c0_6 = arith.constant 0 : index
    %c0_7 = arith.constant 0 : index
    %3 = vector.load %arg0[%c0_5, %c0_6, %c0_7] : memref<8x8x28xf32, #tpu.memory_space<vmem>>, vector<8x8x28xf32>
    %4 = vector.shape_cast %3 : vector<8x8x28xf32> to vector<64x28xf32>
    %cst = arith.constant dense<0.000000e+00> : vector<64x512xf32>
    %5 = tpu.matmul %4, %0, %cst {dimension_numbers = #tpu.dot_dimension_numbers<[1], [0], [0], [1], [0, 0, 1, 1], [], []>} : vector<64x28xf32>, vector<28x512xf32>, vector<64x512xf32> -> vector<64x512xf32>
    %c0_8 = arith.constant 0 : index
    %c0_9 = arith.constant 0 : index
    %6 = vector.load %arg3[%c0_8, %c0_9] : memref<1x512xf32, #tpu.memory_space<vmem>>, vector<1x512xf32>
    %7 = vector.broadcast %6 : vector<1x512xf32> to vector<64x512xf32>
    %8 = arith.addf %5, %7 : vector<64x512xf32>
    %c0_10 = arith.constant 0 : index
    %c0_11 = arith.constant 0 : index
    %9 = vector.load %arg5[%c0_10, %c0_11] : memref<1x512xf32, #tpu.memory_space<vmem>>, vector<1x512xf32>
    %10 = vector.shape_cast %9 : vector<1x512xf32> to vector<1x512xf32>
    %11 = vector.broadcast %10 : vector<1x512xf32> to vector<8x512xf32>
    %cst_12 = arith.constant 0.000000e+00 : f32
    %12 = vector.broadcast %cst_12 : f32 to vector<8x128xf32>
    %13 = vector.extract_strided_slice %8 {offsets = [0, 0], sizes = [8, 512], strides = [1, 1]} : vector<64x512xf32> to vector<8x512xf32>
    %cst_13 = arith.constant dense<0.000000e+00> : vector<8x512xf32>
    %14 = tpu.matmul %12, %1, %cst_13 {dimension_numbers = #tpu.dot_dimension_numbers<[1], [0], [0], [1], [0, 0, 1, 1], [], []>} : vector<8x128xf32>, vector<128x512xf32>, vector<8x512xf32> -> vector<8x512xf32>
    %15 = arith.addf %13, %14 : vector<8x512xf32>
    %16 = vector.extract_strided_slice %15 {offsets = [0, 0], sizes = [8, 384], strides = [1, 1]} : vector<8x512xf32> to vector<8x384xf32>
    %17 = arith.negf %16 : vector<8x384xf32>
    %18 = math.exp %17 : vector<8x384xf32>
    %cst_14 = arith.constant 1.000000e+00 : f32
    %19 = vector.broadcast %cst_14 : f32 to vector<8x384xf32>
    %20 = arith.addf %19, %18 : vector<8x384xf32>
    %21 = arith.divf %19, %20 : vector<8x384xf32>
    %22 = vector.extract_strided_slice %21 {offsets = [0, 0], sizes = [8, 128], strides = [1, 1]} : vector<8x384xf32> to vector<8x128xf32>
    %23 = vector.extract_strided_slice %21 {offsets = [0, 128], sizes = [8, 128], strides = [1, 1]} : vector<8x384xf32> to vector<8x128xf32>
    %24 = vector.extract_strided_slice %21 {offsets = [0, 256], sizes = [8, 128], strides = [1, 1]} : vector<8x384xf32> to vector<8x128xf32>
    %25 = vector.extract_strided_slice %15 {offsets = [0, 384], sizes = [8, 128], strides = [1, 1]} : vector<8x512xf32> to vector<8x128xf32>
    %26 = math.tanh %25 : vector<8x128xf32>
    %27 = arith.mulf %23, %12 : vector<8x128xf32>
    %28 = arith.mulf %22, %26 : vector<8x128xf32>
    %29 = arith.addf %27, %28 : vector<8x128xf32>
    %30 = math.tanh %29 : vector<8x128xf32>
    %31 = arith.mulf %24, %30 : vector<8x128xf32>
    %32 = tpu.concatenate %31, %12 in 1 : vector<8x128xf32>, vector<8x128xf32> -> vector<8x256xf32>
    %cst_15 = arith.constant dense<0.000000e+00> : vector<8x512xf32>
    %33 = tpu.matmul %32, %2, %cst_15 {dimension_numbers = #tpu.dot_dimension_numbers<[1], [0], [0], [1], [0, 0, 1, 1], [], []>} : vector<8x256xf32>, vector<256x512xf32>, vector<8x512xf32> -> vector<8x512xf32>
    %34 = arith.addf %33, %11 : vector<8x512xf32>
    %35 = vector.extract_strided_slice %34 {offsets = [0, 0], sizes = [8, 384], strides = [1, 1]} : vector<8x512xf32> to vector<8x384xf32>
    %36 = arith.negf %35 : vector<8x384xf32>
    %37 = math.exp %36 : vector<8x384xf32>
    %cst_16 = arith.constant 1.000000e+00 : f32
    %38 = vector.broadcast %cst_16 : f32 to vector<8x384xf32>
    %39 = arith.addf %38, %37 : vector<8x384xf32>
    %40 = arith.divf %38, %39 : vector<8x384xf32>
    %41 = vector.extract_strided_slice %40 {offsets = [0, 0], sizes = [8, 128], strides = [1, 1]} : vector<8x384xf32> to vector<8x128xf32>
    %42 = vector.extract_strided_slice %40 {offsets = [0, 128], sizes = [8, 128], strides = [1, 1]} : vector<8x384xf32> to vector<8x128xf32>
    %43 = vector.extract_strided_slice %40 {offsets = [0, 256], sizes = [8, 128], strides = [1, 1]} : vector<8x384xf32> to vector<8x128xf32>
    %44 = vector.extract_strided_slice %34 {offsets = [0, 384], sizes = [8, 128], strides = [1, 1]} : vector<8x512xf32> to vector<8x128xf32>
    %45 = math.tanh %44 : vector<8x128xf32>
    %46 = arith.mulf %42, %12 : vector<8x128xf32>
    %47 = arith.mulf %41, %45 : vector<8x128xf32>
    %48 = arith.addf %46, %47 : vector<8x128xf32>
    %49 = math.tanh %48 : vector<8x128xf32>
    %50 = arith.mulf %43, %49 : vector<8x128xf32>
    %51 = vector.extract_strided_slice %8 {offsets = [8, 0], sizes = [8, 512], strides = [1, 1]} : vector<64x512xf32> to vector<8x512xf32>
    %cst_17 = arith.constant dense<0.000000e+00> : vector<8x512xf32>
    %52 = tpu.matmul %31, %1, %cst_17 {dimension_numbers = #tpu.dot_dimension_numbers<[1], [0], [0], [1], [0, 0, 1, 1], [], []>} : vector<8x128xf32>, vector<128x512xf32>, vector<8x512xf32> -> vector<8x512xf32>
    %53 = arith.addf %51, %52 : vector<8x512xf32>
    %54 = vector.extract_strided_slice %53 {offsets = [0, 0], sizes = [8, 384], strides = [1, 1]} : vector<8x512xf32> to vector<8x384xf32>
    %55 = arith.negf %54 : vector<8x384xf32>
    %56 = math.exp %55 : vector<8x384xf32>
    %cst_18 = arith.constant 1.000000e+00 : f32
    %57 = vector.broadcast %cst_18 : f32 to vector<8x384xf32>
    %58 = arith.addf %57, %56 : vector<8x384xf32>
    %59 = arith.divf %57, %58 : vector<8x384xf32>
    %60 = vector.extract_strided_slice %59 {offsets = [0, 0], sizes = [8, 128], strides = [1, 1]} : vector<8x384xf32> to vector<8x128xf32>
    %61 = vector.extract_strided_slice %59 {offsets = [0, 128], sizes = [8, 128], strides = [1, 1]} : vector<8x384xf32> to vector<8x128xf32>
    %62 = vector.extract_strided_slice %59 {offsets = [0, 256], sizes = [8, 128], strides = [1, 1]} : vector<8x384xf32> to vector<8x128xf32>
    %63 = vector.extract_strided_slice %53 {offsets = [0, 384], sizes = [8, 128], strides = [1, 1]} : vector<8x512xf32> to vector<8x128xf32>
    %64 = math.tanh %63 : vector<8x128xf32>
    %65 = arith.mulf %61, %29 : vector<8x128xf32>
    %66 = arith.mulf %60, %64 : vector<8x128xf32>
    %67 = arith.addf %65, %66 : vector<8x128xf32>
    %68 = math.tanh %67 : vector<8x128xf32>
    %69 = arith.mulf %62, %68 : vector<8x128xf32>
    %70 = tpu.concatenate %69, %50 in 1 : vector<8x128xf32>, vector<8x128xf32> -> vector<8x256xf32>
    %cst_19 = arith.constant dense<0.000000e+00> : vector<8x512xf32>
    %71 = tpu.matmul %70, %2, %cst_19 {dimension_numbers = #tpu.dot_dimension_numbers<[1], [0], [0], [1], [0, 0, 1, 1], [], []>} : vector<8x256xf32>, vector<256x512xf32>, vector<8x512xf32> -> vector<8x512xf32>
    %72 = arith.addf %71, %11 : vector<8x512xf32>
    %73 = vector.extract_strided_slice %72 {offsets = [0, 0], sizes = [8, 384], strides = [1, 1]} : vector<8x512xf32> to vector<8x384xf32>
    %74 = arith.negf %73 : vector<8x384xf32>
    %75 = math.exp %74 : vector<8x384xf32>
    %cst_20 = arith.constant 1.000000e+00 : f32
    %76 = vector.broadcast %cst_20 : f32 to vector<8x384xf32>
    %77 = arith.addf %76, %75 : vector<8x384xf32>
    %78 = arith.divf %76, %77 : vector<8x384xf32>
    %79 = vector.extract_strided_slice %78 {offsets = [0, 0], sizes = [8, 128], strides = [1, 1]} : vector<8x384xf32> to vector<8x128xf32>
    %80 = vector.extract_strided_slice %78 {offsets = [0, 128], sizes = [8, 128], strides = [1, 1]} : vector<8x384xf32> to vector<8x128xf32>
    %81 = vector.extract_strided_slice %78 {offsets = [0, 256], sizes = [8, 128], strides = [1, 1]} : vector<8x384xf32> to vector<8x128xf32>
    %82 = vector.extract_strided_slice %72 {offsets = [0, 384], sizes = [8, 128], strides = [1, 1]} : vector<8x512xf32> to vector<8x128xf32>
    %83 = math.tanh %82 : vector<8x128xf32>
    %84 = arith.mulf %80, %48 : vector<8x128xf32>
    %85 = arith.mulf %79, %83 : vector<8x128xf32>
    %86 = arith.addf %84, %85 : vector<8x128xf32>
    %87 = math.tanh %86 : vector<8x128xf32>
    %88 = arith.mulf %81, %87 : vector<8x128xf32>
    %89 = vector.extract_strided_slice %8 {offsets = [16, 0], sizes = [8, 512], strides = [1, 1]} : vector<64x512xf32> to vector<8x512xf32>
    %cst_21 = arith.constant dense<0.000000e+00> : vector<8x512xf32>
    %90 = tpu.matmul %69, %1, %cst_21 {dimension_numbers = #tpu.dot_dimension_numbers<[1], [0], [0], [1], [0, 0, 1, 1], [], []>} : vector<8x128xf32>, vector<128x512xf32>, vector<8x512xf32> -> vector<8x512xf32>
    %91 = arith.addf %89, %90 : vector<8x512xf32>
    %92 = vector.extract_strided_slice %91 {offsets = [0, 0], sizes = [8, 384], strides = [1, 1]} : vector<8x512xf32> to vector<8x384xf32>
    %93 = arith.negf %92 : vector<8x384xf32>
    %94 = math.exp %93 : vector<8x384xf32>
    %cst_22 = arith.constant 1.000000e+00 : f32
    %95 = vector.broadcast %cst_22 : f32 to vector<8x384xf32>
    %96 = arith.addf %95, %94 : vector<8x384xf32>
    %97 = arith.divf %95, %96 : vector<8x384xf32>
    %98 = vector.extract_strided_slice %97 {offsets = [0, 0], sizes = [8, 128], strides = [1, 1]} : vector<8x384xf32> to vector<8x128xf32>
    %99 = vector.extract_strided_slice %97 {offsets = [0, 128], sizes = [8, 128], strides = [1, 1]} : vector<8x384xf32> to vector<8x128xf32>
    %100 = vector.extract_strided_slice %97 {offsets = [0, 256], sizes = [8, 128], strides = [1, 1]} : vector<8x384xf32> to vector<8x128xf32>
    %101 = vector.extract_strided_slice %91 {offsets = [0, 384], sizes = [8, 128], strides = [1, 1]} : vector<8x512xf32> to vector<8x128xf32>
    %102 = math.tanh %101 : vector<8x128xf32>
    %103 = arith.mulf %99, %67 : vector<8x128xf32>
    %104 = arith.mulf %98, %102 : vector<8x128xf32>
    %105 = arith.addf %103, %104 : vector<8x128xf32>
    %106 = math.tanh %105 : vector<8x128xf32>
    %107 = arith.mulf %100, %106 : vector<8x128xf32>
    %108 = tpu.concatenate %107, %88 in 1 : vector<8x128xf32>, vector<8x128xf32> -> vector<8x256xf32>
    %cst_23 = arith.constant dense<0.000000e+00> : vector<8x512xf32>
    %109 = tpu.matmul %108, %2, %cst_23 {dimension_numbers = #tpu.dot_dimension_numbers<[1], [0], [0], [1], [0, 0, 1, 1], [], []>} : vector<8x256xf32>, vector<256x512xf32>, vector<8x512xf32> -> vector<8x512xf32>
    %110 = arith.addf %109, %11 : vector<8x512xf32>
    %111 = vector.extract_strided_slice %110 {offsets = [0, 0], sizes = [8, 384], strides = [1, 1]} : vector<8x512xf32> to vector<8x384xf32>
    %112 = arith.negf %111 : vector<8x384xf32>
    %113 = math.exp %112 : vector<8x384xf32>
    %cst_24 = arith.constant 1.000000e+00 : f32
    %114 = vector.broadcast %cst_24 : f32 to vector<8x384xf32>
    %115 = arith.addf %114, %113 : vector<8x384xf32>
    %116 = arith.divf %114, %115 : vector<8x384xf32>
    %117 = vector.extract_strided_slice %116 {offsets = [0, 0], sizes = [8, 128], strides = [1, 1]} : vector<8x384xf32> to vector<8x128xf32>
    %118 = vector.extract_strided_slice %116 {offsets = [0, 128], sizes = [8, 128], strides = [1, 1]} : vector<8x384xf32> to vector<8x128xf32>
    %119 = vector.extract_strided_slice %116 {offsets = [0, 256], sizes = [8, 128], strides = [1, 1]} : vector<8x384xf32> to vector<8x128xf32>
    %120 = vector.extract_strided_slice %110 {offsets = [0, 384], sizes = [8, 128], strides = [1, 1]} : vector<8x512xf32> to vector<8x128xf32>
    %121 = math.tanh %120 : vector<8x128xf32>
    %122 = arith.mulf %118, %86 : vector<8x128xf32>
    %123 = arith.mulf %117, %121 : vector<8x128xf32>
    %124 = arith.addf %122, %123 : vector<8x128xf32>
    %125 = math.tanh %124 : vector<8x128xf32>
    %126 = arith.mulf %119, %125 : vector<8x128xf32>
    %127 = vector.extract_strided_slice %8 {offsets = [24, 0], sizes = [8, 512], strides = [1, 1]} : vector<64x512xf32> to vector<8x512xf32>
    %cst_25 = arith.constant dense<0.000000e+00> : vector<8x512xf32>
    %128 = tpu.matmul %107, %1, %cst_25 {dimension_numbers = #tpu.dot_dimension_numbers<[1], [0], [0], [1], [0, 0, 1, 1], [], []>} : vector<8x128xf32>, vector<128x512xf32>, vector<8x512xf32> -> vector<8x512xf32>
    %129 = arith.addf %127, %128 : vector<8x512xf32>
    %130 = vector.extract_strided_slice %129 {offsets = [0, 0], sizes = [8, 384], strides = [1, 1]} : vector<8x512xf32> to vector<8x384xf32>
    %131 = arith.negf %130 : vector<8x384xf32>
    %132 = math.exp %131 : vector<8x384xf32>
    %cst_26 = arith.constant 1.000000e+00 : f32
    %133 = vector.broadcast %cst_26 : f32 to vector<8x384xf32>
    %134 = arith.addf %133, %132 : vector<8x384xf32>
    %135 = arith.divf %133, %134 : vector<8x384xf32>
    %136 = vector.extract_strided_slice %135 {offsets = [0, 0], sizes = [8, 128], strides = [1, 1]} : vector<8x384xf32> to vector<8x128xf32>
    %137 = vector.extract_strided_slice %135 {offsets = [0, 128], sizes = [8, 128], strides = [1, 1]} : vector<8x384xf32> to vector<8x128xf32>
    %138 = vector.extract_strided_slice %135 {offsets = [0, 256], sizes = [8, 128], strides = [1, 1]} : vector<8x384xf32> to vector<8x128xf32>
    %139 = vector.extract_strided_slice %129 {offsets = [0, 384], sizes = [8, 128], strides = [1, 1]} : vector<8x512xf32> to vector<8x128xf32>
    %140 = math.tanh %139 : vector<8x128xf32>
    %141 = arith.mulf %137, %105 : vector<8x128xf32>
    %142 = arith.mulf %136, %140 : vector<8x128xf32>
    %143 = arith.addf %141, %142 : vector<8x128xf32>
    %144 = math.tanh %143 : vector<8x128xf32>
    %145 = arith.mulf %138, %144 : vector<8x128xf32>
    %146 = tpu.concatenate %145, %126 in 1 : vector<8x128xf32>, vector<8x128xf32> -> vector<8x256xf32>
    %cst_27 = arith.constant dense<0.000000e+00> : vector<8x512xf32>
    %147 = tpu.matmul %146, %2, %cst_27 {dimension_numbers = #tpu.dot_dimension_numbers<[1], [0], [0], [1], [0, 0, 1, 1], [], []>} : vector<8x256xf32>, vector<256x512xf32>, vector<8x512xf32> -> vector<8x512xf32>
    %148 = arith.addf %147, %11 : vector<8x512xf32>
    %149 = vector.extract_strided_slice %148 {offsets = [0, 0], sizes = [8, 384], strides = [1, 1]} : vector<8x512xf32> to vector<8x384xf32>
    %150 = arith.negf %149 : vector<8x384xf32>
    %151 = math.exp %150 : vector<8x384xf32>
    %cst_28 = arith.constant 1.000000e+00 : f32
    %152 = vector.broadcast %cst_28 : f32 to vector<8x384xf32>
    %153 = arith.addf %152, %151 : vector<8x384xf32>
    %154 = arith.divf %152, %153 : vector<8x384xf32>
    %155 = vector.extract_strided_slice %154 {offsets = [0, 0], sizes = [8, 128], strides = [1, 1]} : vector<8x384xf32> to vector<8x128xf32>
    %156 = vector.extract_strided_slice %154 {offsets = [0, 128], sizes = [8, 128], strides = [1, 1]} : vector<8x384xf32> to vector<8x128xf32>
    %157 = vector.extract_strided_slice %154 {offsets = [0, 256], sizes = [8, 128], strides = [1, 1]} : vector<8x384xf32> to vector<8x128xf32>
    %158 = vector.extract_strided_slice %148 {offsets = [0, 384], sizes = [8, 128], strides = [1, 1]} : vector<8x512xf32> to vector<8x128xf32>
    %159 = math.tanh %158 : vector<8x128xf32>
    %160 = arith.mulf %156, %124 : vector<8x128xf32>
    %161 = arith.mulf %155, %159 : vector<8x128xf32>
    %162 = arith.addf %160, %161 : vector<8x128xf32>
    %163 = math.tanh %162 : vector<8x128xf32>
    %164 = arith.mulf %157, %163 : vector<8x128xf32>
    %165 = vector.extract_strided_slice %8 {offsets = [32, 0], sizes = [8, 512], strides = [1, 1]} : vector<64x512xf32> to vector<8x512xf32>
    %cst_29 = arith.constant dense<0.000000e+00> : vector<8x512xf32>
    %166 = tpu.matmul %145, %1, %cst_29 {dimension_numbers = #tpu.dot_dimension_numbers<[1], [0], [0], [1], [0, 0, 1, 1], [], []>} : vector<8x128xf32>, vector<128x512xf32>, vector<8x512xf32> -> vector<8x512xf32>
    %167 = arith.addf %165, %166 : vector<8x512xf32>
    %168 = vector.extract_strided_slice %167 {offsets = [0, 0], sizes = [8, 384], strides = [1, 1]} : vector<8x512xf32> to vector<8x384xf32>
    %169 = arith.negf %168 : vector<8x384xf32>
    %170 = math.exp %169 : vector<8x384xf32>
    %cst_30 = arith.constant 1.000000e+00 : f32
    %171 = vector.broadcast %cst_30 : f32 to vector<8x384xf32>
    %172 = arith.addf %171, %170 : vector<8x384xf32>
    %173 = arith.divf %171, %172 : vector<8x384xf32>
    %174 = vector.extract_strided_slice %173 {offsets = [0, 0], sizes = [8, 128], strides = [1, 1]} : vector<8x384xf32> to vector<8x128xf32>
    %175 = vector.extract_strided_slice %173 {offsets = [0, 128], sizes = [8, 128], strides = [1, 1]} : vector<8x384xf32> to vector<8x128xf32>
    %176 = vector.extract_strided_slice %173 {offsets = [0, 256], sizes = [8, 128], strides = [1, 1]} : vector<8x384xf32> to vector<8x128xf32>
    %177 = vector.extract_strided_slice %167 {offsets = [0, 384], sizes = [8, 128], strides = [1, 1]} : vector<8x512xf32> to vector<8x128xf32>
    %178 = math.tanh %177 : vector<8x128xf32>
    %179 = arith.mulf %175, %143 : vector<8x128xf32>
    %180 = arith.mulf %174, %178 : vector<8x128xf32>
    %181 = arith.addf %179, %180 : vector<8x128xf32>
    %182 = math.tanh %181 : vector<8x128xf32>
    %183 = arith.mulf %176, %182 : vector<8x128xf32>
    %184 = tpu.concatenate %183, %164 in 1 : vector<8x128xf32>, vector<8x128xf32> -> vector<8x256xf32>
    %cst_31 = arith.constant dense<0.000000e+00> : vector<8x512xf32>
    %185 = tpu.matmul %184, %2, %cst_31 {dimension_numbers = #tpu.dot_dimension_numbers<[1], [0], [0], [1], [0, 0, 1, 1], [], []>} : vector<8x256xf32>, vector<256x512xf32>, vector<8x512xf32> -> vector<8x512xf32>
    %186 = arith.addf %185, %11 : vector<8x512xf32>
    %187 = vector.extract_strided_slice %186 {offsets = [0, 0], sizes = [8, 384], strides = [1, 1]} : vector<8x512xf32> to vector<8x384xf32>
    %188 = arith.negf %187 : vector<8x384xf32>
    %189 = math.exp %188 : vector<8x384xf32>
    %cst_32 = arith.constant 1.000000e+00 : f32
    %190 = vector.broadcast %cst_32 : f32 to vector<8x384xf32>
    %191 = arith.addf %190, %189 : vector<8x384xf32>
    %192 = arith.divf %190, %191 : vector<8x384xf32>
    %193 = vector.extract_strided_slice %192 {offsets = [0, 0], sizes = [8, 128], strides = [1, 1]} : vector<8x384xf32> to vector<8x128xf32>
    %194 = vector.extract_strided_slice %192 {offsets = [0, 128], sizes = [8, 128], strides = [1, 1]} : vector<8x384xf32> to vector<8x128xf32>
    %195 = vector.extract_strided_slice %192 {offsets = [0, 256], sizes = [8, 128], strides = [1, 1]} : vector<8x384xf32> to vector<8x128xf32>
    %196 = vector.extract_strided_slice %186 {offsets = [0, 384], sizes = [8, 128], strides = [1, 1]} : vector<8x512xf32> to vector<8x128xf32>
    %197 = math.tanh %196 : vector<8x128xf32>
    %198 = arith.mulf %194, %162 : vector<8x128xf32>
    %199 = arith.mulf %193, %197 : vector<8x128xf32>
    %200 = arith.addf %198, %199 : vector<8x128xf32>
    %201 = math.tanh %200 : vector<8x128xf32>
    %202 = arith.mulf %195, %201 : vector<8x128xf32>
    %203 = vector.extract_strided_slice %8 {offsets = [40, 0], sizes = [8, 512], strides = [1, 1]} : vector<64x512xf32> to vector<8x512xf32>
    %cst_33 = arith.constant dense<0.000000e+00> : vector<8x512xf32>
    %204 = tpu.matmul %183, %1, %cst_33 {dimension_numbers = #tpu.dot_dimension_numbers<[1], [0], [0], [1], [0, 0, 1, 1], [], []>} : vector<8x128xf32>, vector<128x512xf32>, vector<8x512xf32> -> vector<8x512xf32>
    %205 = arith.addf %203, %204 : vector<8x512xf32>
    %206 = vector.extract_strided_slice %205 {offsets = [0, 0], sizes = [8, 384], strides = [1, 1]} : vector<8x512xf32> to vector<8x384xf32>
    %207 = arith.negf %206 : vector<8x384xf32>
    %208 = math.exp %207 : vector<8x384xf32>
    %cst_34 = arith.constant 1.000000e+00 : f32
    %209 = vector.broadcast %cst_34 : f32 to vector<8x384xf32>
    %210 = arith.addf %209, %208 : vector<8x384xf32>
    %211 = arith.divf %209, %210 : vector<8x384xf32>
    %212 = vector.extract_strided_slice %211 {offsets = [0, 0], sizes = [8, 128], strides = [1, 1]} : vector<8x384xf32> to vector<8x128xf32>
    %213 = vector.extract_strided_slice %211 {offsets = [0, 128], sizes = [8, 128], strides = [1, 1]} : vector<8x384xf32> to vector<8x128xf32>
    %214 = vector.extract_strided_slice %211 {offsets = [0, 256], sizes = [8, 128], strides = [1, 1]} : vector<8x384xf32> to vector<8x128xf32>
    %215 = vector.extract_strided_slice %205 {offsets = [0, 384], sizes = [8, 128], strides = [1, 1]} : vector<8x512xf32> to vector<8x128xf32>
    %216 = math.tanh %215 : vector<8x128xf32>
    %217 = arith.mulf %213, %181 : vector<8x128xf32>
    %218 = arith.mulf %212, %216 : vector<8x128xf32>
    %219 = arith.addf %217, %218 : vector<8x128xf32>
    %220 = math.tanh %219 : vector<8x128xf32>
    %221 = arith.mulf %214, %220 : vector<8x128xf32>
    %222 = tpu.concatenate %221, %202 in 1 : vector<8x128xf32>, vector<8x128xf32> -> vector<8x256xf32>
    %cst_35 = arith.constant dense<0.000000e+00> : vector<8x512xf32>
    %223 = tpu.matmul %222, %2, %cst_35 {dimension_numbers = #tpu.dot_dimension_numbers<[1], [0], [0], [1], [0, 0, 1, 1], [], []>} : vector<8x256xf32>, vector<256x512xf32>, vector<8x512xf32> -> vector<8x512xf32>
    %224 = arith.addf %223, %11 : vector<8x512xf32>
    %225 = vector.extract_strided_slice %224 {offsets = [0, 0], sizes = [8, 384], strides = [1, 1]} : vector<8x512xf32> to vector<8x384xf32>
    %226 = arith.negf %225 : vector<8x384xf32>
    %227 = math.exp %226 : vector<8x384xf32>
    %cst_36 = arith.constant 1.000000e+00 : f32
    %228 = vector.broadcast %cst_36 : f32 to vector<8x384xf32>
    %229 = arith.addf %228, %227 : vector<8x384xf32>
    %230 = arith.divf %228, %229 : vector<8x384xf32>
    %231 = vector.extract_strided_slice %230 {offsets = [0, 0], sizes = [8, 128], strides = [1, 1]} : vector<8x384xf32> to vector<8x128xf32>
    %232 = vector.extract_strided_slice %230 {offsets = [0, 128], sizes = [8, 128], strides = [1, 1]} : vector<8x384xf32> to vector<8x128xf32>
    %233 = vector.extract_strided_slice %230 {offsets = [0, 256], sizes = [8, 128], strides = [1, 1]} : vector<8x384xf32> to vector<8x128xf32>
    %234 = vector.extract_strided_slice %224 {offsets = [0, 384], sizes = [8, 128], strides = [1, 1]} : vector<8x512xf32> to vector<8x128xf32>
    %235 = math.tanh %234 : vector<8x128xf32>
    %236 = arith.mulf %232, %200 : vector<8x128xf32>
    %237 = arith.mulf %231, %235 : vector<8x128xf32>
    %238 = arith.addf %236, %237 : vector<8x128xf32>
    %239 = math.tanh %238 : vector<8x128xf32>
    %240 = arith.mulf %233, %239 : vector<8x128xf32>
    %241 = vector.extract_strided_slice %8 {offsets = [48, 0], sizes = [8, 512], strides = [1, 1]} : vector<64x512xf32> to vector<8x512xf32>
    %cst_37 = arith.constant dense<0.000000e+00> : vector<8x512xf32>
    %242 = tpu.matmul %221, %1, %cst_37 {dimension_numbers = #tpu.dot_dimension_numbers<[1], [0], [0], [1], [0, 0, 1, 1], [], []>} : vector<8x128xf32>, vector<128x512xf32>, vector<8x512xf32> -> vector<8x512xf32>
    %243 = arith.addf %241, %242 : vector<8x512xf32>
    %244 = vector.extract_strided_slice %243 {offsets = [0, 0], sizes = [8, 384], strides = [1, 1]} : vector<8x512xf32> to vector<8x384xf32>
    %245 = arith.negf %244 : vector<8x384xf32>
    %246 = math.exp %245 : vector<8x384xf32>
    %cst_38 = arith.constant 1.000000e+00 : f32
    %247 = vector.broadcast %cst_38 : f32 to vector<8x384xf32>
    %248 = arith.addf %247, %246 : vector<8x384xf32>
    %249 = arith.divf %247, %248 : vector<8x384xf32>
    %250 = vector.extract_strided_slice %249 {offsets = [0, 0], sizes = [8, 128], strides = [1, 1]} : vector<8x384xf32> to vector<8x128xf32>
    %251 = vector.extract_strided_slice %249 {offsets = [0, 128], sizes = [8, 128], strides = [1, 1]} : vector<8x384xf32> to vector<8x128xf32>
    %252 = vector.extract_strided_slice %249 {offsets = [0, 256], sizes = [8, 128], strides = [1, 1]} : vector<8x384xf32> to vector<8x128xf32>
    %253 = vector.extract_strided_slice %243 {offsets = [0, 384], sizes = [8, 128], strides = [1, 1]} : vector<8x512xf32> to vector<8x128xf32>
    %254 = math.tanh %253 : vector<8x128xf32>
    %255 = arith.mulf %251, %219 : vector<8x128xf32>
    %256 = arith.mulf %250, %254 : vector<8x128xf32>
    %257 = arith.addf %255, %256 : vector<8x128xf32>
    %258 = math.tanh %257 : vector<8x128xf32>
    %259 = arith.mulf %252, %258 : vector<8x128xf32>
    %260 = tpu.concatenate %259, %240 in 1 : vector<8x128xf32>, vector<8x128xf32> -> vector<8x256xf32>
    %cst_39 = arith.constant dense<0.000000e+00> : vector<8x512xf32>
    %261 = tpu.matmul %260, %2, %cst_39 {dimension_numbers = #tpu.dot_dimension_numbers<[1], [0], [0], [1], [0, 0, 1, 1], [], []>} : vector<8x256xf32>, vector<256x512xf32>, vector<8x512xf32> -> vector<8x512xf32>
    %262 = arith.addf %261, %11 : vector<8x512xf32>
    %263 = vector.extract_strided_slice %262 {offsets = [0, 0], sizes = [8, 384], strides = [1, 1]} : vector<8x512xf32> to vector<8x384xf32>
    %264 = arith.negf %263 : vector<8x384xf32>
    %265 = math.exp %264 : vector<8x384xf32>
    %cst_40 = arith.constant 1.000000e+00 : f32
    %266 = vector.broadcast %cst_40 : f32 to vector<8x384xf32>
    %267 = arith.addf %266, %265 : vector<8x384xf32>
    %268 = arith.divf %266, %267 : vector<8x384xf32>
    %269 = vector.extract_strided_slice %268 {offsets = [0, 0], sizes = [8, 128], strides = [1, 1]} : vector<8x384xf32> to vector<8x128xf32>
    %270 = vector.extract_strided_slice %268 {offsets = [0, 128], sizes = [8, 128], strides = [1, 1]} : vector<8x384xf32> to vector<8x128xf32>
    %271 = vector.extract_strided_slice %268 {offsets = [0, 256], sizes = [8, 128], strides = [1, 1]} : vector<8x384xf32> to vector<8x128xf32>
    %272 = vector.extract_strided_slice %262 {offsets = [0, 384], sizes = [8, 128], strides = [1, 1]} : vector<8x512xf32> to vector<8x128xf32>
    %273 = math.tanh %272 : vector<8x128xf32>
    %274 = arith.mulf %270, %238 : vector<8x128xf32>
    %275 = arith.mulf %269, %273 : vector<8x128xf32>
    %276 = arith.addf %274, %275 : vector<8x128xf32>
    %277 = math.tanh %276 : vector<8x128xf32>
    %278 = arith.mulf %271, %277 : vector<8x128xf32>
    %279 = vector.extract_strided_slice %8 {offsets = [56, 0], sizes = [8, 512], strides = [1, 1]} : vector<64x512xf32> to vector<8x512xf32>
    %cst_41 = arith.constant dense<0.000000e+00> : vector<8x512xf32>
    %280 = tpu.matmul %259, %1, %cst_41 {dimension_numbers = #tpu.dot_dimension_numbers<[1], [0], [0], [1], [0, 0, 1, 1], [], []>} : vector<8x128xf32>, vector<128x512xf32>, vector<8x512xf32> -> vector<8x512xf32>
    %281 = arith.addf %279, %280 : vector<8x512xf32>
    %282 = vector.extract_strided_slice %281 {offsets = [0, 0], sizes = [8, 384], strides = [1, 1]} : vector<8x512xf32> to vector<8x384xf32>
    %283 = arith.negf %282 : vector<8x384xf32>
    %284 = math.exp %283 : vector<8x384xf32>
    %cst_42 = arith.constant 1.000000e+00 : f32
    %285 = vector.broadcast %cst_42 : f32 to vector<8x384xf32>
    %286 = arith.addf %285, %284 : vector<8x384xf32>
    %287 = arith.divf %285, %286 : vector<8x384xf32>
    %288 = vector.extract_strided_slice %287 {offsets = [0, 0], sizes = [8, 128], strides = [1, 1]} : vector<8x384xf32> to vector<8x128xf32>
    %289 = vector.extract_strided_slice %287 {offsets = [0, 128], sizes = [8, 128], strides = [1, 1]} : vector<8x384xf32> to vector<8x128xf32>
    %290 = vector.extract_strided_slice %287 {offsets = [0, 256], sizes = [8, 128], strides = [1, 1]} : vector<8x384xf32> to vector<8x128xf32>
    %291 = vector.extract_strided_slice %281 {offsets = [0, 384], sizes = [8, 128], strides = [1, 1]} : vector<8x512xf32> to vector<8x128xf32>
    %292 = math.tanh %291 : vector<8x128xf32>
    %293 = arith.mulf %289, %257 : vector<8x128xf32>
    %294 = arith.mulf %288, %292 : vector<8x128xf32>
    %295 = arith.addf %293, %294 : vector<8x128xf32>
    %296 = math.tanh %295 : vector<8x128xf32>
    %297 = arith.mulf %290, %296 : vector<8x128xf32>
    %298 = tpu.concatenate %297, %278 in 1 : vector<8x128xf32>, vector<8x128xf32> -> vector<8x256xf32>
    %cst_43 = arith.constant dense<0.000000e+00> : vector<8x512xf32>
    %299 = tpu.matmul %298, %2, %cst_43 {dimension_numbers = #tpu.dot_dimension_numbers<[1], [0], [0], [1], [0, 0, 1, 1], [], []>} : vector<8x256xf32>, vector<256x512xf32>, vector<8x512xf32> -> vector<8x512xf32>
    %300 = arith.addf %299, %11 : vector<8x512xf32>
    %301 = vector.extract_strided_slice %300 {offsets = [0, 0], sizes = [8, 384], strides = [1, 1]} : vector<8x512xf32> to vector<8x384xf32>
    %302 = arith.negf %301 : vector<8x384xf32>
    %303 = math.exp %302 : vector<8x384xf32>
    %cst_44 = arith.constant 1.000000e+00 : f32
    %304 = vector.broadcast %cst_44 : f32 to vector<8x384xf32>
    %305 = arith.addf %304, %303 : vector<8x384xf32>
    %306 = arith.divf %304, %305 : vector<8x384xf32>
    %307 = vector.extract_strided_slice %306 {offsets = [0, 0], sizes = [8, 128], strides = [1, 1]} : vector<8x384xf32> to vector<8x128xf32>
    %308 = vector.extract_strided_slice %306 {offsets = [0, 128], sizes = [8, 128], strides = [1, 1]} : vector<8x384xf32> to vector<8x128xf32>
    %309 = vector.extract_strided_slice %306 {offsets = [0, 256], sizes = [8, 128], strides = [1, 1]} : vector<8x384xf32> to vector<8x128xf32>
    %310 = vector.extract_strided_slice %300 {offsets = [0, 384], sizes = [8, 128], strides = [1, 1]} : vector<8x512xf32> to vector<8x128xf32>
    %311 = math.tanh %310 : vector<8x128xf32>
    %312 = arith.mulf %308, %276 : vector<8x128xf32>
    %313 = arith.mulf %307, %311 : vector<8x128xf32>
    %314 = arith.addf %312, %313 : vector<8x128xf32>
    %315 = math.tanh %314 : vector<8x128xf32>
    %316 = arith.mulf %309, %315 : vector<8x128xf32>
    %c0_45 = arith.constant 0 : index
    %c0_46 = arith.constant 0 : index
    %317 = vector.load %arg6[%c0_45, %c0_46] : memref<128x128xf32, #tpu.memory_space<vmem>>, vector<128x128xf32>
    %cst_47 = arith.constant dense<0.000000e+00> : vector<8x128xf32>
    %318 = tpu.matmul %316, %317, %cst_47 {dimension_numbers = #tpu.dot_dimension_numbers<[1], [0], [0], [1], [0, 0, 1, 1], [], []>} : vector<8x128xf32>, vector<128x128xf32>, vector<8x128xf32> -> vector<8x128xf32>
    %c0_48 = arith.constant 0 : index
    %c0_49 = arith.constant 0 : index
    %319 = vector.load %arg7[%c0_48, %c0_49] : memref<1x128xf32, #tpu.memory_space<vmem>>, vector<1x128xf32>
    %320 = vector.broadcast %319 : vector<1x128xf32> to vector<8x128xf32>
    %321 = arith.addf %318, %320 : vector<8x128xf32>
    %c0_50 = arith.constant 0 : index
    %c0_51 = arith.constant 0 : index
    %322 = vector.load %arg8[%c0_50, %c0_51] : memref<8x128xf32, #tpu.memory_space<vmem>>, vector<8x128xf32>
    tpu.vector_store %arg8[%c0_50, %c0_51], %321 {strides = array<i32>} : memref<8x128xf32, #tpu.memory_space<vmem>>, vector<8x128xf32>,
    return
  }
}

</mosaic_0001>

<bundles_post_ra>
// kernel: tpu_custom_call.1
= control target key start
LH: loop header
LB: loop body
LE: loop exit
PB: predicated region body
PF: predicated region fallthrough
CT: control target
= control target key end

     0   :  { %13 = vsyncpa [#allocation3], 0  ;;  %s7970_s0 = inlined_call_operand.hbm [shape: f32[8,8,28], index: 0, kind: input, shape index: {}]   ;;  %s7971_s1 = inlined_call_operand.hbm [shape: f32[28,512], index: 1, kind: input, shape index: {}]   ;;  %s7972_s2 = inlined_call_operand.hbm [shape: f32[128,512], index: 2, kind: input, shape index: {}]   ;;  %s7973_s3 = inlined_call_operand.vmem [shape: f32[1,512], index: 3, kind: input, shape index: {}]   ;;  %s7974_s4 = inlined_call_operand.hbm [shape: f32[256,512], index: 4, kind: input, shape index: {}]   ;;  %s7975_s5 = inlined_call_operand.vmem [shape: f32[1,512], index: 5, kind: input, shape index: {}]   ;;  %s7976_s6 = inlined_call_operand.hbm [shape: f32[128,128], index: 6, kind: input, shape index: {}]   ;;  %s7977_s7 = inlined_call_operand.vmem [shape: f32[1,128], index: 7, kind: input, shape index: {}]   ;;  %s7978_s8 = inlined_call_operand.hbm [shape: f32[8,128], index: 8, kind: output, shape index: {}]  }
   0x1   :  { %14 = vsyncpa [#allocation6], 0 }
   0x2   :  { %15 = vsyncpa [#allocation9], 0 }
   0x3   :  { %16 = vsyncpa [#allocation4], 0  ;;  %s4532_s27 = smov [#allocation5]  }
   0x4   :  { %s34_s28 = sshll.u32 %s4532_s27, 4  ;;  %s35_s28 = int_to_ptr.vmem [resolvable:$true] %s34_s28 }
   0x5   :  { %s4412_s29 = scalar_lea.vmem %s35_s28, 2048  ;;  %p4417_p1 = scmp.lt.s32.totalorder %s35_s28, %s35_s28 }
   0x6   :  { %p4413_p0 = scmp.ne.s32.totalorder %s35_s28, %s4412_s29  ;;  %p4418_p2 = scmp.lt.s32.totalorder %s4412_s29, %s4412_s29 }
   0x8   :  { %p4419_p3 = por %p4418_p2, %p4417_p1 }
   0xa   :  { %p4420_p4 = pnand %p4419_p3, %p4413_p0 }
   0xc   :  { %4423 = shalt.err (!%p4420_p4)
}
   0xd   :  { %s4533_s30 = smov 512   ;;  %s4534_s9 = smov 32  }
   0xe   :  { %40 = dma.hbm_to_vmem [thread:$0]  %s7971_s1, 2048, %s35_s28, [#allocation6], %s4533_s30, %s4533_s30, %s4534_s9  }
   0xf   :  { %s4535_s12 = smov [#allocation8]   ;;  %s4536_s14 = smov [#allocation2]  }
  0x10   :  { %s60_s13 = sshll.u32 %s4535_s12, 4  ;;  %s22_s15 = sshll.u32 %s4536_s14, 4  ;;  %s61_s13 = int_to_ptr.vmem [resolvable:$true] %s60_s13  ;;  %s23_s15 = int_to_ptr.vmem [resolvable:$true] %s22_s15 }
  0x11   :  { %s4432_s16 = scalar_lea.vmem %s61_s13, 16384  ;;  %p4437_p6 = scmp.lt.s32.totalorder %s61_s13, %s61_s13 }
  0x12   :  { %p4433_p5 = scmp.ne.s32.totalorder %s61_s13, %s4432_s16  ;;  %p4438_p7 = scmp.lt.s32.totalorder %s4432_s16, %s4432_s16 }
  0x14   :  { %p4439_p8 = por %p4438_p7, %p4437_p6 }
  0x16   :  { %p4440_p9 = pnand %p4439_p8, %p4433_p5 }
  0x18   :  { %4443 = shalt.err (!%p4440_p9)
}
  0x19   :  { %66 = dma.hbm_to_vmem [thread:$0]  %s7974_s4, 16384, %s61_s13, [#allocation9], %s4533_s30, %s4533_s30, %s4534_s9  }
  0x1a   :  { %s4452_s1 = scalar_lea.vmem %s23_s15, 1024  ;;  %p4457_p11 = scmp.lt.s32.totalorder %s23_s15, %s23_s15 }
  0x1b   :  { %p4453_p10 = scmp.ne.s32.totalorder %s23_s15, %s4452_s1  ;;  %p4458_p12 = scmp.lt.s32.totalorder %s4452_s1, %s4452_s1 }
  0x1d   :  { %p4459_p13 = por %p4458_p12, %p4457_p11 }
  0x1f   :  { %p4460_p0 = pnand %p4459_p13, %p4453_p10 }
  0x21   :  { %4463 = shalt.err (!%p4460_p0)
}
  0x22   :  { %s4537_s19 = smov 128   ;;  %s4538_s20 = smov 8  }
  0x23   :  { %28 = dma.hbm_to_vmem [thread:$0]  %s7970_s0, 1024, %s23_s15, [#allocation3], %s4537_s19, %s4537_s19, %s4538_s20  }
  0x24   :  { %s4539_s23 = smov [#allocation7]   ;;  %s4540_s25 = smov [#allocation10]  }
  0x25   :  { %s46_s24 = sshll.u32 %s4539_s23, 4  ;;  %s74_s26 = sshll.u32 %s4540_s25, 4  ;;  %s47_s24 = int_to_ptr.vmem [resolvable:$true] %s46_s24  ;;  %s75_s26 = int_to_ptr.vmem [resolvable:$true] %s74_s26 }
  0x26   :  { %s4472_s4 = scalar_lea.vmem %s47_s24, 8192  ;;  %p4477_p2 = scmp.lt.s32.totalorder %s47_s24, %s47_s24 }
  0x27   :  { %p4473_p1 = scmp.ne.s32.totalorder %s47_s24, %s4472_s4  ;;  %p4478_p3 = scmp.lt.s32.totalorder %s4472_s4, %s4472_s4 }
  0x29   :  { %p4479_p4 = por %p4478_p3, %p4477_p2 }
  0x2b   :  { %p4480_p5 = pnand %p4479_p4, %p4473_p1 }
  0x2d   :  { %4483 = shalt.err (!%p4480_p5)
}
  0x2e   :  { %52 = dma.hbm_to_vmem [thread:$0]  %s7972_s2, 8192, %s47_s24, [#allocation6], %s4533_s30, %s4533_s30, %s4534_s9  }
  0x2f   :  { %s4492_s0 = scalar_lea.vmem %s75_s26, 2048  ;;  %p4497_p7 = scmp.lt.s32.totalorder %s75_s26, %s75_s26 }
  0x30   :  { %p4493_p6 = scmp.ne.s32.totalorder %s75_s26, %s4492_s0  ;;  %p4498_p8 = scmp.lt.s32.totalorder %s4492_s0, %s4492_s0 }
  0x32   :  { %p4499_p9 = por %p4498_p8, %p4497_p7 }
  0x34   :  { %p4500_p10 = pnand %p4499_p9, %p4493_p6 }
  0x36   :  { %4503 = shalt.err (!%p4500_p10)
}
  0x37   :  { %80 = dma.hbm_to_vmem [thread:$0]  %s7976_s6, 2048, %s75_s26, [#allocation9], %s4537_s19, %s4537_s19, %s4538_s20  }
  0x38   :  { %4524 = dma.done.wait [#allocation3], 1024  }
  0x39   :  { %4525 = vsyncadd [#allocation3], 4294966272 }
  0x3a   :  { %4526 = dma.done.wait [#allocation6], 10240  }
  0x3b   :  { %4527 = vsyncadd [#allocation6], 4294957056 }
  0x3c   :  { %4528 = dma.done.wait [#allocation9], 18432  }
  0x3d   :  { %4529 = vsyncadd [#allocation9], 4294948864  ;;  %v7979_v0 = vmov 0.0   ;;  %vm361_vm0 = vcmask 1043456   ;;  %v111_v1 = vld [vmem:[#allocation5 + $0x68] sm:$0xf] }
  0x3e   :  { %438 = vmatprep.mubr.f32.mxu0 %v7979_v0  ;;  %551 = vmatprep.mubr.f32.mxu1 %v7979_v0  ;;  %v113_v2 = vld [vmem:[#allocation5 + $0x78] sm:$0xf]  ;;  %v110_v3 = vld [vmem:[#allocation5 + $0x60] sm:$0xf]  ;;  %v112_v4 = vld [vmem:[#allocation5 + $0x70] sm:$0xf] }
  0x3f   :  { %3421 = vmatprep.subr.msk.mxu0 %vm361_vm0, %v111_v1  ;;  %3431 = vmatprep.subr.msk.mxu1 %vm361_vm0, %v113_v2  ;;  %v107_v5 = vld [vmem:[#allocation5 + $0x48] sm:$0xff]  ;;  %v109_v6 = vld [vmem:[#allocation5 + $0x58] sm:$0xff]  ;;  %v106_v7 = vld [vmem:[#allocation5 + $0x40] sm:$0xff]  ;;  %vm336_vm1 = vcmask 228352   ;;  %vm4542_vm2 = vmmov 0   ;;  %s4543_s11 = smov [#allocation11]  }
  0x40   :  { %3422 = vmatpush1.msk.msra.mxu0 %vm361_vm0, %v110_v3  ;;  %3432 = vmatpush1.msk.msra.mxu1 %vm361_vm0, %v112_v4  ;;  %v108_v8 = vld [vmem:[#allocation5 + $0x50] sm:$0xff]  ;;  %v103_v9 = vld [vmem:[#allocation5 + $0x28] sm:$0xff]  ;;  %v105_v10 = vld [vmem:[#allocation5 + $0x38] sm:$0xff]  ;;  %s3410_s12 = sshll.u32 %s4543_s11, 4  ;;  %s3411_s12 = int_to_ptr.vmem [resolvable:$true] %s3410_s12 }
  0x41   :  { %400 = vmatprep.subr.mxu0 %v107_v5  ;;  %513 = vmatprep.subr.mxu1 %v109_v6  ;;  %v102_v11 = vld [vmem:[#allocation5 + $0x20] sm:$0xff]  ;;  %v104_v12 = vld [vmem:[#allocation5 + $0x30] sm:$0xff]  ;;  %v99_v13 = vld [vmem:[#allocation5 + $0x8] sm:$0xff]  ;;  %s4504_s13 = scalar_lea.vmem %s3411_s12, 128  ;;  %p4509_p12 = scmp.lt.s32.totalorder %s3411_s12, %s3411_s12 }
  0x42   :  { %401 = vmatpush1.msra.mxu0 %v106_v7  ;;  %514 = vmatpush1.msra.mxu1 %v108_v8  ;;  %v101_v14 = vld [vmem:[#allocation5 + $0x18] sm:$0xff]  ;;  %v98_v15 = vld [vmem:[#allocation5] sm:$0xff]  ;;  %v100_v16 = vld [vmem:[#allocation5 + $0x10] sm:$0xff]  ;;  %p4505_p11 = scmp.ne.s32.totalorder %s3411_s12, %s4504_s13  ;;  %p4510_p13 = scmp.lt.s32.totalorder %s4504_s13, %s4504_s13 }
  0x43   :  { %402 = vmatprep.subr.mxu0 %v103_v9  ;;  %515 = vmatprep.subr.mxu1 %v105_v10  ;;  %v306_v17 = vld [vmem:[#allocation2] sm:$0xff]  ;;  %v4615_v18 = vld [vmem:[#allocation7 + $0x1e8] sm:$0xff]  ;;  %v4617_v19 = vld [vmem:[#allocation7 + $0x1f8] sm:$0xff] }
  0x44   :  { %403 = vmatpush1.msra.mxu0 %v102_v11  ;;  %516 = vmatpush1.msra.mxu1 %v104_v12  ;;  %v174_v20 = vld [vmem:[#allocation7 + $0x1e0] sm:$0xff]  ;;  %v176_v21 = vld [vmem:[#allocation7 + $0x1f0] sm:$0xff]  ;;  %v171_v22 = vld [vmem:[#allocation7 + $0x1c8] sm:$0xff]  ;;  %p4511_p0 = por %p4510_p13, %p4509_p12 }
  0x45   :  { %404 = vmatprep.subr.mxu0 %v99_v13  ;;  %517 = vmatprep.subr.mxu1 %v101_v14  ;;  %v173_v23 = vld [vmem:[#allocation7 + $0x1d8] sm:$0xff]  ;;  %v170_v24 = vld [vmem:[#allocation7 + $0x1c0] sm:$0xff]  ;;  %v172_v25 = vld [vmem:[#allocation7 + $0x1d0] sm:$0xff] }
  0x46   :  { %405 = vmatpush1.msra.mxu0 %v98_v15  ;;  %518 = vmatpush1.msra.mxu1 %v100_v16  ;;  %v307_v26 = vld [vmem:[#allocation2 + $0x8] sm:$0xff]  ;;  %v169_v28 = vld [vmem:[#allocation7 + $0x1b8] sm:$0xff]  ;;  %v166_v29 = vld [vmem:[#allocation7 + $0x1a0] sm:$0xff]  ;;  %p4512_p1 = pnand %p4511_p0, %p4505_p11 }
  0x47   :  { %3423 = vmatmul.mubr.msk.f32.vlgmr.msra.gmra.mxu0 %vm336_vm1, %v306_v17  ;;  %3433 = vmatmul.mubr.msk.f32.vlgmr.msra.gmra.mxu1 %vm336_vm1, %v306_v17  ;;  %v167_v27 = vld [vmem:[#allocation7 + $0x1a8] sm:$0xff]  ;;  %v168_v30 = vld [vmem:[#allocation7 + $0x1b0] sm:$0xff]  ;;  %v165_v32 = vld [vmem:[#allocation7 + $0x198] sm:$0xff] }
  0x48   :  { %622 = vmatprep.subr.mxu0 %v4615_v18  ;;  %693 = vmatprep.subr.mxu1 %v4617_v19  ;;  %v163_v31 = vld [vmem:[#allocation7 + $0x188] sm:$0xff]  ;;  %v162_v33 = vld [vmem:[#allocation7 + $0x180] sm:$0xff]  ;;  %v164_v34 = vld [vmem:[#allocation7 + $0x190] sm:$0xff] }
  0x49   :  { %623 = vmatpush1.msra.mxu0 %v174_v20  ;;  %694 = vmatpush1.msra.mxu1 %v176_v21  ;;  %v308_v35 = vld [vmem:[#allocation2 + $0x10] sm:$0xff]  ;;  %v159_v36 = vld [vmem:[#allocation7 + $0x168] sm:$0xff]  ;;  %v161_v37 = vld [vmem:[#allocation7 + $0x178] sm:$0xff] }
  0x4a   :  { %624 = vmatprep.subr.mxu0 %v171_v22  ;;  %695 = vmatprep.subr.mxu1 %v173_v23  ;;  %v158_v38 = vld [vmem:[#allocation7 + $0x160] sm:$0xff]  ;;  %v160_v39 = vld [vmem:[#allocation7 + $0x170] sm:$0xff]  ;;  %v4631_v40 = vld [vmem:[#allocation7 + $0x148] sm:$0xff] }
  0x4b   :  { %444 = vmatprep.mubr.f32.mxu0 %v7979_v0  ;;  %557 = vmatprep.mubr.f32.mxu1 %v7979_v0  ;;  %v4633_v41 = vld [vmem:[#allocation7 + $0x158] sm:$0xff]  ;;  %v4635_v42 = vld [vmem:[#allocation7 + $0x140] sm:$0xff]  ;;  %v4637_v43 = vld [vmem:[#allocation7 + $0x150] sm:$0xff] }
  0x4c   :  { %625 = vmatpush1.msra.mxu0 %v170_v24  ;;  %696 = vmatpush1.msra.mxu1 %v172_v25  ;;  %v309_v44 = vld [vmem:[#allocation2 + $0x18] sm:$0xff]  ;;  %v4643_v45 = vld [vmem:[#allocation7 + $0x128] sm:$0xff]  ;;  %v4649_v47 = vld [vmem:[#allocation7 + $0x120] sm:$0xff] }
  0x4d   :  { %3424 = vmatmul.mubr.msk.f32.gmra.mxu0 %vm336_vm1, %v307_v26  ;;  %3434 = vmatmul.mubr.msk.f32.gmra.mxu1 %vm336_vm1, %v307_v26  ;;  %v4645_v46 = vld [vmem:[#allocation7 + $0x138] sm:$0xff]  ;;  %v4651_v48 = vld [vmem:[#allocation7 + $0x130] sm:$0xff]  ;;  %v4655_v49 = vld [vmem:[#allocation7 + $0x108] sm:$0xff] }
  0x4e   :  { %626 = vmatprep.subr.mxu0 %v167_v27  ;;  %697 = vmatprep.subr.mxu1 %v169_v28  ;;  %v4657_v50 = vld [vmem:[#allocation7 + $0x118] sm:$0xff]  ;;  %v4663_v51 = vld [vmem:[#allocation7 + $0x100] sm:$0xff]  ;;  %v4665_v52 = vld [vmem:[#allocation7 + $0x110] sm:$0xff] }
  0x4f   :  { %627 = vmatpush1.msra.mxu0 %v166_v29  ;;  %698 = vmatpush1.msra.mxu1 %v168_v30  ;;  %v310_v53 = vld [vmem:[#allocation2 + $0x20] sm:$0xff]  ;;  %v4671_v54 = vld [vmem:[#allocation7 + $0xe8] sm:$0xff]  ;;  %v4673_v55 = vld [vmem:[#allocation7 + $0xf8] sm:$0xff] }
  0x50   :  { %628 = vmatprep.subr.mxu0 %v163_v31  ;;  %699 = vmatprep.subr.mxu1 %v165_v32  ;;  %v4677_v56 = vld [vmem:[#allocation7 + $0xe0] sm:$0xff]  ;;  %v4679_v57 = vld [vmem:[#allocation7 + $0xf0] sm:$0xff]  ;;  %v4683_v58 = vld [vmem:[#allocation7 + $0xc8] sm:$0xff] }
  0x51   :  { %450 = vmatprep.mubr.f32.mxu0 %v7979_v0  ;;  %563 = vmatprep.mubr.f32.mxu1 %v7979_v0  ;;  %v4685_v59 = vld [vmem:[#allocation7 + $0xd8] sm:$0xff]  ;;  %v4691_v60 = vld [vmem:[#allocation7 + $0xc0] sm:$0xff]  ;;  %v4693_v61 = vld [vmem:[#allocation7 + $0xd0] sm:$0xff] }
  0x52   :  { %629 = vmatpush1.msra.mxu0 %v162_v33  ;;  %700 = vmatpush1.msra.mxu1 %v164_v34  ;;  %v311_v62 = vld [vmem:[#allocation2 + $0x28] sm:$0xff]  ;;  %v4701_v1 = vld [vmem:[#allocation7 + $0xb8] sm:$0xff]  ;;  %v4705_v2 = vld [vmem:[#allocation7 + $0xa0] sm:$0xff] }
  0x53   :  { %3425 = vmatmul.mubr.msk.f32.gmra.mxu0 %vm336_vm1, %v308_v35  ;;  %3435 = vmatmul.mubr.msk.f32.gmra.mxu1 %vm336_vm1, %v308_v35  ;;  %v4699_v63 = vld [vmem:[#allocation7 + $0xa8] sm:$0xff]  ;;  %v4707_v3 = vld [vmem:[#allocation7 + $0xb0] sm:$0xff]  ;;  %v4713_v5 = vld [vmem:[#allocation7 + $0x98] sm:$0xff] }
  0x54   :  { %630 = vmatprep.subr.mxu0 %v159_v36  ;;  %701 = vmatprep.subr.mxu1 %v161_v37  ;;  %v4711_v4 = vld [vmem:[#allocation7 + $0x88] sm:$0xff]  ;;  %v4719_v6 = vld [vmem:[#allocation7 + $0x80] sm:$0xff]  ;;  %v4721_v7 = vld [vmem:[#allocation7 + $0x90] sm:$0xff] }
  0x55   :  { %631 = vmatpush1.msra.mxu0 %v158_v38  ;;  %702 = vmatpush1.msra.mxu1 %v160_v39  ;;  %v312_v8 = vld [vmem:[#allocation2 + $0x30] sm:$0xff]  ;;  %v4727_v9 = vld [vmem:[#allocation7 + $0x68] sm:$0xff]  ;;  %v4729_v10 = vld [vmem:[#allocation7 + $0x78] sm:$0xff] }
  0x56   :  { %632 = vmatprep.subr.mxu0 %v4631_v40  ;;  %703 = vmatprep.subr.mxu1 %v4633_v41  ;;  %v4733_v11 = vld [vmem:[#allocation7 + $0x60] sm:$0xff]  ;;  %v4735_v12 = vld [vmem:[#allocation7 + $0x70] sm:$0xff]  ;;  %v4739_v13 = vld [vmem:[#allocation7 + $0x48] sm:$0xff] }
  0x57   :  { %456 = vmatprep.mubr.f32.mxu0 %v7979_v0  ;;  %569 = vmatprep.mubr.f32.mxu1 %v7979_v0  ;;  %v4741_v14 = vld [vmem:[#allocation7 + $0x58] sm:$0xff]  ;;  %v4747_v15 = vld [vmem:[#allocation7 + $0x40] sm:$0xff]  ;;  %v4749_v16 = vld [vmem:[#allocation7 + $0x50] sm:$0xff] }
  0x58   :  { %633 = vmatpush1.msra.mxu0 %v4635_v42  ;;  %704 = vmatpush1.msra.mxu1 %v4637_v43  ;;  %v313_v17 = vld [vmem:[#allocation2 + $0x38] sm:$0xff]  ;;  %v4755_v20 = vld [vmem:[#allocation7 + $0x28] sm:$0xff]  ;;  %v4761_v22 = vld [vmem:[#allocation7 + $0x20] sm:$0xff] }
  0x59   :  { %3426 = vmatmul.mubr.msk.f32.gmra.mxu0 %vm336_vm1, %v309_v44  ;;  %3436 = vmatmul.mubr.msk.f32.gmra.mxu1 %vm336_vm1, %v309_v44  ;;  %v4757_v21 = vld [vmem:[#allocation7 + $0x38] sm:$0xff]  ;;  %v4763_v23 = vld [vmem:[#allocation7 + $0x30] sm:$0xff]  ;;  %v4767_v24 = vld [vmem:[#allocation7 + $0x8] sm:$0xff] }
  0x5a   :  { %634 = vmatprep.subr.mxu0 %v4643_v45  ;;  %705 = vmatprep.subr.mxu1 %v4645_v46  ;;  %v4769_v25 = vld [vmem:[#allocation7 + $0x18] sm:$0xff]  ;;  %v4773_v26 = vld [vmem:[#allocation7] sm:$0xff]  ;;  %v4777_v27 = vld [vmem:[#allocation7 + $0x10] sm:$0xff] }
  0x5b   :  { %635 = vmatpush1.msra.mxu0 %v4649_v47  ;;  %706 = vmatpush1.msra.mxu1 %v4651_v48  ;;  %8525 = vst [vmem:[#allocation16_spill] sm:$0xff] %v4769_v25  ;;  %8526 = vst [vmem:[#allocation17_spill] sm:$0xff] %v4773_v26  ;;  %v4789_v28 = vld [vmem:[#allocation8 + $0x1e8] sm:$0xff]  ;;  %v4791_v29 = vld [vmem:[#allocation8 + $0x1f8] sm:$0xff] }
  0x5c   :  { %636 = vmatprep.subr.mxu0 %v4655_v49  ;;  %707 = vmatprep.subr.mxu1 %v4657_v50  ;;  %8527 = vst [vmem:[#allocation18_spill] sm:$0xff] %v4777_v27  ;;  %8528 = vst [vmem:[#allocation19_spill] sm:$0xff] %v4789_v28  ;;  %v4793_v30 = vld [vmem:[#allocation8 + $0x1e0] sm:$0xff]  ;;  %v4797_v31 = vld [vmem:[#allocation8 + $0x1f0] sm:$0xff] }
  0x5d   :  { %462 = vmatprep.mubr.f32.mxu0 %v7979_v0  ;;  %575 = vmatprep.mubr.f32.mxu1 %v7979_v0  ;;  %8529 = vst [vmem:[#allocation20_spill] sm:$0xff] %v4791_v29  ;;  %8530 = vst [vmem:[#allocation21_spill] sm:$0xff] %v4793_v30  ;;  %v4801_v32 = vld [vmem:[#allocation8 + $0x1c8] sm:$0xff]  ;;  %v4803_v33 = vld [vmem:[#allocation8 + $0x1d8] sm:$0xff] }
  0x5e   :  { %637 = vmatpush1.msra.mxu0 %v4663_v51  ;;  %708 = vmatpush1.msra.mxu1 %v4665_v52  ;;  %8531 = vst [vmem:[#allocation22_spill] sm:$0xff] %v4797_v31  ;;  %8532 = vst [vmem:[#allocation23_spill] sm:$0xff] %v4801_v32  ;;  %v4805_v34 = vld [vmem:[#allocation8 + $0x1c0] sm:$0xff]  ;;  %v4809_v35 = vld [vmem:[#allocation8 + $0x1d0] sm:$0xff] }
  0x5f   :  { %3427 = vmatmul.mubr.msk.f32.gmra.mxu0 %vm336_vm1, %v310_v53  ;;  %3437 = vmatmul.mubr.msk.f32.gmra.mxu1 %vm336_vm1, %v310_v53  ;;  %8533 = vst [vmem:[#allocation24_spill] sm:$0xff] %v4803_v33  ;;  %8534 = vst [vmem:[#allocation25_spill] sm:$0xff] %v4805_v34  ;;  %v4813_v36 = vld [vmem:[#allocation8 + $0x1a8] sm:$0xff]  ;;  %v4815_v37 = vld [vmem:[#allocation8 + $0x1b8] sm:$0xff] }
  0x60   :  { %638 = vmatprep.subr.mxu0 %v4671_v54  ;;  %709 = vmatprep.subr.mxu1 %v4673_v55  ;;  %8535 = vst [vmem:[#allocation26_spill] sm:$0xff] %v4809_v35  ;;  %8536 = vst [vmem:[#allocation27_spill] sm:$0xff] %v4813_v36  ;;  %v4817_v38 = vld [vmem:[#allocation8 + $0x1a0] sm:$0xff]  ;;  %v4821_v39 = vld [vmem:[#allocation8 + $0x1b0] sm:$0xff] }
  0x61   :  { %639 = vmatpush1.msra.mxu0 %v4677_v56  ;;  %710 = vmatpush1.msra.mxu1 %v4679_v57  ;;  %8537 = vst [vmem:[#allocation28_spill] sm:$0xff] %v4815_v37  ;;  %8538 = vst [vmem:[#allocation29_spill] sm:$0xff] %v4817_v38  ;;  %v4825_v44 = vld [vmem:[#allocation8 + $0x188] sm:$0xff]  ;;  %v4827_v53 = vld [vmem:[#allocation8 + $0x198] sm:$0xff] }
  0x62   :  { %640 = vmatprep.subr.mxu0 %v4683_v58  ;;  %711 = vmatprep.subr.mxu1 %v4685_v59  ;;  %8539 = vst [vmem:[#allocation30_spill] sm:$0xff] %v4821_v39  ;;  %8540 = vst [vmem:[#allocation31_spill] sm:$0xff] %v4825_v44 }
  0x63   :  { %468 = vmatprep.mubr.f32.mxu0 %v7979_v0  ;;  %581 = vmatprep.mubr.f32.mxu1 %v7979_v0  ;;  %8541 = vst [vmem:[#allocation32_spill] sm:$0xff] %v4827_v53 }
  0x64   :  { %641 = vmatpush1.msra.mxu0 %v4691_v60  ;;  %712 = vmatpush1.msra.mxu1 %v4693_v61 }
  0x65   :  { %3428 = vmatmul.mubr.msk.f32.gmra.mxu0 %vm336_vm1, %v311_v62  ;;  %3438 = vmatmul.mubr.msk.f32.gmra.mxu1 %vm336_vm1, %v311_v62  ;;  %v4829_v62 = vld [vmem:[#allocation8 + $0x180] sm:$0xff] }
  0x66   :  { %642 = vmatprep.subr.mxu0 %v4699_v63  ;;  %713 = vmatprep.subr.mxu1 %v4701_v1  ;;  %8542 = vst [vmem:[#allocation33_spill] sm:$0xff] %v4829_v62 }
  0x67   :  { %643 = vmatpush1.msra.mxu0 %v4705_v2  ;;  %714 = vmatpush1.msra.mxu1 %v4707_v3 }
  0x68   :  { %644 = vmatprep.subr.mxu0 %v4711_v4  ;;  %715 = vmatprep.subr.mxu1 %v4713_v5 }
  0x69   :  { %474 = vmatprep.mubr.f32.mxu0 %v7979_v0  ;;  %587 = vmatprep.mubr.f32.mxu1 %v7979_v0 }
  0x6a   :  { %645 = vmatpush1.msra.mxu0 %v4719_v6  ;;  %716 = vmatpush1.msra.mxu1 %v4721_v7 }
  0x6b   :  { %3429 = vmatmul.mubr.msk.f32.gmra.mxu0 %vm336_vm1, %v312_v8  ;;  %3439 = vmatmul.mubr.msk.f32.gmra.mxu1 %vm336_vm1, %v312_v8  ;;  %v4833_v8 = vld [vmem:[#allocation8 + $0x190] sm:$0xff] }
  0x6c   :  { %646 = vmatprep.subr.mxu0 %v4727_v9  ;;  %717 = vmatprep.subr.mxu1 %v4729_v10  ;;  %8543 = vst [vmem:[#allocation34_spill] sm:$0xff] %v4833_v8 }
  0x6d   :  { %647 = vmatpush1.msra.mxu0 %v4733_v11  ;;  %718 = vmatpush1.msra.mxu1 %v4735_v12 }
  0x6e   :  { %648 = vmatprep.subr.mxu0 %v4739_v13  ;;  %719 = vmatprep.subr.mxu1 %v4741_v14 }
  0x6f   :  { %480 = vmatprep.mubr.f32.mxu0 %v7979_v0  ;;  %593 = vmatprep.mubr.f32.mxu1 %v7979_v0 }
  0x70   :  { %649 = vmatpush1.msra.mxu0 %v4747_v15  ;;  %720 = vmatpush1.msra.mxu1 %v4749_v16 }
  0x71   :  { %3430 = vmatmul.mubr.msk.f32.gmra.mxu0 %vm336_vm1, %v313_v17  ;;  %3440 = vmatmul.mubr.msk.f32.gmra.mxu1 %vm336_vm1, %v313_v17  ;;  %v4837_v17 = vld [vmem:[#allocation8 + $0x168] sm:$0xff] }
  0x72   :  { %650 = vmatprep.subr.mxu0 %v4755_v20  ;;  %721 = vmatprep.subr.mxu1 %v4757_v21  ;;  %8544 = vst [vmem:[#allocation35_spill] sm:$0xff] %v4837_v17 }
  0x73   :  { %651 = vmatpush1.msra.mxu0 %v4761_v22  ;;  %722 = vmatpush1.msra.mxu1 %v4763_v23 }
  0x74   :  { %652 = vmatprep.subr.mxu0 %v4767_v24  ;;  %723 = vmatprep.subr.mxu1 %v4769_v25 }
  0x75   :  { %653 = vmatpush1.msra.mxu0 %v4773_v26  ;;  %686 = vmatprep.mubr.f32.mxu0 %v7979_v0 }
  0x76   :  { %724 = vmatpush1.msra.mxu1 %v4777_v27  ;;  %757 = vmatprep.mubr.f32.mxu1 %v7979_v0 }
  0x77   :  { %687 = vmatmul.mubr.f32.vlgmr.msra.gmra.mxu0 %v7979_v0  ;;  %758 = vmatmul.mubr.f32.vlgmr.msra.gmra.mxu1 %v7979_v0 }
  0x78   :  { %856 = vmatprep.mubr.f32.mxu0 %v7979_v0  ;;  %927 = vmatprep.mubr.f32.mxu1 %v7979_v0  ;;  %v4839_v0 = vld [vmem:[#allocation8 + $0x178] sm:$0xff] }
  0x79   :  { %792 = vmatprep.subr.mxu0 %v4789_v28  ;;  %863 = vmatprep.subr.mxu1 %v4791_v29  ;;  %8545 = vst [vmem:[#allocation36_spill] sm:$0xff] %v4839_v0 }
  0x7a   :  { %793 = vmatpush1.msra.mxu0 %v4793_v30  ;;  %864 = vmatpush1.msra.mxu1 %v4797_v31 }
  0x7b   :  { %794 = vmatprep.subr.mxu0 %v4801_v32  ;;  %865 = vmatprep.subr.mxu1 %v4803_v33 }
  0x7c   :  { %795 = vmatpush1.msra.mxu0 %v4805_v34  ;;  %866 = vmatpush1.msra.mxu1 %v4809_v35  ;;  %v5115_v35 = vld [vmem:[#allocation8 + $0x280] sm:$0xff] }
  0x7d   :  { %796 = vmatprep.subr.mxu0 %v4813_v36  ;;  %867 = vmatprep.subr.mxu1 %v4815_v37  ;;  %v5091_v37 = vld [vmem:[#allocation8 + $0x2c0] sm:$0xff]  ;;  %v5099_v36 = vld [vmem:[#allocation8 + $0x2b8] sm:$0xff]  ;;  %8638 = vst [vmem:[#allocation129_spill] sm:$0xff] %v5115_v35 }
  0x7e   :  { %797 = vmatpush1.msra.mxu0 %v4817_v38  ;;  %868 = vmatpush1.msra.mxu1 %v4821_v39  ;;  %v4843_v39 = vld [vmem:[#allocation8 + $0x160] sm:$0xff]  ;;  %v4845_v38 = vld [vmem:[#allocation8 + $0x170] sm:$0xff]  ;;  %8630 = vst [vmem:[#allocation121_spill] sm:$0xff] %v5091_v37  ;;  %8633 = vst [vmem:[#allocation124_spill] sm:$0xff] %v5099_v36 }
  0x7f   :  { %798 = vmatprep.subr.mxu0 %v4825_v44  ;;  %869 = vmatprep.subr.mxu1 %v4827_v53  ;;  %8546 = vst [vmem:[#allocation37_spill] sm:$0xff] %v4843_v39  ;;  %8547 = vst [vmem:[#allocation38_spill] sm:$0xff] %v4845_v38  ;;  %v4849_v53 = vld [vmem:[#allocation8 + $0x148] sm:$0xff]  ;;  %v5083_v44 = vld [vmem:[#allocation8 + $0x2f0] sm:$0xff] }
  0x80   :  { %799 = vmatpush1.msra.mxu0 %v4829_v62  ;;  %870 = vmatpush1.msra.mxu1 %v4833_v8  ;;  %8548 = vst [vmem:[#allocation39_spill] sm:$0xff] %v4849_v53  ;;  %v4851_v62 = vld [vmem:[#allocation8 + $0x158] sm:$0xff]  ;;  %v4855_v8 = vld [vmem:[#allocation8 + $0x140] sm:$0xff]  ;;  %8627 = vst [vmem:[#allocation118_spill] sm:$0xff] %v5083_v44 }
  0x81   :  { %800 = vmatprep.subr.mxu0 %v4837_v17  ;;  %871 = vmatprep.subr.mxu1 %v4839_v0  ;;  %8549 = vst [vmem:[#allocation40_spill] sm:$0xff] %v4851_v62  ;;  %8550 = vst [vmem:[#allocation41_spill] sm:$0xff] %v4855_v8  ;;  %v4857_v17 = vld [vmem:[#allocation8 + $0x150] sm:$0xff]  ;;  %v4861_v0 = vld [vmem:[#allocation8 + $0x128] sm:$0xff] }
  0x82   :  { %801 = vmatpush1.msra.mxu0 %v4843_v39  ;;  %872 = vmatpush1.msra.mxu1 %v4845_v38  ;;  %8551 = vst [vmem:[#allocation42_spill] sm:$0xff] %v4857_v17  ;;  %8552 = vst [vmem:[#allocation43_spill] sm:$0xff] %v4861_v0  ;;  %v4863_v39 = vld [vmem:[#allocation8 + $0x138] sm:$0xff]  ;;  %v4867_v38 = vld [vmem:[#allocation8 + $0x120] sm:$0xff] }
  0x83   :  { %802 = vmatprep.subr.mxu0 %v4849_v53  ;;  %873 = vmatprep.subr.mxu1 %v4851_v62  ;;  %8553 = vst [vmem:[#allocation44_spill] sm:$0xff] %v4863_v39  ;;  %8554 = vst [vmem:[#allocation45_spill] sm:$0xff] %v4867_v38  ;;  %v4869_v53 = vld [vmem:[#allocation8 + $0x130] sm:$0xff]  ;;  %v4873_v62 = vld [vmem:[#allocation8 + $0x108] sm:$0xff] }
  0x84   :  { %803 = vmatpush1.msra.mxu0 %v4855_v8  ;;  %874 = vmatpush1.msra.mxu1 %v4857_v17  ;;  %8555 = vst [vmem:[#allocation46_spill] sm:$0xff] %v4869_v53  ;;  %8556 = vst [vmem:[#allocation47_spill] sm:$0xff] %v4873_v62  ;;  %v4875_v8 = vld [vmem:[#allocation8 + $0x118] sm:$0xff]  ;;  %v4879_v17 = vld [vmem:[#allocation8 + $0x100] sm:$0xff] }
  0x85   :  { %804 = vmatprep.subr.mxu0 %v4861_v0  ;;  %875 = vmatprep.subr.mxu1 %v4863_v39  ;;  %8557 = vst [vmem:[#allocation48_spill] sm:$0xff] %v4875_v8  ;;  %8558 = vst [vmem:[#allocation49_spill] sm:$0xff] %v4879_v17  ;;  %v4881_v0 = vld [vmem:[#allocation8 + $0x110] sm:$0xff]  ;;  %v4885_v39 = vld [vmem:[#allocation8 + $0xe8] sm:$0xff] }
  0x86   :  { %805 = vmatpush1.msra.mxu0 %v4867_v38  ;;  %876 = vmatpush1.msra.mxu1 %v4869_v53  ;;  %8559 = vst [vmem:[#allocation50_spill] sm:$0xff] %v4881_v0  ;;  %8560 = vst [vmem:[#allocation51_spill] sm:$0xff] %v4885_v39  ;;  %v4887_v38 = vld [vmem:[#allocation8 + $0xf8] sm:$0xff]  ;;  %v4891_v53 = vld [vmem:[#allocation8 + $0xe0] sm:$0xff] }
  0x87   :  { %806 = vmatprep.subr.mxu0 %v4873_v62  ;;  %877 = vmatprep.subr.mxu1 %v4875_v8  ;;  %8561 = vst [vmem:[#allocation52_spill] sm:$0xff] %v4887_v38  ;;  %8562 = vst [vmem:[#allocation53_spill] sm:$0xff] %v4891_v53  ;;  %v4893_v62 = vld [vmem:[#allocation8 + $0xf0] sm:$0xff]  ;;  %v4897_v8 = vld [vmem:[#allocation8 + $0xc8] sm:$0xff] }
  0x88   :  { %807 = vmatpush1.msra.mxu0 %v4879_v17  ;;  %878 = vmatpush1.msra.mxu1 %v4881_v0  ;;  %8563 = vst [vmem:[#allocation54_spill] sm:$0xff] %v4893_v62  ;;  %8564 = vst [vmem:[#allocation55_spill] sm:$0xff] %v4897_v8  ;;  %v4899_v17 = vld [vmem:[#allocation8 + $0xd8] sm:$0xff]  ;;  %v4903_v0 = vld [vmem:[#allocation8 + $0xc0] sm:$0xff] }
  0x89   :  { %808 = vmatprep.subr.mxu0 %v4885_v39  ;;  %879 = vmatprep.subr.mxu1 %v4887_v38  ;;  %8565 = vst [vmem:[#allocation56_spill] sm:$0xff] %v4899_v17  ;;  %8566 = vst [vmem:[#allocation57_spill] sm:$0xff] %v4903_v0  ;;  %v4905_v39 = vld [vmem:[#allocation8 + $0xd0] sm:$0xff]  ;;  %v4909_v38 = vld [vmem:[#allocation8 + $0xa8] sm:$0xff] }
  0x8a   :  { %809 = vmatpush1.msra.mxu0 %v4891_v53  ;;  %880 = vmatpush1.msra.mxu1 %v4893_v62  ;;  %8567 = vst [vmem:[#allocation58_spill] sm:$0xff] %v4905_v39  ;;  %8568 = vst [vmem:[#allocation59_spill] sm:$0xff] %v4909_v38  ;;  %v4911_v53 = vld [vmem:[#allocation8 + $0xb8] sm:$0xff]  ;;  %v4915_v62 = vld [vmem:[#allocation8 + $0xa0] sm:$0xff] }
  0x8b   :  { %810 = vmatprep.subr.mxu0 %v4897_v8  ;;  %881 = vmatprep.subr.mxu1 %v4899_v17  ;;  %8569 = vst [vmem:[#allocation60_spill] sm:$0xff] %v4911_v53  ;;  %8570 = vst [vmem:[#allocation61_spill] sm:$0xff] %v4915_v62  ;;  %v4917_v8 = vld [vmem:[#allocation8 + $0xb0] sm:$0xff]  ;;  %v4921_v17 = vld [vmem:[#allocation8 + $0x88] sm:$0xff] }
  0x8c   :  { %811 = vmatpush1.msra.mxu0 %v4903_v0  ;;  %882 = vmatpush1.msra.mxu1 %v4905_v39  ;;  %8571 = vst [vmem:[#allocation62_spill] sm:$0xff] %v4917_v8  ;;  %8572 = vst [vmem:[#allocation63_spill] sm:$0xff] %v4921_v17  ;;  %v4923_v0 = vld [vmem:[#allocation8 + $0x98] sm:$0xff]  ;;  %v4927_v39 = vld [vmem:[#allocation8 + $0x80] sm:$0xff] }
  0x8d   :  { %812 = vmatprep.subr.mxu0 %v4909_v38  ;;  %883 = vmatprep.subr.mxu1 %v4911_v53  ;;  %8573 = vst [vmem:[#allocation64_spill] sm:$0xff] %v4923_v0  ;;  %8574 = vst [vmem:[#allocation65_spill] sm:$0xff] %v4927_v39  ;;  %v4929_v38 = vld [vmem:[#allocation8 + $0x90] sm:$0xff]  ;;  %v4933_v53 = vld [vmem:[#allocation8 + $0x68] sm:$0xff] }
  0x8e   :  { %813 = vmatpush1.msra.mxu0 %v4915_v62  ;;  %884 = vmatpush1.msra.mxu1 %v4917_v8  ;;  %8575 = vst [vmem:[#allocation66_spill] sm:$0xff] %v4929_v38  ;;  %8576 = vst [vmem:[#allocation67_spill] sm:$0xff] %v4933_v53  ;;  %v4935_v62 = vld [vmem:[#allocation8 + $0x78] sm:$0xff]  ;;  %v4939_v8 = vld [vmem:[#allocation8 + $0x60] sm:$0xff] }
  0x8f   :  { %814 = vmatprep.subr.mxu0 %v4921_v17  ;;  %885 = vmatprep.subr.mxu1 %v4923_v0  ;;  %8577 = vst [vmem:[#allocation68_spill] sm:$0xff] %v4935_v62  ;;  %8578 = vst [vmem:[#allocation69_spill] sm:$0xff] %v4939_v8  ;;  %v4941_v17 = vld [vmem:[#allocation8 + $0x70] sm:$0xff]  ;;  %v4945_v0 = vld [vmem:[#allocation8 + $0x48] sm:$0xff] }
  0x90   :  { %815 = vmatpush1.msra.mxu0 %v4927_v39  ;;  %886 = vmatpush1.msra.mxu1 %v4929_v38  ;;  %8579 = vst [vmem:[#allocation70_spill] sm:$0xff] %v4941_v17  ;;  %8580 = vst [vmem:[#allocation71_spill] sm:$0xff] %v4945_v0  ;;  %v4947_v39 = vld [vmem:[#allocation8 + $0x58] sm:$0xff]  ;;  %v4951_v38 = vld [vmem:[#allocation8 + $0x40] sm:$0xff] }
  0x91   :  { %816 = vmatprep.subr.mxu0 %v4933_v53  ;;  %887 = vmatprep.subr.mxu1 %v4935_v62  ;;  %8581 = vst [vmem:[#allocation72_spill] sm:$0xff] %v4947_v39  ;;  %8582 = vst [vmem:[#allocation73_spill] sm:$0xff] %v4951_v38  ;;  %v4953_v53 = vld [vmem:[#allocation8 + $0x50] sm:$0xff]  ;;  %v4957_v62 = vld [vmem:[#allocation8 + $0x28] sm:$0xff] }
  0x92   :  { %817 = vmatpush1.msra.mxu0 %v4939_v8  ;;  %888 = vmatpush1.msra.mxu1 %v4941_v17  ;;  %8583 = vst [vmem:[#allocation74_spill] sm:$0xff] %v4953_v53  ;;  %8584 = vst [vmem:[#allocation75_spill] sm:$0xff] %v4957_v62  ;;  %v4959_v8 = vld [vmem:[#allocation8 + $0x38] sm:$0xff]  ;;  %v4963_v17 = vld [vmem:[#allocation8 + $0x20] sm:$0xff] }
  0x93   :  { %818 = vmatprep.subr.mxu0 %v4945_v0  ;;  %889 = vmatprep.subr.mxu1 %v4947_v39  ;;  %8585 = vst [vmem:[#allocation76_spill] sm:$0xff] %v4959_v8  ;;  %8586 = vst [vmem:[#allocation77_spill] sm:$0xff] %v4963_v17  ;;  %v4965_v0 = vld [vmem:[#allocation8 + $0x30] sm:$0xff]  ;;  %v4969_v39 = vld [vmem:[#allocation8 + $0x8] sm:$0xff] }
  0x94   :  { %819 = vmatpush1.msra.mxu0 %v4951_v38  ;;  %890 = vmatpush1.msra.mxu1 %v4953_v53  ;;  %8587 = vst [vmem:[#allocation78_spill] sm:$0xff] %v4965_v0  ;;  %8588 = vst [vmem:[#allocation79_spill] sm:$0xff] %v4969_v39  ;;  %v4971_v38 = vld [vmem:[#allocation8 + $0x18] sm:$0xff]  ;;  %v4975_v53 = vld [vmem:[#allocation8] sm:$0xff] }
  0x95   :  { %820 = vmatprep.subr.mxu0 %v4957_v62  ;;  %891 = vmatprep.subr.mxu1 %v4959_v8  ;;  %8589 = vst [vmem:[#allocation80_spill] sm:$0xff] %v4971_v38  ;;  %8590 = vst [vmem:[#allocation81_spill] sm:$0xff] %v4975_v53  ;;  %v4977_v62 = vld [vmem:[#allocation8 + $0x10] sm:$0xff]  ;;  %v4981_v8 = vld [vmem:[#allocation8 + $0x3e8] sm:$0xff] }
  0x96   :  { %821 = vmatpush1.msra.mxu0 %v4963_v17  ;;  %892 = vmatpush1.msra.mxu1 %v4965_v0  ;;  %8591 = vst [vmem:[#allocation82_spill] sm:$0xff] %v4977_v62  ;;  %8592 = vst [vmem:[#allocation83_spill] sm:$0xff] %v4981_v8  ;;  %v4983_v17 = vld [vmem:[#allocation8 + $0x3f8] sm:$0xff]  ;;  %v4987_v0 = vld [vmem:[#allocation8 + $0x3e0] sm:$0xff] }
  0x97   :  { %822 = vmatprep.subr.mxu0 %v4969_v39  ;;  %893 = vmatprep.subr.mxu1 %v4971_v38  ;;  %8593 = vst [vmem:[#allocation84_spill] sm:$0xff] %v4983_v17  ;;  %8594 = vst [vmem:[#allocation85_spill] sm:$0xff] %v4987_v0  ;;  %v4989_v39 = vld [vmem:[#allocation8 + $0x3f0] sm:$0xff]  ;;  %v4993_v38 = vld [vmem:[#allocation8 + $0x3c8] sm:$0xff] }
  0x98   :  { %823 = vmatpush1.msra.mxu0 %v4975_v53  ;;  %894 = vmatpush1.msra.mxu1 %v4977_v62  ;;  %8595 = vst [vmem:[#allocation86_spill] sm:$0xff] %v4989_v39  ;;  %8596 = vst [vmem:[#allocation87_spill] sm:$0xff] %v4993_v38  ;;  %v4995_v53 = vld [vmem:[#allocation8 + $0x3d8] sm:$0xff]  ;;  %v4999_v62 = vld [vmem:[#allocation8 + $0x3c0] sm:$0xff] }
  0x99   :  { %824 = vmatprep.subr.mxu0 %v4981_v8  ;;  %895 = vmatprep.subr.mxu1 %v4983_v17  ;;  %8597 = vst [vmem:[#allocation88_spill] sm:$0xff] %v4995_v53  ;;  %8598 = vst [vmem:[#allocation89_spill] sm:$0xff] %v4999_v62  ;;  %v5001_v8 = vld [vmem:[#allocation8 + $0x3d0] sm:$0xff]  ;;  %v5005_v17 = vld [vmem:[#allocation8 + $0x3a8] sm:$0xff] }
  0x9a   :  { %825 = vmatpush2.msra.mxu0 %v4987_v0  ;;  %896 = vmatpush2.msra.mxu1 %v4989_v39  ;;  %8599 = vst [vmem:[#allocation90_spill] sm:$0xff] %v5001_v8  ;;  %8600 = vst [vmem:[#allocation91_spill] sm:$0xff] %v5005_v17  ;;  %v5007_v0 = vld [vmem:[#allocation8 + $0x3b8] sm:$0xff]  ;;  %v5011_v39 = vld [vmem:[#allocation8 + $0x3a0] sm:$0xff] }
  0x9b   :  { %826 = vmatprep.subr.mxu0 %v4993_v38  ;;  %897 = vmatprep.subr.mxu1 %v4995_v53  ;;  %8601 = vst [vmem:[#allocation92_spill] sm:$0xff] %v5007_v0  ;;  %8602 = vst [vmem:[#allocation93_spill] sm:$0xff] %v5011_v39  ;;  %v5013_v38 = vld [vmem:[#allocation8 + $0x3b0] sm:$0xff]  ;;  %v5017_v53 = vld [vmem:[#allocation8 + $0x388] sm:$0xff] }
  0x9c   :  { %827 = vmatpush2.msra.mxu0 %v4999_v62  ;;  %898 = vmatpush2.msra.mxu1 %v5001_v8  ;;  %8603 = vst [vmem:[#allocation94_spill] sm:$0xff] %v5013_v38  ;;  %8604 = vst [vmem:[#allocation95_spill] sm:$0xff] %v5017_v53  ;;  %v5019_v62 = vld [vmem:[#allocation8 + $0x398] sm:$0xff]  ;;  %v5023_v8 = vld [vmem:[#allocation8 + $0x380] sm:$0xff] }
  0x9d   :  { %828 = vmatprep.subr.mxu0 %v5005_v17  ;;  %899 = vmatprep.subr.mxu1 %v5007_v0  ;;  %8605 = vst [vmem:[#allocation96_spill] sm:$0xff] %v5019_v62  ;;  %8606 = vst [vmem:[#allocation97_spill] sm:$0xff] %v5023_v8  ;;  %v5025_v17 = vld [vmem:[#allocation8 + $0x390] sm:$0xff]  ;;  %v5029_v0 = vld [vmem:[#allocation8 + $0x368] sm:$0xff] }
  0x9e   :  { %829 = vmatpush2.msra.mxu0 %v5011_v39  ;;  %900 = vmatpush2.msra.mxu1 %v5013_v38  ;;  %8607 = vst [vmem:[#allocation98_spill] sm:$0xff] %v5025_v17  ;;  %8608 = vst [vmem:[#allocation99_spill] sm:$0xff] %v5029_v0  ;;  %v5031_v39 = vld [vmem:[#allocation8 + $0x378] sm:$0xff]  ;;  %v5035_v38 = vld [vmem:[#allocation8 + $0x360] sm:$0xff] }
  0x9f   :  { %830 = vmatprep.subr.mxu0 %v5017_v53  ;;  %901 = vmatprep.subr.mxu1 %v5019_v62  ;;  %8609 = vst [vmem:[#allocation100_spill] sm:$0xff] %v5031_v39  ;;  %8610 = vst [vmem:[#allocation101_spill] sm:$0xff] %v5035_v38  ;;  %v5037_v53 = vld [vmem:[#allocation8 + $0x370] sm:$0xff]  ;;  %v5041_v62 = vld [vmem:[#allocation8 + $0x348] sm:$0xff] }
  0xa0   :  { %831 = vmatpush2.msra.mxu0 %v5023_v8  ;;  %902 = vmatpush2.msra.mxu1 %v5025_v17  ;;  %8611 = vst [vmem:[#allocation102_spill] sm:$0xff] %v5037_v53  ;;  %8612 = vst [vmem:[#allocation103_spill] sm:$0xff] %v5041_v62  ;;  %v5043_v8 = vld [vmem:[#allocation8 + $0x358] sm:$0xff]  ;;  %v5047_v17 = vld [vmem:[#allocation8 + $0x340] sm:$0xff] }
  0xa1   :  { %832 = vmatprep.subr.mxu0 %v5029_v0  ;;  %903 = vmatprep.subr.mxu1 %v5031_v39  ;;  %8613 = vst [vmem:[#allocation104_spill] sm:$0xff] %v5043_v8  ;;  %8614 = vst [vmem:[#allocation105_spill] sm:$0xff] %v5047_v17  ;;  %v5049_v0 = vld [vmem:[#allocation8 + $0x350] sm:$0xff]  ;;  %v5053_v39 = vld [vmem:[#allocation8 + $0x328] sm:$0xff] }
  0xa2   :  { %833 = vmatpush2.msra.mxu0 %v5035_v38  ;;  %904 = vmatpush2.msra.mxu1 %v5037_v53  ;;  %8615 = vst [vmem:[#allocation106_spill] sm:$0xff] %v5049_v0  ;;  %8616 = vst [vmem:[#allocation107_spill] sm:$0xff] %v5053_v39  ;;  %v5055_v38 = vld [vmem:[#allocation8 + $0x338] sm:$0xff]  ;;  %v5059_v53 = vld [vmem:[#allocation8 + $0x320] sm:$0xff] }
  0xa3   :  { %834 = vmatprep.subr.mxu0 %v5041_v62  ;;  %905 = vmatprep.subr.mxu1 %v5043_v8  ;;  %8617 = vst [vmem:[#allocation108_spill] sm:$0xff] %v5055_v38  ;;  %8618 = vst [vmem:[#allocation109_spill] sm:$0xff] %v5059_v53  ;;  %v5061_v62 = vld [vmem:[#allocation8 + $0x330] sm:$0xff]  ;;  %v5065_v8 = vld [vmem:[#allocation8 + $0x308] sm:$0xff] }
  0xa4   :  { %835 = vmatpush2.msra.mxu0 %v5047_v17  ;;  %906 = vmatpush2.msra.mxu1 %v5049_v0  ;;  %8619 = vst [vmem:[#allocation110_spill] sm:$0xff] %v5061_v62  ;;  %8620 = vst [vmem:[#allocation111_spill] sm:$0xff] %v5065_v8  ;;  %v5067_v17 = vld [vmem:[#allocation8 + $0x318] sm:$0xff]  ;;  %v5071_v0 = vld [vmem:[#allocation8 + $0x300] sm:$0xff] }
  0xa5   :  { %836 = vmatprep.subr.mxu0 %v5053_v39  ;;  %907 = vmatprep.subr.mxu1 %v5055_v38  ;;  %8621 = vst [vmem:[#allocation112_spill] sm:$0xff] %v5067_v17  ;;  %8622 = vst [vmem:[#allocation113_spill] sm:$0xff] %v5071_v0  ;;  %v5073_v39 = vld [vmem:[#allocation8 + $0x310] sm:$0xff]  ;;  %v5075_v38 = vld [vmem:[#allocation8 + $0x2e8] sm:$0xff] }
  0xa6   :  { %837 = vmatpush2.msra.mxu0 %v5059_v53  ;;  %908 = vmatpush2.msra.mxu1 %v5061_v62  ;;  %8623 = vst [vmem:[#allocation114_spill] sm:$0xff] %v5073_v39  ;;  %8624 = vst [vmem:[#allocation115_spill] sm:$0xff] %v5075_v38  ;;  %v5079_v53 = vld [vmem:[#allocation8 + $0x2f8] sm:$0xff]  ;;  %v5081_v62 = vld [vmem:[#allocation8 + $0x2e0] sm:$0xff] }
  0xa7   :  { %838 = vmatprep.subr.mxu0 %v5065_v8  ;;  %909 = vmatprep.subr.mxu1 %v5067_v17  ;;  %8625 = vst [vmem:[#allocation116_spill] sm:$0xff] %v5079_v53  ;;  %8626 = vst [vmem:[#allocation117_spill] sm:$0xff] %v5081_v62  ;;  %v5087_v17 = vld [vmem:[#allocation8 + $0x2c8] sm:$0xff]  ;;  %v5089_v8 = vld [vmem:[#allocation8 + $0x2d8] sm:$0xff] }
  0xa8   :  { %839 = vmatpush2.msra.mxu0 %v5071_v0  ;;  %910 = vmatpush2.msra.mxu1 %v5073_v39  ;;  %8628 = vst [vmem:[#allocation119_spill] sm:$0xff] %v5087_v17  ;;  %8629 = vst [vmem:[#allocation120_spill] sm:$0xff] %v5089_v8  ;;  %v5095_v39 = vld [vmem:[#allocation8 + $0x2d0] sm:$0xff]  ;;  %v5097_v0 = vld [vmem:[#allocation8 + $0x2a8] sm:$0xff] }
  0xa9   :  { %840 = vmatprep.subr.mxu0 %v5075_v38  ;;  %911 = vmatprep.subr.mxu1 %v5079_v53  ;;  %8631 = vst [vmem:[#allocation122_spill] sm:$0xff] %v5095_v39  ;;  %8632 = vst [vmem:[#allocation123_spill] sm:$0xff] %v5097_v0  ;;  %v5103_v53 = vld [vmem:[#allocation8 + $0x2a0] sm:$0xff]  ;;  %v5105_v38 = vld [vmem:[#allocation8 + $0x2b0] sm:$0xff] }
  0xaa   :  { %841 = vmatpush2.msra.mxu0 %v5081_v62  ;;  %912 = vmatpush2.msra.mxu1 %v5083_v44  ;;  %8634 = vst [vmem:[#allocation125_spill] sm:$0xff] %v5103_v53  ;;  %8635 = vst [vmem:[#allocation126_spill] sm:$0xff] %v5105_v38  ;;  %v5109_v62 = vld [vmem:[#allocation8 + $0x288] sm:$0xff]  ;;  %v5111_v44 = vld [vmem:[#allocation8 + $0x298] sm:$0xff] }
  0xab   :  { %842 = vmatprep.subr.mxu0 %v5087_v17  ;;  %913 = vmatprep.subr.mxu1 %v5089_v8  ;;  %8636 = vst [vmem:[#allocation127_spill] sm:$0xff] %v5109_v62  ;;  %8637 = vst [vmem:[#allocation128_spill] sm:$0xff] %v5111_v44  ;;  %v5117_v17 = vld [vmem:[#allocation8 + $0x290] sm:$0xff]  ;;  %v5121_v8 = vld [vmem:[#allocation8 + $0x268] sm:$0xff] }
  0xac   :  { %843 = vmatpush2.msra.mxu0 %v5091_v37  ;;  %914 = vmatpush2.msra.mxu1 %v5095_v39  ;;  %8639 = vst [vmem:[#allocation130_spill] sm:$0xff] %v5117_v17  ;;  %8640 = vst [vmem:[#allocation131_spill] sm:$0xff] %v5121_v8  ;;  %v5123_v37 = vld [vmem:[#allocation8 + $0x278] sm:$0xff]  ;;  %v5127_v39 = vld [vmem:[#allocation8 + $0x260] sm:$0xff] }
  0xad   :  { %844 = vmatprep.subr.mxu0 %v5097_v0  ;;  %915 = vmatprep.subr.mxu1 %v5099_v36  ;;  %8641 = vst [vmem:[#allocation132_spill] sm:$0xff] %v5123_v37  ;;  %8642 = vst [vmem:[#allocation133_spill] sm:$0xff] %v5127_v39  ;;  %v5129_v0 = vld [vmem:[#allocation8 + $0x270] sm:$0xff]  ;;  %v5133_v36 = vld [vmem:[#allocation8 + $0x248] sm:$0xff] }
  0xae   :  { %845 = vmatpush2.msra.mxu0 %v5103_v53  ;;  %916 = vmatpush2.msra.mxu1 %v5105_v38  ;;  %8643 = vst [vmem:[#allocation134_spill] sm:$0xff] %v5129_v0  ;;  %8644 = vst [vmem:[#allocation135_spill] sm:$0xff] %v5133_v36  ;;  %v5135_v53 = vld [vmem:[#allocation8 + $0x258] sm:$0xff]  ;;  %v5139_v38 = vld [vmem:[#allocation8 + $0x240] sm:$0xff] }
  0xaf   :  { %846 = vmatprep.subr.mxu0 %v5109_v62  ;;  %917 = vmatprep.subr.mxu1 %v5111_v44  ;;  %8645 = vst [vmem:[#allocation136_spill] sm:$0xff] %v5135_v53  ;;  %8646 = vst [vmem:[#allocation137_spill] sm:$0xff] %v5139_v38  ;;  %v5141_v62 = vld [vmem:[#allocation8 + $0x250] sm:$0xff]  ;;  %v5145_v44 = vld [vmem:[#allocation8 + $0x228] sm:$0xff] }
  0xb0   :  { %847 = vmatpush2.msra.mxu0 %v5115_v35  ;;  %918 = vmatpush2.msra.mxu1 %v5117_v17  ;;  %8647 = vst [vmem:[#allocation138_spill] sm:$0xff] %v5141_v62  ;;  %8648 = vst [vmem:[#allocation139_spill] sm:$0xff] %v5145_v44  ;;  %v5147_v35 = vld [vmem:[#allocation8 + $0x238] sm:$0xff]  ;;  %v5151_v17 = vld [vmem:[#allocation8 + $0x220] sm:$0xff] }
  0xb1   :  { %848 = vmatprep.subr.mxu0 %v5121_v8  ;;  %919 = vmatprep.subr.mxu1 %v5123_v37  ;;  %8649 = vst [vmem:[#allocation140_spill] sm:$0xff] %v5147_v35  ;;  %8650 = vst [vmem:[#allocation141_spill] sm:$0xff] %v5151_v17  ;;  %v5153_v8 = vld [vmem:[#allocation8 + $0x230] sm:$0xff]  ;;  %v5157_v37 = vld [vmem:[#allocation8 + $0x208] sm:$0xff] }
  0xb2   :  { %849 = vmatpush2.msra.mxu0 %v5127_v39  ;;  %920 = vmatpush2.msra.mxu1 %v5129_v0  ;;  %8651 = vst [vmem:[#allocation142_spill] sm:$0xff] %v5153_v8  ;;  %8652 = vst [vmem:[#allocation143_spill] sm:$0xff] %v5157_v37  ;;  %v5159_v39 = vld [vmem:[#allocation8 + $0x218] sm:$0xff]  ;;  %v5163_v0 = vld [vmem:[#allocation8 + $0x200] sm:$0xff] }
  0xb3   :  { %850 = vmatprep.subr.mxu0 %v5133_v36  ;;  %921 = vmatprep.subr.mxu1 %v5135_v53  ;;  %8653 = vst [vmem:[#allocation144_spill] sm:$0xff] %v5159_v39  ;;  %8654 = vst [vmem:[#allocation145_spill] sm:$0xff] %v5163_v0  ;;  %v5165_v36 = vld [vmem:[#allocation8 + $0x210] sm:$0xff] }
  0xb4   :  { %851 = vmatpush2.msra.mxu0 %v5139_v38  ;;  %922 = vmatpush2.msra.mxu1 %v5141_v62  ;;  %8655 = vst [vmem:[#allocation146_spill] sm:$0xff] %v5165_v36 }
  0xb5   :  { %852 = vmatprep.subr.mxu0 %v5145_v44  ;;  %923 = vmatprep.subr.mxu1 %v5147_v35  ;;  %v316_v35 = vlaneseq }
  0xb6   :  { %853 = vmatpush2.msra.mxu0 %v5151_v17  ;;  %924 = vmatpush2.msra.mxu1 %v5153_v8 }
  0xb7   :  { %854 = vmatprep.subr.mxu0 %v5157_v37  ;;  %925 = vmatprep.subr.mxu1 %v5159_v39  ;;  %v5175_v44 = vshrl.u32 %v316_v35, 7 }
  0xb8   :  { %855 = vmatpush2.msra.mxu0 %v5163_v0  ;;  %926 = vmatpush2.msra.mxu1 %v5165_v36  ;;  %v314_v0 = vld [vmem:[%s7973_s3] sm:$0xf] }
  0xb9   :  { %958 = vmatprep.subr.mxu0 %v4615_v18  ;;  %1029 = vmatprep.subr.mxu1 %v4617_v19  ;;  %v8108_v8 = vsub.s32 0, %v5175_v44  ;;  %v8110_v37 = vsub.s32 2, %v5175_v44  ;;  %v8114_v19 = vsub.s32 1, %v5175_v44  ;;  %v8115_v35 = vsub.s32 3, %v5175_v44 }
  0xbb   :  { %v319_v39 = vrot.slane %v314_v0, %v8108_v8  ;;  %v5196_v38 = vrot.slane %v314_v0, %v8110_v37  ;;  %v323_v33 = vrot.slane %v314_v0, %v8114_v19  ;;  %v5202_v32 = vrot.slane %v314_v0, %v8115_v35 }
 0x107   :  { %v5177_v62 = vpop.f32.mrf.mxu0  ;;  %v5179_v17 = vpop.f32.mrf.mxu1 }
 0x109   :  { %v5186_v36 = vpop.f32.mrf.mxu0  ;;  %v5188_v18 = vpop.f32.mrf.mxu1 }
 0x10d   :  { %v446_v53 = vpop.f32.mrf.mxu0  ;;  %v559_v34 = vpop.f32.mrf.mxu1 }
 0x10e   :  { %v5204_v31 = vadd.f32 %v446_v53, %v319_v39  ;;  %v5207_v30 = vadd.f32 %v559_v34, %v5196_v38 }
 0x10f   :  { %v448_v29 = vpop.f32.mrf.mxu0  ;;  %v561_v8 = vpop.f32.mrf.mxu1 }
 0x110   :  { %8656 = vst [vmem:[#allocation147_spill] sm:$0xff] %v5204_v31  ;;  %8657 = vst [vmem:[#allocation148_spill] sm:$0xff] %v5207_v30  ;;  %v5209_v28 = vadd.f32 %v448_v29, %v323_v33  ;;  %v5212_v37 = vadd.f32 %v561_v8, %v5202_v32 }
 0x112   :  { %8658 = vst [vmem:[#allocation149_spill] sm:$0xff] %v5209_v28  ;;  %8659 = vst [vmem:[#allocation150_spill] sm:$0xff] %v5212_v37 }
 0x113   :  { %v452_v27 = vpop.f32.mrf.mxu0  ;;  %v565_v26 = vpop.f32.mrf.mxu1 }
 0x114   :  { %v5214_v25 = vadd.f32 %v452_v27, %v319_v39  ;;  %v5217_v19 = vadd.f32 %v565_v26, %v5196_v38 }
 0x115   :  { %v454_v0 = vpop.f32.mrf.mxu0  ;;  %v567_v53 = vpop.f32.mrf.mxu1 }
 0x116   :  { %8660 = vst [vmem:[#allocation151_spill] sm:$0xff] %v5214_v25  ;;  %8661 = vst [vmem:[#allocation152_spill] sm:$0xff] %v5217_v19  ;;  %v5219_v35 = vadd.f32 %v454_v0, %v323_v33  ;;  %v5222_v34 = vadd.f32 %v567_v53, %v5202_v32 }
 0x118   :  { %8662 = vst [vmem:[#allocation153_spill] sm:$0xff] %v5219_v35  ;;  %8663 = vst [vmem:[#allocation154_spill] sm:$0xff] %v5222_v34 }
 0x119   :  { %v458_v30 = vpop.f32.mrf.mxu0  ;;  %v571_v29 = vpop.f32.mrf.mxu1 }
 0x11a   :  { %v5224_v28 = vadd.f32 %v458_v30, %v319_v39  ;;  %v5227_v8 = vadd.f32 %v571_v29, %v5196_v38 }
 0x11b   :  { %v460_v37 = vpop.f32.mrf.mxu0  ;;  %v573_v27 = vpop.f32.mrf.mxu1 }
 0x11c   :  { %8664 = vst [vmem:[#allocation155_spill] sm:$0xff] %v5224_v28  ;;  %8665 = vst [vmem:[#allocation156_spill] sm:$0xff] %v5227_v8  ;;  %v5229_v25 = vadd.f32 %v460_v37, %v323_v33  ;;  %v5232_v26 = vadd.f32 %v573_v27, %v5202_v32 }
 0x11e   :  { %8666 = vst [vmem:[#allocation157_spill] sm:$0xff] %v5229_v25  ;;  %8667 = vst [vmem:[#allocation158_spill] sm:$0xff] %v5232_v26 }
 0x11f   :  { %v464_v19 = vpop.f32.mrf.mxu0  ;;  %v577_v0 = vpop.f32.mrf.mxu1 }
 0x120   :  { %v5234_v35 = vadd.f32 %v464_v19, %v319_v39  ;;  %v5237_v53 = vadd.f32 %v577_v0, %v5196_v38 }
 0x121   :  { %v466_v34 = vpop.f32.mrf.mxu0  ;;  %v579_v30 = vpop.f32.mrf.mxu1 }
 0x122   :  { %8668 = vst [vmem:[#allocation159_spill] sm:$0xff] %v5234_v35  ;;  %8669 = vst [vmem:[#allocation160_spill] sm:$0xff] %v5237_v53  ;;  %v5239_v28 = vadd.f32 %v466_v34, %v323_v33  ;;  %v5242_v29 = vadd.f32 %v579_v30, %v5202_v32 }
 0x124   :  { %8670 = vst [vmem:[#allocation161_spill] sm:$0xff] %v5239_v28  ;;  %8671 = vst [vmem:[#allocation162_spill] sm:$0xff] %v5242_v29 }
 0x125   :  { %v470_v8 = vpop.f32.mrf.mxu0  ;;  %v583_v37 = vpop.f32.mrf.mxu1 }
 0x126   :  { %v5244_v25 = vadd.f32 %v470_v8, %v319_v39  ;;  %v5247_v27 = vadd.f32 %v583_v37, %v5196_v38 }
 0x127   :  { %v472_v26 = vpop.f32.mrf.mxu0  ;;  %v585_v19 = vpop.f32.mrf.mxu1 }
 0x128   :  { %8672 = vst [vmem:[#allocation163_spill] sm:$0xff] %v5244_v25  ;;  %8673 = vst [vmem:[#allocation164_spill] sm:$0xff] %v5247_v27  ;;  %v5249_v35 = vadd.f32 %v472_v26, %v323_v33  ;;  %v5252_v0 = vadd.f32 %v585_v19, %v5202_v32 }
 0x12a   :  { %8674 = vst [vmem:[#allocation165_spill] sm:$0xff] %v5249_v35  ;;  %8675 = vst [vmem:[#allocation166_spill] sm:$0xff] %v5252_v0 }
 0x12b   :  { %v476_v53 = vpop.f32.mrf.mxu0  ;;  %v589_v34 = vpop.f32.mrf.mxu1 }
 0x12c   :  { %v5254_v28 = vadd.f32 %v476_v53, %v319_v39  ;;  %v5257_v30 = vadd.f32 %v589_v34, %v5196_v38 }
 0x12d   :  { %v478_v29 = vpop.f32.mrf.mxu0  ;;  %v591_v8 = vpop.f32.mrf.mxu1 }
 0x12e   :  { %8676 = vst [vmem:[#allocation167_spill] sm:$0xff] %v5254_v28  ;;  %8677 = vst [vmem:[#allocation168_spill] sm:$0xff] %v5257_v30  ;;  %v5259_v25 = vadd.f32 %v478_v29, %v323_v33  ;;  %v5262_v37 = vadd.f32 %v591_v8, %v5202_v32  ;;  %v441_v29 = vadd.f32 %v5177_v62, %v319_v39 }
 0x12f   :  { %v443_v8 = vadd.f32 %v5186_v36, %v323_v33 }
 0x130   :  { %8678 = vst [vmem:[#allocation169_spill] sm:$0xff] %v5259_v25  ;;  %8679 = vst [vmem:[#allocation170_spill] sm:$0xff] %v5262_v37 }
 0x131   :  { %v482_v27 = vpop.f32.mrf.mxu0  ;;  %v595_v26 = vpop.f32.mrf.mxu1 }
 0x132   :  { %v5264_v35 = vadd.f32 %v482_v27, %v319_v39  ;;  %v5267_v19 = vadd.f32 %v595_v26, %v5196_v38 }
 0x133   :  { %v484_v0 = vpop.f32.mrf.mxu0  ;;  %v597_v53 = vpop.f32.mrf.mxu1 }
 0x134   :  { %8680 = vst [vmem:[#allocation171_spill] sm:$0xff] %v5264_v35  ;;  %8681 = vst [vmem:[#allocation172_spill] sm:$0xff] %v5267_v19  ;;  %v5269_v28 = vadd.f32 %v484_v0, %v323_v33  ;;  %v5272_v34 = vadd.f32 %v597_v53, %v5202_v32  ;;  %v554_v0 = vadd.f32 %v5179_v17, %v5196_v38 }
 0x135   :  { %v556_v53 = vadd.f32 %v5188_v18, %v5202_v32 }
 0x136   :  { %8682 = vst [vmem:[#allocation173_spill] sm:$0xff] %v5269_v28  ;;  %8683 = vst [vmem:[#allocation174_spill] sm:$0xff] %v5272_v34 }
 0x137   :  { %v688_v30 = vpop.f32.mrf.mxu0  ;;  %v759_v26 = vpop.f32.mrf.mxu1 }
 0x138   :  { %v764_v37 = vadd.f32 %v688_v30, %v441_v29  ;;  %v766_v19 = vadd.f32 %v759_v26, %v554_v0  ;;  %v5296_v26 = vld [vmem:[#allocation7 + $0x1d8] sm:$0xff]  ;;  %v5299_v0 = vld [vmem:[#allocation7 + $0x1c0] sm:$0xff] }
 0x139   :  { %v690_v25 = vpop.f32.mrf.mxu0  ;;  %v761_v28 = vpop.f32.mrf.mxu1 }
 0x13a   :  { %v3441_v31 = vmul.f32 -1.442695, %v764_v37  ;;  %v765_v27 = vadd.f32 %v690_v25, %v443_v8  ;;  %v3443_v39 = vmul.f32 -1.442695, %v766_v19  ;;  %v767_v34 = vadd.f32 %v761_v28, %v556_v53  ;;  %v5287_v19 = vld [vmem:[#allocation7 + $0x1e0] sm:$0xff]  ;;  %v5302_v53 = vld [vmem:[#allocation7 + $0x1d0] sm:$0xff] }
 0x13c   :  { %3554 = vpow2.f32 %v3441_v31  ;;  %v3442_v35 = vmul.f32 -1.442695, %v765_v27  ;;  %v5293_v27 = vld [vmem:[#allocation7 + $0x1c8] sm:$0xff] }
 0x13e   :  { %3556 = vpow2.f32 %v3442_v35 }
 0x13f   :  { %3558 = vpow2.f32 %v3443_v39  ;;  %v5305_v39 = vld [vmem:[#allocation7 + $0x1a8] sm:$0xff] }
 0x149   :  { %v3555_v62 = vpop.eup %3554 }
 0x14a   :  { %v777_v33 = vadd.f32 1.0, %v3555_v62  ;;  %v5308_v62 = vld [vmem:[#allocation7 + $0x1b8] sm:$0xff] }
 0x14b   :  { %v3557_v36 = vpop.eup %3556 }
 0x14c   :  { %3560 = vrcp.f32 %v777_v33  ;;  %v778_v25 = vadd.f32 1.0, %v3557_v36  ;;  %v3559_v31 = vpop.eup %3558  ;;  %v5311_v33 = vld [vmem:[#allocation7 + $0x1a0] sm:$0xff]  ;;  %v5314_v36 = vld [vmem:[#allocation7 + $0x1b0] sm:$0xff] }
 0x14d   :  { %3562 = vtanh.f32 %v767_v34  ;;  %v779_v38 = vadd.f32 1.0, %v3559_v31  ;;  %v5290_v34 = vld [vmem:[#allocation7 + $0x1f0] sm:$0xff]  ;;  %v5320_v31 = vld [vmem:[#allocation7 + $0x198] sm:$0xff] }
 0x14e   :  { %3564 = vrcp.f32 %v778_v25  ;;  %v5317_v25 = vld [vmem:[#allocation7 + $0x188] sm:$0xff] }
 0x14f   :  { %3566 = vrcp.f32 %v779_v38  ;;  %v5332_v38 = vld [vmem:[#allocation7 + $0x178] sm:$0xff] }
 0x159   :  { %v3561_v35 = vpop.eup %3560 }
 0x15a   :  { %v3563_v30 = vpop.eup %3562 }
 0x15b   :  { %v3565_v37 = vpop.eup %3564  ;;  %v788_v29 = vmul.f32 %v3563_v30, %v3561_v35  ;;  %v5323_v35 = vld [vmem:[#allocation7 + $0x180] sm:$0xff]  ;;  %v5326_v30 = vld [vmem:[#allocation7 + $0x190] sm:$0xff] }
 0x15c   :  { %v787_v17 = vmul.f32 0.0, %v3565_v37  ;;  %v3567_v28 = vpop.eup %3566  ;;  %v5329_v37 = vld [vmem:[#allocation7 + $0x168] sm:$0xff] }
 0x15e   :  { %v5280_v8 = vadd.f32 %v788_v29, %v787_v17  ;;  %v5335_v17 = vld [vmem:[#allocation7 + $0x160] sm:$0xff]  ;;  %v5338_v29 = vld [vmem:[#allocation7 + $0x170] sm:$0xff] }
 0x160   :  { %3568 = vtanh.f32 %v5280_v8 }
 0x16d   :  { %v3569_v32 = vpop.eup %3568 }
 0x16e   :  { %v5283_v18 = vmul.f32 %v3569_v32, %v3567_v28  ;;  %v8725_v28 = vld [vmem:[#allocation56_spill] sm:$0xff]  ;;  %v8726_v32 = vld [vmem:[#allocation57_spill] sm:$0xff] }
 0x170   :  { %857 = vmatmul.mubr.f32.vlgmr.msra.gmra.mxu0 %v5283_v18  ;;  %928 = vmatmul.mubr.f32.vlgmr.msra.gmra.mxu1 %v5283_v18 }
 0x171   :  { %959 = vmatpush1.msra.mxu0 %v5287_v19  ;;  %1030 = vmatpush1.msra.mxu1 %v5290_v34 }
 0x172   :  { %960 = vmatprep.subr.mxu0 %v5293_v27  ;;  %1031 = vmatprep.subr.mxu1 %v5296_v26 }
 0x173   :  { %961 = vmatpush1.msra.mxu0 %v5299_v0  ;;  %1032 = vmatpush1.msra.mxu1 %v5302_v53 }
 0x174   :  { %962 = vmatprep.subr.mxu0 %v5305_v39  ;;  %1033 = vmatprep.subr.mxu1 %v5308_v62 }
 0x175   :  { %963 = vmatpush1.msra.mxu0 %v5311_v33  ;;  %1034 = vmatpush1.msra.mxu1 %v5314_v36 }
 0x176   :  { %964 = vmatprep.subr.mxu0 %v5317_v25  ;;  %1035 = vmatprep.subr.mxu1 %v5320_v31 }
 0x177   :  { %965 = vmatpush1.msra.mxu0 %v5323_v35  ;;  %1036 = vmatpush1.msra.mxu1 %v5326_v30 }
 0x178   :  { %966 = vmatprep.subr.mxu0 %v5329_v37  ;;  %1037 = vmatprep.subr.mxu1 %v5332_v38 }
 0x179   :  { %967 = vmatpush1.msra.mxu0 %v5335_v17  ;;  %1038 = vmatpush1.msra.mxu1 %v5338_v29 }
 0x17a   :  { %968 = vmatprep.subr.mxu0 %v4631_v40  ;;  %1039 = vmatprep.subr.mxu1 %v4633_v41  ;;  %v8684_v40 = vld [vmem:[#allocation16_spill] sm:$0xff]  ;;  %v8685_v41 = vld [vmem:[#allocation17_spill] sm:$0xff] }
 0x17b   :  { %969 = vmatpush1.msra.mxu0 %v4635_v42  ;;  %1040 = vmatpush1.msra.mxu1 %v4637_v43  ;;  %v8686_v42 = vmov 0.0   ;;  %v8687_v43 = vld [vmem:[#allocation18_spill] sm:$0xff] }
 0x17c   :  { %970 = vmatprep.subr.mxu0 %v4643_v45  ;;  %1041 = vmatprep.subr.mxu1 %v4645_v46  ;;  %v8688_v45 = vld [vmem:[#allocation19_spill] sm:$0xff]  ;;  %v8689_v46 = vld [vmem:[#allocation20_spill] sm:$0xff] }
 0x17d   :  { %971 = vmatpush1.msra.mxu0 %v4649_v47  ;;  %1042 = vmatpush1.msra.mxu1 %v4651_v48  ;;  %v8690_v47 = vld [vmem:[#allocation21_spill] sm:$0xff]  ;;  %v8691_v48 = vld [vmem:[#allocation22_spill] sm:$0xff] }
 0x17e   :  { %972 = vmatprep.subr.mxu0 %v4655_v49  ;;  %1043 = vmatprep.subr.mxu1 %v4657_v50  ;;  %v8692_v49 = vld [vmem:[#allocation23_spill] sm:$0xff]  ;;  %v8693_v50 = vld [vmem:[#allocation24_spill] sm:$0xff] }
 0x17f   :  { %973 = vmatpush1.msra.mxu0 %v4663_v51  ;;  %1044 = vmatpush1.msra.mxu1 %v4665_v52  ;;  %v8694_v51 = vld [vmem:[#allocation25_spill] sm:$0xff]  ;;  %v8695_v52 = vld [vmem:[#allocation26_spill] sm:$0xff] }
 0x180   :  { %974 = vmatprep.subr.mxu0 %v4671_v54  ;;  %1045 = vmatprep.subr.mxu1 %v4673_v55  ;;  %v8696_v54 = vld [vmem:[#allocation27_spill] sm:$0xff]  ;;  %v8697_v55 = vld [vmem:[#allocation28_spill] sm:$0xff] }
 0x181   :  { %975 = vmatpush1.msra.mxu0 %v4677_v56  ;;  %1046 = vmatpush1.msra.mxu1 %v4679_v57  ;;  %v8698_v56 = vld [vmem:[#allocation29_spill] sm:$0xff]  ;;  %v8699_v57 = vld [vmem:[#allocation30_spill] sm:$0xff] }
 0x182   :  { %976 = vmatprep.subr.mxu0 %v4683_v58  ;;  %1047 = vmatprep.subr.mxu1 %v4685_v59  ;;  %v8700_v58 = vld [vmem:[#allocation31_spill] sm:$0xff]  ;;  %v8701_v59 = vld [vmem:[#allocation32_spill] sm:$0xff] }
 0x183   :  { %977 = vmatpush1.msra.mxu0 %v4691_v60  ;;  %1048 = vmatpush1.msra.mxu1 %v4693_v61  ;;  %v8702_v60 = vld [vmem:[#allocation33_spill] sm:$0xff]  ;;  %v8703_v61 = vld [vmem:[#allocation34_spill] sm:$0xff] }
 0x184   :  { %978 = vmatprep.subr.mxu0 %v4699_v63  ;;  %1049 = vmatprep.subr.mxu1 %v4701_v1  ;;  %v8704_v63 = vld [vmem:[#allocation35_spill] sm:$0xff]  ;;  %v8705_v1 = vld [vmem:[#allocation36_spill] sm:$0xff] }
 0x185   :  { %979 = vmatpush1.msra.mxu0 %v4705_v2  ;;  %1050 = vmatpush1.msra.mxu1 %v4707_v3  ;;  %v8706_v2 = vld [vmem:[#allocation37_spill] sm:$0xff]  ;;  %v8707_v3 = vld [vmem:[#allocation38_spill] sm:$0xff] }
 0x186   :  { %980 = vmatprep.subr.mxu0 %v4711_v4  ;;  %1051 = vmatprep.subr.mxu1 %v4713_v5  ;;  %v8708_v4 = vld [vmem:[#allocation39_spill] sm:$0xff]  ;;  %v8709_v5 = vld [vmem:[#allocation40_spill] sm:$0xff] }
 0x187   :  { %981 = vmatpush1.msra.mxu0 %v4719_v6  ;;  %1052 = vmatpush1.msra.mxu1 %v4721_v7  ;;  %v8710_v6 = vld [vmem:[#allocation41_spill] sm:$0xff]  ;;  %v8711_v7 = vld [vmem:[#allocation42_spill] sm:$0xff] }
 0x188   :  { %982 = vmatprep.subr.mxu0 %v4727_v9  ;;  %1053 = vmatprep.subr.mxu1 %v4729_v10  ;;  %v8712_v9 = vld [vmem:[#allocation43_spill] sm:$0xff]  ;;  %v8713_v10 = vld [vmem:[#allocation44_spill] sm:$0xff] }
 0x189   :  { %983 = vmatpush1.msra.mxu0 %v4733_v11  ;;  %1054 = vmatpush1.msra.mxu1 %v4735_v12  ;;  %v8714_v11 = vld [vmem:[#allocation45_spill] sm:$0xff]  ;;  %v8715_v12 = vld [vmem:[#allocation46_spill] sm:$0xff] }
 0x18a   :  { %984 = vmatprep.subr.mxu0 %v4739_v13  ;;  %1055 = vmatprep.subr.mxu1 %v4741_v14  ;;  %v8716_v13 = vld [vmem:[#allocation47_spill] sm:$0xff]  ;;  %v8717_v14 = vld [vmem:[#allocation48_spill] sm:$0xff] }
 0x18b   :  { %985 = vmatpush1.msra.mxu0 %v4747_v15  ;;  %1056 = vmatpush1.msra.mxu1 %v4749_v16  ;;  %v8718_v15 = vld [vmem:[#allocation49_spill] sm:$0xff]  ;;  %v8719_v16 = vld [vmem:[#allocation50_spill] sm:$0xff] }
 0x18c   :  { %986 = vmatprep.subr.mxu0 %v4755_v20  ;;  %1057 = vmatprep.subr.mxu1 %v4757_v21  ;;  %v8720_v20 = vld [vmem:[#allocation51_spill] sm:$0xff]  ;;  %v8721_v21 = vld [vmem:[#allocation52_spill] sm:$0xff] }
 0x18d   :  { %987 = vmatpush1.msra.mxu0 %v4761_v22  ;;  %1058 = vmatpush1.msra.mxu1 %v4763_v23  ;;  %v8722_v22 = vld [vmem:[#allocation53_spill] sm:$0xff]  ;;  %v8723_v23 = vld [vmem:[#allocation54_spill] sm:$0xff] }
 0x18e   :  { %988 = vmatprep.subr.mxu0 %v4767_v24  ;;  %1059 = vmatprep.subr.mxu1 %v8684_v40  ;;  %v8724_v24 = vld [vmem:[#allocation55_spill] sm:$0xff] }
 0x18f   :  { %989 = vmatpush1.msra.mxu0 %v8685_v41  ;;  %1022 = vmatprep.mubr.f32.mxu0 %v8686_v42  ;;  %v8728_v40 = vld [vmem:[#allocation59_spill] sm:$0xff]  ;;  %v8729_v41 = vld [vmem:[#allocation60_spill] sm:$0xff] }
 0x190   :  { %1060 = vmatpush1.msra.mxu1 %v8687_v43  ;;  %1093 = vmatprep.mubr.f32.mxu1 %v8686_v42  ;;  %v8730_v43 = vld [vmem:[#allocation61_spill] sm:$0xff] }
 0x191   :  { %1023 = vmatmul.mubr.f32.vlgmr.msra.gmra.mxu0 %v5283_v18  ;;  %1094 = vmatmul.mubr.f32.vlgmr.msra.gmra.mxu1 %v5283_v18  ;;  %v8727_v18 = vld [vmem:[#allocation58_spill] sm:$0xff] }
 0x192   :  { %1128 = vmatprep.subr.mxu0 %v8688_v45  ;;  %1199 = vmatprep.subr.mxu1 %v8689_v46  ;;  %v8731_v45 = vld [vmem:[#allocation62_spill] sm:$0xff]  ;;  %v8732_v46 = vld [vmem:[#allocation63_spill] sm:$0xff] }
 0x193   :  { %1129 = vmatpush1.msra.mxu0 %v8690_v47  ;;  %1200 = vmatpush1.msra.mxu1 %v8691_v48  ;;  %v8733_v47 = vld [vmem:[#allocation64_spill] sm:$0xff]  ;;  %v8734_v48 = vld [vmem:[#allocation65_spill] sm:$0xff] }
 0x194   :  { %1130 = vmatprep.subr.mxu0 %v8692_v49  ;;  %1201 = vmatprep.subr.mxu1 %v8693_v50  ;;  %v8735_v49 = vld [vmem:[#allocation66_spill] sm:$0xff]  ;;  %v8736_v50 = vld [vmem:[#allocation67_spill] sm:$0xff] }
 0x195   :  { %1131 = vmatpush1.msra.mxu0 %v8694_v51  ;;  %1202 = vmatpush1.msra.mxu1 %v8695_v52  ;;  %v8737_v51 = vld [vmem:[#allocation68_spill] sm:$0xff]  ;;  %v8738_v52 = vld [vmem:[#allocation69_spill] sm:$0xff] }
 0x196   :  { %1132 = vmatprep.subr.mxu0 %v8696_v54  ;;  %1203 = vmatprep.subr.mxu1 %v8697_v55  ;;  %v8739_v54 = vld [vmem:[#allocation70_spill] sm:$0xff]  ;;  %v8740_v55 = vld [vmem:[#allocation71_spill] sm:$0xff] }
 0x197   :  { %1133 = vmatpush1.msra.mxu0 %v8698_v56  ;;  %1204 = vmatpush1.msra.mxu1 %v8699_v57  ;;  %v8741_v56 = vld [vmem:[#allocation72_spill] sm:$0xff]  ;;  %v8742_v57 = vld [vmem:[#allocation73_spill] sm:$0xff] }
 0x198   :  { %1134 = vmatprep.subr.mxu0 %v8700_v58  ;;  %1205 = vmatprep.subr.mxu1 %v8701_v59  ;;  %v8743_v58 = vld [vmem:[#allocation74_spill] sm:$0xff]  ;;  %v8744_v59 = vld [vmem:[#allocation75_spill] sm:$0xff] }
 0x199   :  { %1135 = vmatpush1.msra.mxu0 %v8702_v60  ;;  %1206 = vmatpush1.msra.mxu1 %v8703_v61  ;;  %v8745_v60 = vld [vmem:[#allocation76_spill] sm:$0xff]  ;;  %v8746_v61 = vld [vmem:[#allocation77_spill] sm:$0xff] }
 0x19a   :  { %1136 = vmatprep.subr.mxu0 %v8704_v63  ;;  %1207 = vmatprep.subr.mxu1 %v8705_v1  ;;  %v8747_v63 = vld [vmem:[#allocation78_spill] sm:$0xff]  ;;  %v8748_v1 = vld [vmem:[#allocation79_spill] sm:$0xff] }
 0x19b   :  { %1137 = vmatpush1.msra.mxu0 %v8706_v2  ;;  %1208 = vmatpush1.msra.mxu1 %v8707_v3  ;;  %v8749_v2 = vld [vmem:[#allocation80_spill] sm:$0xff]  ;;  %v8750_v3 = vld [vmem:[#allocation81_spill] sm:$0xff] }
 0x19c   :  { %1138 = vmatprep.subr.mxu0 %v8708_v4  ;;  %1209 = vmatprep.subr.mxu1 %v8709_v5  ;;  %v8751_v4 = vld [vmem:[#allocation82_spill] sm:$0xff]  ;;  %v8752_v5 = vld [vmem:[#allocation83_spill] sm:$0xff] }
 0x19d   :  { %1139 = vmatpush1.msra.mxu0 %v8710_v6  ;;  %1210 = vmatpush1.msra.mxu1 %v8711_v7  ;;  %v8753_v6 = vld [vmem:[#allocation84_spill] sm:$0xff]  ;;  %v8754_v7 = vld [vmem:[#allocation85_spill] sm:$0xff] }
 0x19e   :  { %1140 = vmatprep.subr.mxu0 %v8712_v9  ;;  %1211 = vmatprep.subr.mxu1 %v8713_v10  ;;  %v8755_v9 = vld [vmem:[#allocation86_spill] sm:$0xff]  ;;  %v8756_v10 = vld [vmem:[#allocation87_spill] sm:$0xff] }
 0x19f   :  { %1141 = vmatpush1.msra.mxu0 %v8714_v11  ;;  %1212 = vmatpush1.msra.mxu1 %v8715_v12  ;;  %v8757_v11 = vld [vmem:[#allocation88_spill] sm:$0xff]  ;;  %v8758_v12 = vld [vmem:[#allocation89_spill] sm:$0xff] }
 0x1a0   :  { %1142 = vmatprep.subr.mxu0 %v8716_v13  ;;  %1213 = vmatprep.subr.mxu1 %v8717_v14  ;;  %v8759_v13 = vld [vmem:[#allocation90_spill] sm:$0xff]  ;;  %v8760_v14 = vld [vmem:[#allocation91_spill] sm:$0xff] }
 0x1a1   :  { %1143 = vmatpush1.msra.mxu0 %v8718_v15  ;;  %1214 = vmatpush1.msra.mxu1 %v8719_v16  ;;  %v8761_v15 = vld [vmem:[#allocation92_spill] sm:$0xff]  ;;  %v8762_v16 = vld [vmem:[#allocation93_spill] sm:$0xff] }
 0x1a2   :  { %1144 = vmatprep.subr.mxu0 %v8720_v20  ;;  %1215 = vmatprep.subr.mxu1 %v8721_v21  ;;  %v8763_v20 = vld [vmem:[#allocation94_spill] sm:$0xff]  ;;  %v8764_v21 = vld [vmem:[#allocation95_spill] sm:$0xff] }
 0x1a3   :  { %1145 = vmatpush1.msra.mxu0 %v8722_v22  ;;  %1216 = vmatpush1.msra.mxu1 %v8723_v23  ;;  %v8765_v22 = vld [vmem:[#allocation96_spill] sm:$0xff]  ;;  %v8766_v23 = vld [vmem:[#allocation97_spill] sm:$0xff] }
 0x1a4   :  { %1146 = vmatprep.subr.mxu0 %v8724_v24  ;;  %1217 = vmatprep.subr.mxu1 %v8725_v28  ;;  %v8767_v24 = vld [vmem:[#allocation98_spill] sm:$0xff]  ;;  %v8768_v28 = vld [vmem:[#allocation99_spill] sm:$0xff] }
 0x1a5   :  { %1147 = vmatpush1.msra.mxu0 %v8726_v32  ;;  %1218 = vmatpush1.msra.mxu1 %v8727_v18  ;;  %v8769_v32 = vld [vmem:[#allocation100_spill] sm:$0xff]  ;;  %v8770_v18 = vld [vmem:[#allocation101_spill] sm:$0xff] }
 0x1a6   :  { %1148 = vmatprep.subr.mxu0 %v8728_v40  ;;  %1219 = vmatprep.subr.mxu1 %v8729_v41  ;;  %v8771_v40 = vld [vmem:[#allocation102_spill] sm:$0xff]  ;;  %v8772_v41 = vld [vmem:[#allocation103_spill] sm:$0xff] }
 0x1a7   :  { %1149 = vmatpush1.msra.mxu0 %v8730_v43  ;;  %1220 = vmatpush1.msra.mxu1 %v8731_v45  ;;  %v8773_v43 = vld [vmem:[#allocation104_spill] sm:$0xff]  ;;  %v8774_v45 = vld [vmem:[#allocation105_spill] sm:$0xff] }
 0x1a8   :  { %1150 = vmatprep.subr.mxu0 %v8732_v46  ;;  %1221 = vmatprep.subr.mxu1 %v8733_v47  ;;  %v8775_v46 = vld [vmem:[#allocation106_spill] sm:$0xff]  ;;  %v8776_v47 = vld [vmem:[#allocation107_spill] sm:$0xff] }
 0x1a9   :  { %1151 = vmatpush1.msra.mxu0 %v8734_v48  ;;  %1222 = vmatpush1.msra.mxu1 %v8735_v49  ;;  %v8777_v48 = vld [vmem:[#allocation108_spill] sm:$0xff]  ;;  %v8778_v49 = vld [vmem:[#allocation109_spill] sm:$0xff] }
 0x1aa   :  { %1152 = vmatprep.subr.mxu0 %v8736_v50  ;;  %1223 = vmatprep.subr.mxu1 %v8737_v51  ;;  %v8779_v50 = vld [vmem:[#allocation110_spill] sm:$0xff]  ;;  %v8780_v51 = vld [vmem:[#allocation111_spill] sm:$0xff] }
 0x1ab   :  { %1153 = vmatpush1.msra.mxu0 %v8738_v52  ;;  %1224 = vmatpush1.msra.mxu1 %v8739_v54  ;;  %v8781_v52 = vld [vmem:[#allocation112_spill] sm:$0xff]  ;;  %v8782_v54 = vld [vmem:[#allocation113_spill] sm:$0xff] }
 0x1ac   :  { %1154 = vmatprep.subr.mxu0 %v8740_v55  ;;  %1225 = vmatprep.subr.mxu1 %v8741_v56  ;;  %v8783_v55 = vld [vmem:[#allocation114_spill] sm:$0xff]  ;;  %v8784_v56 = vld [vmem:[#allocation115_spill] sm:$0xff] }
 0x1ad   :  { %1155 = vmatpush1.msra.mxu0 %v8742_v57  ;;  %1226 = vmatpush1.msra.mxu1 %v8743_v58  ;;  %v8785_v57 = vld [vmem:[#allocation116_spill] sm:$0xff]  ;;  %v8786_v58 = vld [vmem:[#allocation117_spill] sm:$0xff] }
 0x1ae   :  { %1156 = vmatprep.subr.mxu0 %v8744_v59  ;;  %1227 = vmatprep.subr.mxu1 %v8745_v60  ;;  %v8787_v59 = vld [vmem:[#allocation118_spill] sm:$0xff]  ;;  %v8788_v60 = vld [vmem:[#allocation119_spill] sm:$0xff] }
 0x1af   :  { %1157 = vmatpush1.msra.mxu0 %v8746_v61  ;;  %1228 = vmatpush1.msra.mxu1 %v8747_v63  ;;  %v8789_v61 = vld [vmem:[#allocation120_spill] sm:$0xff]  ;;  %v8790_v63 = vld [vmem:[#allocation121_spill] sm:$0xff] }
 0x1b0   :  { %1158 = vmatprep.subr.mxu0 %v8748_v1  ;;  %1229 = vmatprep.subr.mxu1 %v8749_v2  ;;  %v8791_v1 = vld [vmem:[#allocation122_spill] sm:$0xff]  ;;  %v8792_v2 = vld [vmem:[#allocation123_spill] sm:$0xff] }
 0x1b1   :  { %1159 = vmatpush1.msra.mxu0 %v8750_v3  ;;  %1230 = vmatpush1.msra.mxu1 %v8751_v4  ;;  %v8793_v3 = vld [vmem:[#allocation124_spill] sm:$0xff]  ;;  %v8794_v4 = vld [vmem:[#allocation125_spill] sm:$0xff] }
 0x1b2   :  { %1160 = vmatprep.subr.mxu0 %v8752_v5  ;;  %1231 = vmatprep.subr.mxu1 %v8753_v6  ;;  %v8795_v5 = vld [vmem:[#allocation126_spill] sm:$0xff]  ;;  %v8796_v6 = vld [vmem:[#allocation127_spill] sm:$0xff] }
 0x1b3   :  { %1161 = vmatpush2.msra.mxu0 %v8754_v7  ;;  %1232 = vmatpush2.msra.mxu1 %v8755_v9  ;;  %v8797_v7 = vld [vmem:[#allocation128_spill] sm:$0xff]  ;;  %v8798_v9 = vld [vmem:[#allocation129_spill] sm:$0xff] }
 0x1b4   :  { %1162 = vmatprep.subr.mxu0 %v8756_v10  ;;  %1233 = vmatprep.subr.mxu1 %v8757_v11  ;;  %v8799_v10 = vld [vmem:[#allocation130_spill] sm:$0xff]  ;;  %v8800_v11 = vld [vmem:[#allocation131_spill] sm:$0xff] }
 0x1b5   :  { %1163 = vmatpush2.msra.mxu0 %v8758_v12  ;;  %1234 = vmatpush2.msra.mxu1 %v8759_v13  ;;  %v8801_v12 = vld [vmem:[#allocation132_spill] sm:$0xff]  ;;  %v8802_v13 = vld [vmem:[#allocation133_spill] sm:$0xff] }
 0x1b6   :  { %1164 = vmatprep.subr.mxu0 %v8760_v14  ;;  %1235 = vmatprep.subr.mxu1 %v8761_v15  ;;  %v8803_v14 = vld [vmem:[#allocation134_spill] sm:$0xff]  ;;  %v8804_v15 = vld [vmem:[#allocation135_spill] sm:$0xff] }
 0x1b7   :  { %1165 = vmatpush2.msra.mxu0 %v8762_v16  ;;  %1236 = vmatpush2.msra.mxu1 %v8763_v20  ;;  %v8805_v16 = vld [vmem:[#allocation136_spill] sm:$0xff]  ;;  %v8806_v20 = vld [vmem:[#allocation137_spill] sm:$0xff] }
 0x1b8   :  { %1166 = vmatprep.subr.mxu0 %v8764_v21  ;;  %1237 = vmatprep.subr.mxu1 %v8765_v22  ;;  %v8807_v21 = vld [vmem:[#allocation138_spill] sm:$0xff]  ;;  %v8808_v22 = vld [vmem:[#allocation139_spill] sm:$0xff] }
 0x1b9   :  { %1167 = vmatpush2.msra.mxu0 %v8766_v23  ;;  %1238 = vmatpush2.msra.mxu1 %v8767_v24  ;;  %v8809_v23 = vld [vmem:[#allocation140_spill] sm:$0xff]  ;;  %v8810_v24 = vld [vmem:[#allocation141_spill] sm:$0xff] }
 0x1ba   :  { %1168 = vmatprep.subr.mxu0 %v8768_v28  ;;  %1239 = vmatprep.subr.mxu1 %v8769_v32  ;;  %v8811_v28 = vld [vmem:[#allocation142_spill] sm:$0xff]  ;;  %v8812_v32 = vld [vmem:[#allocation143_spill] sm:$0xff] }
 0x1bb   :  { %1169 = vmatpush2.msra.mxu0 %v8770_v18  ;;  %1240 = vmatpush2.msra.mxu1 %v8771_v40  ;;  %v8813_v18 = vld [vmem:[#allocation144_spill] sm:$0xff]  ;;  %v8814_v40 = vld [vmem:[#allocation145_spill] sm:$0xff] }
 0x1bc   :  { %1170 = vmatprep.subr.mxu0 %v8772_v41  ;;  %1241 = vmatprep.subr.mxu1 %v8773_v43  ;;  %v8815_v41 = vld [vmem:[#allocation146_spill] sm:$0xff]  ;;  %v5517_v43 = vld [vmem:[#allocation7 + $0x1e8] sm:$0xff] }
 0x1bd   :  { %1171 = vmatpush2.msra.mxu0 %v8774_v45  ;;  %1242 = vmatpush2.msra.mxu1 %v8775_v46  ;;  %v5520_v45 = vld [vmem:[#allocation7 + $0x1f8] sm:$0xff]  ;;  %v600_v46 = vld [vmem:[%s7975_s5] sm:$0xf] }
 0x1be   :  { %1172 = vmatprep.subr.mxu0 %v8776_v47  ;;  %1243 = vmatprep.subr.mxu1 %v8777_v48  ;;  %v8816_v47 = vsub.s32 0, %v5175_v44 }
 0x1bf   :  { %1173 = vmatpush2.msra.mxu0 %v8778_v49  ;;  %1244 = vmatpush2.msra.mxu1 %v8779_v50  ;;  %v8818_v49 = vsub.s32 1, %v5175_v44 }
 0x1c0   :  { %1174 = vmatprep.subr.mxu0 %v8780_v51  ;;  %1245 = vmatprep.subr.mxu1 %v8781_v52  ;;  %v5528_v48 = vrot.slane %v600_v46, %v8816_v47 }
 0x1c1   :  { %1175 = vmatpush2.msra.mxu0 %v8782_v54  ;;  %1246 = vmatpush2.msra.mxu1 %v8783_v55  ;;  %v5532_v50 = vrot.slane %v600_v46, %v8818_v49 }
 0x1c2   :  { %1176 = vmatprep.subr.mxu0 %v8784_v56  ;;  %1247 = vmatprep.subr.mxu1 %v8785_v57  ;;  %8817 = vst [vmem:[#allocation16_spill] sm:$0xff] %v5528_v48 }
 0x1c3   :  { %1177 = vmatpush2.msra.mxu0 %v8786_v58  ;;  %1248 = vmatpush2.msra.mxu1 %v8787_v59  ;;  %8819 = vst [vmem:[#allocation17_spill] sm:$0xff] %v5532_v50  ;;  %v8820_v58 = vsub.s32 2, %v5175_v44 }
 0x1c4   :  { %1178 = vmatprep.subr.mxu0 %v8788_v60  ;;  %1249 = vmatprep.subr.mxu1 %v8789_v61 }
 0x1c5   :  { %1179 = vmatpush2.msra.mxu0 %v8790_v63  ;;  %1250 = vmatpush2.msra.mxu1 %v8791_v1  ;;  %v5538_v59 = vrot.slane %v600_v46, %v8820_v58  ;;  %v8822_v63 = vsub.s32 3, %v5175_v44 }
 0x1c6   :  { %1180 = vmatprep.subr.mxu0 %v8792_v2  ;;  %1251 = vmatprep.subr.mxu1 %v8793_v3 }
 0x1c7   :  { %1181 = vmatpush2.msra.mxu0 %v8794_v4  ;;  %1252 = vmatpush2.msra.mxu1 %v8795_v5  ;;  %8821 = vst [vmem:[#allocation18_spill] sm:$0xff] %v5538_v59  ;;  %v5543_v1 = vrot.slane %v600_v46, %v8822_v63 }
 0x1c8   :  { %1182 = vmatprep.subr.mxu0 %v8796_v6  ;;  %1253 = vmatprep.subr.mxu1 %v8797_v7 }
 0x1c9   :  { %1183 = vmatpush2.msra.mxu0 %v8798_v9  ;;  %1254 = vmatpush2.msra.mxu1 %v8799_v10  ;;  %8823 = vst [vmem:[#allocation19_spill] sm:$0xff] %v5543_v1 }
 0x1ca   :  { %1184 = vmatprep.subr.mxu0 %v8800_v11  ;;  %1255 = vmatprep.subr.mxu1 %v8801_v12 }
 0x1cb   :  { %1185 = vmatpush2.msra.mxu0 %v8802_v13  ;;  %1256 = vmatpush2.msra.mxu1 %v8803_v14  ;;  %v8824_v13 = vld [vmem:[#allocation147_spill] sm:$0xff] }
 0x1cc   :  { %1186 = vmatprep.subr.mxu0 %v8804_v15  ;;  %1257 = vmatprep.subr.mxu1 %v8805_v16 }
 0x1cd   :  { %1187 = vmatpush2.msra.mxu0 %v8806_v20  ;;  %1258 = vmatpush2.msra.mxu1 %v8807_v21  ;;  %v8825_v21 = vld [vmem:[#allocation149_spill] sm:$0xff] }
 0x1ce   :  { %1188 = vmatprep.subr.mxu0 %v8808_v22  ;;  %1259 = vmatprep.subr.mxu1 %v8809_v23 }
 0x1cf   :  { %1189 = vmatpush2.msra.mxu0 %v8810_v24  ;;  %1260 = vmatpush2.msra.mxu1 %v8811_v28 }
 0x1d0   :  { %1190 = vmatprep.subr.mxu0 %v8812_v32  ;;  %1261 = vmatprep.subr.mxu1 %v8813_v18 }
 0x1d1   :  { %1191 = vmatpush2.msra.mxu0 %v8814_v40  ;;  %1262 = vmatpush2.msra.mxu1 %v8815_v41  ;;  %v8826_v41 = vld [vmem:[#allocation148_spill] sm:$0xff] }
 0x1d2   :  { %1294 = vmatprep.subr.mxu0 %v5517_v43  ;;  %1365 = vmatprep.subr.mxu1 %v5520_v45 }
 0x230   :  { %v858_v51 = vpop.f32.mrf.mxu0  ;;  %v929_v60 = vpop.f32.mrf.mxu1 }
 0x231   :  { %v859_v52 = vadd.f32 %v858_v51, %v5528_v48  ;;  %v930_v61 = vadd.f32 %v929_v60, %v5538_v59  ;;  %v8827_v51 = vld [vmem:[#allocation150_spill] sm:$0xff] }
 0x232   :  { %v860_v54 = vpop.f32.mrf.mxu0  ;;  %v931_v2 = vpop.f32.mrf.mxu1 }
 0x233   :  { %v3444_v55 = vmul.f32 -1.442695, %v859_v52  ;;  %v861_v56 = vadd.f32 %v860_v54, %v5532_v50  ;;  %v3446_v3 = vmul.f32 -1.442695, %v930_v61  ;;  %v932_v5 = vadd.f32 %v931_v2, %v5543_v1 }
 0x235   :  { %3570 = vpow2.f32 %v3444_v55  ;;  %v3445_v57 = vmul.f32 -1.442695, %v861_v56 }
 0x237   :  { %3572 = vpow2.f32 %v3445_v57 }
 0x238   :  { %3574 = vpow2.f32 %v3446_v3 }
 0x242   :  { %v3571_v4 = vpop.eup %3570 }
 0x243   :  { %v943_v6 = vadd.f32 1.0, %v3571_v4 }
 0x244   :  { %v3573_v7 = vpop.eup %3572 }
 0x245   :  { %3576 = vrcp.f32 %v943_v6  ;;  %v944_v9 = vadd.f32 1.0, %v3573_v7  ;;  %v3575_v10 = vpop.eup %3574 }
 0x246   :  { %3578 = vtanh.f32 %v932_v5  ;;  %v945_v23 = vadd.f32 1.0, %v3575_v10 }
 0x247   :  { %3580 = vrcp.f32 %v944_v9 }
 0x251   :  { %v1024_v11 = vpop.f32.mrf.mxu0  ;;  %v1095_v40 = vpop.f32.mrf.mxu1 }
 0x252   :  { %v3577_v12 = vpop.eup %3576  ;;  %v1100_v14 = vadd.f32 %v1024_v11, %v8824_v13  ;;  %v1102_v46 = vadd.f32 %v1095_v40, %v8826_v41  ;;  %v5636_v13 = vld [vmem:[#allocation7 + $0xd0] sm:$0xff]  ;;  %v5675_v41 = vld [vmem:[#allocation7 + $0x48] sm:$0xff] }
 0x253   :  { %v3579_v44 = vpop.eup %3578  ;;  %v1026_v15 = vpop.f32.mrf.mxu0  ;;  %v5672_v40 = vld [vmem:[#allocation7 + $0x70] sm:$0xff] }
 0x254   :  { %v3581_v16 = vpop.eup %3580  ;;  %v3447_v20 = vmul.f32 -1.442695, %v1100_v14  ;;  %v1101_v22 = vadd.f32 %v1026_v15, %v8825_v21  ;;  %v954_v28 = vmul.f32 %v3579_v44, %v3577_v12  ;;  %v1097_v47 = vpop.f32.mrf.mxu1  ;;  %v3449_v49 = vmul.f32 -1.442695, %v1102_v46  ;;  %v5639_v14 = vld [vmem:[#allocation7 + $0xa8] sm:$0xff]  ;;  %v5642_v44 = vld [vmem:[#allocation7 + $0xb8] sm:$0xff] }
 0x255   :  { %v953_v24 = vmul.f32 0.0, %v3581_v16  ;;  %v1103_v52 = vadd.f32 %v1097_v47, %v8827_v51  ;;  %v5645_v15 = vld [vmem:[#allocation7 + $0xa0] sm:$0xff]  ;;  %v5648_v16 = vld [vmem:[#allocation7 + $0xb0] sm:$0xff]  ;;  %v5654_v21 = vld [vmem:[#allocation7 + $0x98] sm:$0xff] }
 0x256   :  { %3582 = vpow2.f32 %v3447_v20  ;;  %v3448_v32 = vmul.f32 -1.442695, %v1101_v22  ;;  %v5651_v20 = vld [vmem:[#allocation7 + $0x88] sm:$0xff]  ;;  %v5657_v22 = vld [vmem:[#allocation7 + $0x80] sm:$0xff]  ;;  %v5678_v46 = vld [vmem:[#allocation7 + $0x58] sm:$0xff] }
 0x257   :  { %v5548_v18 = vadd.f32 %v954_v28, %v953_v24  ;;  %v5663_v24 = vld [vmem:[#allocation7 + $0x68] sm:$0xff]  ;;  %v5666_v28 = vld [vmem:[#allocation7 + $0x78] sm:$0xff]  ;;  %v5681_v47 = vld [vmem:[#allocation7 + $0x40] sm:$0xff] }
 0x258   :  { %3584 = vpow2.f32 %v3448_v32  ;;  %v5669_v32 = vld [vmem:[#allocation7 + $0x60] sm:$0xff]  ;;  %v5687_v51 = vld [vmem:[#allocation7 + $0x28] sm:$0xff] }
 0x259   :  { %3586 = vrcp.f32 %v945_v23  ;;  %v5660_v23 = vld [vmem:[#allocation7 + $0x90] sm:$0xff] }
 0x25a   :  { %3588 = vtanh.f32 %v5548_v18 }
 0x25b   :  { %3590 = vpow2.f32 %v3449_v49  ;;  %v5684_v49 = vld [vmem:[#allocation7 + $0x50] sm:$0xff] }
 0x25c   :  { %3592 = vtanh.f32 %v1103_v52  ;;  %v5690_v52 = vld [vmem:[#allocation7 + $0x38] sm:$0xff] }
 0x263   :  { %v3583_v54 = vpop.eup %3582 }
 0x264   :  { %v1113_v55 = vadd.f32 1.0, %v3583_v54  ;;  %v5693_v54 = vld [vmem:[#allocation7 + $0x20] sm:$0xff] }
 0x265   :  { %v3585_v56 = vpop.eup %3584 }
 0x266   :  { %v3587_v57 = vpop.eup %3586  ;;  %3594 = vrcp.f32 %v1113_v55  ;;  %v1114_v58 = vadd.f32 1.0, %v3585_v56  ;;  %v5696_v55 = vld [vmem:[#allocation7 + $0x30] sm:$0xff]  ;;  %v5699_v56 = vld [vmem:[#allocation7 + $0x8] sm:$0xff] }
 0x267   :  { %v3589_v60 = vpop.eup %3588 }
 0x268   :  { %3596 = vrcp.f32 %v1114_v58  ;;  %v957_v61 = vmul.f32 %v3589_v60, %v3587_v57  ;;  %v3591_v63 = vpop.eup %3590  ;;  %v5702_v57 = vld [vmem:[#allocation7 + $0x18] sm:$0xff]  ;;  %v5705_v58 = vld [vmem:[#allocation7] sm:$0xff]  ;;  %v5709_v60 = vld [vmem:[#allocation7 + $0x10] sm:$0xff] }
 0x269   :  { %v3593_v2 = vpop.eup %3592  ;;  %v1115_v6 = vadd.f32 1.0, %v3591_v63  ;;  %8828 = vst [vmem:[#allocation20_spill] sm:$0xff] %v5705_v58  ;;  %8829 = vst [vmem:[#allocation21_spill] sm:$0xff] %v5709_v60  ;;  %v5718_v63 = vld [vmem:[#allocation8 + $0x1f8] sm:$0xff] }
 0x26a   :  { %1192 = vmatprep.mubr.f32.mxu0 %v957_v61  ;;  %1263 = vmatprep.mubr.f32.mxu1 %v957_v61  ;;  %v5715_v61 = vld [vmem:[#allocation8 + $0x1e8] sm:$0xff]  ;;  %8831 = vst [vmem:[#allocation23_spill] sm:$0xff] %v5718_v63 }
 0x26b   :  { %3598 = vrcp.f32 %v1115_v6  ;;  %8830 = vst [vmem:[#allocation22_spill] sm:$0xff] %v5715_v61  ;;  %v5733_v6 = vld [vmem:[#allocation8 + $0x1c0] sm:$0xff] }
 0x26c   :  { %8836 = vst [vmem:[#allocation28_spill] sm:$0xff] %v5733_v6 }
 0x273   :  { %v3595_v3 = vpop.eup %3594 }
 0x274   :  { %v1124_v4 = vmul.f32 %v3595_v3, %v3593_v2  ;;  %v5721_v2 = vld [vmem:[#allocation8 + $0x1e0] sm:$0xff]  ;;  %v5724_v3 = vld [vmem:[#allocation8 + $0x1f0] sm:$0xff] }
 0x275   :  { %v3597_v5 = vpop.eup %3596  ;;  %8832 = vst [vmem:[#allocation24_spill] sm:$0xff] %v5721_v2  ;;  %8833 = vst [vmem:[#allocation25_spill] sm:$0xff] %v5724_v3 }
 0x276   :  { %v1123_v7 = vmul.f32 %v3597_v5, %v5280_v8  ;;  %v5579_v8 = vld [vmem:[#allocation7 + $0x148] sm:$0xff]  ;;  %v5730_v5 = vld [vmem:[#allocation8 + $0x1d8] sm:$0xff] }
 0x277   :  { %8835 = vst [vmem:[#allocation27_spill] sm:$0xff] %v5730_v5 }
 0x278   :  { %v5554_v9 = vadd.f32 %v1124_v4, %v1123_v7  ;;  %v3599_v10 = vpop.eup %3598  ;;  %v5727_v4 = vld [vmem:[#allocation8 + $0x1c8] sm:$0xff]  ;;  %v5736_v7 = vld [vmem:[#allocation8 + $0x1d0] sm:$0xff] }
 0x279   :  { %8834 = vst [vmem:[#allocation26_spill] sm:$0xff] %v5727_v4  ;;  %8837 = vst [vmem:[#allocation29_spill] sm:$0xff] %v5736_v7 }
 0x27a   :  { %3600 = vtanh.f32 %v5554_v9 }
 0x287   :  { %v3601_v11 = vpop.eup %3600 }
 0x288   :  { %v5557_v12 = vmul.f32 %v3601_v11, %v3599_v10  ;;  %v5739_v10 = vld [vmem:[#allocation8 + $0x1a8] sm:$0xff]  ;;  %v5742_v11 = vld [vmem:[#allocation8 + $0x1b8] sm:$0xff] }
 0x289   :  { %8838 = vst [vmem:[#allocation30_spill] sm:$0xff] %v5739_v10  ;;  %8839 = vst [vmem:[#allocation31_spill] sm:$0xff] %v5742_v11 }
 0x28a   :  { %1193 = vmatmul.mubr.f32.vlgmr.msra.gmra.mxu0 %v5557_v12  ;;  %1264 = vmatmul.mubr.f32.vlgmr.msra.gmra.mxu1 %v5557_v12 }
 0x28b   :  { %1295 = vmatpush1.msra.mxu0 %v5287_v19  ;;  %1366 = vmatpush1.msra.mxu1 %v5290_v34  ;;  %v5582_v19 = vld [vmem:[#allocation7 + $0x158] sm:$0xff]  ;;  %v5585_v34 = vld [vmem:[#allocation7 + $0x140] sm:$0xff] }
 0x28c   :  { %1296 = vmatprep.subr.mxu0 %v5293_v27  ;;  %1367 = vmatprep.subr.mxu1 %v5296_v26  ;;  %v5588_v27 = vld [vmem:[#allocation7 + $0x150] sm:$0xff]  ;;  %v5591_v26 = vld [vmem:[#allocation7 + $0x128] sm:$0xff] }
 0x28d   :  { %1297 = vmatpush1.msra.mxu0 %v5299_v0  ;;  %1368 = vmatpush1.msra.mxu1 %v5302_v53  ;;  %v5594_v0 = vld [vmem:[#allocation7 + $0x138] sm:$0xff]  ;;  %v5597_v53 = vld [vmem:[#allocation7 + $0x120] sm:$0xff] }
 0x28e   :  { %1298 = vmatprep.subr.mxu0 %v5305_v39  ;;  %1369 = vmatprep.subr.mxu1 %v5308_v62  ;;  %v5600_v39 = vld [vmem:[#allocation7 + $0x130] sm:$0xff]  ;;  %v5603_v62 = vld [vmem:[#allocation7 + $0x108] sm:$0xff] }
 0x28f   :  { %1299 = vmatpush1.msra.mxu0 %v5311_v33  ;;  %1370 = vmatpush1.msra.mxu1 %v5314_v36  ;;  %v5606_v33 = vld [vmem:[#allocation7 + $0x118] sm:$0xff]  ;;  %v5609_v36 = vld [vmem:[#allocation7 + $0x100] sm:$0xff] }
 0x290   :  { %1300 = vmatprep.subr.mxu0 %v5317_v25  ;;  %1371 = vmatprep.subr.mxu1 %v5320_v31  ;;  %v5612_v25 = vld [vmem:[#allocation7 + $0x110] sm:$0xff]  ;;  %v5615_v31 = vld [vmem:[#allocation7 + $0xe8] sm:$0xff] }
 0x291   :  { %1301 = vmatpush1.msra.mxu0 %v5323_v35  ;;  %1372 = vmatpush1.msra.mxu1 %v5326_v30  ;;  %v5618_v35 = vld [vmem:[#allocation7 + $0xf8] sm:$0xff]  ;;  %v5621_v30 = vld [vmem:[#allocation7 + $0xe0] sm:$0xff] }
 0x292   :  { %1302 = vmatprep.subr.mxu0 %v5329_v37  ;;  %1373 = vmatprep.subr.mxu1 %v5332_v38  ;;  %v5624_v37 = vld [vmem:[#allocation7 + $0xf0] sm:$0xff]  ;;  %v5627_v38 = vld [vmem:[#allocation7 + $0xc8] sm:$0xff] }
 0x293   :  { %1303 = vmatpush1.msra.mxu0 %v5335_v17  ;;  %1374 = vmatpush1.msra.mxu1 %v5338_v29  ;;  %v5630_v17 = vld [vmem:[#allocation7 + $0xd8] sm:$0xff]  ;;  %v5633_v29 = vld [vmem:[#allocation7 + $0xc0] sm:$0xff] }
 0x294   :  { %1304 = vmatprep.subr.mxu0 %v5579_v8  ;;  %1375 = vmatprep.subr.mxu1 %v5582_v19 }
 0x295   :  { %1305 = vmatpush1.msra.mxu0 %v5585_v34  ;;  %1376 = vmatpush1.msra.mxu1 %v5588_v27 }
 0x296   :  { %1306 = vmatprep.subr.mxu0 %v5591_v26  ;;  %1377 = vmatprep.subr.mxu1 %v5594_v0 }
 0x297   :  { %1307 = vmatpush1.msra.mxu0 %v5597_v53  ;;  %1378 = vmatpush1.msra.mxu1 %v5600_v39 }
 0x298   :  { %1308 = vmatprep.subr.mxu0 %v5603_v62  ;;  %1379 = vmatprep.subr.mxu1 %v5606_v33 }
 0x299   :  { %1309 = vmatpush1.msra.mxu0 %v5609_v36  ;;  %1380 = vmatpush1.msra.mxu1 %v5612_v25 }
 0x29a   :  { %1310 = vmatprep.subr.mxu0 %v5615_v31  ;;  %1381 = vmatprep.subr.mxu1 %v5618_v35 }
 0x29b   :  { %1311 = vmatpush1.msra.mxu0 %v5621_v30  ;;  %1382 = vmatpush1.msra.mxu1 %v5624_v37 }
 0x29c   :  { %1312 = vmatprep.subr.mxu0 %v5627_v38  ;;  %1383 = vmatprep.subr.mxu1 %v5630_v17 }
 0x29d   :  { %1313 = vmatpush1.msra.mxu0 %v5633_v29  ;;  %1384 = vmatpush1.msra.mxu1 %v5636_v13 }
 0x29e   :  { %1314 = vmatprep.subr.mxu0 %v5639_v14  ;;  %1385 = vmatprep.subr.mxu1 %v5642_v44 }
 0x29f   :  { %1315 = vmatpush1.msra.mxu0 %v5645_v15  ;;  %1386 = vmatpush1.msra.mxu1 %v5648_v16 }
 0x2a0   :  { %1316 = vmatprep.subr.mxu0 %v5651_v20  ;;  %1387 = vmatprep.subr.mxu1 %v5654_v21 }
 0x2a1   :  { %1317 = vmatpush1.msra.mxu0 %v5657_v22  ;;  %1388 = vmatpush1.msra.mxu1 %v5660_v23 }
 0x2a2   :  { %1318 = vmatprep.subr.mxu0 %v5663_v24  ;;  %1389 = vmatprep.subr.mxu1 %v5666_v28 }
 0x2a3   :  { %1319 = vmatpush1.msra.mxu0 %v5669_v32  ;;  %1390 = vmatpush1.msra.mxu1 %v5672_v40 }
 0x2a4   :  { %1320 = vmatprep.subr.mxu0 %v5675_v41  ;;  %1391 = vmatprep.subr.mxu1 %v5678_v46 }
 0x2a5   :  { %1321 = vmatpush1.msra.mxu0 %v5681_v47  ;;  %1392 = vmatpush1.msra.mxu1 %v5684_v49 }
 0x2a6   :  { %1322 = vmatprep.subr.mxu0 %v5687_v51  ;;  %1393 = vmatprep.subr.mxu1 %v5690_v52 }
 0x2a7   :  { %1323 = vmatpush1.msra.mxu0 %v5693_v54  ;;  %1394 = vmatpush1.msra.mxu1 %v5696_v55 }
 0x2a8   :  { %1324 = vmatprep.subr.mxu0 %v5699_v56  ;;  %1395 = vmatprep.subr.mxu1 %v5702_v57 }
 0x2a9   :  { %1325 = vmatpush1.msra.mxu0 %v5705_v58  ;;  %1358 = vmatprep.mubr.f32.mxu0 %v8686_v42 }
 0x2aa   :  { %1396 = vmatpush1.msra.mxu1 %v5709_v60  ;;  %1429 = vmatprep.mubr.f32.mxu1 %v8686_v42 }
 0x2ab   :  { %1359 = vmatmul.mubr.f32.vlgmr.msra.gmra.mxu0 %v5557_v12  ;;  %1430 = vmatmul.mubr.f32.vlgmr.msra.gmra.mxu1 %v5557_v12  ;;  %v5745_v12 = vld [vmem:[#allocation8 + $0x1a0] sm:$0xff] }
 0x2ac   :  { %1464 = vmatprep.subr.mxu0 %v5715_v61  ;;  %1535 = vmatprep.subr.mxu1 %v5718_v63  ;;  %8840 = vst [vmem:[#allocation32_spill] sm:$0xff] %v5745_v12 }
 0x2ad   :  { %1465 = vmatpush1.msra.mxu0 %v5721_v2  ;;  %1536 = vmatpush1.msra.mxu1 %v5724_v3 }
 0x2ae   :  { %1466 = vmatprep.subr.mxu0 %v5727_v4  ;;  %1537 = vmatprep.subr.mxu1 %v5730_v5  ;;  %v5748_v5 = vld [vmem:[#allocation8 + $0x1b0] sm:$0xff] }
 0x2af   :  { %1467 = vmatpush1.msra.mxu0 %v5733_v6  ;;  %1538 = vmatpush1.msra.mxu1 %v5736_v7  ;;  %8841 = vst [vmem:[#allocation33_spill] sm:$0xff] %v5748_v5  ;;  %v5751_v6 = vld [vmem:[#allocation8 + $0x188] sm:$0xff]  ;;  %v5754_v7 = vld [vmem:[#allocation8 + $0x198] sm:$0xff] }
 0x2b0   :  { %1468 = vmatprep.subr.mxu0 %v5739_v10  ;;  %1539 = vmatprep.subr.mxu1 %v5742_v11  ;;  %8842 = vst [vmem:[#allocation34_spill] sm:$0xff] %v5751_v6  ;;  %8843 = vst [vmem:[#allocation35_spill] sm:$0xff] %v5754_v7  ;;  %v5757_v10 = vld [vmem:[#allocation8 + $0x180] sm:$0xff]  ;;  %v5760_v11 = vld [vmem:[#allocation8 + $0x190] sm:$0xff] }
 0x2b1   :  { %1469 = vmatpush1.msra.mxu0 %v5745_v12  ;;  %1540 = vmatpush1.msra.mxu1 %v5748_v5  ;;  %8844 = vst [vmem:[#allocation36_spill] sm:$0xff] %v5757_v10  ;;  %8845 = vst [vmem:[#allocation37_spill] sm:$0xff] %v5760_v11  ;;  %v5763_v12 = vld [vmem:[#allocation8 + $0x168] sm:$0xff]  ;;  %v5766_v5 = vld [vmem:[#allocation8 + $0x178] sm:$0xff] }
 0x2b2   :  { %1470 = vmatprep.subr.mxu0 %v5751_v6  ;;  %1541 = vmatprep.subr.mxu1 %v5754_v7  ;;  %8846 = vst [vmem:[#allocation38_spill] sm:$0xff] %v5763_v12  ;;  %8847 = vst [vmem:[#allocation39_spill] sm:$0xff] %v5766_v5  ;;  %v5769_v6 = vld [vmem:[#allocation8 + $0x160] sm:$0xff]  ;;  %v5772_v7 = vld [vmem:[#allocation8 + $0x170] sm:$0xff] }
 0x2b3   :  { %1471 = vmatpush1.msra.mxu0 %v5757_v10  ;;  %1542 = vmatpush1.msra.mxu1 %v5760_v11  ;;  %8848 = vst [vmem:[#allocation40_spill] sm:$0xff] %v5769_v6  ;;  %8849 = vst [vmem:[#allocation41_spill] sm:$0xff] %v5772_v7  ;;  %v5775_v10 = vld [vmem:[#allocation8 + $0x148] sm:$0xff]  ;;  %v5778_v11 = vld [vmem:[#allocation8 + $0x158] sm:$0xff] }
 0x2b4   :  { %1472 = vmatprep.subr.mxu0 %v5763_v12  ;;  %1543 = vmatprep.subr.mxu1 %v5766_v5  ;;  %8850 = vst [vmem:[#allocation42_spill] sm:$0xff] %v5775_v10  ;;  %8851 = vst [vmem:[#allocation43_spill] sm:$0xff] %v5778_v11  ;;  %v5781_v12 = vld [vmem:[#allocation8 + $0x140] sm:$0xff]  ;;  %v5784_v5 = vld [vmem:[#allocation8 + $0x150] sm:$0xff] }
 0x2b5   :  { %1473 = vmatpush1.msra.mxu0 %v5769_v6  ;;  %1544 = vmatpush1.msra.mxu1 %v5772_v7  ;;  %8852 = vst [vmem:[#allocation44_spill] sm:$0xff] %v5781_v12  ;;  %8853 = vst [vmem:[#allocation45_spill] sm:$0xff] %v5784_v5  ;;  %v5787_v6 = vld [vmem:[#allocation8 + $0x128] sm:$0xff]  ;;  %v5790_v7 = vld [vmem:[#allocation8 + $0x138] sm:$0xff] }
 0x2b6   :  { %1474 = vmatprep.subr.mxu0 %v5775_v10  ;;  %1545 = vmatprep.subr.mxu1 %v5778_v11  ;;  %8854 = vst [vmem:[#allocation46_spill] sm:$0xff] %v5787_v6  ;;  %8855 = vst [vmem:[#allocation47_spill] sm:$0xff] %v5790_v7  ;;  %v5793_v10 = vld [vmem:[#allocation8 + $0x120] sm:$0xff]  ;;  %v5796_v11 = vld [vmem:[#allocation8 + $0x130] sm:$0xff] }
 0x2b7   :  { %1475 = vmatpush1.msra.mxu0 %v5781_v12  ;;  %1546 = vmatpush1.msra.mxu1 %v5784_v5  ;;  %8856 = vst [vmem:[#allocation48_spill] sm:$0xff] %v5793_v10  ;;  %8857 = vst [vmem:[#allocation49_spill] sm:$0xff] %v5796_v11  ;;  %v5799_v12 = vld [vmem:[#allocation8 + $0x108] sm:$0xff]  ;;  %v5802_v5 = vld [vmem:[#allocation8 + $0x118] sm:$0xff] }
 0x2b8   :  { %1476 = vmatprep.subr.mxu0 %v5787_v6  ;;  %1547 = vmatprep.subr.mxu1 %v5790_v7  ;;  %8858 = vst [vmem:[#allocation50_spill] sm:$0xff] %v5799_v12  ;;  %8859 = vst [vmem:[#allocation51_spill] sm:$0xff] %v5802_v5  ;;  %v5805_v6 = vld [vmem:[#allocation8 + $0x100] sm:$0xff]  ;;  %v5808_v7 = vld [vmem:[#allocation8 + $0x110] sm:$0xff] }
 0x2b9   :  { %1477 = vmatpush1.msra.mxu0 %v5793_v10  ;;  %1548 = vmatpush1.msra.mxu1 %v5796_v11  ;;  %8860 = vst [vmem:[#allocation52_spill] sm:$0xff] %v5805_v6  ;;  %8861 = vst [vmem:[#allocation53_spill] sm:$0xff] %v5808_v7  ;;  %v5811_v10 = vld [vmem:[#allocation8 + $0xe8] sm:$0xff]  ;;  %v5814_v11 = vld [vmem:[#allocation8 + $0xf8] sm:$0xff] }
 0x2ba   :  { %1478 = vmatprep.subr.mxu0 %v5799_v12  ;;  %1549 = vmatprep.subr.mxu1 %v5802_v5  ;;  %8862 = vst [vmem:[#allocation54_spill] sm:$0xff] %v5811_v10  ;;  %8863 = vst [vmem:[#allocation55_spill] sm:$0xff] %v5814_v11  ;;  %v5817_v12 = vld [vmem:[#allocation8 + $0xe0] sm:$0xff]  ;;  %v5820_v5 = vld [vmem:[#allocation8 + $0xf0] sm:$0xff] }
 0x2bb   :  { %1479 = vmatpush1.msra.mxu0 %v5805_v6  ;;  %1550 = vmatpush1.msra.mxu1 %v5808_v7  ;;  %8864 = vst [vmem:[#allocation56_spill] sm:$0xff] %v5817_v12  ;;  %8865 = vst [vmem:[#allocation57_spill] sm:$0xff] %v5820_v5  ;;  %v5823_v6 = vld [vmem:[#allocation8 + $0xc8] sm:$0xff]  ;;  %v5826_v7 = vld [vmem:[#allocation8 + $0xd8] sm:$0xff] }
 0x2bc   :  { %1480 = vmatprep.subr.mxu0 %v5811_v10  ;;  %1551 = vmatprep.subr.mxu1 %v5814_v11  ;;  %8866 = vst [vmem:[#allocation58_spill] sm:$0xff] %v5823_v6  ;;  %8867 = vst [vmem:[#allocation59_spill] sm:$0xff] %v5826_v7  ;;  %v5829_v10 = vld [vmem:[#allocation8 + $0xc0] sm:$0xff]  ;;  %v5832_v11 = vld [vmem:[#allocation8 + $0xd0] sm:$0xff] }
 0x2bd   :  { %1481 = vmatpush1.msra.mxu0 %v5817_v12  ;;  %1552 = vmatpush1.msra.mxu1 %v5820_v5  ;;  %8868 = vst [vmem:[#allocation60_spill] sm:$0xff] %v5829_v10  ;;  %8869 = vst [vmem:[#allocation61_spill] sm:$0xff] %v5832_v11  ;;  %v5835_v12 = vld [vmem:[#allocation8 + $0xa8] sm:$0xff]  ;;  %v5838_v5 = vld [vmem:[#allocation8 + $0xb8] sm:$0xff] }
 0x2be   :  { %1482 = vmatprep.subr.mxu0 %v5823_v6  ;;  %1553 = vmatprep.subr.mxu1 %v5826_v7  ;;  %8870 = vst [vmem:[#allocation62_spill] sm:$0xff] %v5835_v12  ;;  %8871 = vst [vmem:[#allocation63_spill] sm:$0xff] %v5838_v5  ;;  %v5841_v6 = vld [vmem:[#allocation8 + $0xa0] sm:$0xff]  ;;  %v5844_v7 = vld [vmem:[#allocation8 + $0xb0] sm:$0xff] }
 0x2bf   :  { %1483 = vmatpush1.msra.mxu0 %v5829_v10  ;;  %1554 = vmatpush1.msra.mxu1 %v5832_v11  ;;  %8872 = vst [vmem:[#allocation64_spill] sm:$0xff] %v5841_v6  ;;  %8873 = vst [vmem:[#allocation65_spill] sm:$0xff] %v5844_v7  ;;  %v5847_v10 = vld [vmem:[#allocation8 + $0x88] sm:$0xff]  ;;  %v5850_v11 = vld [vmem:[#allocation8 + $0x98] sm:$0xff] }
 0x2c0   :  { %1484 = vmatprep.subr.mxu0 %v5835_v12  ;;  %1555 = vmatprep.subr.mxu1 %v5838_v5  ;;  %8874 = vst [vmem:[#allocation66_spill] sm:$0xff] %v5847_v10  ;;  %8875 = vst [vmem:[#allocation67_spill] sm:$0xff] %v5850_v11  ;;  %v5853_v12 = vld [vmem:[#allocation8 + $0x80] sm:$0xff]  ;;  %v5856_v5 = vld [vmem:[#allocation8 + $0x90] sm:$0xff] }
 0x2c1   :  { %1485 = vmatpush1.msra.mxu0 %v5841_v6  ;;  %1556 = vmatpush1.msra.mxu1 %v5844_v7  ;;  %8876 = vst [vmem:[#allocation68_spill] sm:$0xff] %v5853_v12  ;;  %8877 = vst [vmem:[#allocation69_spill] sm:$0xff] %v5856_v5  ;;  %v5859_v6 = vld [vmem:[#allocation8 + $0x68] sm:$0xff]  ;;  %v5862_v7 = vld [vmem:[#allocation8 + $0x78] sm:$0xff] }
 0x2c2   :  { %1486 = vmatprep.subr.mxu0 %v5847_v10  ;;  %1557 = vmatprep.subr.mxu1 %v5850_v11  ;;  %8878 = vst [vmem:[#allocation70_spill] sm:$0xff] %v5859_v6  ;;  %8879 = vst [vmem:[#allocation71_spill] sm:$0xff] %v5862_v7  ;;  %v5865_v10 = vld [vmem:[#allocation8 + $0x60] sm:$0xff]  ;;  %v5868_v11 = vld [vmem:[#allocation8 + $0x70] sm:$0xff] }
 0x2c3   :  { %1487 = vmatpush1.msra.mxu0 %v5853_v12  ;;  %1558 = vmatpush1.msra.mxu1 %v5856_v5  ;;  %8880 = vst [vmem:[#allocation72_spill] sm:$0xff] %v5865_v10  ;;  %8881 = vst [vmem:[#allocation73_spill] sm:$0xff] %v5868_v11  ;;  %v5871_v12 = vld [vmem:[#allocation8 + $0x48] sm:$0xff]  ;;  %v5874_v5 = vld [vmem:[#allocation8 + $0x58] sm:$0xff] }
 0x2c4   :  { %1488 = vmatprep.subr.mxu0 %v5859_v6  ;;  %1559 = vmatprep.subr.mxu1 %v5862_v7  ;;  %8882 = vst [vmem:[#allocation74_spill] sm:$0xff] %v5871_v12  ;;  %8883 = vst [vmem:[#allocation75_spill] sm:$0xff] %v5874_v5  ;;  %v5877_v6 = vld [vmem:[#allocation8 + $0x40] sm:$0xff]  ;;  %v5880_v7 = vld [vmem:[#allocation8 + $0x50] sm:$0xff] }
 0x2c5   :  { %1489 = vmatpush1.msra.mxu0 %v5865_v10  ;;  %1560 = vmatpush1.msra.mxu1 %v5868_v11  ;;  %8884 = vst [vmem:[#allocation76_spill] sm:$0xff] %v5877_v6  ;;  %8885 = vst [vmem:[#allocation77_spill] sm:$0xff] %v5880_v7  ;;  %v5883_v10 = vld [vmem:[#allocation8 + $0x28] sm:$0xff]  ;;  %v5886_v11 = vld [vmem:[#allocation8 + $0x38] sm:$0xff] }
 0x2c6   :  { %1490 = vmatprep.subr.mxu0 %v5871_v12  ;;  %1561 = vmatprep.subr.mxu1 %v5874_v5  ;;  %8886 = vst [vmem:[#allocation78_spill] sm:$0xff] %v5883_v10  ;;  %8887 = vst [vmem:[#allocation79_spill] sm:$0xff] %v5886_v11  ;;  %v5889_v12 = vld [vmem:[#allocation8 + $0x20] sm:$0xff]  ;;  %v5892_v5 = vld [vmem:[#allocation8 + $0x30] sm:$0xff] }
 0x2c7   :  { %1491 = vmatpush1.msra.mxu0 %v5877_v6  ;;  %1562 = vmatpush1.msra.mxu1 %v5880_v7  ;;  %8888 = vst [vmem:[#allocation80_spill] sm:$0xff] %v5889_v12  ;;  %8889 = vst [vmem:[#allocation81_spill] sm:$0xff] %v5892_v5  ;;  %v5895_v6 = vld [vmem:[#allocation8 + $0x8] sm:$0xff]  ;;  %v5898_v7 = vld [vmem:[#allocation8 + $0x18] sm:$0xff] }
 0x2c8   :  { %1492 = vmatprep.subr.mxu0 %v5883_v10  ;;  %1563 = vmatprep.subr.mxu1 %v5886_v11  ;;  %8890 = vst [vmem:[#allocation82_spill] sm:$0xff] %v5895_v6  ;;  %8891 = vst [vmem:[#allocation83_spill] sm:$0xff] %v5898_v7  ;;  %v5901_v10 = vld [vmem:[#allocation8] sm:$0xff]  ;;  %v5904_v11 = vld [vmem:[#allocation8 + $0x10] sm:$0xff] }
 0x2c9   :  { %1493 = vmatpush1.msra.mxu0 %v5889_v12  ;;  %1564 = vmatpush1.msra.mxu1 %v5892_v5  ;;  %8892 = vst [vmem:[#allocation84_spill] sm:$0xff] %v5901_v10  ;;  %8893 = vst [vmem:[#allocation85_spill] sm:$0xff] %v5904_v11  ;;  %v5907_v12 = vld [vmem:[#allocation8 + $0x3e8] sm:$0xff]  ;;  %v5910_v5 = vld [vmem:[#allocation8 + $0x3f8] sm:$0xff] }
 0x2ca   :  { %1494 = vmatprep.subr.mxu0 %v5895_v6  ;;  %1565 = vmatprep.subr.mxu1 %v5898_v7  ;;  %8894 = vst [vmem:[#allocation86_spill] sm:$0xff] %v5907_v12  ;;  %8895 = vst [vmem:[#allocation87_spill] sm:$0xff] %v5910_v5  ;;  %v5913_v6 = vld [vmem:[#allocation8 + $0x3e0] sm:$0xff]  ;;  %v5916_v7 = vld [vmem:[#allocation8 + $0x3f0] sm:$0xff] }
 0x2cb   :  { %1495 = vmatpush1.msra.mxu0 %v5901_v10  ;;  %1566 = vmatpush1.msra.mxu1 %v5904_v11  ;;  %8896 = vst [vmem:[#allocation88_spill] sm:$0xff] %v5913_v6  ;;  %8897 = vst [vmem:[#allocation89_spill] sm:$0xff] %v5916_v7  ;;  %v5919_v10 = vld [vmem:[#allocation8 + $0x3c8] sm:$0xff]  ;;  %v5922_v11 = vld [vmem:[#allocation8 + $0x3d8] sm:$0xff] }
 0x2cc   :  { %1496 = vmatprep.subr.mxu0 %v5907_v12  ;;  %1567 = vmatprep.subr.mxu1 %v5910_v5  ;;  %8898 = vst [vmem:[#allocation90_spill] sm:$0xff] %v5919_v10  ;;  %8899 = vst [vmem:[#allocation91_spill] sm:$0xff] %v5922_v11  ;;  %v5925_v12 = vld [vmem:[#allocation8 + $0x3c0] sm:$0xff]  ;;  %v5928_v5 = vld [vmem:[#allocation8 + $0x3d0] sm:$0xff] }
 0x2cd   :  { %1497 = vmatpush2.msra.mxu0 %v5913_v6  ;;  %1568 = vmatpush2.msra.mxu1 %v5916_v7  ;;  %8900 = vst [vmem:[#allocation92_spill] sm:$0xff] %v5925_v12  ;;  %8901 = vst [vmem:[#allocation93_spill] sm:$0xff] %v5928_v5  ;;  %v5931_v6 = vld [vmem:[#allocation8 + $0x3a8] sm:$0xff]  ;;  %v5934_v7 = vld [vmem:[#allocation8 + $0x3b8] sm:$0xff] }
 0x2ce   :  { %1498 = vmatprep.subr.mxu0 %v5919_v10  ;;  %1569 = vmatprep.subr.mxu1 %v5922_v11  ;;  %8902 = vst [vmem:[#allocation94_spill] sm:$0xff] %v5931_v6  ;;  %8903 = vst [vmem:[#allocation95_spill] sm:$0xff] %v5934_v7  ;;  %v5937_v10 = vld [vmem:[#allocation8 + $0x3a0] sm:$0xff]  ;;  %v5940_v11 = vld [vmem:[#allocation8 + $0x3b0] sm:$0xff] }
 0x2cf   :  { %1499 = vmatpush2.msra.mxu0 %v5925_v12  ;;  %1570 = vmatpush2.msra.mxu1 %v5928_v5  ;;  %8904 = vst [vmem:[#allocation96_spill] sm:$0xff] %v5937_v10  ;;  %8905 = vst [vmem:[#allocation97_spill] sm:$0xff] %v5940_v11  ;;  %v5943_v12 = vld [vmem:[#allocation8 + $0x388] sm:$0xff]  ;;  %v5946_v5 = vld [vmem:[#allocation8 + $0x398] sm:$0xff] }
 0x2d0   :  { %1500 = vmatprep.subr.mxu0 %v5931_v6  ;;  %1571 = vmatprep.subr.mxu1 %v5934_v7  ;;  %8906 = vst [vmem:[#allocation98_spill] sm:$0xff] %v5943_v12  ;;  %8907 = vst [vmem:[#allocation99_spill] sm:$0xff] %v5946_v5  ;;  %v5949_v6 = vld [vmem:[#allocation8 + $0x380] sm:$0xff]  ;;  %v5952_v7 = vld [vmem:[#allocation8 + $0x390] sm:$0xff] }
 0x2d1   :  { %1501 = vmatpush2.msra.mxu0 %v5937_v10  ;;  %1572 = vmatpush2.msra.mxu1 %v5940_v11  ;;  %8908 = vst [vmem:[#allocation100_spill] sm:$0xff] %v5949_v6  ;;  %8909 = vst [vmem:[#allocation101_spill] sm:$0xff] %v5952_v7  ;;  %v5955_v10 = vld [vmem:[#allocation8 + $0x368] sm:$0xff]  ;;  %v5958_v11 = vld [vmem:[#allocation8 + $0x378] sm:$0xff] }
 0x2d2   :  { %1502 = vmatprep.subr.mxu0 %v5943_v12  ;;  %1573 = vmatprep.subr.mxu1 %v5946_v5  ;;  %8910 = vst [vmem:[#allocation102_spill] sm:$0xff] %v5955_v10  ;;  %8911 = vst [vmem:[#allocation103_spill] sm:$0xff] %v5958_v11  ;;  %v5961_v12 = vld [vmem:[#allocation8 + $0x360] sm:$0xff]  ;;  %v5964_v5 = vld [vmem:[#allocation8 + $0x370] sm:$0xff] }
 0x2d3   :  { %1503 = vmatpush2.msra.mxu0 %v5949_v6  ;;  %1574 = vmatpush2.msra.mxu1 %v5952_v7  ;;  %8912 = vst [vmem:[#allocation104_spill] sm:$0xff] %v5961_v12  ;;  %8913 = vst [vmem:[#allocation105_spill] sm:$0xff] %v5964_v5  ;;  %v5967_v6 = vld [vmem:[#allocation8 + $0x348] sm:$0xff]  ;;  %v5970_v7 = vld [vmem:[#allocation8 + $0x358] sm:$0xff] }
 0x2d4   :  { %1504 = vmatprep.subr.mxu0 %v5955_v10  ;;  %1575 = vmatprep.subr.mxu1 %v5958_v11  ;;  %8914 = vst [vmem:[#allocation106_spill] sm:$0xff] %v5967_v6  ;;  %8915 = vst [vmem:[#allocation107_spill] sm:$0xff] %v5970_v7  ;;  %v5973_v10 = vld [vmem:[#allocation8 + $0x340] sm:$0xff]  ;;  %v5976_v11 = vld [vmem:[#allocation8 + $0x350] sm:$0xff] }
 0x2d5   :  { %1505 = vmatpush2.msra.mxu0 %v5961_v12  ;;  %1576 = vmatpush2.msra.mxu1 %v5964_v5  ;;  %8916 = vst [vmem:[#allocation108_spill] sm:$0xff] %v5973_v10  ;;  %8917 = vst [vmem:[#allocation109_spill] sm:$0xff] %v5976_v11  ;;  %v5979_v12 = vld [vmem:[#allocation8 + $0x328] sm:$0xff]  ;;  %v5982_v5 = vld [vmem:[#allocation8 + $0x338] sm:$0xff] }
 0x2d6   :  { %1506 = vmatprep.subr.mxu0 %v5967_v6  ;;  %1577 = vmatprep.subr.mxu1 %v5970_v7  ;;  %8918 = vst [vmem:[#allocation110_spill] sm:$0xff] %v5979_v12  ;;  %8919 = vst [vmem:[#allocation111_spill] sm:$0xff] %v5982_v5  ;;  %v5985_v6 = vld [vmem:[#allocation8 + $0x320] sm:$0xff]  ;;  %v5988_v7 = vld [vmem:[#allocation8 + $0x330] sm:$0xff] }
 0x2d7   :  { %1507 = vmatpush2.msra.mxu0 %v5973_v10  ;;  %1578 = vmatpush2.msra.mxu1 %v5976_v11  ;;  %8920 = vst [vmem:[#allocation112_spill] sm:$0xff] %v5985_v6  ;;  %8921 = vst [vmem:[#allocation113_spill] sm:$0xff] %v5988_v7  ;;  %v5991_v10 = vld [vmem:[#allocation8 + $0x308] sm:$0xff]  ;;  %v5994_v11 = vld [vmem:[#allocation8 + $0x318] sm:$0xff] }
 0x2d8   :  { %1508 = vmatprep.subr.mxu0 %v5979_v12  ;;  %1579 = vmatprep.subr.mxu1 %v5982_v5  ;;  %8922 = vst [vmem:[#allocation114_spill] sm:$0xff] %v5991_v10  ;;  %8923 = vst [vmem:[#allocation115_spill] sm:$0xff] %v5994_v11  ;;  %v5997_v12 = vld [vmem:[#allocation8 + $0x300] sm:$0xff]  ;;  %v6000_v5 = vld [vmem:[#allocation8 + $0x310] sm:$0xff] }
 0x2d9   :  { %1509 = vmatpush2.msra.mxu0 %v5985_v6  ;;  %1580 = vmatpush2.msra.mxu1 %v5988_v7  ;;  %8924 = vst [vmem:[#allocation116_spill] sm:$0xff] %v5997_v12  ;;  %8925 = vst [vmem:[#allocation117_spill] sm:$0xff] %v6000_v5  ;;  %v6003_v6 = vld [vmem:[#allocation8 + $0x2e8] sm:$0xff]  ;;  %v6006_v7 = vld [vmem:[#allocation8 + $0x2f8] sm:$0xff] }
 0x2da   :  { %1510 = vmatprep.subr.mxu0 %v5991_v10  ;;  %1581 = vmatprep.subr.mxu1 %v5994_v11  ;;  %8926 = vst [vmem:[#allocation118_spill] sm:$0xff] %v6003_v6  ;;  %8927 = vst [vmem:[#allocation119_spill] sm:$0xff] %v6006_v7  ;;  %v6009_v10 = vld [vmem:[#allocation8 + $0x2e0] sm:$0xff]  ;;  %v6012_v11 = vld [vmem:[#allocation8 + $0x2f0] sm:$0xff] }
 0x2db   :  { %1511 = vmatpush2.msra.mxu0 %v5997_v12  ;;  %1582 = vmatpush2.msra.mxu1 %v6000_v5  ;;  %8928 = vst [vmem:[#allocation120_spill] sm:$0xff] %v6009_v10  ;;  %8929 = vst [vmem:[#allocation121_spill] sm:$0xff] %v6012_v11  ;;  %v6015_v12 = vld [vmem:[#allocation8 + $0x2c8] sm:$0xff]  ;;  %v6018_v5 = vld [vmem:[#allocation8 + $0x2d8] sm:$0xff] }
 0x2dc   :  { %1512 = vmatprep.subr.mxu0 %v6003_v6  ;;  %1583 = vmatprep.subr.mxu1 %v6006_v7  ;;  %8930 = vst [vmem:[#allocation122_spill] sm:$0xff] %v6015_v12  ;;  %8931 = vst [vmem:[#allocation123_spill] sm:$0xff] %v6018_v5  ;;  %v6021_v6 = vld [vmem:[#allocation8 + $0x2c0] sm:$0xff]  ;;  %v6024_v7 = vld [vmem:[#allocation8 + $0x2d0] sm:$0xff] }
 0x2dd   :  { %1513 = vmatpush2.msra.mxu0 %v6009_v10  ;;  %1584 = vmatpush2.msra.mxu1 %v6012_v11  ;;  %8932 = vst [vmem:[#allocation124_spill] sm:$0xff] %v6021_v6  ;;  %8933 = vst [vmem:[#allocation125_spill] sm:$0xff] %v6024_v7  ;;  %v6027_v10 = vld [vmem:[#allocation8 + $0x2a8] sm:$0xff]  ;;  %v6030_v11 = vld [vmem:[#allocation8 + $0x2b8] sm:$0xff] }
 0x2de   :  { %1514 = vmatprep.subr.mxu0 %v6015_v12  ;;  %1585 = vmatprep.subr.mxu1 %v6018_v5  ;;  %8934 = vst [vmem:[#allocation126_spill] sm:$0xff] %v6027_v10  ;;  %8935 = vst [vmem:[#allocation127_spill] sm:$0xff] %v6030_v11  ;;  %v6033_v12 = vld [vmem:[#allocation8 + $0x2a0] sm:$0xff]  ;;  %v6036_v5 = vld [vmem:[#allocation8 + $0x2b0] sm:$0xff] }
 0x2df   :  { %1515 = vmatpush2.msra.mxu0 %v6021_v6  ;;  %1586 = vmatpush2.msra.mxu1 %v6024_v7  ;;  %8936 = vst [vmem:[#allocation128_spill] sm:$0xff] %v6033_v12  ;;  %8937 = vst [vmem:[#allocation129_spill] sm:$0xff] %v6036_v5  ;;  %v6039_v6 = vld [vmem:[#allocation8 + $0x288] sm:$0xff]  ;;  %v6042_v7 = vld [vmem:[#allocation8 + $0x298] sm:$0xff] }
 0x2e0   :  { %1516 = vmatprep.subr.mxu0 %v6027_v10  ;;  %1587 = vmatprep.subr.mxu1 %v6030_v11  ;;  %8938 = vst [vmem:[#allocation130_spill] sm:$0xff] %v6039_v6  ;;  %8939 = vst [vmem:[#allocation131_spill] sm:$0xff] %v6042_v7  ;;  %v6045_v10 = vld [vmem:[#allocation8 + $0x280] sm:$0xff]  ;;  %v6048_v11 = vld [vmem:[#allocation8 + $0x290] sm:$0xff] }
 0x2e1   :  { %1517 = vmatpush2.msra.mxu0 %v6033_v12  ;;  %1588 = vmatpush2.msra.mxu1 %v6036_v5  ;;  %8940 = vst [vmem:[#allocation132_spill] sm:$0xff] %v6045_v10  ;;  %8941 = vst [vmem:[#allocation133_spill] sm:$0xff] %v6048_v11  ;;  %v6051_v12 = vld [vmem:[#allocation8 + $0x268] sm:$0xff]  ;;  %v6054_v5 = vld [vmem:[#allocation8 + $0x278] sm:$0xff] }
 0x2e2   :  { %1518 = vmatprep.subr.mxu0 %v6039_v6  ;;  %1589 = vmatprep.subr.mxu1 %v6042_v7  ;;  %8942 = vst [vmem:[#allocation134_spill] sm:$0xff] %v6051_v12  ;;  %8943 = vst [vmem:[#allocation135_spill] sm:$0xff] %v6054_v5  ;;  %v6057_v6 = vld [vmem:[#allocation8 + $0x260] sm:$0xff]  ;;  %v6060_v7 = vld [vmem:[#allocation8 + $0x270] sm:$0xff] }
 0x2e3   :  { %1519 = vmatpush2.msra.mxu0 %v6045_v10  ;;  %1590 = vmatpush2.msra.mxu1 %v6048_v11  ;;  %8944 = vst [vmem:[#allocation136_spill] sm:$0xff] %v6057_v6  ;;  %8945 = vst [vmem:[#allocation137_spill] sm:$0xff] %v6060_v7  ;;  %v6063_v10 = vld [vmem:[#allocation8 + $0x248] sm:$0xff]  ;;  %v6066_v11 = vld [vmem:[#allocation8 + $0x258] sm:$0xff] }
 0x2e4   :  { %1520 = vmatprep.subr.mxu0 %v6051_v12  ;;  %1591 = vmatprep.subr.mxu1 %v6054_v5  ;;  %8946 = vst [vmem:[#allocation138_spill] sm:$0xff] %v6063_v10  ;;  %8947 = vst [vmem:[#allocation139_spill] sm:$0xff] %v6066_v11  ;;  %v6069_v12 = vld [vmem:[#allocation8 + $0x240] sm:$0xff]  ;;  %v6072_v5 = vld [vmem:[#allocation8 + $0x250] sm:$0xff] }
 0x2e5   :  { %1521 = vmatpush2.msra.mxu0 %v6057_v6  ;;  %1592 = vmatpush2.msra.mxu1 %v6060_v7  ;;  %8948 = vst [vmem:[#allocation140_spill] sm:$0xff] %v6069_v12  ;;  %8949 = vst [vmem:[#allocation141_spill] sm:$0xff] %v6072_v5  ;;  %v6075_v6 = vld [vmem:[#allocation8 + $0x228] sm:$0xff]  ;;  %v6078_v7 = vld [vmem:[#allocation8 + $0x238] sm:$0xff] }
 0x2e6   :  { %1522 = vmatprep.subr.mxu0 %v6063_v10  ;;  %1593 = vmatprep.subr.mxu1 %v6066_v11  ;;  %8950 = vst [vmem:[#allocation142_spill] sm:$0xff] %v6075_v6  ;;  %8951 = vst [vmem:[#allocation143_spill] sm:$0xff] %v6078_v7  ;;  %v6081_v10 = vld [vmem:[#allocation8 + $0x220] sm:$0xff]  ;;  %v6084_v11 = vld [vmem:[#allocation8 + $0x230] sm:$0xff] }
 0x2e7   :  { %1523 = vmatpush2.msra.mxu0 %v6069_v12  ;;  %1594 = vmatpush2.msra.mxu1 %v6072_v5  ;;  %8952 = vst [vmem:[#allocation144_spill] sm:$0xff] %v6081_v10  ;;  %8953 = vst [vmem:[#allocation145_spill] sm:$0xff] %v6084_v11  ;;  %v6087_v12 = vld [vmem:[#allocation8 + $0x208] sm:$0xff]  ;;  %v6090_v5 = vld [vmem:[#allocation8 + $0x218] sm:$0xff] }
 0x2e8   :  { %1524 = vmatprep.subr.mxu0 %v6075_v6  ;;  %1595 = vmatprep.subr.mxu1 %v6078_v7  ;;  %8954 = vst [vmem:[#allocation146_spill] sm:$0xff] %v6087_v12  ;;  %8955 = vst [vmem:[#allocation147_spill] sm:$0xff] %v6090_v5  ;;  %v6093_v6 = vld [vmem:[#allocation8 + $0x200] sm:$0xff]  ;;  %v6096_v7 = vld [vmem:[#allocation8 + $0x210] sm:$0xff] }
 0x2e9   :  { %1525 = vmatpush2.msra.mxu0 %v6081_v10  ;;  %1596 = vmatpush2.msra.mxu1 %v6084_v11  ;;  %8956 = vst [vmem:[#allocation149_spill] sm:$0xff] %v6093_v6  ;;  %8957 = vst [vmem:[#allocation148_spill] sm:$0xff] %v6096_v7 }
 0x2ea   :  { %1526 = vmatprep.subr.mxu0 %v6087_v12  ;;  %1597 = vmatprep.subr.mxu1 %v6090_v5 }
 0x2eb   :  { %1527 = vmatpush2.msra.mxu0 %v6093_v6  ;;  %1598 = vmatpush2.msra.mxu1 %v6096_v7 }
 0x2ec   :  { %1630 = vmatprep.subr.mxu0 %v5517_v43  ;;  %1701 = vmatprep.subr.mxu1 %v5520_v45 }
 0x34a   :  { %v1194_v11 = vpop.f32.mrf.mxu0  ;;  %v1265_v2 = vpop.f32.mrf.mxu1 }
 0x34b   :  { %v1195_v10 = vadd.f32 %v1194_v11, %v5528_v48  ;;  %v1266_v6 = vadd.f32 %v1265_v2, %v5538_v59 }
 0x34c   :  { %v1196_v12 = vpop.f32.mrf.mxu0  ;;  %v1267_v63 = vpop.f32.mrf.mxu1 }
 0x34d   :  { %v3450_v4 = vmul.f32 -1.442695, %v1195_v10  ;;  %v1197_v3 = vadd.f32 %v1196_v12, %v5532_v50  ;;  %v3452_v61 = vmul.f32 -1.442695, %v1266_v6  ;;  %v1268_v43 = vadd.f32 %v1267_v63, %v5543_v1  ;;  %v8959_v6 = vld [vmem:[#allocation153_spill] sm:$0xff] }
 0x34f   :  { %3602 = vpow2.f32 %v3450_v4  ;;  %v3451_v5 = vmul.f32 -1.442695, %v1197_v3  ;;  %v8958_v3 = vld [vmem:[#allocation151_spill] sm:$0xff] }
 0x351   :  { %3604 = vpow2.f32 %v3451_v5 }
 0x352   :  { %3606 = vpow2.f32 %v3452_v61 }
 0x35c   :  { %v3603_v7 = vpop.eup %3602 }
 0x35d   :  { %v1279_v60 = vadd.f32 1.0, %v3603_v7 }
 0x35e   :  { %v3605_v45 = vpop.eup %3604 }
 0x35f   :  { %3608 = vrcp.f32 %v1279_v60  ;;  %v1280_v11 = vadd.f32 1.0, %v3605_v45  ;;  %v3607_v10 = vpop.eup %3606  ;;  %v8960_v45 = vld [vmem:[#allocation152_spill] sm:$0xff] }
 0x360   :  { %3610 = vtanh.f32 %v1268_v43  ;;  %v1281_v58 = vadd.f32 1.0, %v3607_v10 }
 0x361   :  { %3612 = vrcp.f32 %v1280_v11 }
 0x36b   :  { %v1360_v12 = vpop.f32.mrf.mxu0  ;;  %v1431_v43 = vpop.f32.mrf.mxu1 }
 0x36c   :  { %v3609_v4 = vpop.eup %3608  ;;  %v1436_v5 = vadd.f32 %v1360_v12, %v8958_v3  ;;  %v1438_v11 = vadd.f32 %v1431_v43, %v8960_v45 }
 0x36d   :  { %v3611_v50 = vpop.eup %3610  ;;  %v1362_v48 = vpop.f32.mrf.mxu0 }
 0x36e   :  { %v3613_v2 = vpop.eup %3612  ;;  %v3453_v59 = vmul.f32 -1.442695, %v1436_v5  ;;  %v1437_v42 = vadd.f32 %v1362_v48, %v8959_v6  ;;  %v1290_v7 = vmul.f32 %v3611_v50, %v3609_v4  ;;  %v1433_v12 = vpop.f32.mrf.mxu1  ;;  %v3455_v3 = vmul.f32 -1.442695, %v1438_v11  ;;  %v8961_v5 = vld [vmem:[#allocation154_spill] sm:$0xff] }
 0x36f   :  { %v1289_v63 = vmul.f32 %v3613_v2, %v5548_v18  ;;  %v1439_v1 = vadd.f32 %v1433_v12, %v8961_v5  ;;  %v6124_v5 = vld [vmem:[#allocation7 + $0x1f0] sm:$0xff] }
 0x370   :  { %3614 = vpow2.f32 %v3453_v59  ;;  %v3454_v60 = vmul.f32 -1.442695, %v1437_v42 }
 0x371   :  { %v6108_v61 = vadd.f32 %v1290_v7, %v1289_v63 }
 0x372   :  { %3616 = vpow2.f32 %v3454_v60 }
 0x373   :  { %3618 = vrcp.f32 %v1281_v58 }
 0x374   :  { %3620 = vtanh.f32 %v6108_v61 }
 0x375   :  { %3622 = vpow2.f32 %v3455_v3  ;;  %v6121_v3 = vld [vmem:[#allocation7 + $0x1e0] sm:$0xff] }
 0x376   :  { %3624 = vtanh.f32 %v1439_v1 }
 0x37d   :  { %v3615_v48 = vpop.eup %3614 }
 0x37e   :  { %v1449_v10 = vadd.f32 1.0, %v3615_v48  ;;  %v6130_v48 = vld [vmem:[#allocation7 + $0x1d8] sm:$0xff] }
 0x37f   :  { %v3617_v18 = vpop.eup %3616 }
 0x380   :  { %v3619_v50 = vpop.eup %3618  ;;  %3626 = vrcp.f32 %v1449_v10  ;;  %v1450_v42 = vadd.f32 1.0, %v3617_v18  ;;  %v6133_v10 = vld [vmem:[#allocation7 + $0x1c0] sm:$0xff]  ;;  %v6136_v18 = vld [vmem:[#allocation7 + $0x1d0] sm:$0xff] }
 0x381   :  { %v3621_v59 = vpop.eup %3620 }
 0x382   :  { %3628 = vrcp.f32 %v1450_v42  ;;  %v1293_v58 = vmul.f32 %v3621_v59, %v3619_v50  ;;  %v3623_v4 = vpop.eup %3622  ;;  %v6139_v50 = vld [vmem:[#allocation7 + $0x1a8] sm:$0xff]  ;;  %v6142_v42 = vld [vmem:[#allocation7 + $0x1b8] sm:$0xff]  ;;  %v6145_v59 = vld [vmem:[#allocation7 + $0x1a0] sm:$0xff] }
 0x383   :  { %v3625_v2 = vpop.eup %3624  ;;  %v1451_v60 = vadd.f32 1.0, %v3623_v4  ;;  %v6151_v4 = vld [vmem:[#allocation7 + $0x188] sm:$0xff] }
 0x384   :  { %1528 = vmatprep.mubr.f32.mxu0 %v1293_v58  ;;  %1599 = vmatprep.mubr.f32.mxu1 %v1293_v58  ;;  %v6148_v58 = vld [vmem:[#allocation7 + $0x1b0] sm:$0xff] }
 0x385   :  { %3630 = vrcp.f32 %v1451_v60  ;;  %v6166_v60 = vld [vmem:[#allocation7 + $0x178] sm:$0xff] }
 0x38d   :  { %v3627_v6 = vpop.eup %3626 }
 0x38e   :  { %v1460_v63 = vmul.f32 %v3627_v6, %v3625_v2  ;;  %v6154_v2 = vld [vmem:[#allocation7 + $0x198] sm:$0xff]  ;;  %v6157_v6 = vld [vmem:[#allocation7 + $0x180] sm:$0xff] }
 0x38f   :  { %v3629_v7 = vpop.eup %3628 }
 0x390   :  { %v1459_v43 = vmul.f32 %v3629_v7, %v5554_v9  ;;  %v6127_v9 = vld [vmem:[#allocation7 + $0x1c8] sm:$0xff] }
 0x391   :  { %v6163_v7 = vld [vmem:[#allocation7 + $0x168] sm:$0xff] }
 0x392   :  { %v6114_v45 = vadd.f32 %v1460_v63, %v1459_v43  ;;  %v3631_v1 = vpop.eup %3630  ;;  %v6160_v63 = vld [vmem:[#allocation7 + $0x190] sm:$0xff]  ;;  %v6169_v43 = vld [vmem:[#allocation7 + $0x160] sm:$0xff] }
 0x394   :  { %3632 = vtanh.f32 %v6114_v45 }
 0x3a1   :  { %v3633_v11 = vpop.eup %3632 }
 0x3a2   :  { %v6117_v12 = vmul.f32 %v3633_v11, %v3631_v1  ;;  %v6172_v1 = vld [vmem:[#allocation7 + $0x170] sm:$0xff] }
 0x3a3   :  { %v9004_v11 = vld [vmem:[#allocation61_spill] sm:$0xff] }
 0x3a4   :  { %1529 = vmatmul.mubr.f32.vlgmr.msra.gmra.mxu0 %v6117_v12  ;;  %1600 = vmatmul.mubr.f32.vlgmr.msra.gmra.mxu1 %v6117_v12 }
 0x3a5   :  { %1631 = vmatpush1.msra.mxu0 %v6121_v3  ;;  %1702 = vmatpush1.msra.mxu1 %v6124_v5 }
 0x3a6   :  { %1632 = vmatprep.subr.mxu0 %v6127_v9  ;;  %1703 = vmatprep.subr.mxu1 %v6130_v48 }
 0x3a7   :  { %1633 = vmatpush1.msra.mxu0 %v6133_v10  ;;  %1704 = vmatpush1.msra.mxu1 %v6136_v18 }
 0x3a8   :  { %1634 = vmatprep.subr.mxu0 %v6139_v50  ;;  %1705 = vmatprep.subr.mxu1 %v6142_v42 }
 0x3a9   :  { %1635 = vmatpush1.msra.mxu0 %v6145_v59  ;;  %1706 = vmatpush1.msra.mxu1 %v6148_v58 }
 0x3aa   :  { %1636 = vmatprep.subr.mxu0 %v6151_v4  ;;  %1707 = vmatprep.subr.mxu1 %v6154_v2 }
 0x3ab   :  { %1637 = vmatpush1.msra.mxu0 %v6157_v6  ;;  %1708 = vmatpush1.msra.mxu1 %v6160_v63 }
 0x3ac   :  { %1638 = vmatprep.subr.mxu0 %v6163_v7  ;;  %1709 = vmatprep.subr.mxu1 %v6166_v60 }
 0x3ad   :  { %1639 = vmatpush1.msra.mxu0 %v6169_v43  ;;  %1710 = vmatpush1.msra.mxu1 %v6172_v1 }
 0x3ae   :  { %1640 = vmatprep.subr.mxu0 %v5579_v8  ;;  %1711 = vmatprep.subr.mxu1 %v5582_v19  ;;  %v8962_v8 = vld [vmem:[#allocation20_spill] sm:$0xff]  ;;  %v8963_v19 = vmov 0.0  }
 0x3af   :  { %1641 = vmatpush1.msra.mxu0 %v5585_v34  ;;  %1712 = vmatpush1.msra.mxu1 %v5588_v27  ;;  %v8964_v34 = vld [vmem:[#allocation21_spill] sm:$0xff]  ;;  %v8965_v27 = vld [vmem:[#allocation22_spill] sm:$0xff] }
 0x3b0   :  { %1642 = vmatprep.subr.mxu0 %v5591_v26  ;;  %1713 = vmatprep.subr.mxu1 %v5594_v0  ;;  %v8966_v26 = vld [vmem:[#allocation23_spill] sm:$0xff]  ;;  %v8967_v0 = vld [vmem:[#allocation24_spill] sm:$0xff] }
 0x3b1   :  { %1643 = vmatpush1.msra.mxu0 %v5597_v53  ;;  %1714 = vmatpush1.msra.mxu1 %v5600_v39  ;;  %v8968_v53 = vld [vmem:[#allocation25_spill] sm:$0xff]  ;;  %v8969_v39 = vld [vmem:[#allocation26_spill] sm:$0xff] }
 0x3b2   :  { %1644 = vmatprep.subr.mxu0 %v5603_v62  ;;  %1715 = vmatprep.subr.mxu1 %v5606_v33  ;;  %v8970_v62 = vld [vmem:[#allocation27_spill] sm:$0xff]  ;;  %v8971_v33 = vld [vmem:[#allocation28_spill] sm:$0xff] }
 0x3b3   :  { %1645 = vmatpush1.msra.mxu0 %v5609_v36  ;;  %1716 = vmatpush1.msra.mxu1 %v5612_v25  ;;  %v8972_v36 = vld [vmem:[#allocation29_spill] sm:$0xff]  ;;  %v8973_v25 = vld [vmem:[#allocation30_spill] sm:$0xff] }
 0x3b4   :  { %1646 = vmatprep.subr.mxu0 %v5615_v31  ;;  %1717 = vmatprep.subr.mxu1 %v5618_v35  ;;  %v8974_v31 = vld [vmem:[#allocation31_spill] sm:$0xff]  ;;  %v8975_v35 = vld [vmem:[#allocation32_spill] sm:$0xff] }
 0x3b5   :  { %1647 = vmatpush1.msra.mxu0 %v5621_v30  ;;  %1718 = vmatpush1.msra.mxu1 %v5624_v37  ;;  %v8976_v30 = vld [vmem:[#allocation33_spill] sm:$0xff]  ;;  %v8977_v37 = vld [vmem:[#allocation34_spill] sm:$0xff] }
 0x3b6   :  { %1648 = vmatprep.subr.mxu0 %v5627_v38  ;;  %1719 = vmatprep.subr.mxu1 %v5630_v17  ;;  %v8978_v38 = vld [vmem:[#allocation35_spill] sm:$0xff]  ;;  %v8979_v17 = vld [vmem:[#allocation36_spill] sm:$0xff] }
 0x3b7   :  { %1649 = vmatpush1.msra.mxu0 %v5633_v29  ;;  %1720 = vmatpush1.msra.mxu1 %v5636_v13  ;;  %v8980_v29 = vld [vmem:[#allocation37_spill] sm:$0xff]  ;;  %v8981_v13 = vld [vmem:[#allocation38_spill] sm:$0xff] }
 0x3b8   :  { %1650 = vmatprep.subr.mxu0 %v5639_v14  ;;  %1721 = vmatprep.subr.mxu1 %v5642_v44  ;;  %v8982_v14 = vld [vmem:[#allocation39_spill] sm:$0xff]  ;;  %v8983_v44 = vld [vmem:[#allocation40_spill] sm:$0xff] }
 0x3b9   :  { %1651 = vmatpush1.msra.mxu0 %v5645_v15  ;;  %1722 = vmatpush1.msra.mxu1 %v5648_v16  ;;  %v8984_v15 = vld [vmem:[#allocation41_spill] sm:$0xff]  ;;  %v8985_v16 = vld [vmem:[#allocation42_spill] sm:$0xff] }
 0x3ba   :  { %1652 = vmatprep.subr.mxu0 %v5651_v20  ;;  %1723 = vmatprep.subr.mxu1 %v5654_v21  ;;  %v8986_v20 = vld [vmem:[#allocation43_spill] sm:$0xff]  ;;  %v8987_v21 = vld [vmem:[#allocation44_spill] sm:$0xff] }
 0x3bb   :  { %1653 = vmatpush1.msra.mxu0 %v5657_v22  ;;  %1724 = vmatpush1.msra.mxu1 %v5660_v23  ;;  %v8988_v22 = vld [vmem:[#allocation45_spill] sm:$0xff]  ;;  %v8989_v23 = vld [vmem:[#allocation46_spill] sm:$0xff] }
 0x3bc   :  { %1654 = vmatprep.subr.mxu0 %v5663_v24  ;;  %1725 = vmatprep.subr.mxu1 %v5666_v28  ;;  %v8990_v24 = vld [vmem:[#allocation47_spill] sm:$0xff]  ;;  %v8991_v28 = vld [vmem:[#allocation48_spill] sm:$0xff] }
 0x3bd   :  { %1655 = vmatpush1.msra.mxu0 %v5669_v32  ;;  %1726 = vmatpush1.msra.mxu1 %v5672_v40  ;;  %v8992_v32 = vld [vmem:[#allocation49_spill] sm:$0xff]  ;;  %v8993_v40 = vld [vmem:[#allocation50_spill] sm:$0xff] }
 0x3be   :  { %1656 = vmatprep.subr.mxu0 %v5675_v41  ;;  %1727 = vmatprep.subr.mxu1 %v5678_v46  ;;  %v8994_v41 = vld [vmem:[#allocation51_spill] sm:$0xff]  ;;  %v8995_v46 = vld [vmem:[#allocation52_spill] sm:$0xff] }
 0x3bf   :  { %1657 = vmatpush1.msra.mxu0 %v5681_v47  ;;  %1728 = vmatpush1.msra.mxu1 %v5684_v49  ;;  %v8996_v47 = vld [vmem:[#allocation53_spill] sm:$0xff]  ;;  %v8997_v49 = vld [vmem:[#allocation54_spill] sm:$0xff] }
 0x3c0   :  { %1658 = vmatprep.subr.mxu0 %v5687_v51  ;;  %1729 = vmatprep.subr.mxu1 %v5690_v52  ;;  %v8998_v51 = vld [vmem:[#allocation55_spill] sm:$0xff]  ;;  %v8999_v52 = vld [vmem:[#allocation56_spill] sm:$0xff] }
 0x3c1   :  { %1659 = vmatpush1.msra.mxu0 %v5693_v54  ;;  %1730 = vmatpush1.msra.mxu1 %v5696_v55  ;;  %v9000_v54 = vld [vmem:[#allocation57_spill] sm:$0xff]  ;;  %v9001_v55 = vld [vmem:[#allocation58_spill] sm:$0xff] }
 0x3c2   :  { %1660 = vmatprep.subr.mxu0 %v5699_v56  ;;  %1731 = vmatprep.subr.mxu1 %v5702_v57  ;;  %v9002_v56 = vld [vmem:[#allocation59_spill] sm:$0xff]  ;;  %v9003_v57 = vld [vmem:[#allocation60_spill] sm:$0xff] }
 0x3c3   :  { %1661 = vmatpush1.msra.mxu0 %v8962_v8  ;;  %1694 = vmatprep.mubr.f32.mxu0 %v8963_v19  ;;  %v9006_v8 = vld [vmem:[#allocation63_spill] sm:$0xff] }
 0x3c4   :  { %1732 = vmatpush1.msra.mxu1 %v8964_v34  ;;  %1765 = vmatprep.mubr.f32.mxu1 %v8963_v19  ;;  %v9007_v34 = vld [vmem:[#allocation64_spill] sm:$0xff] }
 0x3c5   :  { %1695 = vmatmul.mubr.f32.vlgmr.msra.gmra.mxu0 %v6117_v12  ;;  %1766 = vmatmul.mubr.f32.vlgmr.msra.gmra.mxu1 %v6117_v12  ;;  %v9005_v12 = vld [vmem:[#allocation62_spill] sm:$0xff] }
 0x3c6   :  { %1800 = vmatprep.subr.mxu0 %v8965_v27  ;;  %1871 = vmatprep.subr.mxu1 %v8966_v26  ;;  %v9008_v27 = vld [vmem:[#allocation65_spill] sm:$0xff]  ;;  %v9009_v26 = vld [vmem:[#allocation66_spill] sm:$0xff] }
 0x3c7   :  { %1801 = vmatpush1.msra.mxu0 %v8967_v0  ;;  %1872 = vmatpush1.msra.mxu1 %v8968_v53  ;;  %v9010_v0 = vld [vmem:[#allocation67_spill] sm:$0xff]  ;;  %v9011_v53 = vld [vmem:[#allocation68_spill] sm:$0xff] }
 0x3c8   :  { %1802 = vmatprep.subr.mxu0 %v8969_v39  ;;  %1873 = vmatprep.subr.mxu1 %v8970_v62  ;;  %v9012_v39 = vld [vmem:[#allocation69_spill] sm:$0xff]  ;;  %v9013_v62 = vld [vmem:[#allocation70_spill] sm:$0xff] }
 0x3c9   :  { %1803 = vmatpush1.msra.mxu0 %v8971_v33  ;;  %1874 = vmatpush1.msra.mxu1 %v8972_v36  ;;  %v9014_v33 = vld [vmem:[#allocation71_spill] sm:$0xff]  ;;  %v9015_v36 = vld [vmem:[#allocation72_spill] sm:$0xff] }
 0x3ca   :  { %1804 = vmatprep.subr.mxu0 %v8973_v25  ;;  %1875 = vmatprep.subr.mxu1 %v8974_v31  ;;  %v9016_v25 = vld [vmem:[#allocation73_spill] sm:$0xff]  ;;  %v9017_v31 = vld [vmem:[#allocation74_spill] sm:$0xff] }
 0x3cb   :  { %1805 = vmatpush1.msra.mxu0 %v8975_v35  ;;  %1876 = vmatpush1.msra.mxu1 %v8976_v30  ;;  %v9018_v35 = vld [vmem:[#allocation75_spill] sm:$0xff]  ;;  %v9019_v30 = vld [vmem:[#allocation76_spill] sm:$0xff] }
 0x3cc   :  { %1806 = vmatprep.subr.mxu0 %v8977_v37  ;;  %1877 = vmatprep.subr.mxu1 %v8978_v38  ;;  %v9020_v37 = vld [vmem:[#allocation77_spill] sm:$0xff]  ;;  %v9021_v38 = vld [vmem:[#allocation78_spill] sm:$0xff] }
 0x3cd   :  { %1807 = vmatpush1.msra.mxu0 %v8979_v17  ;;  %1878 = vmatpush1.msra.mxu1 %v8980_v29  ;;  %v9022_v17 = vld [vmem:[#allocation79_spill] sm:$0xff]  ;;  %v9023_v29 = vld [vmem:[#allocation80_spill] sm:$0xff] }
 0x3ce   :  { %1808 = vmatprep.subr.mxu0 %v8981_v13  ;;  %1879 = vmatprep.subr.mxu1 %v8982_v14  ;;  %v9024_v13 = vld [vmem:[#allocation81_spill] sm:$0xff]  ;;  %v9025_v14 = vld [vmem:[#allocation82_spill] sm:$0xff] }
 0x3cf   :  { %1809 = vmatpush1.msra.mxu0 %v8983_v44  ;;  %1880 = vmatpush1.msra.mxu1 %v8984_v15  ;;  %v9026_v44 = vld [vmem:[#allocation83_spill] sm:$0xff]  ;;  %v9027_v15 = vld [vmem:[#allocation84_spill] sm:$0xff] }
 0x3d0   :  { %1810 = vmatprep.subr.mxu0 %v8985_v16  ;;  %1881 = vmatprep.subr.mxu1 %v8986_v20  ;;  %v9028_v16 = vld [vmem:[#allocation85_spill] sm:$0xff]  ;;  %v9029_v20 = vld [vmem:[#allocation86_spill] sm:$0xff] }
 0x3d1   :  { %1811 = vmatpush1.msra.mxu0 %v8987_v21  ;;  %1882 = vmatpush1.msra.mxu1 %v8988_v22  ;;  %v9030_v21 = vld [vmem:[#allocation87_spill] sm:$0xff]  ;;  %v9031_v22 = vld [vmem:[#allocation88_spill] sm:$0xff] }
 0x3d2   :  { %1812 = vmatprep.subr.mxu0 %v8989_v23  ;;  %1883 = vmatprep.subr.mxu1 %v8990_v24  ;;  %v9032_v23 = vld [vmem:[#allocation89_spill] sm:$0xff]  ;;  %v9033_v24 = vld [vmem:[#allocation90_spill] sm:$0xff] }
 0x3d3   :  { %1813 = vmatpush1.msra.mxu0 %v8991_v28  ;;  %1884 = vmatpush1.msra.mxu1 %v8992_v32  ;;  %v9034_v28 = vld [vmem:[#allocation91_spill] sm:$0xff]  ;;  %v9035_v32 = vld [vmem:[#allocation92_spill] sm:$0xff] }
 0x3d4   :  { %1814 = vmatprep.subr.mxu0 %v8993_v40  ;;  %1885 = vmatprep.subr.mxu1 %v8994_v41  ;;  %v9036_v40 = vld [vmem:[#allocation93_spill] sm:$0xff]  ;;  %v9037_v41 = vld [vmem:[#allocation94_spill] sm:$0xff] }
 0x3d5   :  { %1815 = vmatpush1.msra.mxu0 %v8995_v46  ;;  %1886 = vmatpush1.msra.mxu1 %v8996_v47  ;;  %v9038_v46 = vld [vmem:[#allocation95_spill] sm:$0xff]  ;;  %v9039_v47 = vld [vmem:[#allocation96_spill] sm:$0xff] }
 0x3d6   :  { %1816 = vmatprep.subr.mxu0 %v8997_v49  ;;  %1887 = vmatprep.subr.mxu1 %v8998_v51  ;;  %v9040_v49 = vld [vmem:[#allocation97_spill] sm:$0xff]  ;;  %v9041_v51 = vld [vmem:[#allocation98_spill] sm:$0xff] }
 0x3d7   :  { %1817 = vmatpush1.msra.mxu0 %v8999_v52  ;;  %1888 = vmatpush1.msra.mxu1 %v9000_v54  ;;  %v9042_v52 = vld [vmem:[#allocation99_spill] sm:$0xff]  ;;  %v9043_v54 = vld [vmem:[#allocation100_spill] sm:$0xff] }
 0x3d8   :  { %1818 = vmatprep.subr.mxu0 %v9001_v55  ;;  %1889 = vmatprep.subr.mxu1 %v9002_v56  ;;  %v9044_v55 = vld [vmem:[#allocation101_spill] sm:$0xff]  ;;  %v9045_v56 = vld [vmem:[#allocation102_spill] sm:$0xff] }
 0x3d9   :  { %1819 = vmatpush1.msra.mxu0 %v9003_v57  ;;  %1890 = vmatpush1.msra.mxu1 %v9004_v11  ;;  %v9046_v57 = vld [vmem:[#allocation103_spill] sm:$0xff]  ;;  %v9047_v11 = vld [vmem:[#allocation104_spill] sm:$0xff] }
 0x3da   :  { %1820 = vmatprep.subr.mxu0 %v9005_v12  ;;  %1891 = vmatprep.subr.mxu1 %v9006_v8  ;;  %v9048_v12 = vld [vmem:[#allocation105_spill] sm:$0xff]  ;;  %v9049_v8 = vld [vmem:[#allocation106_spill] sm:$0xff] }
 0x3db   :  { %1821 = vmatpush1.msra.mxu0 %v9007_v34  ;;  %1892 = vmatpush1.msra.mxu1 %v9008_v27  ;;  %v9050_v34 = vld [vmem:[#allocation107_spill] sm:$0xff]  ;;  %v9051_v27 = vld [vmem:[#allocation108_spill] sm:$0xff] }
 0x3dc   :  { %1822 = vmatprep.subr.mxu0 %v9009_v26  ;;  %1893 = vmatprep.subr.mxu1 %v9010_v0  ;;  %v9052_v26 = vld [vmem:[#allocation109_spill] sm:$0xff]  ;;  %v9053_v0 = vld [vmem:[#allocation110_spill] sm:$0xff] }
 0x3dd   :  { %1823 = vmatpush1.msra.mxu0 %v9011_v53  ;;  %1894 = vmatpush1.msra.mxu1 %v9012_v39  ;;  %v9054_v53 = vld [vmem:[#allocation111_spill] sm:$0xff]  ;;  %v9055_v39 = vld [vmem:[#allocation112_spill] sm:$0xff] }
 0x3de   :  { %1824 = vmatprep.subr.mxu0 %v9013_v62  ;;  %1895 = vmatprep.subr.mxu1 %v9014_v33  ;;  %v9056_v62 = vld [vmem:[#allocation113_spill] sm:$0xff]  ;;  %v9057_v33 = vld [vmem:[#allocation114_spill] sm:$0xff] }
 0x3df   :  { %1825 = vmatpush1.msra.mxu0 %v9015_v36  ;;  %1896 = vmatpush1.msra.mxu1 %v9016_v25  ;;  %v9058_v36 = vld [vmem:[#allocation115_spill] sm:$0xff]  ;;  %v9059_v25 = vld [vmem:[#allocation116_spill] sm:$0xff] }
 0x3e0   :  { %1826 = vmatprep.subr.mxu0 %v9017_v31  ;;  %1897 = vmatprep.subr.mxu1 %v9018_v35  ;;  %v9060_v31 = vld [vmem:[#allocation117_spill] sm:$0xff]  ;;  %v9061_v35 = vld [vmem:[#allocation118_spill] sm:$0xff] }
 0x3e1   :  { %1827 = vmatpush1.msra.mxu0 %v9019_v30  ;;  %1898 = vmatpush1.msra.mxu1 %v9020_v37  ;;  %v9062_v30 = vld [vmem:[#allocation119_spill] sm:$0xff]  ;;  %v9063_v37 = vld [vmem:[#allocation120_spill] sm:$0xff] }
 0x3e2   :  { %1828 = vmatprep.subr.mxu0 %v9021_v38  ;;  %1899 = vmatprep.subr.mxu1 %v9022_v17  ;;  %v9064_v38 = vld [vmem:[#allocation121_spill] sm:$0xff]  ;;  %v9065_v17 = vld [vmem:[#allocation122_spill] sm:$0xff] }
 0x3e3   :  { %1829 = vmatpush1.msra.mxu0 %v9023_v29  ;;  %1900 = vmatpush1.msra.mxu1 %v9024_v13  ;;  %v9066_v29 = vld [vmem:[#allocation123_spill] sm:$0xff]  ;;  %v9067_v13 = vld [vmem:[#allocation124_spill] sm:$0xff] }
 0x3e4   :  { %1830 = vmatprep.subr.mxu0 %v9025_v14  ;;  %1901 = vmatprep.subr.mxu1 %v9026_v44  ;;  %v9068_v14 = vld [vmem:[#allocation125_spill] sm:$0xff]  ;;  %v9069_v44 = vld [vmem:[#allocation126_spill] sm:$0xff] }
 0x3e5   :  { %1831 = vmatpush1.msra.mxu0 %v9027_v15  ;;  %1902 = vmatpush1.msra.mxu1 %v9028_v16  ;;  %v9070_v15 = vld [vmem:[#allocation127_spill] sm:$0xff]  ;;  %v9071_v16 = vld [vmem:[#allocation128_spill] sm:$0xff] }
 0x3e6   :  { %1832 = vmatprep.subr.mxu0 %v9029_v20  ;;  %1903 = vmatprep.subr.mxu1 %v9030_v21  ;;  %v9072_v20 = vld [vmem:[#allocation129_spill] sm:$0xff]  ;;  %v9073_v21 = vld [vmem:[#allocation130_spill] sm:$0xff] }
 0x3e7   :  { %1833 = vmatpush2.msra.mxu0 %v9031_v22  ;;  %1904 = vmatpush2.msra.mxu1 %v9032_v23  ;;  %v9074_v22 = vld [vmem:[#allocation131_spill] sm:$0xff]  ;;  %v9075_v23 = vld [vmem:[#allocation132_spill] sm:$0xff] }
 0x3e8   :  { %1834 = vmatprep.subr.mxu0 %v9033_v24  ;;  %1905 = vmatprep.subr.mxu1 %v9034_v28  ;;  %v9076_v24 = vld [vmem:[#allocation133_spill] sm:$0xff]  ;;  %v9077_v28 = vld [vmem:[#allocation134_spill] sm:$0xff] }
 0x3e9   :  { %1835 = vmatpush2.msra.mxu0 %v9035_v32  ;;  %1906 = vmatpush2.msra.mxu1 %v9036_v40  ;;  %v9078_v32 = vld [vmem:[#allocation135_spill] sm:$0xff]  ;;  %v9079_v40 = vld [vmem:[#allocation136_spill] sm:$0xff] }
 0x3ea   :  { %1836 = vmatprep.subr.mxu0 %v9037_v41  ;;  %1907 = vmatprep.subr.mxu1 %v9038_v46  ;;  %v9080_v41 = vld [vmem:[#allocation137_spill] sm:$0xff]  ;;  %v9081_v46 = vld [vmem:[#allocation138_spill] sm:$0xff] }
 0x3eb   :  { %1837 = vmatpush2.msra.mxu0 %v9039_v47  ;;  %1908 = vmatpush2.msra.mxu1 %v9040_v49  ;;  %v9082_v47 = vld [vmem:[#allocation139_spill] sm:$0xff]  ;;  %v9083_v49 = vld [vmem:[#allocation140_spill] sm:$0xff] }
 0x3ec   :  { %1838 = vmatprep.subr.mxu0 %v9041_v51  ;;  %1909 = vmatprep.subr.mxu1 %v9042_v52  ;;  %v9084_v51 = vld [vmem:[#allocation141_spill] sm:$0xff]  ;;  %v9085_v52 = vld [vmem:[#allocation142_spill] sm:$0xff] }
 0x3ed   :  { %1839 = vmatpush2.msra.mxu0 %v9043_v54  ;;  %1910 = vmatpush2.msra.mxu1 %v9044_v55  ;;  %v9086_v54 = vld [vmem:[#allocation143_spill] sm:$0xff]  ;;  %v9087_v55 = vld [vmem:[#allocation144_spill] sm:$0xff] }
 0x3ee   :  { %1840 = vmatprep.subr.mxu0 %v9045_v56  ;;  %1911 = vmatprep.subr.mxu1 %v9046_v57  ;;  %v9088_v56 = vld [vmem:[#allocation145_spill] sm:$0xff]  ;;  %v9089_v57 = vld [vmem:[#allocation146_spill] sm:$0xff] }
 0x3ef   :  { %1841 = vmatpush2.msra.mxu0 %v9047_v11  ;;  %1912 = vmatpush2.msra.mxu1 %v9048_v12  ;;  %v9090_v11 = vld [vmem:[#allocation147_spill] sm:$0xff]  ;;  %v9091_v12 = vld [vmem:[#allocation149_spill] sm:$0xff] }
 0x3f0   :  { %1842 = vmatprep.subr.mxu0 %v9049_v8  ;;  %1913 = vmatprep.subr.mxu1 %v9050_v34  ;;  %v9092_v8 = vld [vmem:[#allocation148_spill] sm:$0xff] }
 0x3f1   :  { %1843 = vmatpush2.msra.mxu0 %v9051_v27  ;;  %1914 = vmatpush2.msra.mxu1 %v9052_v26  ;;  %v6351_v34 = vld [vmem:[#allocation7 + $0x1e8] sm:$0xff]  ;;  %v6354_v27 = vld [vmem:[#allocation7 + $0x1f8] sm:$0xff] }
 0x3f2   :  { %1844 = vmatprep.subr.mxu0 %v9053_v0  ;;  %1915 = vmatprep.subr.mxu1 %v9054_v53  ;;  %v9093_v0 = vld [vmem:[#allocation16_spill] sm:$0xff] }
 0x3f3   :  { %1845 = vmatpush2.msra.mxu0 %v9055_v39  ;;  %1916 = vmatpush2.msra.mxu1 %v9056_v62 }
 0x3f4   :  { %1846 = vmatprep.subr.mxu0 %v9057_v33  ;;  %1917 = vmatprep.subr.mxu1 %v9058_v36  ;;  %v9094_v33 = vld [vmem:[#allocation17_spill] sm:$0xff] }
 0x3f5   :  { %1847 = vmatpush2.msra.mxu0 %v9059_v25  ;;  %1918 = vmatpush2.msra.mxu1 %v9060_v31 }
 0x3f6   :  { %1848 = vmatprep.subr.mxu0 %v9061_v35  ;;  %1919 = vmatprep.subr.mxu1 %v9062_v30  ;;  %v9095_v35 = vld [vmem:[#allocation18_spill] sm:$0xff] }
 0x3f7   :  { %1849 = vmatpush2.msra.mxu0 %v9063_v37  ;;  %1920 = vmatpush2.msra.mxu1 %v9064_v38 }
 0x3f8   :  { %1850 = vmatprep.subr.mxu0 %v9065_v17  ;;  %1921 = vmatprep.subr.mxu1 %v9066_v29  ;;  %v9096_v29 = vld [vmem:[#allocation19_spill] sm:$0xff] }
 0x3f9   :  { %1851 = vmatpush2.msra.mxu0 %v9067_v13  ;;  %1922 = vmatpush2.msra.mxu1 %v9068_v14 }
 0x3fa   :  { %1852 = vmatprep.subr.mxu0 %v9069_v44  ;;  %1923 = vmatprep.subr.mxu1 %v9070_v15 }
 0x3fb   :  { %1853 = vmatpush2.msra.mxu0 %v9071_v16  ;;  %1924 = vmatpush2.msra.mxu1 %v9072_v20 }
 0x3fc   :  { %1854 = vmatprep.subr.mxu0 %v9073_v21  ;;  %1925 = vmatprep.subr.mxu1 %v9074_v22  ;;  %v9097_v22 = vld [vmem:[#allocation155_spill] sm:$0xff] }
 0x3fd   :  { %1855 = vmatpush2.msra.mxu0 %v9075_v23  ;;  %1926 = vmatpush2.msra.mxu1 %v9076_v24 }
 0x3fe   :  { %1856 = vmatprep.subr.mxu0 %v9077_v28  ;;  %1927 = vmatprep.subr.mxu1 %v9078_v32 }
 0x3ff   :  { %1857 = vmatpush2.msra.mxu0 %v9079_v40  ;;  %1928 = vmatpush2.msra.mxu1 %v9080_v41  ;;  %v9098_v41 = vld [vmem:[#allocation157_spill] sm:$0xff] }
 0x400   :  { %1858 = vmatprep.subr.mxu0 %v9081_v46  ;;  %1929 = vmatprep.subr.mxu1 %v9082_v47 }
 0x401   :  { %1859 = vmatpush2.msra.mxu0 %v9083_v49  ;;  %1930 = vmatpush2.msra.mxu1 %v9084_v51 }
 0x402   :  { %1860 = vmatprep.subr.mxu0 %v9085_v52  ;;  %1931 = vmatprep.subr.mxu1 %v9086_v54 }
 0x403   :  { %1861 = vmatpush2.msra.mxu0 %v9087_v55  ;;  %1932 = vmatpush2.msra.mxu1 %v9088_v56  ;;  %v9099_v56 = vld [vmem:[#allocation156_spill] sm:$0xff] }
 0x404   :  { %1862 = vmatprep.subr.mxu0 %v9089_v57  ;;  %1933 = vmatprep.subr.mxu1 %v9090_v11 }
 0x405   :  { %1863 = vmatpush2.msra.mxu0 %v9091_v12  ;;  %1934 = vmatpush2.msra.mxu1 %v9092_v8  ;;  %v9100_v8 = vld [vmem:[#allocation158_spill] sm:$0xff] }
 0x406   :  { %1966 = vmatprep.subr.mxu0 %v6351_v34  ;;  %2037 = vmatprep.subr.mxu1 %v6354_v27 }
 0x464   :  { %v1530_v26 = vpop.f32.mrf.mxu0  ;;  %v1601_v31 = vpop.f32.mrf.mxu1 }
 0x465   :  { %v1531_v53 = vadd.f32 %v1530_v26, %v9093_v0  ;;  %v1602_v30 = vadd.f32 %v1601_v31, %v9095_v35 }
 0x466   :  { %v1532_v39 = vpop.f32.mrf.mxu0  ;;  %v1603_v37 = vpop.f32.mrf.mxu1 }
 0x467   :  { %v3456_v62 = vmul.f32 -1.442695, %v1531_v53  ;;  %v1533_v36 = vadd.f32 %v1532_v39, %v9094_v33  ;;  %v3458_v38 = vmul.f32 -1.442695, %v1602_v30  ;;  %v1604_v13 = vadd.f32 %v1603_v37, %v9096_v29 }
 0x469   :  { %3634 = vpow2.f32 %v3456_v62  ;;  %v3457_v25 = vmul.f32 -1.442695, %v1533_v36 }
 0x46b   :  { %3636 = vpow2.f32 %v3457_v25 }
 0x46c   :  { %3638 = vpow2.f32 %v3458_v38 }
 0x476   :  { %v3635_v17 = vpop.eup %3634 }
 0x477   :  { %v1615_v14 = vadd.f32 1.0, %v3635_v17 }
 0x478   :  { %v3637_v44 = vpop.eup %3636 }
 0x479   :  { %3640 = vrcp.f32 %v1615_v14  ;;  %v1616_v15 = vadd.f32 1.0, %v3637_v44  ;;  %v3639_v16 = vpop.eup %3638 }
 0x47a   :  { %3642 = vtanh.f32 %v1604_v13  ;;  %v1617_v47 = vadd.f32 1.0, %v3639_v16 }
 0x47b   :  { %3644 = vrcp.f32 %v1616_v15 }
 0x485   :  { %v1696_v20 = vpop.f32.mrf.mxu0  ;;  %v1767_v55 = vpop.f32.mrf.mxu1 }
 0x486   :  { %v3641_v21 = vpop.eup %3640  ;;  %v1772_v23 = vadd.f32 %v1696_v20, %v9097_v22  ;;  %v1774_v57 = vadd.f32 %v1767_v55, %v9099_v56  ;;  %v6452_v22 = vld [vmem:[#allocation7 + $0xd0] sm:$0xff]  ;;  %v6491_v56 = vld [vmem:[#allocation7 + $0x48] sm:$0xff] }
 0x487   :  { %v3643_v24 = vpop.eup %3642  ;;  %v1698_v28 = vpop.f32.mrf.mxu0  ;;  %v6488_v55 = vld [vmem:[#allocation7 + $0x70] sm:$0xff] }
 0x488   :  { %v3645_v32 = vpop.eup %3644  ;;  %v3459_v40 = vmul.f32 -1.442695, %v1772_v23  ;;  %v1773_v46 = vadd.f32 %v1698_v28, %v9098_v41  ;;  %v1626_v51 = vmul.f32 %v3643_v24, %v3641_v21  ;;  %v1769_v11 = vpop.f32.mrf.mxu1  ;;  %v3461_v12 = vmul.f32 -1.442695, %v1774_v57  ;;  %v6455_v23 = vld [vmem:[#allocation7 + $0xa8] sm:$0xff]  ;;  %v6458_v24 = vld [vmem:[#allocation7 + $0xb8] sm:$0xff] }
 0x489   :  { %v1625_v49 = vmul.f32 %v3645_v32, %v6108_v61  ;;  %v1775_v26 = vadd.f32 %v1769_v11, %v9100_v8  ;;  %v6461_v28 = vld [vmem:[#allocation7 + $0xa0] sm:$0xff]  ;;  %v6464_v32 = vld [vmem:[#allocation7 + $0xb0] sm:$0xff]  ;;  %v6470_v41 = vld [vmem:[#allocation7 + $0x98] sm:$0xff] }
 0x48a   :  { %3646 = vpow2.f32 %v3459_v40  ;;  %v3460_v52 = vmul.f32 -1.442695, %v1773_v46  ;;  %v6467_v40 = vld [vmem:[#allocation7 + $0x88] sm:$0xff]  ;;  %v6473_v46 = vld [vmem:[#allocation7 + $0x80] sm:$0xff]  ;;  %v6494_v57 = vld [vmem:[#allocation7 + $0x58] sm:$0xff] }
 0x48b   :  { %v6364_v54 = vadd.f32 %v1626_v51, %v1625_v49  ;;  %v6479_v49 = vld [vmem:[#allocation7 + $0x68] sm:$0xff]  ;;  %v6482_v51 = vld [vmem:[#allocation7 + $0x78] sm:$0xff]  ;;  %v6497_v11 = vld [vmem:[#allocation7 + $0x40] sm:$0xff] }
 0x48c   :  { %3648 = vpow2.f32 %v3460_v52  ;;  %v6485_v52 = vld [vmem:[#allocation7 + $0x60] sm:$0xff]  ;;  %v6503_v8 = vld [vmem:[#allocation7 + $0x28] sm:$0xff] }
 0x48d   :  { %3650 = vrcp.f32 %v1617_v47  ;;  %v6476_v47 = vld [vmem:[#allocation7 + $0x90] sm:$0xff] }
 0x48e   :  { %3652 = vtanh.f32 %v6364_v54 }
 0x48f   :  { %3654 = vpow2.f32 %v3461_v12  ;;  %v6500_v12 = vld [vmem:[#allocation7 + $0x50] sm:$0xff] }
 0x490   :  { %3656 = vtanh.f32 %v1775_v26  ;;  %v6506_v26 = vld [vmem:[#allocation7 + $0x38] sm:$0xff] }
 0x497   :  { %v3647_v53 = vpop.eup %3646 }
 0x498   :  { %v1785_v39 = vadd.f32 1.0, %v3647_v53  ;;  %v6509_v53 = vld [vmem:[#allocation7 + $0x20] sm:$0xff] }
 0x499   :  { %v3649_v61 = vpop.eup %3648 }
 0x49a   :  { %v3651_v62 = vpop.eup %3650  ;;  %3658 = vrcp.f32 %v1785_v39  ;;  %v1786_v36 = vadd.f32 1.0, %v3649_v61  ;;  %v6512_v39 = vld [vmem:[#allocation7 + $0x30] sm:$0xff]  ;;  %v6515_v61 = vld [vmem:[#allocation7 + $0x8] sm:$0xff] }
 0x49b   :  { %v3653_v25 = vpop.eup %3652 }
 0x49c   :  { %3660 = vrcp.f32 %v1786_v36  ;;  %v1629_v31 = vmul.f32 %v3653_v25, %v3651_v62  ;;  %v3655_v30 = vpop.eup %3654  ;;  %v6518_v62 = vld [vmem:[#allocation7 + $0x18] sm:$0xff]  ;;  %v6521_v36 = vld [vmem:[#allocation7] sm:$0xff]  ;;  %v6525_v25 = vld [vmem:[#allocation7 + $0x10] sm:$0xff] }
 0x49d   :  { %v3657_v37 = vpop.eup %3656  ;;  %v1787_v14 = vadd.f32 1.0, %v3655_v30  ;;  %9101 = vst [vmem:[#allocation150_spill] sm:$0xff] %v6521_v36  ;;  %9102 = vst [vmem:[#allocation151_spill] sm:$0xff] %v6525_v25  ;;  %v6534_v30 = vld [vmem:[#allocation8 + $0x1f8] sm:$0xff] }
 0x49e   :  { %1864 = vmatprep.mubr.f32.mxu0 %v1629_v31  ;;  %1935 = vmatprep.mubr.f32.mxu1 %v1629_v31  ;;  %v6531_v31 = vld [vmem:[#allocation8 + $0x1e8] sm:$0xff]  ;;  %9104 = vst [vmem:[#allocation152_spill] sm:$0xff] %v6534_v30 }
 0x49f   :  { %3662 = vrcp.f32 %v1787_v14  ;;  %9103 = vst [vmem:[#allocation153_spill] sm:$0xff] %v6531_v31  ;;  %v6549_v14 = vld [vmem:[#allocation8 + $0x1c0] sm:$0xff] }
 0x4a0   :  { %9109 = vst [vmem:[#allocation23_spill] sm:$0xff] %v6549_v14 }
 0x4a7   :  { %v3659_v38 = vpop.eup %3658 }
 0x4a8   :  { %v1796_v17 = vmul.f32 %v3659_v38, %v3657_v37  ;;  %v6537_v37 = vld [vmem:[#allocation8 + $0x1e0] sm:$0xff]  ;;  %v6540_v38 = vld [vmem:[#allocation8 + $0x1f0] sm:$0xff] }
 0x4a9   :  { %v3661_v13 = vpop.eup %3660  ;;  %9105 = vst [vmem:[#allocation154_spill] sm:$0xff] %v6537_v37  ;;  %9106 = vst [vmem:[#allocation20_spill] sm:$0xff] %v6540_v38 }
 0x4aa   :  { %v1795_v44 = vmul.f32 %v3661_v13, %v6114_v45  ;;  %v6395_v45 = vld [vmem:[#allocation7 + $0x148] sm:$0xff]  ;;  %v6546_v13 = vld [vmem:[#allocation8 + $0x1d8] sm:$0xff] }
 0x4ab   :  { %9108 = vst [vmem:[#allocation22_spill] sm:$0xff] %v6546_v13 }
 0x4ac   :  { %v6370_v15 = vadd.f32 %v1796_v17, %v1795_v44  ;;  %v3663_v16 = vpop.eup %3662  ;;  %v6543_v17 = vld [vmem:[#allocation8 + $0x1c8] sm:$0xff]  ;;  %v6552_v44 = vld [vmem:[#allocation8 + $0x1d0] sm:$0xff] }
 0x4ad   :  { %9107 = vst [vmem:[#allocation21_spill] sm:$0xff] %v6543_v17  ;;  %9110 = vst [vmem:[#allocation24_spill] sm:$0xff] %v6552_v44 }
 0x4ae   :  { %3664 = vtanh.f32 %v6370_v15 }
 0x4bb   :  { %v3665_v20 = vpop.eup %3664 }
 0x4bc   :  { %v6373_v21 = vmul.f32 %v3665_v20, %v3663_v16  ;;  %v6555_v16 = vld [vmem:[#allocation8 + $0x1a8] sm:$0xff]  ;;  %v6558_v20 = vld [vmem:[#allocation8 + $0x1b8] sm:$0xff] }
 0x4bd   :  { %9111 = vst [vmem:[#allocation25_spill] sm:$0xff] %v6555_v16  ;;  %9112 = vst [vmem:[#allocation26_spill] sm:$0xff] %v6558_v20 }
 0x4be   :  { %1865 = vmatmul.mubr.f32.vlgmr.msra.gmra.mxu0 %v6373_v21  ;;  %1936 = vmatmul.mubr.f32.vlgmr.msra.gmra.mxu1 %v6373_v21 }
 0x4bf   :  { %1967 = vmatpush1.msra.mxu0 %v6121_v3  ;;  %2038 = vmatpush1.msra.mxu1 %v6124_v5  ;;  %v6398_v3 = vld [vmem:[#allocation7 + $0x158] sm:$0xff]  ;;  %v6401_v5 = vld [vmem:[#allocation7 + $0x140] sm:$0xff] }
 0x4c0   :  { %1968 = vmatprep.subr.mxu0 %v6127_v9  ;;  %2039 = vmatprep.subr.mxu1 %v6130_v48  ;;  %v6404_v9 = vld [vmem:[#allocation7 + $0x150] sm:$0xff]  ;;  %v6407_v48 = vld [vmem:[#allocation7 + $0x128] sm:$0xff] }
 0x4c1   :  { %1969 = vmatpush1.msra.mxu0 %v6133_v10  ;;  %2040 = vmatpush1.msra.mxu1 %v6136_v18  ;;  %v6410_v10 = vld [vmem:[#allocation7 + $0x138] sm:$0xff]  ;;  %v6413_v18 = vld [vmem:[#allocation7 + $0x120] sm:$0xff] }
 0x4c2   :  { %1970 = vmatprep.subr.mxu0 %v6139_v50  ;;  %2041 = vmatprep.subr.mxu1 %v6142_v42  ;;  %v6416_v50 = vld [vmem:[#allocation7 + $0x130] sm:$0xff]  ;;  %v6419_v42 = vld [vmem:[#allocation7 + $0x108] sm:$0xff] }
 0x4c3   :  { %1971 = vmatpush1.msra.mxu0 %v6145_v59  ;;  %2042 = vmatpush1.msra.mxu1 %v6148_v58  ;;  %v6422_v59 = vld [vmem:[#allocation7 + $0x118] sm:$0xff]  ;;  %v6425_v58 = vld [vmem:[#allocation7 + $0x100] sm:$0xff] }
 0x4c4   :  { %1972 = vmatprep.subr.mxu0 %v6151_v4  ;;  %2043 = vmatprep.subr.mxu1 %v6154_v2  ;;  %v6428_v4 = vld [vmem:[#allocation7 + $0x110] sm:$0xff]  ;;  %v6431_v2 = vld [vmem:[#allocation7 + $0xe8] sm:$0xff] }
 0x4c5   :  { %1973 = vmatpush1.msra.mxu0 %v6157_v6  ;;  %2044 = vmatpush1.msra.mxu1 %v6160_v63  ;;  %v6434_v6 = vld [vmem:[#allocation7 + $0xf8] sm:$0xff]  ;;  %v6437_v63 = vld [vmem:[#allocation7 + $0xe0] sm:$0xff] }
 0x4c6   :  { %1974 = vmatprep.subr.mxu0 %v6163_v7  ;;  %2045 = vmatprep.subr.mxu1 %v6166_v60  ;;  %v6440_v7 = vld [vmem:[#allocation7 + $0xf0] sm:$0xff]  ;;  %v6443_v60 = vld [vmem:[#allocation7 + $0xc8] sm:$0xff] }
 0x4c7   :  { %1975 = vmatpush1.msra.mxu0 %v6169_v43  ;;  %2046 = vmatpush1.msra.mxu1 %v6172_v1  ;;  %v6446_v43 = vld [vmem:[#allocation7 + $0xd8] sm:$0xff]  ;;  %v6449_v1 = vld [vmem:[#allocation7 + $0xc0] sm:$0xff] }
 0x4c8   :  { %1976 = vmatprep.subr.mxu0 %v6395_v45  ;;  %2047 = vmatprep.subr.mxu1 %v6398_v3 }
 0x4c9   :  { %1977 = vmatpush1.msra.mxu0 %v6401_v5  ;;  %2048 = vmatpush1.msra.mxu1 %v6404_v9 }
 0x4ca   :  { %1978 = vmatprep.subr.mxu0 %v6407_v48  ;;  %2049 = vmatprep.subr.mxu1 %v6410_v10 }
 0x4cb   :  { %1979 = vmatpush1.msra.mxu0 %v6413_v18  ;;  %2050 = vmatpush1.msra.mxu1 %v6416_v50 }
 0x4cc   :  { %1980 = vmatprep.subr.mxu0 %v6419_v42  ;;  %2051 = vmatprep.subr.mxu1 %v6422_v59 }
 0x4cd   :  { %1981 = vmatpush1.msra.mxu0 %v6425_v58  ;;  %2052 = vmatpush1.msra.mxu1 %v6428_v4 }
 0x4ce   :  { %1982 = vmatprep.subr.mxu0 %v6431_v2  ;;  %2053 = vmatprep.subr.mxu1 %v6434_v6 }
 0x4cf   :  { %1983 = vmatpush1.msra.mxu0 %v6437_v63  ;;  %2054 = vmatpush1.msra.mxu1 %v6440_v7 }
 0x4d0   :  { %1984 = vmatprep.subr.mxu0 %v6443_v60  ;;  %2055 = vmatprep.subr.mxu1 %v6446_v43 }
 0x4d1   :  { %1985 = vmatpush1.msra.mxu0 %v6449_v1  ;;  %2056 = vmatpush1.msra.mxu1 %v6452_v22 }
 0x4d2   :  { %1986 = vmatprep.subr.mxu0 %v6455_v23  ;;  %2057 = vmatprep.subr.mxu1 %v6458_v24 }
 0x4d3   :  { %1987 = vmatpush1.msra.mxu0 %v6461_v28  ;;  %2058 = vmatpush1.msra.mxu1 %v6464_v32 }
 0x4d4   :  { %1988 = vmatprep.subr.mxu0 %v6467_v40  ;;  %2059 = vmatprep.subr.mxu1 %v6470_v41 }
 0x4d5   :  { %1989 = vmatpush1.msra.mxu0 %v6473_v46  ;;  %2060 = vmatpush1.msra.mxu1 %v6476_v47 }
 0x4d6   :  { %1990 = vmatprep.subr.mxu0 %v6479_v49  ;;  %2061 = vmatprep.subr.mxu1 %v6482_v51 }
 0x4d7   :  { %1991 = vmatpush1.msra.mxu0 %v6485_v52  ;;  %2062 = vmatpush1.msra.mxu1 %v6488_v55 }
 0x4d8   :  { %1992 = vmatprep.subr.mxu0 %v6491_v56  ;;  %2063 = vmatprep.subr.mxu1 %v6494_v57 }
 0x4d9   :  { %1993 = vmatpush1.msra.mxu0 %v6497_v11  ;;  %2064 = vmatpush1.msra.mxu1 %v6500_v12 }
 0x4da   :  { %1994 = vmatprep.subr.mxu0 %v6503_v8  ;;  %2065 = vmatprep.subr.mxu1 %v6506_v26 }
 0x4db   :  { %1995 = vmatpush1.msra.mxu0 %v6509_v53  ;;  %2066 = vmatpush1.msra.mxu1 %v6512_v39 }
 0x4dc   :  { %1996 = vmatprep.subr.mxu0 %v6515_v61  ;;  %2067 = vmatprep.subr.mxu1 %v6518_v62 }
 0x4dd   :  { %1997 = vmatpush1.msra.mxu0 %v6521_v36  ;;  %2030 = vmatprep.mubr.f32.mxu0 %v8963_v19 }
 0x4de   :  { %2068 = vmatpush1.msra.mxu1 %v6525_v25  ;;  %2101 = vmatprep.mubr.f32.mxu1 %v8963_v19 }
 0x4df   :  { %2031 = vmatmul.mubr.f32.vlgmr.msra.gmra.mxu0 %v6373_v21  ;;  %2102 = vmatmul.mubr.f32.vlgmr.msra.gmra.mxu1 %v6373_v21  ;;  %v6561_v21 = vld [vmem:[#allocation8 + $0x1a0] sm:$0xff] }
 0x4e0   :  { %2136 = vmatprep.subr.mxu0 %v6531_v31  ;;  %2207 = vmatprep.subr.mxu1 %v6534_v30  ;;  %9113 = vst [vmem:[#allocation27_spill] sm:$0xff] %v6561_v21 }
 0x4e1   :  { %2137 = vmatpush1.msra.mxu0 %v6537_v37  ;;  %2208 = vmatpush1.msra.mxu1 %v6540_v38 }
 0x4e2   :  { %2138 = vmatprep.subr.mxu0 %v6543_v17  ;;  %2209 = vmatprep.subr.mxu1 %v6546_v13  ;;  %v6564_v13 = vld [vmem:[#allocation8 + $0x1b0] sm:$0xff] }
 0x4e3   :  { %2139 = vmatpush1.msra.mxu0 %v6549_v14  ;;  %2210 = vmatpush1.msra.mxu1 %v6552_v44  ;;  %9114 = vst [vmem:[#allocation28_spill] sm:$0xff] %v6564_v13  ;;  %v6567_v14 = vld [vmem:[#allocation8 + $0x188] sm:$0xff]  ;;  %v6570_v44 = vld [vmem:[#allocation8 + $0x198] sm:$0xff] }
 0x4e4   :  { %2140 = vmatprep.subr.mxu0 %v6555_v16  ;;  %2211 = vmatprep.subr.mxu1 %v6558_v20  ;;  %9115 = vst [vmem:[#allocation29_spill] sm:$0xff] %v6567_v14  ;;  %9116 = vst [vmem:[#allocation30_spill] sm:$0xff] %v6570_v44  ;;  %v6573_v16 = vld [vmem:[#allocation8 + $0x180] sm:$0xff]  ;;  %v6576_v20 = vld [vmem:[#allocation8 + $0x190] sm:$0xff] }
 0x4e5   :  { %2141 = vmatpush1.msra.mxu0 %v6561_v21  ;;  %2212 = vmatpush1.msra.mxu1 %v6564_v13  ;;  %9117 = vst [vmem:[#allocation31_spill] sm:$0xff] %v6573_v16  ;;  %9118 = vst [vmem:[#allocation32_spill] sm:$0xff] %v6576_v20  ;;  %v6579_v21 = vld [vmem:[#allocation8 + $0x168] sm:$0xff]  ;;  %v6582_v13 = vld [vmem:[#allocation8 + $0x178] sm:$0xff] }
 0x4e6   :  { %2142 = vmatprep.subr.mxu0 %v6567_v14  ;;  %2213 = vmatprep.subr.mxu1 %v6570_v44  ;;  %9119 = vst [vmem:[#allocation33_spill] sm:$0xff] %v6579_v21  ;;  %9120 = vst [vmem:[#allocation34_spill] sm:$0xff] %v6582_v13  ;;  %v6585_v14 = vld [vmem:[#allocation8 + $0x160] sm:$0xff]  ;;  %v6588_v44 = vld [vmem:[#allocation8 + $0x170] sm:$0xff] }
 0x4e7   :  { %2143 = vmatpush1.msra.mxu0 %v6573_v16  ;;  %2214 = vmatpush1.msra.mxu1 %v6576_v20  ;;  %9121 = vst [vmem:[#allocation35_spill] sm:$0xff] %v6585_v14  ;;  %9122 = vst [vmem:[#allocation36_spill] sm:$0xff] %v6588_v44  ;;  %v6591_v16 = vld [vmem:[#allocation8 + $0x148] sm:$0xff]  ;;  %v6594_v20 = vld [vmem:[#allocation8 + $0x158] sm:$0xff] }
 0x4e8   :  { %2144 = vmatprep.subr.mxu0 %v6579_v21  ;;  %2215 = vmatprep.subr.mxu1 %v6582_v13  ;;  %9123 = vst [vmem:[#allocation37_spill] sm:$0xff] %v6591_v16  ;;  %9124 = vst [vmem:[#allocation38_spill] sm:$0xff] %v6594_v20  ;;  %v6597_v21 = vld [vmem:[#allocation8 + $0x140] sm:$0xff]  ;;  %v6600_v13 = vld [vmem:[#allocation8 + $0x150] sm:$0xff] }
 0x4e9   :  { %2145 = vmatpush1.msra.mxu0 %v6585_v14  ;;  %2216 = vmatpush1.msra.mxu1 %v6588_v44  ;;  %9125 = vst [vmem:[#allocation39_spill] sm:$0xff] %v6597_v21  ;;  %9126 = vst [vmem:[#allocation40_spill] sm:$0xff] %v6600_v13  ;;  %v6603_v14 = vld [vmem:[#allocation8 + $0x128] sm:$0xff]  ;;  %v6606_v44 = vld [vmem:[#allocation8 + $0x138] sm:$0xff] }
 0x4ea   :  { %2146 = vmatprep.subr.mxu0 %v6591_v16  ;;  %2217 = vmatprep.subr.mxu1 %v6594_v20  ;;  %9127 = vst [vmem:[#allocation41_spill] sm:$0xff] %v6603_v14  ;;  %9128 = vst [vmem:[#allocation42_spill] sm:$0xff] %v6606_v44  ;;  %v6609_v16 = vld [vmem:[#allocation8 + $0x120] sm:$0xff]  ;;  %v6612_v20 = vld [vmem:[#allocation8 + $0x130] sm:$0xff] }
 0x4eb   :  { %2147 = vmatpush1.msra.mxu0 %v6597_v21  ;;  %2218 = vmatpush1.msra.mxu1 %v6600_v13  ;;  %9129 = vst [vmem:[#allocation43_spill] sm:$0xff] %v6609_v16  ;;  %9130 = vst [vmem:[#allocation44_spill] sm:$0xff] %v6612_v20  ;;  %v6615_v21 = vld [vmem:[#allocation8 + $0x108] sm:$0xff]  ;;  %v6618_v13 = vld [vmem:[#allocation8 + $0x118] sm:$0xff] }
 0x4ec   :  { %2148 = vmatprep.subr.mxu0 %v6603_v14  ;;  %2219 = vmatprep.subr.mxu1 %v6606_v44  ;;  %9131 = vst [vmem:[#allocation45_spill] sm:$0xff] %v6615_v21  ;;  %9132 = vst [vmem:[#allocation46_spill] sm:$0xff] %v6618_v13  ;;  %v6621_v14 = vld [vmem:[#allocation8 + $0x100] sm:$0xff]  ;;  %v6624_v44 = vld [vmem:[#allocation8 + $0x110] sm:$0xff] }
 0x4ed   :  { %2149 = vmatpush1.msra.mxu0 %v6609_v16  ;;  %2220 = vmatpush1.msra.mxu1 %v6612_v20  ;;  %9133 = vst [vmem:[#allocation47_spill] sm:$0xff] %v6621_v14  ;;  %9134 = vst [vmem:[#allocation48_spill] sm:$0xff] %v6624_v44  ;;  %v6627_v16 = vld [vmem:[#allocation8 + $0xe8] sm:$0xff]  ;;  %v6630_v20 = vld [vmem:[#allocation8 + $0xf8] sm:$0xff] }
 0x4ee   :  { %2150 = vmatprep.subr.mxu0 %v6615_v21  ;;  %2221 = vmatprep.subr.mxu1 %v6618_v13  ;;  %9135 = vst [vmem:[#allocation49_spill] sm:$0xff] %v6627_v16  ;;  %9136 = vst [vmem:[#allocation50_spill] sm:$0xff] %v6630_v20  ;;  %v6633_v21 = vld [vmem:[#allocation8 + $0xe0] sm:$0xff]  ;;  %v6636_v13 = vld [vmem:[#allocation8 + $0xf0] sm:$0xff] }
 0x4ef   :  { %2151 = vmatpush1.msra.mxu0 %v6621_v14  ;;  %2222 = vmatpush1.msra.mxu1 %v6624_v44  ;;  %9137 = vst [vmem:[#allocation51_spill] sm:$0xff] %v6633_v21  ;;  %9138 = vst [vmem:[#allocation52_spill] sm:$0xff] %v6636_v13  ;;  %v6639_v14 = vld [vmem:[#allocation8 + $0xc8] sm:$0xff]  ;;  %v6642_v44 = vld [vmem:[#allocation8 + $0xd8] sm:$0xff] }
 0x4f0   :  { %2152 = vmatprep.subr.mxu0 %v6627_v16  ;;  %2223 = vmatprep.subr.mxu1 %v6630_v20  ;;  %9139 = vst [vmem:[#allocation53_spill] sm:$0xff] %v6639_v14  ;;  %9140 = vst [vmem:[#allocation54_spill] sm:$0xff] %v6642_v44  ;;  %v6645_v16 = vld [vmem:[#allocation8 + $0xc0] sm:$0xff]  ;;  %v6648_v20 = vld [vmem:[#allocation8 + $0xd0] sm:$0xff] }
 0x4f1   :  { %2153 = vmatpush1.msra.mxu0 %v6633_v21  ;;  %2224 = vmatpush1.msra.mxu1 %v6636_v13  ;;  %9141 = vst [vmem:[#allocation55_spill] sm:$0xff] %v6645_v16  ;;  %9142 = vst [vmem:[#allocation56_spill] sm:$0xff] %v6648_v20  ;;  %v6651_v21 = vld [vmem:[#allocation8 + $0xa8] sm:$0xff]  ;;  %v6654_v13 = vld [vmem:[#allocation8 + $0xb8] sm:$0xff] }
 0x4f2   :  { %2154 = vmatprep.subr.mxu0 %v6639_v14  ;;  %2225 = vmatprep.subr.mxu1 %v6642_v44  ;;  %9143 = vst [vmem:[#allocation57_spill] sm:$0xff] %v6651_v21  ;;  %9144 = vst [vmem:[#allocation58_spill] sm:$0xff] %v6654_v13  ;;  %v6657_v14 = vld [vmem:[#allocation8 + $0xa0] sm:$0xff]  ;;  %v6660_v44 = vld [vmem:[#allocation8 + $0xb0] sm:$0xff] }
 0x4f3   :  { %2155 = vmatpush1.msra.mxu0 %v6645_v16  ;;  %2226 = vmatpush1.msra.mxu1 %v6648_v20  ;;  %9145 = vst [vmem:[#allocation59_spill] sm:$0xff] %v6657_v14  ;;  %9146 = vst [vmem:[#allocation60_spill] sm:$0xff] %v6660_v44  ;;  %v6663_v16 = vld [vmem:[#allocation8 + $0x88] sm:$0xff]  ;;  %v6666_v20 = vld [vmem:[#allocation8 + $0x98] sm:$0xff] }
 0x4f4   :  { %2156 = vmatprep.subr.mxu0 %v6651_v21  ;;  %2227 = vmatprep.subr.mxu1 %v6654_v13  ;;  %9147 = vst [vmem:[#allocation61_spill] sm:$0xff] %v6663_v16  ;;  %9148 = vst [vmem:[#allocation62_spill] sm:$0xff] %v6666_v20  ;;  %v6669_v21 = vld [vmem:[#allocation8 + $0x80] sm:$0xff]  ;;  %v6672_v13 = vld [vmem:[#allocation8 + $0x90] sm:$0xff] }
 0x4f5   :  { %2157 = vmatpush1.msra.mxu0 %v6657_v14  ;;  %2228 = vmatpush1.msra.mxu1 %v6660_v44  ;;  %9149 = vst [vmem:[#allocation63_spill] sm:$0xff] %v6669_v21  ;;  %9150 = vst [vmem:[#allocation64_spill] sm:$0xff] %v6672_v13  ;;  %v6675_v14 = vld [vmem:[#allocation8 + $0x68] sm:$0xff]  ;;  %v6678_v44 = vld [vmem:[#allocation8 + $0x78] sm:$0xff] }
 0x4f6   :  { %2158 = vmatprep.subr.mxu0 %v6663_v16  ;;  %2229 = vmatprep.subr.mxu1 %v6666_v20  ;;  %9151 = vst [vmem:[#allocation65_spill] sm:$0xff] %v6675_v14  ;;  %9152 = vst [vmem:[#allocation66_spill] sm:$0xff] %v6678_v44  ;;  %v6681_v16 = vld [vmem:[#allocation8 + $0x60] sm:$0xff]  ;;  %v6684_v20 = vld [vmem:[#allocation8 + $0x70] sm:$0xff] }
 0x4f7   :  { %2159 = vmatpush1.msra.mxu0 %v6669_v21  ;;  %2230 = vmatpush1.msra.mxu1 %v6672_v13  ;;  %9153 = vst [vmem:[#allocation67_spill] sm:$0xff] %v6681_v16  ;;  %9154 = vst [vmem:[#allocation68_spill] sm:$0xff] %v6684_v20  ;;  %v6687_v21 = vld [vmem:[#allocation8 + $0x48] sm:$0xff]  ;;  %v6690_v13 = vld [vmem:[#allocation8 + $0x58] sm:$0xff] }
 0x4f8   :  { %2160 = vmatprep.subr.mxu0 %v6675_v14  ;;  %2231 = vmatprep.subr.mxu1 %v6678_v44  ;;  %9155 = vst [vmem:[#allocation69_spill] sm:$0xff] %v6687_v21  ;;  %9156 = vst [vmem:[#allocation70_spill] sm:$0xff] %v6690_v13  ;;  %v6693_v14 = vld [vmem:[#allocation8 + $0x40] sm:$0xff]  ;;  %v6696_v44 = vld [vmem:[#allocation8 + $0x50] sm:$0xff] }
 0x4f9   :  { %2161 = vmatpush1.msra.mxu0 %v6681_v16  ;;  %2232 = vmatpush1.msra.mxu1 %v6684_v20  ;;  %9157 = vst [vmem:[#allocation71_spill] sm:$0xff] %v6693_v14  ;;  %9158 = vst [vmem:[#allocation72_spill] sm:$0xff] %v6696_v44  ;;  %v6699_v16 = vld [vmem:[#allocation8 + $0x28] sm:$0xff]  ;;  %v6702_v20 = vld [vmem:[#allocation8 + $0x38] sm:$0xff] }
 0x4fa   :  { %2162 = vmatprep.subr.mxu0 %v6687_v21  ;;  %2233 = vmatprep.subr.mxu1 %v6690_v13  ;;  %9159 = vst [vmem:[#allocation73_spill] sm:$0xff] %v6699_v16  ;;  %9160 = vst [vmem:[#allocation74_spill] sm:$0xff] %v6702_v20  ;;  %v6705_v21 = vld [vmem:[#allocation8 + $0x20] sm:$0xff]  ;;  %v6708_v13 = vld [vmem:[#allocation8 + $0x30] sm:$0xff] }
 0x4fb   :  { %2163 = vmatpush1.msra.mxu0 %v6693_v14  ;;  %2234 = vmatpush1.msra.mxu1 %v6696_v44  ;;  %9161 = vst [vmem:[#allocation75_spill] sm:$0xff] %v6705_v21  ;;  %9162 = vst [vmem:[#allocation76_spill] sm:$0xff] %v6708_v13  ;;  %v6711_v14 = vld [vmem:[#allocation8 + $0x8] sm:$0xff]  ;;  %v6714_v44 = vld [vmem:[#allocation8 + $0x18] sm:$0xff] }
 0x4fc   :  { %2164 = vmatprep.subr.mxu0 %v6699_v16  ;;  %2235 = vmatprep.subr.mxu1 %v6702_v20  ;;  %9163 = vst [vmem:[#allocation77_spill] sm:$0xff] %v6711_v14  ;;  %9164 = vst [vmem:[#allocation78_spill] sm:$0xff] %v6714_v44  ;;  %v6717_v16 = vld [vmem:[#allocation8] sm:$0xff]  ;;  %v6720_v20 = vld [vmem:[#allocation8 + $0x10] sm:$0xff] }
 0x4fd   :  { %2165 = vmatpush1.msra.mxu0 %v6705_v21  ;;  %2236 = vmatpush1.msra.mxu1 %v6708_v13  ;;  %9165 = vst [vmem:[#allocation79_spill] sm:$0xff] %v6717_v16  ;;  %9166 = vst [vmem:[#allocation80_spill] sm:$0xff] %v6720_v20  ;;  %v6723_v21 = vld [vmem:[#allocation8 + $0x3e8] sm:$0xff]  ;;  %v6726_v13 = vld [vmem:[#allocation8 + $0x3f8] sm:$0xff] }
 0x4fe   :  { %2166 = vmatprep.subr.mxu0 %v6711_v14  ;;  %2237 = vmatprep.subr.mxu1 %v6714_v44  ;;  %9167 = vst [vmem:[#allocation81_spill] sm:$0xff] %v6723_v21  ;;  %9168 = vst [vmem:[#allocation82_spill] sm:$0xff] %v6726_v13  ;;  %v6729_v14 = vld [vmem:[#allocation8 + $0x3e0] sm:$0xff]  ;;  %v6732_v44 = vld [vmem:[#allocation8 + $0x3f0] sm:$0xff] }
 0x4ff   :  { %2167 = vmatpush1.msra.mxu0 %v6717_v16  ;;  %2238 = vmatpush1.msra.mxu1 %v6720_v20  ;;  %9169 = vst [vmem:[#allocation83_spill] sm:$0xff] %v6729_v14  ;;  %9170 = vst [vmem:[#allocation84_spill] sm:$0xff] %v6732_v44  ;;  %v6735_v16 = vld [vmem:[#allocation8 + $0x3c8] sm:$0xff]  ;;  %v6738_v20 = vld [vmem:[#allocation8 + $0x3d8] sm:$0xff] }
 0x500   :  { %2168 = vmatprep.subr.mxu0 %v6723_v21  ;;  %2239 = vmatprep.subr.mxu1 %v6726_v13  ;;  %9171 = vst [vmem:[#allocation85_spill] sm:$0xff] %v6735_v16  ;;  %9172 = vst [vmem:[#allocation86_spill] sm:$0xff] %v6738_v20  ;;  %v6741_v21 = vld [vmem:[#allocation8 + $0x3c0] sm:$0xff]  ;;  %v6744_v13 = vld [vmem:[#allocation8 + $0x3d0] sm:$0xff] }
 0x501   :  { %2169 = vmatpush2.msra.mxu0 %v6729_v14  ;;  %2240 = vmatpush2.msra.mxu1 %v6732_v44  ;;  %9173 = vst [vmem:[#allocation87_spill] sm:$0xff] %v6741_v21  ;;  %9174 = vst [vmem:[#allocation88_spill] sm:$0xff] %v6744_v13  ;;  %v6747_v14 = vld [vmem:[#allocation8 + $0x3a8] sm:$0xff]  ;;  %v6750_v44 = vld [vmem:[#allocation8 + $0x3b8] sm:$0xff] }
 0x502   :  { %2170 = vmatprep.subr.mxu0 %v6735_v16  ;;  %2241 = vmatprep.subr.mxu1 %v6738_v20  ;;  %9175 = vst [vmem:[#allocation89_spill] sm:$0xff] %v6747_v14  ;;  %9176 = vst [vmem:[#allocation90_spill] sm:$0xff] %v6750_v44  ;;  %v6753_v16 = vld [vmem:[#allocation8 + $0x3a0] sm:$0xff]  ;;  %v6756_v20 = vld [vmem:[#allocation8 + $0x3b0] sm:$0xff] }
 0x503   :  { %2171 = vmatpush2.msra.mxu0 %v6741_v21  ;;  %2242 = vmatpush2.msra.mxu1 %v6744_v13  ;;  %9177 = vst [vmem:[#allocation91_spill] sm:$0xff] %v6753_v16  ;;  %9178 = vst [vmem:[#allocation92_spill] sm:$0xff] %v6756_v20  ;;  %v6759_v21 = vld [vmem:[#allocation8 + $0x388] sm:$0xff]  ;;  %v6762_v13 = vld [vmem:[#allocation8 + $0x398] sm:$0xff] }
 0x504   :  { %2172 = vmatprep.subr.mxu0 %v6747_v14  ;;  %2243 = vmatprep.subr.mxu1 %v6750_v44  ;;  %9179 = vst [vmem:[#allocation93_spill] sm:$0xff] %v6759_v21  ;;  %9180 = vst [vmem:[#allocation94_spill] sm:$0xff] %v6762_v13  ;;  %v6765_v14 = vld [vmem:[#allocation8 + $0x380] sm:$0xff]  ;;  %v6768_v44 = vld [vmem:[#allocation8 + $0x390] sm:$0xff] }
 0x505   :  { %2173 = vmatpush2.msra.mxu0 %v6753_v16  ;;  %2244 = vmatpush2.msra.mxu1 %v6756_v20  ;;  %9181 = vst [vmem:[#allocation95_spill] sm:$0xff] %v6765_v14  ;;  %9182 = vst [vmem:[#allocation96_spill] sm:$0xff] %v6768_v44  ;;  %v6771_v16 = vld [vmem:[#allocation8 + $0x368] sm:$0xff]  ;;  %v6774_v20 = vld [vmem:[#allocation8 + $0x378] sm:$0xff] }
 0x506   :  { %2174 = vmatprep.subr.mxu0 %v6759_v21  ;;  %2245 = vmatprep.subr.mxu1 %v6762_v13  ;;  %9183 = vst [vmem:[#allocation97_spill] sm:$0xff] %v6771_v16  ;;  %9184 = vst [vmem:[#allocation98_spill] sm:$0xff] %v6774_v20  ;;  %v6777_v21 = vld [vmem:[#allocation8 + $0x360] sm:$0xff]  ;;  %v6780_v13 = vld [vmem:[#allocation8 + $0x370] sm:$0xff] }
 0x507   :  { %2175 = vmatpush2.msra.mxu0 %v6765_v14  ;;  %2246 = vmatpush2.msra.mxu1 %v6768_v44  ;;  %9185 = vst [vmem:[#allocation99_spill] sm:$0xff] %v6777_v21  ;;  %9186 = vst [vmem:[#allocation100_spill] sm:$0xff] %v6780_v13  ;;  %v6783_v14 = vld [vmem:[#allocation8 + $0x348] sm:$0xff]  ;;  %v6786_v44 = vld [vmem:[#allocation8 + $0x358] sm:$0xff] }
 0x508   :  { %2176 = vmatprep.subr.mxu0 %v6771_v16  ;;  %2247 = vmatprep.subr.mxu1 %v6774_v20  ;;  %9187 = vst [vmem:[#allocation101_spill] sm:$0xff] %v6783_v14  ;;  %9188 = vst [vmem:[#allocation102_spill] sm:$0xff] %v6786_v44  ;;  %v6789_v16 = vld [vmem:[#allocation8 + $0x340] sm:$0xff]  ;;  %v6792_v20 = vld [vmem:[#allocation8 + $0x350] sm:$0xff] }
 0x509   :  { %2177 = vmatpush2.msra.mxu0 %v6777_v21  ;;  %2248 = vmatpush2.msra.mxu1 %v6780_v13  ;;  %9189 = vst [vmem:[#allocation103_spill] sm:$0xff] %v6789_v16  ;;  %9190 = vst [vmem:[#allocation104_spill] sm:$0xff] %v6792_v20  ;;  %v6795_v21 = vld [vmem:[#allocation8 + $0x328] sm:$0xff]  ;;  %v6798_v13 = vld [vmem:[#allocation8 + $0x338] sm:$0xff] }
 0x50a   :  { %2178 = vmatprep.subr.mxu0 %v6783_v14  ;;  %2249 = vmatprep.subr.mxu1 %v6786_v44  ;;  %9191 = vst [vmem:[#allocation105_spill] sm:$0xff] %v6795_v21  ;;  %9192 = vst [vmem:[#allocation106_spill] sm:$0xff] %v6798_v13  ;;  %v6801_v14 = vld [vmem:[#allocation8 + $0x320] sm:$0xff]  ;;  %v6804_v44 = vld [vmem:[#allocation8 + $0x330] sm:$0xff] }
 0x50b   :  { %2179 = vmatpush2.msra.mxu0 %v6789_v16  ;;  %2250 = vmatpush2.msra.mxu1 %v6792_v20  ;;  %9193 = vst [vmem:[#allocation107_spill] sm:$0xff] %v6801_v14  ;;  %9194 = vst [vmem:[#allocation108_spill] sm:$0xff] %v6804_v44  ;;  %v6807_v16 = vld [vmem:[#allocation8 + $0x308] sm:$0xff]  ;;  %v6810_v20 = vld [vmem:[#allocation8 + $0x318] sm:$0xff] }
 0x50c   :  { %2180 = vmatprep.subr.mxu0 %v6795_v21  ;;  %2251 = vmatprep.subr.mxu1 %v6798_v13  ;;  %9195 = vst [vmem:[#allocation109_spill] sm:$0xff] %v6807_v16  ;;  %9196 = vst [vmem:[#allocation110_spill] sm:$0xff] %v6810_v20  ;;  %v6813_v21 = vld [vmem:[#allocation8 + $0x300] sm:$0xff]  ;;  %v6816_v13 = vld [vmem:[#allocation8 + $0x310] sm:$0xff] }
 0x50d   :  { %2181 = vmatpush2.msra.mxu0 %v6801_v14  ;;  %2252 = vmatpush2.msra.mxu1 %v6804_v44  ;;  %9197 = vst [vmem:[#allocation111_spill] sm:$0xff] %v6813_v21  ;;  %9198 = vst [vmem:[#allocation112_spill] sm:$0xff] %v6816_v13  ;;  %v6819_v14 = vld [vmem:[#allocation8 + $0x2e8] sm:$0xff]  ;;  %v6822_v44 = vld [vmem:[#allocation8 + $0x2f8] sm:$0xff] }
 0x50e   :  { %2182 = vmatprep.subr.mxu0 %v6807_v16  ;;  %2253 = vmatprep.subr.mxu1 %v6810_v20  ;;  %9199 = vst [vmem:[#allocation113_spill] sm:$0xff] %v6819_v14  ;;  %9200 = vst [vmem:[#allocation114_spill] sm:$0xff] %v6822_v44  ;;  %v6825_v16 = vld [vmem:[#allocation8 + $0x2e0] sm:$0xff]  ;;  %v6828_v20 = vld [vmem:[#allocation8 + $0x2f0] sm:$0xff] }
 0x50f   :  { %2183 = vmatpush2.msra.mxu0 %v6813_v21  ;;  %2254 = vmatpush2.msra.mxu1 %v6816_v13  ;;  %9201 = vst [vmem:[#allocation115_spill] sm:$0xff] %v6825_v16  ;;  %9202 = vst [vmem:[#allocation116_spill] sm:$0xff] %v6828_v20  ;;  %v6831_v21 = vld [vmem:[#allocation8 + $0x2c8] sm:$0xff]  ;;  %v6834_v13 = vld [vmem:[#allocation8 + $0x2d8] sm:$0xff] }
 0x510   :  { %2184 = vmatprep.subr.mxu0 %v6819_v14  ;;  %2255 = vmatprep.subr.mxu1 %v6822_v44  ;;  %9203 = vst [vmem:[#allocation117_spill] sm:$0xff] %v6831_v21  ;;  %9204 = vst [vmem:[#allocation118_spill] sm:$0xff] %v6834_v13  ;;  %v6837_v14 = vld [vmem:[#allocation8 + $0x2c0] sm:$0xff]  ;;  %v6840_v44 = vld [vmem:[#allocation8 + $0x2d0] sm:$0xff] }
 0x511   :  { %2185 = vmatpush2.msra.mxu0 %v6825_v16  ;;  %2256 = vmatpush2.msra.mxu1 %v6828_v20  ;;  %9205 = vst [vmem:[#allocation119_spill] sm:$0xff] %v6837_v14  ;;  %9206 = vst [vmem:[#allocation120_spill] sm:$0xff] %v6840_v44  ;;  %v6843_v16 = vld [vmem:[#allocation8 + $0x2a8] sm:$0xff]  ;;  %v6846_v20 = vld [vmem:[#allocation8 + $0x2b8] sm:$0xff] }
 0x512   :  { %2186 = vmatprep.subr.mxu0 %v6831_v21  ;;  %2257 = vmatprep.subr.mxu1 %v6834_v13  ;;  %9207 = vst [vmem:[#allocation121_spill] sm:$0xff] %v6843_v16  ;;  %9208 = vst [vmem:[#allocation122_spill] sm:$0xff] %v6846_v20  ;;  %v6849_v21 = vld [vmem:[#allocation8 + $0x2a0] sm:$0xff]  ;;  %v6852_v13 = vld [vmem:[#allocation8 + $0x2b0] sm:$0xff] }
 0x513   :  { %2187 = vmatpush2.msra.mxu0 %v6837_v14  ;;  %2258 = vmatpush2.msra.mxu1 %v6840_v44  ;;  %9209 = vst [vmem:[#allocation123_spill] sm:$0xff] %v6849_v21  ;;  %9210 = vst [vmem:[#allocation124_spill] sm:$0xff] %v6852_v13  ;;  %v6855_v14 = vld [vmem:[#allocation8 + $0x288] sm:$0xff]  ;;  %v6858_v44 = vld [vmem:[#allocation8 + $0x298] sm:$0xff] }
 0x514   :  { %2188 = vmatprep.subr.mxu0 %v6843_v16  ;;  %2259 = vmatprep.subr.mxu1 %v6846_v20  ;;  %9211 = vst [vmem:[#allocation125_spill] sm:$0xff] %v6855_v14  ;;  %9212 = vst [vmem:[#allocation126_spill] sm:$0xff] %v6858_v44  ;;  %v6861_v16 = vld [vmem:[#allocation8 + $0x280] sm:$0xff]  ;;  %v6864_v20 = vld [vmem:[#allocation8 + $0x290] sm:$0xff] }
 0x515   :  { %2189 = vmatpush2.msra.mxu0 %v6849_v21  ;;  %2260 = vmatpush2.msra.mxu1 %v6852_v13  ;;  %9213 = vst [vmem:[#allocation127_spill] sm:$0xff] %v6861_v16  ;;  %9214 = vst [vmem:[#allocation128_spill] sm:$0xff] %v6864_v20  ;;  %v6867_v21 = vld [vmem:[#allocation8 + $0x268] sm:$0xff]  ;;  %v6870_v13 = vld [vmem:[#allocation8 + $0x278] sm:$0xff] }
 0x516   :  { %2190 = vmatprep.subr.mxu0 %v6855_v14  ;;  %2261 = vmatprep.subr.mxu1 %v6858_v44  ;;  %9215 = vst [vmem:[#allocation129_spill] sm:$0xff] %v6867_v21  ;;  %9216 = vst [vmem:[#allocation130_spill] sm:$0xff] %v6870_v13  ;;  %v6873_v14 = vld [vmem:[#allocation8 + $0x260] sm:$0xff]  ;;  %v6876_v44 = vld [vmem:[#allocation8 + $0x270] sm:$0xff] }
 0x517   :  { %2191 = vmatpush2.msra.mxu0 %v6861_v16  ;;  %2262 = vmatpush2.msra.mxu1 %v6864_v20  ;;  %9217 = vst [vmem:[#allocation131_spill] sm:$0xff] %v6873_v14  ;;  %9218 = vst [vmem:[#allocation132_spill] sm:$0xff] %v6876_v44  ;;  %v6879_v16 = vld [vmem:[#allocation8 + $0x248] sm:$0xff]  ;;  %v6882_v20 = vld [vmem:[#allocation8 + $0x258] sm:$0xff] }
 0x518   :  { %2192 = vmatprep.subr.mxu0 %v6867_v21  ;;  %2263 = vmatprep.subr.mxu1 %v6870_v13  ;;  %9219 = vst [vmem:[#allocation133_spill] sm:$0xff] %v6879_v16  ;;  %9220 = vst [vmem:[#allocation134_spill] sm:$0xff] %v6882_v20  ;;  %v6885_v21 = vld [vmem:[#allocation8 + $0x240] sm:$0xff]  ;;  %v6888_v13 = vld [vmem:[#allocation8 + $0x250] sm:$0xff] }
 0x519   :  { %2193 = vmatpush2.msra.mxu0 %v6873_v14  ;;  %2264 = vmatpush2.msra.mxu1 %v6876_v44  ;;  %9221 = vst [vmem:[#allocation135_spill] sm:$0xff] %v6885_v21  ;;  %9222 = vst [vmem:[#allocation136_spill] sm:$0xff] %v6888_v13  ;;  %v6891_v14 = vld [vmem:[#allocation8 + $0x228] sm:$0xff]  ;;  %v6894_v44 = vld [vmem:[#allocation8 + $0x238] sm:$0xff] }
 0x51a   :  { %2194 = vmatprep.subr.mxu0 %v6879_v16  ;;  %2265 = vmatprep.subr.mxu1 %v6882_v20  ;;  %9223 = vst [vmem:[#allocation137_spill] sm:$0xff] %v6891_v14  ;;  %9224 = vst [vmem:[#allocation138_spill] sm:$0xff] %v6894_v44  ;;  %v6897_v16 = vld [vmem:[#allocation8 + $0x220] sm:$0xff]  ;;  %v6900_v20 = vld [vmem:[#allocation8 + $0x230] sm:$0xff] }
 0x51b   :  { %2195 = vmatpush2.msra.mxu0 %v6885_v21  ;;  %2266 = vmatpush2.msra.mxu1 %v6888_v13  ;;  %9225 = vst [vmem:[#allocation139_spill] sm:$0xff] %v6897_v16  ;;  %9226 = vst [vmem:[#allocation140_spill] sm:$0xff] %v6900_v20  ;;  %v6903_v21 = vld [vmem:[#allocation8 + $0x208] sm:$0xff]  ;;  %v6906_v13 = vld [vmem:[#allocation8 + $0x218] sm:$0xff] }
 0x51c   :  { %2196 = vmatprep.subr.mxu0 %v6891_v14  ;;  %2267 = vmatprep.subr.mxu1 %v6894_v44  ;;  %9227 = vst [vmem:[#allocation141_spill] sm:$0xff] %v6903_v21  ;;  %9228 = vst [vmem:[#allocation142_spill] sm:$0xff] %v6906_v13  ;;  %v6909_v14 = vld [vmem:[#allocation8 + $0x200] sm:$0xff]  ;;  %v6912_v44 = vld [vmem:[#allocation8 + $0x210] sm:$0xff] }
 0x51d   :  { %2197 = vmatpush2.msra.mxu0 %v6897_v16  ;;  %2268 = vmatpush2.msra.mxu1 %v6900_v20  ;;  %9229 = vst [vmem:[#allocation143_spill] sm:$0xff] %v6909_v14  ;;  %9230 = vst [vmem:[#allocation144_spill] sm:$0xff] %v6912_v44 }
 0x51e   :  { %2198 = vmatprep.subr.mxu0 %v6903_v21  ;;  %2269 = vmatprep.subr.mxu1 %v6906_v13 }
 0x51f   :  { %2199 = vmatpush2.msra.mxu0 %v6909_v14  ;;  %2270 = vmatpush2.msra.mxu1 %v6912_v44 }
 0x520   :  { %2302 = vmatprep.subr.mxu0 %v6351_v34  ;;  %2373 = vmatprep.subr.mxu1 %v6354_v27 }
 0x57e   :  { %v1866_v20 = vpop.f32.mrf.mxu0  ;;  %v1937_v37 = vpop.f32.mrf.mxu1 }
 0x57f   :  { %v1867_v16 = vadd.f32 %v1866_v20, %v9093_v0  ;;  %v1938_v14 = vadd.f32 %v1937_v37, %v9095_v35 }
 0x580   :  { %v1868_v21 = vpop.f32.mrf.mxu0  ;;  %v1939_v30 = vpop.f32.mrf.mxu1 }
 0x581   :  { %v3462_v17 = vmul.f32 -1.442695, %v1867_v16  ;;  %v1869_v38 = vadd.f32 %v1868_v21, %v9094_v33  ;;  %v3464_v31 = vmul.f32 -1.442695, %v1938_v14  ;;  %v1940_v34 = vadd.f32 %v1939_v30, %v9096_v29  ;;  %v9232_v14 = vld [vmem:[#allocation161_spill] sm:$0xff] }
 0x583   :  { %3666 = vpow2.f32 %v3462_v17  ;;  %v3463_v13 = vmul.f32 -1.442695, %v1869_v38  ;;  %v9231_v38 = vld [vmem:[#allocation159_spill] sm:$0xff] }
 0x585   :  { %3668 = vpow2.f32 %v3463_v13 }
 0x586   :  { %3670 = vpow2.f32 %v3464_v31 }
 0x590   :  { %v3667_v44 = vpop.eup %3666 }
 0x591   :  { %v1951_v25 = vadd.f32 1.0, %v3667_v44 }
 0x592   :  { %v3669_v27 = vpop.eup %3668 }
 0x593   :  { %3672 = vrcp.f32 %v1951_v25  ;;  %v1952_v20 = vadd.f32 1.0, %v3669_v27  ;;  %v3671_v16 = vpop.eup %3670  ;;  %v9233_v27 = vld [vmem:[#allocation160_spill] sm:$0xff] }
 0x594   :  { %3674 = vtanh.f32 %v1940_v34  ;;  %v1953_v36 = vadd.f32 1.0, %v3671_v16 }
 0x595   :  { %3676 = vrcp.f32 %v1952_v20 }
 0x59f   :  { %v2032_v21 = vpop.f32.mrf.mxu0  ;;  %v2103_v34 = vpop.f32.mrf.mxu1 }
 0x5a0   :  { %v3673_v17 = vpop.eup %3672  ;;  %v2108_v13 = vadd.f32 %v2032_v21, %v9231_v38  ;;  %v2110_v20 = vadd.f32 %v2103_v34, %v9233_v27 }
 0x5a1   :  { %v3675_v33 = vpop.eup %3674  ;;  %v2034_v0 = vpop.f32.mrf.mxu0 }
 0x5a2   :  { %v3677_v37 = vpop.eup %3676  ;;  %v3465_v35 = vmul.f32 -1.442695, %v2108_v13  ;;  %v2109_v19 = vadd.f32 %v2034_v0, %v9232_v14  ;;  %v1962_v44 = vmul.f32 %v3675_v33, %v3673_v17  ;;  %v2105_v21 = vpop.f32.mrf.mxu1  ;;  %v3467_v38 = vmul.f32 -1.442695, %v2110_v20  ;;  %v9234_v13 = vld [vmem:[#allocation162_spill] sm:$0xff] }
 0x5a3   :  { %v1961_v30 = vmul.f32 %v3677_v37, %v6364_v54  ;;  %v2111_v29 = vadd.f32 %v2105_v21, %v9234_v13  ;;  %v6940_v13 = vld [vmem:[#allocation7 + $0x1f0] sm:$0xff] }
 0x5a4   :  { %3678 = vpow2.f32 %v3465_v35  ;;  %v3466_v25 = vmul.f32 -1.442695, %v2109_v19 }
 0x5a5   :  { %v6924_v31 = vadd.f32 %v1962_v44, %v1961_v30 }
 0x5a6   :  { %3680 = vpow2.f32 %v3466_v25 }
 0x5a7   :  { %3682 = vrcp.f32 %v1953_v36 }
 0x5a8   :  { %3684 = vtanh.f32 %v6924_v31 }
 0x5a9   :  { %3686 = vpow2.f32 %v3467_v38  ;;  %v6937_v38 = vld [vmem:[#allocation7 + $0x1e0] sm:$0xff] }
 0x5aa   :  { %3688 = vtanh.f32 %v2111_v29 }
 0x5b1   :  { %v3679_v0 = vpop.eup %3678 }
 0x5b2   :  { %v2121_v16 = vadd.f32 1.0, %v3679_v0  ;;  %v6946_v0 = vld [vmem:[#allocation7 + $0x1d8] sm:$0xff] }
 0x5b3   :  { %v3681_v54 = vpop.eup %3680 }
 0x5b4   :  { %v3683_v33 = vpop.eup %3682  ;;  %3690 = vrcp.f32 %v2121_v16  ;;  %v2122_v19 = vadd.f32 1.0, %v3681_v54  ;;  %v6949_v16 = vld [vmem:[#allocation7 + $0x1c0] sm:$0xff]  ;;  %v6952_v54 = vld [vmem:[#allocation7 + $0x1d0] sm:$0xff] }
 0x5b5   :  { %v3685_v35 = vpop.eup %3684 }
 0x5b6   :  { %3692 = vrcp.f32 %v2122_v19  ;;  %v1965_v36 = vmul.f32 %v3685_v35, %v3683_v33  ;;  %v3687_v17 = vpop.eup %3686  ;;  %v6955_v33 = vld [vmem:[#allocation7 + $0x1a8] sm:$0xff]  ;;  %v6958_v19 = vld [vmem:[#allocation7 + $0x1b8] sm:$0xff]  ;;  %v6961_v35 = vld [vmem:[#allocation7 + $0x1a0] sm:$0xff] }
 0x5b7   :  { %v3689_v37 = vpop.eup %3688  ;;  %v2123_v25 = vadd.f32 1.0, %v3687_v17  ;;  %v6967_v17 = vld [vmem:[#allocation7 + $0x188] sm:$0xff] }
 0x5b8   :  { %2200 = vmatprep.mubr.f32.mxu0 %v1965_v36  ;;  %2271 = vmatprep.mubr.f32.mxu1 %v1965_v36  ;;  %v6964_v36 = vld [vmem:[#allocation7 + $0x1b0] sm:$0xff] }
 0x5b9   :  { %3694 = vrcp.f32 %v2123_v25  ;;  %v6982_v25 = vld [vmem:[#allocation7 + $0x178] sm:$0xff] }
 0x5c1   :  { %v3691_v14 = vpop.eup %3690 }
 0x5c2   :  { %v2132_v30 = vmul.f32 %v3691_v14, %v3689_v37  ;;  %v6970_v37 = vld [vmem:[#allocation7 + $0x198] sm:$0xff]  ;;  %v6973_v14 = vld [vmem:[#allocation7 + $0x180] sm:$0xff] }
 0x5c3   :  { %v3693_v44 = vpop.eup %3692 }
 0x5c4   :  { %v2131_v34 = vmul.f32 %v3693_v44, %v6370_v15  ;;  %v6943_v15 = vld [vmem:[#allocation7 + $0x1c8] sm:$0xff] }
 0x5c5   :  { %v6979_v44 = vld [vmem:[#allocation7 + $0x168] sm:$0xff] }
 0x5c6   :  { %v6930_v27 = vadd.f32 %v2132_v30, %v2131_v34  ;;  %v3695_v29 = vpop.eup %3694  ;;  %v6976_v30 = vld [vmem:[#allocation7 + $0x190] sm:$0xff]  ;;  %v6985_v34 = vld [vmem:[#allocation7 + $0x160] sm:$0xff] }
 0x5c8   :  { %3696 = vtanh.f32 %v6930_v27 }
 0x5d5   :  { %v3697_v20 = vpop.eup %3696 }
 0x5d6   :  { %v6933_v21 = vmul.f32 %v3697_v20, %v3695_v29  ;;  %v6988_v29 = vld [vmem:[#allocation7 + $0x170] sm:$0xff]  ;;  %v9277_v20 = vld [vmem:[#allocation56_spill] sm:$0xff] }
 0x5d8   :  { %2201 = vmatmul.mubr.f32.vlgmr.msra.gmra.mxu0 %v6933_v21  ;;  %2272 = vmatmul.mubr.f32.vlgmr.msra.gmra.mxu1 %v6933_v21 }
 0x5d9   :  { %2303 = vmatpush1.msra.mxu0 %v6937_v38  ;;  %2374 = vmatpush1.msra.mxu1 %v6940_v13 }
 0x5da   :  { %2304 = vmatprep.subr.mxu0 %v6943_v15  ;;  %2375 = vmatprep.subr.mxu1 %v6946_v0 }
 0x5db   :  { %2305 = vmatpush1.msra.mxu0 %v6949_v16  ;;  %2376 = vmatpush1.msra.mxu1 %v6952_v54 }
 0x5dc   :  { %2306 = vmatprep.subr.mxu0 %v6955_v33  ;;  %2377 = vmatprep.subr.mxu1 %v6958_v19 }
 0x5dd   :  { %2307 = vmatpush1.msra.mxu0 %v6961_v35  ;;  %2378 = vmatpush1.msra.mxu1 %v6964_v36 }
 0x5de   :  { %2308 = vmatprep.subr.mxu0 %v6967_v17  ;;  %2379 = vmatprep.subr.mxu1 %v6970_v37 }
 0x5df   :  { %2309 = vmatpush1.msra.mxu0 %v6973_v14  ;;  %2380 = vmatpush1.msra.mxu1 %v6976_v30 }
 0x5e0   :  { %2310 = vmatprep.subr.mxu0 %v6979_v44  ;;  %2381 = vmatprep.subr.mxu1 %v6982_v25 }
 0x5e1   :  { %2311 = vmatpush1.msra.mxu0 %v6985_v34  ;;  %2382 = vmatpush1.msra.mxu1 %v6988_v29 }
 0x5e2   :  { %2312 = vmatprep.subr.mxu0 %v6395_v45  ;;  %2383 = vmatprep.subr.mxu1 %v6398_v3  ;;  %v9235_v45 = vld [vmem:[#allocation150_spill] sm:$0xff]  ;;  %v9236_v3 = vmov 0.0  }
 0x5e3   :  { %2313 = vmatpush1.msra.mxu0 %v6401_v5  ;;  %2384 = vmatpush1.msra.mxu1 %v6404_v9  ;;  %v9237_v5 = vld [vmem:[#allocation151_spill] sm:$0xff]  ;;  %v9238_v9 = vld [vmem:[#allocation153_spill] sm:$0xff] }
 0x5e4   :  { %2314 = vmatprep.subr.mxu0 %v6407_v48  ;;  %2385 = vmatprep.subr.mxu1 %v6410_v10  ;;  %v9239_v48 = vld [vmem:[#allocation152_spill] sm:$0xff]  ;;  %v9240_v10 = vld [vmem:[#allocation154_spill] sm:$0xff] }
 0x5e5   :  { %2315 = vmatpush1.msra.mxu0 %v6413_v18  ;;  %2386 = vmatpush1.msra.mxu1 %v6416_v50  ;;  %v9241_v18 = vld [vmem:[#allocation20_spill] sm:$0xff]  ;;  %v9242_v50 = vld [vmem:[#allocation21_spill] sm:$0xff] }
 0x5e6   :  { %2316 = vmatprep.subr.mxu0 %v6419_v42  ;;  %2387 = vmatprep.subr.mxu1 %v6422_v59  ;;  %v9243_v42 = vld [vmem:[#allocation22_spill] sm:$0xff]  ;;  %v9244_v59 = vld [vmem:[#allocation23_spill] sm:$0xff] }
 0x5e7   :  { %2317 = vmatpush1.msra.mxu0 %v6425_v58  ;;  %2388 = vmatpush1.msra.mxu1 %v6428_v4  ;;  %v9245_v58 = vld [vmem:[#allocation24_spill] sm:$0xff]  ;;  %v9246_v4 = vld [vmem:[#allocation25_spill] sm:$0xff] }
 0x5e8   :  { %2318 = vmatprep.subr.mxu0 %v6431_v2  ;;  %2389 = vmatprep.subr.mxu1 %v6434_v6  ;;  %v9247_v2 = vld [vmem:[#allocation26_spill] sm:$0xff]  ;;  %v9248_v6 = vld [vmem:[#allocation27_spill] sm:$0xff] }
 0x5e9   :  { %2319 = vmatpush1.msra.mxu0 %v6437_v63  ;;  %2390 = vmatpush1.msra.mxu1 %v6440_v7  ;;  %v9249_v63 = vld [vmem:[#allocation28_spill] sm:$0xff]  ;;  %v9250_v7 = vld [vmem:[#allocation29_spill] sm:$0xff] }
 0x5ea   :  { %2320 = vmatprep.subr.mxu0 %v6443_v60  ;;  %2391 = vmatprep.subr.mxu1 %v6446_v43  ;;  %v9251_v60 = vld [vmem:[#allocation30_spill] sm:$0xff]  ;;  %v9252_v43 = vld [vmem:[#allocation31_spill] sm:$0xff] }
 0x5eb   :  { %2321 = vmatpush1.msra.mxu0 %v6449_v1  ;;  %2392 = vmatpush1.msra.mxu1 %v6452_v22  ;;  %v9253_v1 = vld [vmem:[#allocation32_spill] sm:$0xff]  ;;  %v9254_v22 = vld [vmem:[#allocation33_spill] sm:$0xff] }
 0x5ec   :  { %2322 = vmatprep.subr.mxu0 %v6455_v23  ;;  %2393 = vmatprep.subr.mxu1 %v6458_v24  ;;  %v9255_v23 = vld [vmem:[#allocation34_spill] sm:$0xff]  ;;  %v9256_v24 = vld [vmem:[#allocation35_spill] sm:$0xff] }
 0x5ed   :  { %2323 = vmatpush1.msra.mxu0 %v6461_v28  ;;  %2394 = vmatpush1.msra.mxu1 %v6464_v32  ;;  %v9257_v28 = vld [vmem:[#allocation36_spill] sm:$0xff]  ;;  %v9258_v32 = vld [vmem:[#allocation37_spill] sm:$0xff] }
 0x5ee   :  { %2324 = vmatprep.subr.mxu0 %v6467_v40  ;;  %2395 = vmatprep.subr.mxu1 %v6470_v41  ;;  %v9259_v40 = vld [vmem:[#allocation38_spill] sm:$0xff]  ;;  %v9260_v41 = vld [vmem:[#allocation39_spill] sm:$0xff] }
 0x5ef   :  { %2325 = vmatpush1.msra.mxu0 %v6473_v46  ;;  %2396 = vmatpush1.msra.mxu1 %v6476_v47  ;;  %v9261_v46 = vld [vmem:[#allocation40_spill] sm:$0xff]  ;;  %v9262_v47 = vld [vmem:[#allocation41_spill] sm:$0xff] }
 0x5f0   :  { %2326 = vmatprep.subr.mxu0 %v6479_v49  ;;  %2397 = vmatprep.subr.mxu1 %v6482_v51  ;;  %v9263_v49 = vld [vmem:[#allocation42_spill] sm:$0xff]  ;;  %v9264_v51 = vld [vmem:[#allocation43_spill] sm:$0xff] }
 0x5f1   :  { %2327 = vmatpush1.msra.mxu0 %v6485_v52  ;;  %2398 = vmatpush1.msra.mxu1 %v6488_v55  ;;  %v9265_v52 = vld [vmem:[#allocation44_spill] sm:$0xff]  ;;  %v9266_v55 = vld [vmem:[#allocation45_spill] sm:$0xff] }
 0x5f2   :  { %2328 = vmatprep.subr.mxu0 %v6491_v56  ;;  %2399 = vmatprep.subr.mxu1 %v6494_v57  ;;  %v9267_v56 = vld [vmem:[#allocation46_spill] sm:$0xff]  ;;  %v9268_v57 = vld [vmem:[#allocation47_spill] sm:$0xff] }
 0x5f3   :  { %2329 = vmatpush1.msra.mxu0 %v6497_v11  ;;  %2400 = vmatpush1.msra.mxu1 %v6500_v12  ;;  %v9269_v11 = vld [vmem:[#allocation48_spill] sm:$0xff]  ;;  %v9270_v12 = vld [vmem:[#allocation49_spill] sm:$0xff] }
 0x5f4   :  { %2330 = vmatprep.subr.mxu0 %v6503_v8  ;;  %2401 = vmatprep.subr.mxu1 %v6506_v26  ;;  %v9271_v8 = vld [vmem:[#allocation50_spill] sm:$0xff]  ;;  %v9272_v26 = vld [vmem:[#allocation51_spill] sm:$0xff] }
 0x5f5   :  { %2331 = vmatpush1.msra.mxu0 %v6509_v53  ;;  %2402 = vmatpush1.msra.mxu1 %v6512_v39  ;;  %v9273_v53 = vld [vmem:[#allocation52_spill] sm:$0xff]  ;;  %v9274_v39 = vld [vmem:[#allocation53_spill] sm:$0xff] }
 0x5f6   :  { %2332 = vmatprep.subr.mxu0 %v6515_v61  ;;  %2403 = vmatprep.subr.mxu1 %v6518_v62  ;;  %v9275_v61 = vld [vmem:[#allocation54_spill] sm:$0xff]  ;;  %v9276_v62 = vld [vmem:[#allocation55_spill] sm:$0xff] }
 0x5f7   :  { %2333 = vmatpush1.msra.mxu0 %v9235_v45  ;;  %2366 = vmatprep.mubr.f32.mxu0 %v9236_v3  ;;  %v9279_v45 = vld [vmem:[#allocation58_spill] sm:$0xff] }
 0x5f8   :  { %2404 = vmatpush1.msra.mxu1 %v9237_v5  ;;  %2437 = vmatprep.mubr.f32.mxu1 %v9236_v3  ;;  %v9280_v5 = vld [vmem:[#allocation59_spill] sm:$0xff] }
 0x5f9   :  { %2367 = vmatmul.mubr.f32.vlgmr.msra.gmra.mxu0 %v6933_v21  ;;  %2438 = vmatmul.mubr.f32.vlgmr.msra.gmra.mxu1 %v6933_v21  ;;  %v9278_v21 = vld [vmem:[#allocation57_spill] sm:$0xff] }
 0x5fa   :  { %2472 = vmatprep.subr.mxu0 %v9238_v9  ;;  %2543 = vmatprep.subr.mxu1 %v9239_v48  ;;  %v9281_v9 = vld [vmem:[#allocation60_spill] sm:$0xff]  ;;  %v9282_v48 = vld [vmem:[#allocation61_spill] sm:$0xff] }
 0x5fb   :  { %2473 = vmatpush1.msra.mxu0 %v9240_v10  ;;  %2544 = vmatpush1.msra.mxu1 %v9241_v18  ;;  %v9283_v10 = vld [vmem:[#allocation62_spill] sm:$0xff]  ;;  %v9284_v18 = vld [vmem:[#allocation63_spill] sm:$0xff] }
 0x5fc   :  { %2474 = vmatprep.subr.mxu0 %v9242_v50  ;;  %2545 = vmatprep.subr.mxu1 %v9243_v42  ;;  %v9285_v50 = vld [vmem:[#allocation64_spill] sm:$0xff]  ;;  %v9286_v42 = vld [vmem:[#allocation65_spill] sm:$0xff] }
 0x5fd   :  { %2475 = vmatpush1.msra.mxu0 %v9244_v59  ;;  %2546 = vmatpush1.msra.mxu1 %v9245_v58  ;;  %v9287_v59 = vld [vmem:[#allocation66_spill] sm:$0xff]  ;;  %v9288_v58 = vld [vmem:[#allocation67_spill] sm:$0xff] }
 0x5fe   :  { %2476 = vmatprep.subr.mxu0 %v9246_v4  ;;  %2547 = vmatprep.subr.mxu1 %v9247_v2  ;;  %v9289_v4 = vld [vmem:[#allocation68_spill] sm:$0xff]  ;;  %v9290_v2 = vld [vmem:[#allocation69_spill] sm:$0xff] }
 0x5ff   :  { %2477 = vmatpush1.msra.mxu0 %v9248_v6  ;;  %2548 = vmatpush1.msra.mxu1 %v9249_v63  ;;  %v9291_v6 = vld [vmem:[#allocation70_spill] sm:$0xff]  ;;  %v9292_v63 = vld [vmem:[#allocation71_spill] sm:$0xff] }
 0x600   :  { %2478 = vmatprep.subr.mxu0 %v9250_v7  ;;  %2549 = vmatprep.subr.mxu1 %v9251_v60  ;;  %v9293_v7 = vld [vmem:[#allocation72_spill] sm:$0xff]  ;;  %v9294_v60 = vld [vmem:[#allocation73_spill] sm:$0xff] }
 0x601   :  { %2479 = vmatpush1.msra.mxu0 %v9252_v43  ;;  %2550 = vmatpush1.msra.mxu1 %v9253_v1  ;;  %v9295_v43 = vld [vmem:[#allocation74_spill] sm:$0xff]  ;;  %v9296_v1 = vld [vmem:[#allocation75_spill] sm:$0xff] }
 0x602   :  { %2480 = vmatprep.subr.mxu0 %v9254_v22  ;;  %2551 = vmatprep.subr.mxu1 %v9255_v23  ;;  %v9297_v22 = vld [vmem:[#allocation76_spill] sm:$0xff]  ;;  %v9298_v23 = vld [vmem:[#allocation77_spill] sm:$0xff] }
 0x603   :  { %2481 = vmatpush1.msra.mxu0 %v9256_v24  ;;  %2552 = vmatpush1.msra.mxu1 %v9257_v28  ;;  %v9299_v24 = vld [vmem:[#allocation78_spill] sm:$0xff]  ;;  %v9300_v28 = vld [vmem:[#allocation79_spill] sm:$0xff] }
 0x604   :  { %2482 = vmatprep.subr.mxu0 %v9258_v32  ;;  %2553 = vmatprep.subr.mxu1 %v9259_v40  ;;  %v9301_v32 = vld [vmem:[#allocation80_spill] sm:$0xff]  ;;  %v9302_v40 = vld [vmem:[#allocation81_spill] sm:$0xff] }
 0x605   :  { %2483 = vmatpush1.msra.mxu0 %v9260_v41  ;;  %2554 = vmatpush1.msra.mxu1 %v9261_v46  ;;  %v9303_v41 = vld [vmem:[#allocation82_spill] sm:$0xff]  ;;  %v9304_v46 = vld [vmem:[#allocation83_spill] sm:$0xff] }
 0x606   :  { %2484 = vmatprep.subr.mxu0 %v9262_v47  ;;  %2555 = vmatprep.subr.mxu1 %v9263_v49  ;;  %v9305_v47 = vld [vmem:[#allocation84_spill] sm:$0xff]  ;;  %v9306_v49 = vld [vmem:[#allocation85_spill] sm:$0xff] }
 0x607   :  { %2485 = vmatpush1.msra.mxu0 %v9264_v51  ;;  %2556 = vmatpush1.msra.mxu1 %v9265_v52  ;;  %v9307_v51 = vld [vmem:[#allocation86_spill] sm:$0xff]  ;;  %v9308_v52 = vld [vmem:[#allocation87_spill] sm:$0xff] }
 0x608   :  { %2486 = vmatprep.subr.mxu0 %v9266_v55  ;;  %2557 = vmatprep.subr.mxu1 %v9267_v56  ;;  %v9309_v55 = vld [vmem:[#allocation88_spill] sm:$0xff]  ;;  %v9310_v56 = vld [vmem:[#allocation89_spill] sm:$0xff] }
 0x609   :  { %2487 = vmatpush1.msra.mxu0 %v9268_v57  ;;  %2558 = vmatpush1.msra.mxu1 %v9269_v11  ;;  %v9311_v57 = vld [vmem:[#allocation90_spill] sm:$0xff]  ;;  %v9312_v11 = vld [vmem:[#allocation91_spill] sm:$0xff] }
 0x60a   :  { %2488 = vmatprep.subr.mxu0 %v9270_v12  ;;  %2559 = vmatprep.subr.mxu1 %v9271_v8  ;;  %v9313_v12 = vld [vmem:[#allocation92_spill] sm:$0xff]  ;;  %v9314_v8 = vld [vmem:[#allocation93_spill] sm:$0xff] }
 0x60b   :  { %2489 = vmatpush1.msra.mxu0 %v9272_v26  ;;  %2560 = vmatpush1.msra.mxu1 %v9273_v53  ;;  %v9315_v26 = vld [vmem:[#allocation94_spill] sm:$0xff]  ;;  %v9316_v53 = vld [vmem:[#allocation95_spill] sm:$0xff] }
 0x60c   :  { %2490 = vmatprep.subr.mxu0 %v9274_v39  ;;  %2561 = vmatprep.subr.mxu1 %v9275_v61  ;;  %v9317_v39 = vld [vmem:[#allocation96_spill] sm:$0xff]  ;;  %v9318_v61 = vld [vmem:[#allocation97_spill] sm:$0xff] }
 0x60d   :  { %2491 = vmatpush1.msra.mxu0 %v9276_v62  ;;  %2562 = vmatpush1.msra.mxu1 %v9277_v20  ;;  %v9319_v62 = vld [vmem:[#allocation98_spill] sm:$0xff]  ;;  %v9320_v20 = vld [vmem:[#allocation99_spill] sm:$0xff] }
 0x60e   :  { %2492 = vmatprep.subr.mxu0 %v9278_v21  ;;  %2563 = vmatprep.subr.mxu1 %v9279_v45  ;;  %v9321_v21 = vld [vmem:[#allocation100_spill] sm:$0xff]  ;;  %v9322_v45 = vld [vmem:[#allocation101_spill] sm:$0xff] }
 0x60f   :  { %2493 = vmatpush1.msra.mxu0 %v9280_v5  ;;  %2564 = vmatpush1.msra.mxu1 %v9281_v9  ;;  %v9323_v5 = vld [vmem:[#allocation102_spill] sm:$0xff]  ;;  %v9324_v9 = vld [vmem:[#allocation103_spill] sm:$0xff] }
 0x610   :  { %2494 = vmatprep.subr.mxu0 %v9282_v48  ;;  %2565 = vmatprep.subr.mxu1 %v9283_v10  ;;  %v9325_v48 = vld [vmem:[#allocation104_spill] sm:$0xff]  ;;  %v9326_v10 = vld [vmem:[#allocation105_spill] sm:$0xff] }
 0x611   :  { %2495 = vmatpush1.msra.mxu0 %v9284_v18  ;;  %2566 = vmatpush1.msra.mxu1 %v9285_v50  ;;  %v9327_v18 = vld [vmem:[#allocation106_spill] sm:$0xff]  ;;  %v9328_v50 = vld [vmem:[#allocation107_spill] sm:$0xff] }
 0x612   :  { %2496 = vmatprep.subr.mxu0 %v9286_v42  ;;  %2567 = vmatprep.subr.mxu1 %v9287_v59  ;;  %v9329_v42 = vld [vmem:[#allocation108_spill] sm:$0xff]  ;;  %v9330_v59 = vld [vmem:[#allocation109_spill] sm:$0xff] }
 0x613   :  { %2497 = vmatpush1.msra.mxu0 %v9288_v58  ;;  %2568 = vmatpush1.msra.mxu1 %v9289_v4  ;;  %v9331_v58 = vld [vmem:[#allocation110_spill] sm:$0xff]  ;;  %v9332_v4 = vld [vmem:[#allocation111_spill] sm:$0xff] }
 0x614   :  { %2498 = vmatprep.subr.mxu0 %v9290_v2  ;;  %2569 = vmatprep.subr.mxu1 %v9291_v6  ;;  %v9333_v2 = vld [vmem:[#allocation112_spill] sm:$0xff]  ;;  %v9334_v6 = vld [vmem:[#allocation113_spill] sm:$0xff] }
 0x615   :  { %2499 = vmatpush1.msra.mxu0 %v9292_v63  ;;  %2570 = vmatpush1.msra.mxu1 %v9293_v7  ;;  %v9335_v63 = vld [vmem:[#allocation114_spill] sm:$0xff]  ;;  %v9336_v7 = vld [vmem:[#allocation115_spill] sm:$0xff] }
 0x616   :  { %2500 = vmatprep.subr.mxu0 %v9294_v60  ;;  %2571 = vmatprep.subr.mxu1 %v9295_v43  ;;  %v9337_v60 = vld [vmem:[#allocation116_spill] sm:$0xff]  ;;  %v9338_v43 = vld [vmem:[#allocation117_spill] sm:$0xff] }
 0x617   :  { %2501 = vmatpush1.msra.mxu0 %v9296_v1  ;;  %2572 = vmatpush1.msra.mxu1 %v9297_v22  ;;  %v9339_v1 = vld [vmem:[#allocation118_spill] sm:$0xff]  ;;  %v9340_v22 = vld [vmem:[#allocation119_spill] sm:$0xff] }
 0x618   :  { %2502 = vmatprep.subr.mxu0 %v9298_v23  ;;  %2573 = vmatprep.subr.mxu1 %v9299_v24  ;;  %v9341_v23 = vld [vmem:[#allocation120_spill] sm:$0xff]  ;;  %v9342_v24 = vld [vmem:[#allocation121_spill] sm:$0xff] }
 0x619   :  { %2503 = vmatpush1.msra.mxu0 %v9300_v28  ;;  %2574 = vmatpush1.msra.mxu1 %v9301_v32  ;;  %v9343_v28 = vld [vmem:[#allocation122_spill] sm:$0xff]  ;;  %v9344_v32 = vld [vmem:[#allocation123_spill] sm:$0xff] }
 0x61a   :  { %2504 = vmatprep.subr.mxu0 %v9302_v40  ;;  %2575 = vmatprep.subr.mxu1 %v9303_v41  ;;  %v9345_v40 = vld [vmem:[#allocation124_spill] sm:$0xff]  ;;  %v9346_v41 = vld [vmem:[#allocation125_spill] sm:$0xff] }
 0x61b   :  { %2505 = vmatpush2.msra.mxu0 %v9304_v46  ;;  %2576 = vmatpush2.msra.mxu1 %v9305_v47  ;;  %v9347_v46 = vld [vmem:[#allocation126_spill] sm:$0xff]  ;;  %v9348_v47 = vld [vmem:[#allocation127_spill] sm:$0xff] }
 0x61c   :  { %2506 = vmatprep.subr.mxu0 %v9306_v49  ;;  %2577 = vmatprep.subr.mxu1 %v9307_v51  ;;  %v9349_v49 = vld [vmem:[#allocation128_spill] sm:$0xff]  ;;  %v9350_v51 = vld [vmem:[#allocation129_spill] sm:$0xff] }
 0x61d   :  { %2507 = vmatpush2.msra.mxu0 %v9308_v52  ;;  %2578 = vmatpush2.msra.mxu1 %v9309_v55  ;;  %v9351_v52 = vld [vmem:[#allocation130_spill] sm:$0xff]  ;;  %v9352_v55 = vld [vmem:[#allocation131_spill] sm:$0xff] }
 0x61e   :  { %2508 = vmatprep.subr.mxu0 %v9310_v56  ;;  %2579 = vmatprep.subr.mxu1 %v9311_v57  ;;  %v9353_v56 = vld [vmem:[#allocation132_spill] sm:$0xff]  ;;  %v9354_v57 = vld [vmem:[#allocation133_spill] sm:$0xff] }
 0x61f   :  { %2509 = vmatpush2.msra.mxu0 %v9312_v11  ;;  %2580 = vmatpush2.msra.mxu1 %v9313_v12  ;;  %v9355_v11 = vld [vmem:[#allocation134_spill] sm:$0xff]  ;;  %v9356_v12 = vld [vmem:[#allocation135_spill] sm:$0xff] }
 0x620   :  { %2510 = vmatprep.subr.mxu0 %v9314_v8  ;;  %2581 = vmatprep.subr.mxu1 %v9315_v26  ;;  %v9357_v8 = vld [vmem:[#allocation136_spill] sm:$0xff]  ;;  %v9358_v26 = vld [vmem:[#allocation137_spill] sm:$0xff] }
 0x621   :  { %2511 = vmatpush2.msra.mxu0 %v9316_v53  ;;  %2582 = vmatpush2.msra.mxu1 %v9317_v39  ;;  %v9359_v53 = vld [vmem:[#allocation138_spill] sm:$0xff]  ;;  %v9360_v39 = vld [vmem:[#allocation139_spill] sm:$0xff] }
 0x622   :  { %2512 = vmatprep.subr.mxu0 %v9318_v61  ;;  %2583 = vmatprep.subr.mxu1 %v9319_v62  ;;  %v9361_v61 = vld [vmem:[#allocation140_spill] sm:$0xff]  ;;  %v9362_v62 = vld [vmem:[#allocation141_spill] sm:$0xff] }
 0x623   :  { %2513 = vmatpush2.msra.mxu0 %v9320_v20  ;;  %2584 = vmatpush2.msra.mxu1 %v9321_v21  ;;  %v9363_v20 = vld [vmem:[#allocation142_spill] sm:$0xff]  ;;  %v9364_v21 = vld [vmem:[#allocation143_spill] sm:$0xff] }
 0x624   :  { %2514 = vmatprep.subr.mxu0 %v9322_v45  ;;  %2585 = vmatprep.subr.mxu1 %v9323_v5  ;;  %v9365_v45 = vld [vmem:[#allocation144_spill] sm:$0xff] }
 0x625   :  { %2515 = vmatpush2.msra.mxu0 %v9324_v9  ;;  %2586 = vmatpush2.msra.mxu1 %v9325_v48  ;;  %v7167_v5 = vld [vmem:[#allocation7 + $0x1e8] sm:$0xff]  ;;  %v7170_v9 = vld [vmem:[#allocation7 + $0x1f8] sm:$0xff] }
 0x626   :  { %2516 = vmatprep.subr.mxu0 %v9326_v10  ;;  %2587 = vmatprep.subr.mxu1 %v9327_v18  ;;  %v9366_v10 = vld [vmem:[#allocation16_spill] sm:$0xff] }
 0x627   :  { %2517 = vmatpush2.msra.mxu0 %v9328_v50  ;;  %2588 = vmatpush2.msra.mxu1 %v9329_v42 }
 0x628   :  { %2518 = vmatprep.subr.mxu0 %v9330_v59  ;;  %2589 = vmatprep.subr.mxu1 %v9331_v58  ;;  %v9367_v59 = vld [vmem:[#allocation17_spill] sm:$0xff] }
 0x629   :  { %2519 = vmatpush2.msra.mxu0 %v9332_v4  ;;  %2590 = vmatpush2.msra.mxu1 %v9333_v2 }
 0x62a   :  { %2520 = vmatprep.subr.mxu0 %v9334_v6  ;;  %2591 = vmatprep.subr.mxu1 %v9335_v63  ;;  %v9368_v6 = vld [vmem:[#allocation18_spill] sm:$0xff] }
 0x62b   :  { %2521 = vmatpush2.msra.mxu0 %v9336_v7  ;;  %2592 = vmatpush2.msra.mxu1 %v9337_v60 }
 0x62c   :  { %2522 = vmatprep.subr.mxu0 %v9338_v43  ;;  %2593 = vmatprep.subr.mxu1 %v9339_v1  ;;  %v9369_v1 = vld [vmem:[#allocation19_spill] sm:$0xff] }
 0x62d   :  { %2523 = vmatpush2.msra.mxu0 %v9340_v22  ;;  %2594 = vmatpush2.msra.mxu1 %v9341_v23 }
 0x62e   :  { %2524 = vmatprep.subr.mxu0 %v9342_v24  ;;  %2595 = vmatprep.subr.mxu1 %v9343_v28 }
 0x62f   :  { %2525 = vmatpush2.msra.mxu0 %v9344_v32  ;;  %2596 = vmatpush2.msra.mxu1 %v9345_v40 }
 0x630   :  { %2526 = vmatprep.subr.mxu0 %v9346_v41  ;;  %2597 = vmatprep.subr.mxu1 %v9347_v46  ;;  %v9370_v46 = vld [vmem:[#allocation163_spill] sm:$0xff] }
 0x631   :  { %2527 = vmatpush2.msra.mxu0 %v9348_v47  ;;  %2598 = vmatpush2.msra.mxu1 %v9349_v49 }
 0x632   :  { %2528 = vmatprep.subr.mxu0 %v9350_v51  ;;  %2599 = vmatprep.subr.mxu1 %v9351_v52 }
 0x633   :  { %2529 = vmatpush2.msra.mxu0 %v9352_v55  ;;  %2600 = vmatpush2.msra.mxu1 %v9353_v56  ;;  %v9371_v56 = vld [vmem:[#allocation165_spill] sm:$0xff] }
 0x634   :  { %2530 = vmatprep.subr.mxu0 %v9354_v57  ;;  %2601 = vmatprep.subr.mxu1 %v9355_v11 }
 0x635   :  { %2531 = vmatpush2.msra.mxu0 %v9356_v12  ;;  %2602 = vmatpush2.msra.mxu1 %v9357_v8 }
 0x636   :  { %2532 = vmatprep.subr.mxu0 %v9358_v26  ;;  %2603 = vmatprep.subr.mxu1 %v9359_v53 }
 0x637   :  { %2533 = vmatpush2.msra.mxu0 %v9360_v39  ;;  %2604 = vmatpush2.msra.mxu1 %v9361_v61  ;;  %v9372_v61 = vld [vmem:[#allocation164_spill] sm:$0xff] }
 0x638   :  { %2534 = vmatprep.subr.mxu0 %v9362_v62  ;;  %2605 = vmatprep.subr.mxu1 %v9363_v20 }
 0x639   :  { %2535 = vmatpush2.msra.mxu0 %v9364_v21  ;;  %2606 = vmatpush2.msra.mxu1 %v9365_v45  ;;  %v9373_v45 = vld [vmem:[#allocation166_spill] sm:$0xff] }
 0x63a   :  { %2638 = vmatprep.subr.mxu0 %v7167_v5  ;;  %2709 = vmatprep.subr.mxu1 %v7170_v9 }
 0x698   :  { %v2202_v48 = vpop.f32.mrf.mxu0  ;;  %v2273_v2 = vpop.f32.mrf.mxu1 }
 0x699   :  { %v2203_v18 = vadd.f32 %v2202_v48, %v9366_v10  ;;  %v2274_v63 = vadd.f32 %v2273_v2, %v9368_v6 }
 0x69a   :  { %v2204_v50 = vpop.f32.mrf.mxu0  ;;  %v2275_v7 = vpop.f32.mrf.mxu1 }
 0x69b   :  { %v3468_v42 = vmul.f32 -1.442695, %v2203_v18  ;;  %v2205_v58 = vadd.f32 %v2204_v50, %v9367_v59  ;;  %v3470_v60 = vmul.f32 -1.442695, %v2274_v63  ;;  %v2276_v22 = vadd.f32 %v2275_v7, %v9369_v1 }
 0x69d   :  { %3698 = vpow2.f32 %v3468_v42  ;;  %v3469_v4 = vmul.f32 -1.442695, %v2205_v58 }
 0x69f   :  { %3700 = vpow2.f32 %v3469_v4 }
 0x6a0   :  { %3702 = vpow2.f32 %v3470_v60 }
 0x6aa   :  { %v3699_v43 = vpop.eup %3698 }
 0x6ab   :  { %v2287_v23 = vadd.f32 1.0, %v3699_v43 }
 0x6ac   :  { %v3701_v24 = vpop.eup %3700 }
 0x6ad   :  { %3704 = vrcp.f32 %v2287_v23  ;;  %v2288_v28 = vadd.f32 1.0, %v3701_v24  ;;  %v3703_v32 = vpop.eup %3702 }
 0x6ae   :  { %3706 = vtanh.f32 %v2276_v22  ;;  %v2289_v11 = vadd.f32 1.0, %v3703_v32 }
 0x6af   :  { %3708 = vrcp.f32 %v2288_v28 }
 0x6b9   :  { %v2368_v40 = vpop.f32.mrf.mxu0  ;;  %v2439_v39 = vpop.f32.mrf.mxu1 }
 0x6ba   :  { %v3705_v41 = vpop.eup %3704  ;;  %v2444_v47 = vadd.f32 %v2368_v40, %v9370_v46  ;;  %v2446_v62 = vadd.f32 %v2439_v39, %v9372_v61  ;;  %v7268_v46 = vld [vmem:[#allocation7 + $0xd0] sm:$0xff]  ;;  %v7307_v61 = vld [vmem:[#allocation7 + $0x48] sm:$0xff] }
 0x6bb   :  { %v3707_v49 = vpop.eup %3706  ;;  %v2370_v51 = vpop.f32.mrf.mxu0  ;;  %v7304_v39 = vld [vmem:[#allocation7 + $0x70] sm:$0xff] }
 0x6bc   :  { %v3709_v52 = vpop.eup %3708  ;;  %v3471_v55 = vmul.f32 -1.442695, %v2444_v47  ;;  %v2445_v57 = vadd.f32 %v2370_v51, %v9371_v56  ;;  %v2298_v8 = vmul.f32 %v3707_v49, %v3705_v41  ;;  %v2441_v20 = vpop.f32.mrf.mxu1  ;;  %v3473_v21 = vmul.f32 -1.442695, %v2446_v62  ;;  %v7271_v47 = vld [vmem:[#allocation7 + $0xa8] sm:$0xff]  ;;  %v7274_v49 = vld [vmem:[#allocation7 + $0xb8] sm:$0xff] }
 0x6bd   :  { %v2297_v12 = vmul.f32 %v3709_v52, %v6924_v31  ;;  %v2447_v48 = vadd.f32 %v2441_v20, %v9373_v45  ;;  %v7277_v51 = vld [vmem:[#allocation7 + $0xa0] sm:$0xff]  ;;  %v7280_v52 = vld [vmem:[#allocation7 + $0xb0] sm:$0xff]  ;;  %v7286_v56 = vld [vmem:[#allocation7 + $0x98] sm:$0xff] }
 0x6be   :  { %3710 = vpow2.f32 %v3471_v55  ;;  %v3472_v26 = vmul.f32 -1.442695, %v2445_v57  ;;  %v7283_v55 = vld [vmem:[#allocation7 + $0x88] sm:$0xff]  ;;  %v7289_v57 = vld [vmem:[#allocation7 + $0x80] sm:$0xff]  ;;  %v7310_v62 = vld [vmem:[#allocation7 + $0x58] sm:$0xff] }
 0x6bf   :  { %v7180_v53 = vadd.f32 %v2298_v8, %v2297_v12  ;;  %v7295_v12 = vld [vmem:[#allocation7 + $0x68] sm:$0xff]  ;;  %v7298_v8 = vld [vmem:[#allocation7 + $0x78] sm:$0xff]  ;;  %v7313_v20 = vld [vmem:[#allocation7 + $0x40] sm:$0xff] }
 0x6c0   :  { %3712 = vpow2.f32 %v3472_v26  ;;  %v7301_v26 = vld [vmem:[#allocation7 + $0x60] sm:$0xff]  ;;  %v7319_v45 = vld [vmem:[#allocation7 + $0x28] sm:$0xff] }
 0x6c1   :  { %3714 = vrcp.f32 %v2289_v11  ;;  %v7292_v11 = vld [vmem:[#allocation7 + $0x90] sm:$0xff] }
 0x6c2   :  { %3716 = vtanh.f32 %v7180_v53 }
 0x6c3   :  { %3718 = vpow2.f32 %v3473_v21  ;;  %v7316_v21 = vld [vmem:[#allocation7 + $0x50] sm:$0xff] }
 0x6c4   :  { %3720 = vtanh.f32 %v2447_v48  ;;  %v7322_v48 = vld [vmem:[#allocation7 + $0x38] sm:$0xff] }
 0x6cb   :  { %v3711_v18 = vpop.eup %3710 }
 0x6cc   :  { %v2457_v50 = vadd.f32 1.0, %v3711_v18  ;;  %v7325_v18 = vld [vmem:[#allocation7 + $0x20] sm:$0xff] }
 0x6cd   :  { %v3713_v31 = vpop.eup %3712 }
 0x6ce   :  { %v3715_v42 = vpop.eup %3714  ;;  %3722 = vrcp.f32 %v2457_v50  ;;  %v2458_v58 = vadd.f32 1.0, %v3713_v31  ;;  %v7328_v50 = vld [vmem:[#allocation7 + $0x30] sm:$0xff]  ;;  %v7331_v31 = vld [vmem:[#allocation7 + $0x8] sm:$0xff] }
 0x6cf   :  { %v3717_v4 = vpop.eup %3716 }
 0x6d0   :  { %3724 = vrcp.f32 %v2458_v58  ;;  %v2301_v2 = vmul.f32 %v3717_v4, %v3715_v42  ;;  %v3719_v63 = vpop.eup %3718  ;;  %v7334_v42 = vld [vmem:[#allocation7 + $0x18] sm:$0xff]  ;;  %v7337_v58 = vld [vmem:[#allocation7] sm:$0xff]  ;;  %v7341_v4 = vld [vmem:[#allocation7 + $0x10] sm:$0xff] }
 0x6d1   :  { %v3721_v7 = vpop.eup %3720  ;;  %v2459_v23 = vadd.f32 1.0, %v3719_v63  ;;  %9374 = vst [vmem:[#allocation145_spill] sm:$0xff] %v7337_v58  ;;  %9375 = vst [vmem:[#allocation146_spill] sm:$0xff] %v7341_v4  ;;  %v7350_v63 = vld [vmem:[#allocation8 + $0x1f8] sm:$0xff] }
 0x6d2   :  { %2536 = vmatprep.mubr.f32.mxu0 %v2301_v2  ;;  %2607 = vmatprep.mubr.f32.mxu1 %v2301_v2  ;;  %v7347_v2 = vld [vmem:[#allocation8 + $0x1e8] sm:$0xff]  ;;  %9377 = vst [vmem:[#allocation149_spill] sm:$0xff] %v7350_v63 }
 0x6d3   :  { %3726 = vrcp.f32 %v2459_v23  ;;  %9376 = vst [vmem:[#allocation147_spill] sm:$0xff] %v7347_v2  ;;  %v7365_v23 = vld [vmem:[#allocation8 + $0x1c0] sm:$0xff] }
 0x6d4   :  { %9382 = vst [vmem:[#allocation158_spill] sm:$0xff] %v7365_v23 }
 0x6db   :  { %v3723_v60 = vpop.eup %3722 }
 0x6dc   :  { %v2468_v43 = vmul.f32 %v3723_v60, %v3721_v7  ;;  %v7353_v7 = vld [vmem:[#allocation8 + $0x1e0] sm:$0xff]  ;;  %v7356_v60 = vld [vmem:[#allocation8 + $0x1f0] sm:$0xff] }
 0x6dd   :  { %v3725_v22 = vpop.eup %3724  ;;  %9378 = vst [vmem:[#allocation148_spill] sm:$0xff] %v7353_v7  ;;  %9379 = vst [vmem:[#allocation155_spill] sm:$0xff] %v7356_v60 }
 0x6de   :  { %v2467_v24 = vmul.f32 %v3725_v22, %v6930_v27  ;;  %v7211_v27 = vld [vmem:[#allocation7 + $0x148] sm:$0xff]  ;;  %v7362_v22 = vld [vmem:[#allocation8 + $0x1d8] sm:$0xff] }
 0x6df   :  { %9381 = vst [vmem:[#allocation156_spill] sm:$0xff] %v7362_v22 }
 0x6e0   :  { %v7186_v28 = vadd.f32 %v2468_v43, %v2467_v24  ;;  %v3727_v32 = vpop.eup %3726  ;;  %v7359_v43 = vld [vmem:[#allocation8 + $0x1c8] sm:$0xff]  ;;  %v7368_v24 = vld [vmem:[#allocation8 + $0x1d0] sm:$0xff] }
 0x6e1   :  { %9380 = vst [vmem:[#allocation157_spill] sm:$0xff] %v7359_v43  ;;  %9383 = vst [vmem:[#allocation159_spill] sm:$0xff] %v7368_v24 }
 0x6e2   :  { %3728 = vtanh.f32 %v7186_v28 }
 0x6ef   :  { %v3729_v40 = vpop.eup %3728 }
 0x6f0   :  { %v7189_v41 = vmul.f32 %v3729_v40, %v3727_v32  ;;  %v7371_v32 = vld [vmem:[#allocation8 + $0x1a8] sm:$0xff]  ;;  %v7374_v40 = vld [vmem:[#allocation8 + $0x1b8] sm:$0xff] }
 0x6f1   :  { %9384 = vst [vmem:[#allocation161_spill] sm:$0xff] %v7371_v32  ;;  %9385 = vst [vmem:[#allocation160_spill] sm:$0xff] %v7374_v40 }
 0x6f2   :  { %2537 = vmatmul.mubr.f32.vlgmr.msra.gmra.mxu0 %v7189_v41  ;;  %2608 = vmatmul.mubr.f32.vlgmr.msra.gmra.mxu1 %v7189_v41 }
 0x6f3   :  { %2639 = vmatpush1.msra.mxu0 %v6937_v38  ;;  %2710 = vmatpush1.msra.mxu1 %v6940_v13  ;;  %v7214_v38 = vld [vmem:[#allocation7 + $0x158] sm:$0xff]  ;;  %v7217_v13 = vld [vmem:[#allocation7 + $0x140] sm:$0xff] }
 0x6f4   :  { %2640 = vmatprep.subr.mxu0 %v6943_v15  ;;  %2711 = vmatprep.subr.mxu1 %v6946_v0  ;;  %v7220_v15 = vld [vmem:[#allocation7 + $0x150] sm:$0xff]  ;;  %v7223_v0 = vld [vmem:[#allocation7 + $0x128] sm:$0xff] }
 0x6f5   :  { %2641 = vmatpush1.msra.mxu0 %v6949_v16  ;;  %2712 = vmatpush1.msra.mxu1 %v6952_v54  ;;  %v7226_v16 = vld [vmem:[#allocation7 + $0x138] sm:$0xff]  ;;  %v7229_v54 = vld [vmem:[#allocation7 + $0x120] sm:$0xff] }
 0x6f6   :  { %2642 = vmatprep.subr.mxu0 %v6955_v33  ;;  %2713 = vmatprep.subr.mxu1 %v6958_v19  ;;  %v7232_v33 = vld [vmem:[#allocation7 + $0x130] sm:$0xff]  ;;  %v7235_v19 = vld [vmem:[#allocation7 + $0x108] sm:$0xff] }
 0x6f7   :  { %2643 = vmatpush1.msra.mxu0 %v6961_v35  ;;  %2714 = vmatpush1.msra.mxu1 %v6964_v36  ;;  %v7238_v35 = vld [vmem:[#allocation7 + $0x118] sm:$0xff]  ;;  %v7241_v36 = vld [vmem:[#allocation7 + $0x100] sm:$0xff] }
 0x6f8   :  { %2644 = vmatprep.subr.mxu0 %v6967_v17  ;;  %2715 = vmatprep.subr.mxu1 %v6970_v37  ;;  %v7244_v17 = vld [vmem:[#allocation7 + $0x110] sm:$0xff]  ;;  %v7247_v37 = vld [vmem:[#allocation7 + $0xe8] sm:$0xff] }
 0x6f9   :  { %2645 = vmatpush1.msra.mxu0 %v6973_v14  ;;  %2716 = vmatpush1.msra.mxu1 %v6976_v30  ;;  %v7250_v14 = vld [vmem:[#allocation7 + $0xf8] sm:$0xff]  ;;  %v7253_v30 = vld [vmem:[#allocation7 + $0xe0] sm:$0xff] }
 0x6fa   :  { %2646 = vmatprep.subr.mxu0 %v6979_v44  ;;  %2717 = vmatprep.subr.mxu1 %v6982_v25  ;;  %v7256_v44 = vld [vmem:[#allocation7 + $0xf0] sm:$0xff]  ;;  %v7259_v25 = vld [vmem:[#allocation7 + $0xc8] sm:$0xff] }
 0x6fb   :  { %2647 = vmatpush1.msra.mxu0 %v6985_v34  ;;  %2718 = vmatpush1.msra.mxu1 %v6988_v29  ;;  %v7262_v34 = vld [vmem:[#allocation7 + $0xd8] sm:$0xff]  ;;  %v7265_v29 = vld [vmem:[#allocation7 + $0xc0] sm:$0xff] }
 0x6fc   :  { %2648 = vmatprep.subr.mxu0 %v7211_v27  ;;  %2719 = vmatprep.subr.mxu1 %v7214_v38 }
 0x6fd   :  { %2649 = vmatpush1.msra.mxu0 %v7217_v13  ;;  %2720 = vmatpush1.msra.mxu1 %v7220_v15 }
 0x6fe   :  { %2650 = vmatprep.subr.mxu0 %v7223_v0  ;;  %2721 = vmatprep.subr.mxu1 %v7226_v16 }
 0x6ff   :  { %2651 = vmatpush1.msra.mxu0 %v7229_v54  ;;  %2722 = vmatpush1.msra.mxu1 %v7232_v33 }
 0x700   :  { %2652 = vmatprep.subr.mxu0 %v7235_v19  ;;  %2723 = vmatprep.subr.mxu1 %v7238_v35 }
 0x701   :  { %2653 = vmatpush1.msra.mxu0 %v7241_v36  ;;  %2724 = vmatpush1.msra.mxu1 %v7244_v17 }
 0x702   :  { %2654 = vmatprep.subr.mxu0 %v7247_v37  ;;  %2725 = vmatprep.subr.mxu1 %v7250_v14 }
 0x703   :  { %2655 = vmatpush1.msra.mxu0 %v7253_v30  ;;  %2726 = vmatpush1.msra.mxu1 %v7256_v44 }
 0x704   :  { %2656 = vmatprep.subr.mxu0 %v7259_v25  ;;  %2727 = vmatprep.subr.mxu1 %v7262_v34 }
 0x705   :  { %2657 = vmatpush1.msra.mxu0 %v7265_v29  ;;  %2728 = vmatpush1.msra.mxu1 %v7268_v46 }
 0x706   :  { %2658 = vmatprep.subr.mxu0 %v7271_v47  ;;  %2729 = vmatprep.subr.mxu1 %v7274_v49 }
 0x707   :  { %2659 = vmatpush1.msra.mxu0 %v7277_v51  ;;  %2730 = vmatpush1.msra.mxu1 %v7280_v52 }
 0x708   :  { %2660 = vmatprep.subr.mxu0 %v7283_v55  ;;  %2731 = vmatprep.subr.mxu1 %v7286_v56 }
 0x709   :  { %2661 = vmatpush1.msra.mxu0 %v7289_v57  ;;  %2732 = vmatpush1.msra.mxu1 %v7292_v11 }
 0x70a   :  { %2662 = vmatprep.subr.mxu0 %v7295_v12  ;;  %2733 = vmatprep.subr.mxu1 %v7298_v8 }
 0x70b   :  { %2663 = vmatpush1.msra.mxu0 %v7301_v26  ;;  %2734 = vmatpush1.msra.mxu1 %v7304_v39 }
 0x70c   :  { %2664 = vmatprep.subr.mxu0 %v7307_v61  ;;  %2735 = vmatprep.subr.mxu1 %v7310_v62 }
 0x70d   :  { %2665 = vmatpush1.msra.mxu0 %v7313_v20  ;;  %2736 = vmatpush1.msra.mxu1 %v7316_v21 }
 0x70e   :  { %2666 = vmatprep.subr.mxu0 %v7319_v45  ;;  %2737 = vmatprep.subr.mxu1 %v7322_v48 }
 0x70f   :  { %2667 = vmatpush1.msra.mxu0 %v7325_v18  ;;  %2738 = vmatpush1.msra.mxu1 %v7328_v50 }
 0x710   :  { %2668 = vmatprep.subr.mxu0 %v7331_v31  ;;  %2739 = vmatprep.subr.mxu1 %v7334_v42 }
 0x711   :  { %2669 = vmatpush1.msra.mxu0 %v7337_v58  ;;  %2702 = vmatprep.mubr.f32.mxu0 %v9236_v3 }
 0x712   :  { %2740 = vmatpush1.msra.mxu1 %v7341_v4  ;;  %2773 = vmatprep.mubr.f32.mxu1 %v9236_v3 }
 0x713   :  { %2703 = vmatmul.mubr.f32.vlgmr.msra.gmra.mxu0 %v7189_v41  ;;  %2774 = vmatmul.mubr.f32.vlgmr.msra.gmra.mxu1 %v7189_v41  ;;  %v7377_v41 = vld [vmem:[#allocation8 + $0x1a0] sm:$0xff] }
 0x714   :  { %2808 = vmatprep.subr.mxu0 %v7347_v2  ;;  %2879 = vmatprep.subr.mxu1 %v7350_v63  ;;  %9386 = vst [vmem:[#allocation162_spill] sm:$0xff] %v7377_v41 }
 0x715   :  { %2809 = vmatpush1.msra.mxu0 %v7353_v7  ;;  %2880 = vmatpush1.msra.mxu1 %v7356_v60 }
 0x716   :  { %2810 = vmatprep.subr.mxu0 %v7359_v43  ;;  %2881 = vmatprep.subr.mxu1 %v7362_v22  ;;  %v7380_v22 = vld [vmem:[#allocation8 + $0x1b0] sm:$0xff] }
 0x717   :  { %2811 = vmatpush1.msra.mxu0 %v7365_v23  ;;  %2882 = vmatpush1.msra.mxu1 %v7368_v24  ;;  %9387 = vst [vmem:[#allocation150_spill] sm:$0xff] %v7380_v22  ;;  %v7383_v23 = vld [vmem:[#allocation8 + $0x188] sm:$0xff]  ;;  %v7386_v24 = vld [vmem:[#allocation8 + $0x198] sm:$0xff] }
 0x718   :  { %2812 = vmatprep.subr.mxu0 %v7371_v32  ;;  %2883 = vmatprep.subr.mxu1 %v7374_v40  ;;  %9388 = vst [vmem:[#allocation151_spill] sm:$0xff] %v7383_v23  ;;  %9389 = vst [vmem:[#allocation153_spill] sm:$0xff] %v7386_v24  ;;  %v7389_v32 = vld [vmem:[#allocation8 + $0x180] sm:$0xff]  ;;  %v7392_v40 = vld [vmem:[#allocation8 + $0x190] sm:$0xff] }
 0x719   :  { %2813 = vmatpush1.msra.mxu0 %v7377_v41  ;;  %2884 = vmatpush1.msra.mxu1 %v7380_v22  ;;  %9390 = vst [vmem:[#allocation152_spill] sm:$0xff] %v7389_v32  ;;  %9391 = vst [vmem:[#allocation154_spill] sm:$0xff] %v7392_v40  ;;  %v7395_v41 = vld [vmem:[#allocation8 + $0x168] sm:$0xff]  ;;  %v7398_v22 = vld [vmem:[#allocation8 + $0x178] sm:$0xff] }
 0x71a   :  { %2814 = vmatprep.subr.mxu0 %v7383_v23  ;;  %2885 = vmatprep.subr.mxu1 %v7386_v24  ;;  %9392 = vst [vmem:[#allocation20_spill] sm:$0xff] %v7395_v41  ;;  %9393 = vst [vmem:[#allocation21_spill] sm:$0xff] %v7398_v22  ;;  %v7401_v23 = vld [vmem:[#allocation8 + $0x160] sm:$0xff]  ;;  %v7404_v24 = vld [vmem:[#allocation8 + $0x170] sm:$0xff] }
 0x71b   :  { %2815 = vmatpush1.msra.mxu0 %v7389_v32  ;;  %2886 = vmatpush1.msra.mxu1 %v7392_v40  ;;  %9394 = vst [vmem:[#allocation22_spill] sm:$0xff] %v7401_v23  ;;  %9395 = vst [vmem:[#allocation23_spill] sm:$0xff] %v7404_v24  ;;  %v7407_v32 = vld [vmem:[#allocation8 + $0x148] sm:$0xff]  ;;  %v7410_v40 = vld [vmem:[#allocation8 + $0x158] sm:$0xff] }
 0x71c   :  { %2816 = vmatprep.subr.mxu0 %v7395_v41  ;;  %2887 = vmatprep.subr.mxu1 %v7398_v22  ;;  %9396 = vst [vmem:[#allocation24_spill] sm:$0xff] %v7407_v32  ;;  %9397 = vst [vmem:[#allocation25_spill] sm:$0xff] %v7410_v40  ;;  %v7413_v41 = vld [vmem:[#allocation8 + $0x140] sm:$0xff]  ;;  %v7416_v22 = vld [vmem:[#allocation8 + $0x150] sm:$0xff] }
 0x71d   :  { %2817 = vmatpush1.msra.mxu0 %v7401_v23  ;;  %2888 = vmatpush1.msra.mxu1 %v7404_v24  ;;  %9398 = vst [vmem:[#allocation26_spill] sm:$0xff] %v7413_v41  ;;  %9399 = vst [vmem:[#allocation27_spill] sm:$0xff] %v7416_v22  ;;  %v7419_v23 = vld [vmem:[#allocation8 + $0x128] sm:$0xff]  ;;  %v7422_v24 = vld [vmem:[#allocation8 + $0x138] sm:$0xff] }
 0x71e   :  { %2818 = vmatprep.subr.mxu0 %v7407_v32  ;;  %2889 = vmatprep.subr.mxu1 %v7410_v40  ;;  %9400 = vst [vmem:[#allocation28_spill] sm:$0xff] %v7419_v23  ;;  %9401 = vst [vmem:[#allocation29_spill] sm:$0xff] %v7422_v24  ;;  %v7425_v32 = vld [vmem:[#allocation8 + $0x120] sm:$0xff]  ;;  %v7428_v40 = vld [vmem:[#allocation8 + $0x130] sm:$0xff] }
 0x71f   :  { %2819 = vmatpush1.msra.mxu0 %v7413_v41  ;;  %2890 = vmatpush1.msra.mxu1 %v7416_v22  ;;  %9402 = vst [vmem:[#allocation30_spill] sm:$0xff] %v7425_v32  ;;  %9403 = vst [vmem:[#allocation31_spill] sm:$0xff] %v7428_v40  ;;  %v7431_v41 = vld [vmem:[#allocation8 + $0x108] sm:$0xff]  ;;  %v7434_v22 = vld [vmem:[#allocation8 + $0x118] sm:$0xff] }
 0x720   :  { %2820 = vmatprep.subr.mxu0 %v7419_v23  ;;  %2891 = vmatprep.subr.mxu1 %v7422_v24  ;;  %9404 = vst [vmem:[#allocation32_spill] sm:$0xff] %v7431_v41  ;;  %9405 = vst [vmem:[#allocation33_spill] sm:$0xff] %v7434_v22  ;;  %v7437_v23 = vld [vmem:[#allocation8 + $0x100] sm:$0xff]  ;;  %v7440_v24 = vld [vmem:[#allocation8 + $0x110] sm:$0xff] }
 0x721   :  { %2821 = vmatpush1.msra.mxu0 %v7425_v32  ;;  %2892 = vmatpush1.msra.mxu1 %v7428_v40  ;;  %9406 = vst [vmem:[#allocation34_spill] sm:$0xff] %v7437_v23  ;;  %9407 = vst [vmem:[#allocation35_spill] sm:$0xff] %v7440_v24  ;;  %v7443_v32 = vld [vmem:[#allocation8 + $0xe8] sm:$0xff]  ;;  %v7446_v40 = vld [vmem:[#allocation8 + $0xf8] sm:$0xff] }
 0x722   :  { %2822 = vmatprep.subr.mxu0 %v7431_v41  ;;  %2893 = vmatprep.subr.mxu1 %v7434_v22  ;;  %9408 = vst [vmem:[#allocation36_spill] sm:$0xff] %v7443_v32  ;;  %9409 = vst [vmem:[#allocation37_spill] sm:$0xff] %v7446_v40  ;;  %v7449_v41 = vld [vmem:[#allocation8 + $0xe0] sm:$0xff]  ;;  %v7452_v22 = vld [vmem:[#allocation8 + $0xf0] sm:$0xff] }
 0x723   :  { %2823 = vmatpush1.msra.mxu0 %v7437_v23  ;;  %2894 = vmatpush1.msra.mxu1 %v7440_v24  ;;  %9410 = vst [vmem:[#allocation38_spill] sm:$0xff] %v7449_v41  ;;  %9411 = vst [vmem:[#allocation39_spill] sm:$0xff] %v7452_v22  ;;  %v7455_v23 = vld [vmem:[#allocation8 + $0xc8] sm:$0xff]  ;;  %v7458_v24 = vld [vmem:[#allocation8 + $0xd8] sm:$0xff] }
 0x724   :  { %2824 = vmatprep.subr.mxu0 %v7443_v32  ;;  %2895 = vmatprep.subr.mxu1 %v7446_v40  ;;  %9412 = vst [vmem:[#allocation40_spill] sm:$0xff] %v7455_v23  ;;  %9413 = vst [vmem:[#allocation41_spill] sm:$0xff] %v7458_v24  ;;  %v7461_v32 = vld [vmem:[#allocation8 + $0xc0] sm:$0xff]  ;;  %v7464_v40 = vld [vmem:[#allocation8 + $0xd0] sm:$0xff] }
 0x725   :  { %2825 = vmatpush1.msra.mxu0 %v7449_v41  ;;  %2896 = vmatpush1.msra.mxu1 %v7452_v22  ;;  %9414 = vst [vmem:[#allocation42_spill] sm:$0xff] %v7461_v32  ;;  %9415 = vst [vmem:[#allocation43_spill] sm:$0xff] %v7464_v40  ;;  %v7467_v41 = vld [vmem:[#allocation8 + $0xa8] sm:$0xff]  ;;  %v7470_v22 = vld [vmem:[#allocation8 + $0xb8] sm:$0xff] }
 0x726   :  { %2826 = vmatprep.subr.mxu0 %v7455_v23  ;;  %2897 = vmatprep.subr.mxu1 %v7458_v24  ;;  %9416 = vst [vmem:[#allocation44_spill] sm:$0xff] %v7467_v41  ;;  %9417 = vst [vmem:[#allocation45_spill] sm:$0xff] %v7470_v22  ;;  %v7473_v23 = vld [vmem:[#allocation8 + $0xa0] sm:$0xff]  ;;  %v7476_v24 = vld [vmem:[#allocation8 + $0xb0] sm:$0xff] }
 0x727   :  { %2827 = vmatpush1.msra.mxu0 %v7461_v32  ;;  %2898 = vmatpush1.msra.mxu1 %v7464_v40  ;;  %9418 = vst [vmem:[#allocation46_spill] sm:$0xff] %v7473_v23  ;;  %9419 = vst [vmem:[#allocation47_spill] sm:$0xff] %v7476_v24  ;;  %v7479_v32 = vld [vmem:[#allocation8 + $0x88] sm:$0xff]  ;;  %v7482_v40 = vld [vmem:[#allocation8 + $0x98] sm:$0xff] }
 0x728   :  { %2828 = vmatprep.subr.mxu0 %v7467_v41  ;;  %2899 = vmatprep.subr.mxu1 %v7470_v22  ;;  %9420 = vst [vmem:[#allocation48_spill] sm:$0xff] %v7479_v32  ;;  %9421 = vst [vmem:[#allocation49_spill] sm:$0xff] %v7482_v40  ;;  %v7485_v41 = vld [vmem:[#allocation8 + $0x80] sm:$0xff]  ;;  %v7488_v22 = vld [vmem:[#allocation8 + $0x90] sm:$0xff] }
 0x729   :  { %2829 = vmatpush1.msra.mxu0 %v7473_v23  ;;  %2900 = vmatpush1.msra.mxu1 %v7476_v24  ;;  %9422 = vst [vmem:[#allocation50_spill] sm:$0xff] %v7485_v41  ;;  %9423 = vst [vmem:[#allocation51_spill] sm:$0xff] %v7488_v22  ;;  %v7491_v23 = vld [vmem:[#allocation8 + $0x68] sm:$0xff]  ;;  %v7494_v24 = vld [vmem:[#allocation8 + $0x78] sm:$0xff] }
 0x72a   :  { %2830 = vmatprep.subr.mxu0 %v7479_v32  ;;  %2901 = vmatprep.subr.mxu1 %v7482_v40  ;;  %9424 = vst [vmem:[#allocation52_spill] sm:$0xff] %v7491_v23  ;;  %9425 = vst [vmem:[#allocation53_spill] sm:$0xff] %v7494_v24  ;;  %v7497_v32 = vld [vmem:[#allocation8 + $0x60] sm:$0xff]  ;;  %v7500_v40 = vld [vmem:[#allocation8 + $0x70] sm:$0xff] }
 0x72b   :  { %2831 = vmatpush1.msra.mxu0 %v7485_v41  ;;  %2902 = vmatpush1.msra.mxu1 %v7488_v22  ;;  %9426 = vst [vmem:[#allocation54_spill] sm:$0xff] %v7497_v32  ;;  %9427 = vst [vmem:[#allocation55_spill] sm:$0xff] %v7500_v40  ;;  %v7503_v41 = vld [vmem:[#allocation8 + $0x48] sm:$0xff]  ;;  %v7506_v22 = vld [vmem:[#allocation8 + $0x58] sm:$0xff] }
 0x72c   :  { %2832 = vmatprep.subr.mxu0 %v7491_v23  ;;  %2903 = vmatprep.subr.mxu1 %v7494_v24  ;;  %9428 = vst [vmem:[#allocation56_spill] sm:$0xff] %v7503_v41  ;;  %9429 = vst [vmem:[#allocation57_spill] sm:$0xff] %v7506_v22  ;;  %v7509_v23 = vld [vmem:[#allocation8 + $0x40] sm:$0xff]  ;;  %v7512_v24 = vld [vmem:[#allocation8 + $0x50] sm:$0xff] }
 0x72d   :  { %2833 = vmatpush1.msra.mxu0 %v7497_v32  ;;  %2904 = vmatpush1.msra.mxu1 %v7500_v40  ;;  %9430 = vst [vmem:[#allocation58_spill] sm:$0xff] %v7509_v23  ;;  %9431 = vst [vmem:[#allocation59_spill] sm:$0xff] %v7512_v24  ;;  %v7515_v32 = vld [vmem:[#allocation8 + $0x28] sm:$0xff]  ;;  %v7518_v40 = vld [vmem:[#allocation8 + $0x38] sm:$0xff] }
 0x72e   :  { %2834 = vmatprep.subr.mxu0 %v7503_v41  ;;  %2905 = vmatprep.subr.mxu1 %v7506_v22  ;;  %9432 = vst [vmem:[#allocation60_spill] sm:$0xff] %v7515_v32  ;;  %9433 = vst [vmem:[#allocation61_spill] sm:$0xff] %v7518_v40  ;;  %v7521_v41 = vld [vmem:[#allocation8 + $0x20] sm:$0xff]  ;;  %v7524_v22 = vld [vmem:[#allocation8 + $0x30] sm:$0xff] }
 0x72f   :  { %2835 = vmatpush1.msra.mxu0 %v7509_v23  ;;  %2906 = vmatpush1.msra.mxu1 %v7512_v24  ;;  %9434 = vst [vmem:[#allocation62_spill] sm:$0xff] %v7521_v41  ;;  %9435 = vst [vmem:[#allocation63_spill] sm:$0xff] %v7524_v22  ;;  %v7527_v23 = vld [vmem:[#allocation8 + $0x8] sm:$0xff]  ;;  %v7530_v24 = vld [vmem:[#allocation8 + $0x18] sm:$0xff] }
 0x730   :  { %2836 = vmatprep.subr.mxu0 %v7515_v32  ;;  %2907 = vmatprep.subr.mxu1 %v7518_v40  ;;  %9436 = vst [vmem:[#allocation64_spill] sm:$0xff] %v7527_v23  ;;  %9437 = vst [vmem:[#allocation65_spill] sm:$0xff] %v7530_v24  ;;  %v7533_v32 = vld [vmem:[#allocation8] sm:$0xff]  ;;  %v7536_v40 = vld [vmem:[#allocation8 + $0x10] sm:$0xff] }
 0x731   :  { %2837 = vmatpush1.msra.mxu0 %v7521_v41  ;;  %2908 = vmatpush1.msra.mxu1 %v7524_v22  ;;  %9438 = vst [vmem:[#allocation66_spill] sm:$0xff] %v7533_v32  ;;  %9439 = vst [vmem:[#allocation67_spill] sm:$0xff] %v7536_v40  ;;  %v7539_v41 = vld [vmem:[#allocation8 + $0x3e8] sm:$0xff]  ;;  %v7542_v22 = vld [vmem:[#allocation8 + $0x3f8] sm:$0xff] }
 0x732   :  { %2838 = vmatprep.subr.mxu0 %v7527_v23  ;;  %2909 = vmatprep.subr.mxu1 %v7530_v24  ;;  %9440 = vst [vmem:[#allocation68_spill] sm:$0xff] %v7539_v41  ;;  %9441 = vst [vmem:[#allocation69_spill] sm:$0xff] %v7542_v22  ;;  %v7545_v23 = vld [vmem:[#allocation8 + $0x3e0] sm:$0xff]  ;;  %v7548_v24 = vld [vmem:[#allocation8 + $0x3f0] sm:$0xff] }
 0x733   :  { %2839 = vmatpush1.msra.mxu0 %v7533_v32  ;;  %2910 = vmatpush1.msra.mxu1 %v7536_v40  ;;  %9442 = vst [vmem:[#allocation70_spill] sm:$0xff] %v7545_v23  ;;  %9443 = vst [vmem:[#allocation71_spill] sm:$0xff] %v7548_v24  ;;  %v7551_v32 = vld [vmem:[#allocation8 + $0x3c8] sm:$0xff]  ;;  %v7554_v40 = vld [vmem:[#allocation8 + $0x3d8] sm:$0xff] }
 0x734   :  { %2840 = vmatprep.subr.mxu0 %v7539_v41  ;;  %2911 = vmatprep.subr.mxu1 %v7542_v22  ;;  %9444 = vst [vmem:[#allocation72_spill] sm:$0xff] %v7551_v32  ;;  %9445 = vst [vmem:[#allocation73_spill] sm:$0xff] %v7554_v40  ;;  %v7557_v41 = vld [vmem:[#allocation8 + $0x3c0] sm:$0xff]  ;;  %v7560_v22 = vld [vmem:[#allocation8 + $0x3d0] sm:$0xff] }
 0x735   :  { %2841 = vmatpush2.msra.mxu0 %v7545_v23  ;;  %2912 = vmatpush2.msra.mxu1 %v7548_v24  ;;  %9446 = vst [vmem:[#allocation74_spill] sm:$0xff] %v7557_v41  ;;  %9447 = vst [vmem:[#allocation75_spill] sm:$0xff] %v7560_v22  ;;  %v7563_v23 = vld [vmem:[#allocation8 + $0x3a8] sm:$0xff]  ;;  %v7566_v24 = vld [vmem:[#allocation8 + $0x3b8] sm:$0xff] }
 0x736   :  { %2842 = vmatprep.subr.mxu0 %v7551_v32  ;;  %2913 = vmatprep.subr.mxu1 %v7554_v40  ;;  %9448 = vst [vmem:[#allocation76_spill] sm:$0xff] %v7563_v23  ;;  %9449 = vst [vmem:[#allocation77_spill] sm:$0xff] %v7566_v24  ;;  %v7569_v32 = vld [vmem:[#allocation8 + $0x3a0] sm:$0xff]  ;;  %v7572_v40 = vld [vmem:[#allocation8 + $0x3b0] sm:$0xff] }
 0x737   :  { %2843 = vmatpush2.msra.mxu0 %v7557_v41  ;;  %2914 = vmatpush2.msra.mxu1 %v7560_v22  ;;  %9450 = vst [vmem:[#allocation78_spill] sm:$0xff] %v7569_v32  ;;  %9451 = vst [vmem:[#allocation79_spill] sm:$0xff] %v7572_v40  ;;  %v7575_v41 = vld [vmem:[#allocation8 + $0x388] sm:$0xff]  ;;  %v7578_v22 = vld [vmem:[#allocation8 + $0x398] sm:$0xff] }
 0x738   :  { %2844 = vmatprep.subr.mxu0 %v7563_v23  ;;  %2915 = vmatprep.subr.mxu1 %v7566_v24  ;;  %9452 = vst [vmem:[#allocation80_spill] sm:$0xff] %v7575_v41  ;;  %9453 = vst [vmem:[#allocation81_spill] sm:$0xff] %v7578_v22  ;;  %v7581_v23 = vld [vmem:[#allocation8 + $0x380] sm:$0xff]  ;;  %v7584_v24 = vld [vmem:[#allocation8 + $0x390] sm:$0xff] }
 0x739   :  { %2845 = vmatpush2.msra.mxu0 %v7569_v32  ;;  %2916 = vmatpush2.msra.mxu1 %v7572_v40  ;;  %9454 = vst [vmem:[#allocation82_spill] sm:$0xff] %v7581_v23  ;;  %9455 = vst [vmem:[#allocation83_spill] sm:$0xff] %v7584_v24  ;;  %v7587_v32 = vld [vmem:[#allocation8 + $0x368] sm:$0xff]  ;;  %v7590_v40 = vld [vmem:[#allocation8 + $0x378] sm:$0xff] }
 0x73a   :  { %2846 = vmatprep.subr.mxu0 %v7575_v41  ;;  %2917 = vmatprep.subr.mxu1 %v7578_v22  ;;  %9456 = vst [vmem:[#allocation84_spill] sm:$0xff] %v7587_v32  ;;  %9457 = vst [vmem:[#allocation85_spill] sm:$0xff] %v7590_v40  ;;  %v7593_v41 = vld [vmem:[#allocation8 + $0x360] sm:$0xff]  ;;  %v7596_v22 = vld [vmem:[#allocation8 + $0x370] sm:$0xff] }
 0x73b   :  { %2847 = vmatpush2.msra.mxu0 %v7581_v23  ;;  %2918 = vmatpush2.msra.mxu1 %v7584_v24  ;;  %9458 = vst [vmem:[#allocation86_spill] sm:$0xff] %v7593_v41  ;;  %9459 = vst [vmem:[#allocation87_spill] sm:$0xff] %v7596_v22  ;;  %v7599_v23 = vld [vmem:[#allocation8 + $0x348] sm:$0xff]  ;;  %v7602_v24 = vld [vmem:[#allocation8 + $0x358] sm:$0xff] }
 0x73c   :  { %2848 = vmatprep.subr.mxu0 %v7587_v32  ;;  %2919 = vmatprep.subr.mxu1 %v7590_v40  ;;  %9460 = vst [vmem:[#allocation88_spill] sm:$0xff] %v7599_v23  ;;  %9461 = vst [vmem:[#allocation89_spill] sm:$0xff] %v7602_v24  ;;  %v7605_v32 = vld [vmem:[#allocation8 + $0x340] sm:$0xff]  ;;  %v7608_v40 = vld [vmem:[#allocation8 + $0x350] sm:$0xff] }
 0x73d   :  { %2849 = vmatpush2.msra.mxu0 %v7593_v41  ;;  %2920 = vmatpush2.msra.mxu1 %v7596_v22  ;;  %9462 = vst [vmem:[#allocation90_spill] sm:$0xff] %v7605_v32  ;;  %9463 = vst [vmem:[#allocation91_spill] sm:$0xff] %v7608_v40  ;;  %v7611_v41 = vld [vmem:[#allocation8 + $0x328] sm:$0xff]  ;;  %v7614_v22 = vld [vmem:[#allocation8 + $0x338] sm:$0xff] }
 0x73e   :  { %2850 = vmatprep.subr.mxu0 %v7599_v23  ;;  %2921 = vmatprep.subr.mxu1 %v7602_v24  ;;  %9464 = vst [vmem:[#allocation92_spill] sm:$0xff] %v7611_v41  ;;  %9465 = vst [vmem:[#allocation93_spill] sm:$0xff] %v7614_v22  ;;  %v7617_v23 = vld [vmem:[#allocation8 + $0x320] sm:$0xff]  ;;  %v7620_v24 = vld [vmem:[#allocation8 + $0x330] sm:$0xff] }
 0x73f   :  { %2851 = vmatpush2.msra.mxu0 %v7605_v32  ;;  %2922 = vmatpush2.msra.mxu1 %v7608_v40  ;;  %9466 = vst [vmem:[#allocation94_spill] sm:$0xff] %v7617_v23  ;;  %9467 = vst [vmem:[#allocation95_spill] sm:$0xff] %v7620_v24  ;;  %v7623_v32 = vld [vmem:[#allocation8 + $0x308] sm:$0xff]  ;;  %v7626_v40 = vld [vmem:[#allocation8 + $0x318] sm:$0xff] }
 0x740   :  { %2852 = vmatprep.subr.mxu0 %v7611_v41  ;;  %2923 = vmatprep.subr.mxu1 %v7614_v22  ;;  %9468 = vst [vmem:[#allocation96_spill] sm:$0xff] %v7623_v32  ;;  %9469 = vst [vmem:[#allocation97_spill] sm:$0xff] %v7626_v40  ;;  %v7629_v41 = vld [vmem:[#allocation8 + $0x300] sm:$0xff]  ;;  %v7632_v22 = vld [vmem:[#allocation8 + $0x310] sm:$0xff] }
 0x741   :  { %2853 = vmatpush2.msra.mxu0 %v7617_v23  ;;  %2924 = vmatpush2.msra.mxu1 %v7620_v24  ;;  %9470 = vst [vmem:[#allocation98_spill] sm:$0xff] %v7629_v41  ;;  %9471 = vst [vmem:[#allocation99_spill] sm:$0xff] %v7632_v22  ;;  %v7635_v23 = vld [vmem:[#allocation8 + $0x2e8] sm:$0xff]  ;;  %v7638_v24 = vld [vmem:[#allocation8 + $0x2f8] sm:$0xff] }
 0x742   :  { %2854 = vmatprep.subr.mxu0 %v7623_v32  ;;  %2925 = vmatprep.subr.mxu1 %v7626_v40  ;;  %9472 = vst [vmem:[#allocation100_spill] sm:$0xff] %v7635_v23  ;;  %9473 = vst [vmem:[#allocation101_spill] sm:$0xff] %v7638_v24  ;;  %v7641_v32 = vld [vmem:[#allocation8 + $0x2e0] sm:$0xff]  ;;  %v7644_v40 = vld [vmem:[#allocation8 + $0x2f0] sm:$0xff] }
 0x743   :  { %2855 = vmatpush2.msra.mxu0 %v7629_v41  ;;  %2926 = vmatpush2.msra.mxu1 %v7632_v22  ;;  %9474 = vst [vmem:[#allocation102_spill] sm:$0xff] %v7641_v32  ;;  %9475 = vst [vmem:[#allocation103_spill] sm:$0xff] %v7644_v40  ;;  %v7647_v41 = vld [vmem:[#allocation8 + $0x2c8] sm:$0xff]  ;;  %v7650_v22 = vld [vmem:[#allocation8 + $0x2d8] sm:$0xff] }
 0x744   :  { %2856 = vmatprep.subr.mxu0 %v7635_v23  ;;  %2927 = vmatprep.subr.mxu1 %v7638_v24  ;;  %9476 = vst [vmem:[#allocation104_spill] sm:$0xff] %v7647_v41  ;;  %9477 = vst [vmem:[#allocation105_spill] sm:$0xff] %v7650_v22  ;;  %v7653_v23 = vld [vmem:[#allocation8 + $0x2c0] sm:$0xff]  ;;  %v7656_v24 = vld [vmem:[#allocation8 + $0x2d0] sm:$0xff] }
 0x745   :  { %2857 = vmatpush2.msra.mxu0 %v7641_v32  ;;  %2928 = vmatpush2.msra.mxu1 %v7644_v40  ;;  %9478 = vst [vmem:[#allocation106_spill] sm:$0xff] %v7653_v23  ;;  %9479 = vst [vmem:[#allocation107_spill] sm:$0xff] %v7656_v24  ;;  %v7659_v32 = vld [vmem:[#allocation8 + $0x2a8] sm:$0xff]  ;;  %v7662_v40 = vld [vmem:[#allocation8 + $0x2b8] sm:$0xff] }
 0x746   :  { %2858 = vmatprep.subr.mxu0 %v7647_v41  ;;  %2929 = vmatprep.subr.mxu1 %v7650_v22  ;;  %9480 = vst [vmem:[#allocation108_spill] sm:$0xff] %v7659_v32  ;;  %9481 = vst [vmem:[#allocation109_spill] sm:$0xff] %v7662_v40  ;;  %v7665_v41 = vld [vmem:[#allocation8 + $0x2a0] sm:$0xff]  ;;  %v7668_v22 = vld [vmem:[#allocation8 + $0x2b0] sm:$0xff] }
 0x747   :  { %2859 = vmatpush2.msra.mxu0 %v7653_v23  ;;  %2930 = vmatpush2.msra.mxu1 %v7656_v24  ;;  %9482 = vst [vmem:[#allocation110_spill] sm:$0xff] %v7665_v41  ;;  %9483 = vst [vmem:[#allocation111_spill] sm:$0xff] %v7668_v22  ;;  %v7671_v23 = vld [vmem:[#allocation8 + $0x288] sm:$0xff]  ;;  %v7674_v24 = vld [vmem:[#allocation8 + $0x298] sm:$0xff] }
 0x748   :  { %2860 = vmatprep.subr.mxu0 %v7659_v32  ;;  %2931 = vmatprep.subr.mxu1 %v7662_v40  ;;  %9484 = vst [vmem:[#allocation112_spill] sm:$0xff] %v7671_v23  ;;  %9485 = vst [vmem:[#allocation113_spill] sm:$0xff] %v7674_v24  ;;  %v7677_v32 = vld [vmem:[#allocation8 + $0x280] sm:$0xff]  ;;  %v7680_v40 = vld [vmem:[#allocation8 + $0x290] sm:$0xff] }
 0x749   :  { %2861 = vmatpush2.msra.mxu0 %v7665_v41  ;;  %2932 = vmatpush2.msra.mxu1 %v7668_v22  ;;  %9486 = vst [vmem:[#allocation114_spill] sm:$0xff] %v7677_v32  ;;  %9487 = vst [vmem:[#allocation115_spill] sm:$0xff] %v7680_v40  ;;  %v7683_v41 = vld [vmem:[#allocation8 + $0x268] sm:$0xff]  ;;  %v7686_v22 = vld [vmem:[#allocation8 + $0x278] sm:$0xff] }
 0x74a   :  { %2862 = vmatprep.subr.mxu0 %v7671_v23  ;;  %2933 = vmatprep.subr.mxu1 %v7674_v24  ;;  %9488 = vst [vmem:[#allocation116_spill] sm:$0xff] %v7683_v41  ;;  %9489 = vst [vmem:[#allocation117_spill] sm:$0xff] %v7686_v22  ;;  %v7689_v23 = vld [vmem:[#allocation8 + $0x260] sm:$0xff]  ;;  %v7692_v24 = vld [vmem:[#allocation8 + $0x270] sm:$0xff] }
 0x74b   :  { %2863 = vmatpush2.msra.mxu0 %v7677_v32  ;;  %2934 = vmatpush2.msra.mxu1 %v7680_v40  ;;  %9490 = vst [vmem:[#allocation118_spill] sm:$0xff] %v7689_v23  ;;  %9491 = vst [vmem:[#allocation119_spill] sm:$0xff] %v7692_v24  ;;  %v7695_v32 = vld [vmem:[#allocation8 + $0x248] sm:$0xff]  ;;  %v7698_v40 = vld [vmem:[#allocation8 + $0x258] sm:$0xff] }
 0x74c   :  { %2864 = vmatprep.subr.mxu0 %v7683_v41  ;;  %2935 = vmatprep.subr.mxu1 %v7686_v22  ;;  %9492 = vst [vmem:[#allocation120_spill] sm:$0xff] %v7695_v32  ;;  %9493 = vst [vmem:[#allocation121_spill] sm:$0xff] %v7698_v40  ;;  %v7701_v41 = vld [vmem:[#allocation8 + $0x240] sm:$0xff]  ;;  %v7704_v22 = vld [vmem:[#allocation8 + $0x250] sm:$0xff] }
 0x74d   :  { %2865 = vmatpush2.msra.mxu0 %v7689_v23  ;;  %2936 = vmatpush2.msra.mxu1 %v7692_v24  ;;  %9494 = vst [vmem:[#allocation122_spill] sm:$0xff] %v7701_v41  ;;  %9495 = vst [vmem:[#allocation123_spill] sm:$0xff] %v7704_v22  ;;  %v7707_v23 = vld [vmem:[#allocation8 + $0x228] sm:$0xff]  ;;  %v7710_v24 = vld [vmem:[#allocation8 + $0x238] sm:$0xff] }
 0x74e   :  { %2866 = vmatprep.subr.mxu0 %v7695_v32  ;;  %2937 = vmatprep.subr.mxu1 %v7698_v40  ;;  %9496 = vst [vmem:[#allocation124_spill] sm:$0xff] %v7707_v23  ;;  %9497 = vst [vmem:[#allocation125_spill] sm:$0xff] %v7710_v24  ;;  %v7713_v32 = vld [vmem:[#allocation8 + $0x220] sm:$0xff]  ;;  %v7716_v40 = vld [vmem:[#allocation8 + $0x230] sm:$0xff] }
 0x74f   :  { %2867 = vmatpush2.msra.mxu0 %v7701_v41  ;;  %2938 = vmatpush2.msra.mxu1 %v7704_v22  ;;  %9498 = vst [vmem:[#allocation126_spill] sm:$0xff] %v7713_v32  ;;  %9499 = vst [vmem:[#allocation127_spill] sm:$0xff] %v7716_v40  ;;  %v7719_v41 = vld [vmem:[#allocation8 + $0x208] sm:$0xff]  ;;  %v7722_v22 = vld [vmem:[#allocation8 + $0x218] sm:$0xff] }
 0x750   :  { %2868 = vmatprep.subr.mxu0 %v7707_v23  ;;  %2939 = vmatprep.subr.mxu1 %v7710_v24  ;;  %9500 = vst [vmem:[#allocation128_spill] sm:$0xff] %v7719_v41  ;;  %9501 = vst [vmem:[#allocation129_spill] sm:$0xff] %v7722_v22  ;;  %v7725_v23 = vld [vmem:[#allocation8 + $0x200] sm:$0xff]  ;;  %v7728_v24 = vld [vmem:[#allocation8 + $0x210] sm:$0xff] }
 0x751   :  { %2869 = vmatpush2.msra.mxu0 %v7713_v32  ;;  %2940 = vmatpush2.msra.mxu1 %v7716_v40  ;;  %9502 = vst [vmem:[#allocation130_spill] sm:$0xff] %v7725_v23  ;;  %9503 = vst [vmem:[#allocation131_spill] sm:$0xff] %v7728_v24 }
 0x752   :  { %2870 = vmatprep.subr.mxu0 %v7719_v41  ;;  %2941 = vmatprep.subr.mxu1 %v7722_v22 }
 0x753   :  { %2871 = vmatpush2.msra.mxu0 %v7725_v23  ;;  %2942 = vmatpush2.msra.mxu1 %v7728_v24 }
 0x754   :  { %2974 = vmatprep.subr.mxu0 %v7167_v5  ;;  %3045 = vmatprep.subr.mxu1 %v7170_v9 }
 0x7b2   :  { %v2538_v40 = vpop.f32.mrf.mxu0  ;;  %v2609_v7 = vpop.f32.mrf.mxu1 }
 0x7b3   :  { %v2539_v32 = vadd.f32 %v2538_v40, %v9366_v10  ;;  %v2610_v23 = vadd.f32 %v2609_v7, %v9368_v6 }
 0x7b4   :  { %v2540_v41 = vpop.f32.mrf.mxu0  ;;  %v2611_v63 = vpop.f32.mrf.mxu1 }
 0x7b5   :  { %v3474_v43 = vmul.f32 -1.442695, %v2539_v32  ;;  %v2541_v60 = vadd.f32 %v2540_v41, %v9367_v59  ;;  %v3476_v2 = vmul.f32 -1.442695, %v2610_v23  ;;  %v2612_v5 = vadd.f32 %v2611_v63, %v9369_v1  ;;  %v9505_v23 = vld [vmem:[#allocation169_spill] sm:$0xff] }
 0x7b7   :  { %3730 = vpow2.f32 %v3474_v43  ;;  %v3475_v22 = vmul.f32 -1.442695, %v2541_v60  ;;  %v9504_v60 = vld [vmem:[#allocation167_spill] sm:$0xff] }
 0x7b9   :  { %3732 = vpow2.f32 %v3475_v22 }
 0x7ba   :  { %3734 = vpow2.f32 %v3476_v2 }
 0x7c4   :  { %v3731_v24 = vpop.eup %3730 }
 0x7c5   :  { %v2623_v4 = vadd.f32 1.0, %v3731_v24 }
 0x7c6   :  { %v3733_v9 = vpop.eup %3732 }
 0x7c7   :  { %3736 = vrcp.f32 %v2623_v4  ;;  %v2624_v40 = vadd.f32 1.0, %v3733_v9  ;;  %v3735_v32 = vpop.eup %3734  ;;  %v9506_v9 = vld [vmem:[#allocation168_spill] sm:$0xff] }
 0x7c8   :  { %3738 = vtanh.f32 %v2612_v5  ;;  %v2625_v58 = vadd.f32 1.0, %v3735_v32 }
 0x7c9   :  { %3740 = vrcp.f32 %v2624_v40 }
 0x7d3   :  { %v2704_v41 = vpop.f32.mrf.mxu0  ;;  %v2775_v5 = vpop.f32.mrf.mxu1 }
 0x7d4   :  { %v3737_v43 = vpop.eup %3736  ;;  %v2780_v22 = vadd.f32 %v2704_v41, %v9504_v60  ;;  %v2782_v40 = vadd.f32 %v2775_v5, %v9506_v9 }
 0x7d5   :  { %v3739_v59 = vpop.eup %3738  ;;  %v2706_v10 = vpop.f32.mrf.mxu0 }
 0x7d6   :  { %v3741_v7 = vpop.eup %3740  ;;  %v3477_v6 = vmul.f32 -1.442695, %v2780_v22  ;;  %v2781_v3 = vadd.f32 %v2706_v10, %v9505_v23  ;;  %v2634_v24 = vmul.f32 %v3739_v59, %v3737_v43  ;;  %v2777_v41 = vpop.f32.mrf.mxu1  ;;  %v3479_v60 = vmul.f32 -1.442695, %v2782_v40  ;;  %v9507_v22 = vld [vmem:[#allocation170_spill] sm:$0xff] }
 0x7d7   :  { %v2633_v63 = vmul.f32 %v3741_v7, %v7180_v53  ;;  %v2783_v1 = vadd.f32 %v2777_v41, %v9507_v22  ;;  %v4387_v22 = vld [vmem:[#allocation7 + $0x1f0] sm:$0xff] }
 0x7d8   :  { %3742 = vpow2.f32 %v3477_v6  ;;  %v3478_v4 = vmul.f32 -1.442695, %v2781_v3 }
 0x7d9   :  { %v7740_v2 = vadd.f32 %v2634_v24, %v2633_v63 }
 0x7da   :  { %3744 = vpow2.f32 %v3478_v4 }
 0x7db   :  { %3746 = vrcp.f32 %v2625_v58 }
 0x7dc   :  { %3748 = vtanh.f32 %v7740_v2 }
 0x7dd   :  { %3750 = vpow2.f32 %v3479_v60  ;;  %v4386_v60 = vld [vmem:[#allocation7 + $0x1e0] sm:$0xff] }
 0x7de   :  { %3752 = vtanh.f32 %v2783_v1 }
 0x7e5   :  { %v3743_v10 = vpop.eup %3742 }
 0x7e6   :  { %v2793_v32 = vadd.f32 1.0, %v3743_v10  ;;  %v4388_v10 = vld [vmem:[#allocation7 + $0x1c8] sm:$0xff] }
 0x7e7   :  { %v3745_v53 = vpop.eup %3744 }
 0x7e8   :  { %v3747_v59 = vpop.eup %3746  ;;  %3754 = vrcp.f32 %v2793_v32  ;;  %v2794_v3 = vadd.f32 1.0, %v3745_v53  ;;  %v4390_v32 = vld [vmem:[#allocation7 + $0x1c0] sm:$0xff]  ;;  %v4391_v53 = vld [vmem:[#allocation7 + $0x1d0] sm:$0xff] }
 0x7e9   :  { %v3749_v6 = vpop.eup %3748 }
 0x7ea   :  { %3756 = vrcp.f32 %v2794_v3  ;;  %v2637_v58 = vmul.f32 %v3749_v6, %v3747_v59  ;;  %v3751_v43 = vpop.eup %3750  ;;  %v4392_v59 = vld [vmem:[#allocation7 + $0x1a8] sm:$0xff]  ;;  %v4393_v3 = vld [vmem:[#allocation7 + $0x1b8] sm:$0xff]  ;;  %v4394_v6 = vld [vmem:[#allocation7 + $0x1a0] sm:$0xff] }
 0x7eb   :  { %v3753_v7 = vpop.eup %3752  ;;  %v2795_v4 = vadd.f32 1.0, %v3751_v43  ;;  %v4396_v43 = vld [vmem:[#allocation7 + $0x188] sm:$0xff] }
 0x7ec   :  { %2872 = vmatprep.mubr.f32.mxu0 %v2637_v58  ;;  %2943 = vmatprep.mubr.f32.mxu1 %v2637_v58  ;;  %v4395_v58 = vld [vmem:[#allocation7 + $0x1b0] sm:$0xff] }
 0x7ed   :  { %3758 = vrcp.f32 %v2795_v4  ;;  %v4401_v4 = vld [vmem:[#allocation7 + $0x178] sm:$0xff] }
 0x7f5   :  { %v3755_v23 = vpop.eup %3754 }
 0x7f6   :  { %v2804_v63 = vmul.f32 %v3755_v23, %v3753_v7  ;;  %v4397_v7 = vld [vmem:[#allocation7 + $0x198] sm:$0xff]  ;;  %v4398_v23 = vld [vmem:[#allocation7 + $0x180] sm:$0xff] }
 0x7f7   :  { %v3757_v24 = vpop.eup %3756 }
 0x7f8   :  { %v2803_v5 = vmul.f32 %v3757_v24, %v7186_v28  ;;  %v4389_v28 = vld [vmem:[#allocation7 + $0x1d8] sm:$0xff]  ;;  %v4400_v24 = vld [vmem:[#allocation7 + $0x168] sm:$0xff] }
 0x7fa   :  { %v7746_v9 = vadd.f32 %v2804_v63, %v2803_v5  ;;  %v3759_v1 = vpop.eup %3758  ;;  %v4399_v63 = vld [vmem:[#allocation7 + $0x190] sm:$0xff]  ;;  %v4402_v5 = vld [vmem:[#allocation7 + $0x160] sm:$0xff] }
 0x7fc   :  { %3760 = vtanh.f32 %v7746_v9 }
 0x809   :  { %v3761_v40 = vpop.eup %3760 }
 0x80a   :  { %v7749_v41 = vmul.f32 %v3761_v40, %v3759_v1  ;;  %v4403_v1 = vld [vmem:[#allocation7 + $0x170] sm:$0xff]  ;;  %v9550_v40 = vld [vmem:[#allocation43_spill] sm:$0xff] }
 0x80c   :  { %2873 = vmatmul.mubr.f32.vlgmr.msra.gmra.mxu0 %v7749_v41  ;;  %2944 = vmatmul.mubr.f32.vlgmr.msra.gmra.mxu1 %v7749_v41 }
 0x80d   :  { %2975 = vmatpush1.msra.mxu0 %v4386_v60  ;;  %3046 = vmatpush1.msra.mxu1 %v4387_v22  ;;  %v9552_v60 = vld [vmem:[#allocation45_spill] sm:$0xff]  ;;  %v9553_v22 = vld [vmem:[#allocation46_spill] sm:$0xff] }
 0x80e   :  { %2976 = vmatprep.subr.mxu0 %v4388_v10  ;;  %3047 = vmatprep.subr.mxu1 %v4389_v28  ;;  %v9554_v10 = vld [vmem:[#allocation47_spill] sm:$0xff]  ;;  %v9555_v28 = vld [vmem:[#allocation48_spill] sm:$0xff] }
 0x80f   :  { %2977 = vmatpush1.msra.mxu0 %v4390_v32  ;;  %3048 = vmatpush1.msra.mxu1 %v4391_v53  ;;  %v9556_v32 = vld [vmem:[#allocation49_spill] sm:$0xff]  ;;  %v9557_v53 = vld [vmem:[#allocation50_spill] sm:$0xff] }
 0x810   :  { %2978 = vmatprep.subr.mxu0 %v4392_v59  ;;  %3049 = vmatprep.subr.mxu1 %v4393_v3  ;;  %v9558_v59 = vld [vmem:[#allocation51_spill] sm:$0xff]  ;;  %v9559_v3 = vld [vmem:[#allocation52_spill] sm:$0xff] }
 0x811   :  { %2979 = vmatpush1.msra.mxu0 %v4394_v6  ;;  %3050 = vmatpush1.msra.mxu1 %v4395_v58  ;;  %v9560_v6 = vld [vmem:[#allocation53_spill] sm:$0xff]  ;;  %v9561_v58 = vld [vmem:[#allocation54_spill] sm:$0xff] }
 0x812   :  { %2980 = vmatprep.subr.mxu0 %v4396_v43  ;;  %3051 = vmatprep.subr.mxu1 %v4397_v7  ;;  %v9562_v43 = vld [vmem:[#allocation55_spill] sm:$0xff]  ;;  %v9563_v7 = vld [vmem:[#allocation56_spill] sm:$0xff] }
 0x813   :  { %2981 = vmatpush1.msra.mxu0 %v4398_v23  ;;  %3052 = vmatpush1.msra.mxu1 %v4399_v63  ;;  %v9564_v23 = vld [vmem:[#allocation57_spill] sm:$0xff]  ;;  %v9565_v63 = vld [vmem:[#allocation58_spill] sm:$0xff] }
 0x814   :  { %2982 = vmatprep.subr.mxu0 %v4400_v24  ;;  %3053 = vmatprep.subr.mxu1 %v4401_v4  ;;  %v9566_v24 = vld [vmem:[#allocation59_spill] sm:$0xff]  ;;  %v9567_v4 = vld [vmem:[#allocation60_spill] sm:$0xff] }
 0x815   :  { %2983 = vmatpush1.msra.mxu0 %v4402_v5  ;;  %3054 = vmatpush1.msra.mxu1 %v4403_v1  ;;  %v9568_v5 = vld [vmem:[#allocation61_spill] sm:$0xff]  ;;  %v9569_v1 = vld [vmem:[#allocation62_spill] sm:$0xff] }
 0x816   :  { %2984 = vmatprep.subr.mxu0 %v7211_v27  ;;  %3055 = vmatprep.subr.mxu1 %v7214_v38  ;;  %v9508_v27 = vld [vmem:[#allocation145_spill] sm:$0xff]  ;;  %v9509_v38 = vmov 0.0  }
 0x817   :  { %2985 = vmatpush1.msra.mxu0 %v7217_v13  ;;  %3056 = vmatpush1.msra.mxu1 %v7220_v15  ;;  %v9510_v13 = vld [vmem:[#allocation146_spill] sm:$0xff]  ;;  %v9511_v15 = vld [vmem:[#allocation147_spill] sm:$0xff] }
 0x818   :  { %2986 = vmatprep.subr.mxu0 %v7223_v0  ;;  %3057 = vmatprep.subr.mxu1 %v7226_v16  ;;  %v9512_v0 = vld [vmem:[#allocation149_spill] sm:$0xff]  ;;  %v9513_v16 = vld [vmem:[#allocation148_spill] sm:$0xff] }
 0x819   :  { %2987 = vmatpush1.msra.mxu0 %v7229_v54  ;;  %3058 = vmatpush1.msra.mxu1 %v7232_v33  ;;  %v9514_v54 = vld [vmem:[#allocation155_spill] sm:$0xff]  ;;  %v9515_v33 = vld [vmem:[#allocation157_spill] sm:$0xff] }
 0x81a   :  { %2988 = vmatprep.subr.mxu0 %v7235_v19  ;;  %3059 = vmatprep.subr.mxu1 %v7238_v35  ;;  %v9516_v19 = vld [vmem:[#allocation156_spill] sm:$0xff]  ;;  %v9517_v35 = vld [vmem:[#allocation158_spill] sm:$0xff] }
 0x81b   :  { %2989 = vmatpush1.msra.mxu0 %v7241_v36  ;;  %3060 = vmatpush1.msra.mxu1 %v7244_v17  ;;  %v9518_v36 = vld [vmem:[#allocation159_spill] sm:$0xff]  ;;  %v9519_v17 = vld [vmem:[#allocation161_spill] sm:$0xff] }
 0x81c   :  { %2990 = vmatprep.subr.mxu0 %v7247_v37  ;;  %3061 = vmatprep.subr.mxu1 %v7250_v14  ;;  %v9520_v37 = vld [vmem:[#allocation160_spill] sm:$0xff]  ;;  %v9521_v14 = vld [vmem:[#allocation162_spill] sm:$0xff] }
 0x81d   :  { %2991 = vmatpush1.msra.mxu0 %v7253_v30  ;;  %3062 = vmatpush1.msra.mxu1 %v7256_v44  ;;  %v9522_v30 = vld [vmem:[#allocation150_spill] sm:$0xff]  ;;  %v9523_v44 = vld [vmem:[#allocation151_spill] sm:$0xff] }
 0x81e   :  { %2992 = vmatprep.subr.mxu0 %v7259_v25  ;;  %3063 = vmatprep.subr.mxu1 %v7262_v34  ;;  %v9524_v25 = vld [vmem:[#allocation153_spill] sm:$0xff]  ;;  %v9525_v34 = vld [vmem:[#allocation152_spill] sm:$0xff] }
 0x81f   :  { %2993 = vmatpush1.msra.mxu0 %v7265_v29  ;;  %3064 = vmatpush1.msra.mxu1 %v7268_v46  ;;  %v9526_v29 = vld [vmem:[#allocation154_spill] sm:$0xff]  ;;  %v9527_v46 = vld [vmem:[#allocation20_spill] sm:$0xff] }
 0x820   :  { %2994 = vmatprep.subr.mxu0 %v7271_v47  ;;  %3065 = vmatprep.subr.mxu1 %v7274_v49  ;;  %v9528_v47 = vld [vmem:[#allocation21_spill] sm:$0xff]  ;;  %v9529_v49 = vld [vmem:[#allocation22_spill] sm:$0xff] }
 0x821   :  { %2995 = vmatpush1.msra.mxu0 %v7277_v51  ;;  %3066 = vmatpush1.msra.mxu1 %v7280_v52  ;;  %v9530_v51 = vld [vmem:[#allocation23_spill] sm:$0xff]  ;;  %v9531_v52 = vld [vmem:[#allocation24_spill] sm:$0xff] }
 0x822   :  { %2996 = vmatprep.subr.mxu0 %v7283_v55  ;;  %3067 = vmatprep.subr.mxu1 %v7286_v56  ;;  %v9532_v55 = vld [vmem:[#allocation25_spill] sm:$0xff]  ;;  %v9533_v56 = vld [vmem:[#allocation26_spill] sm:$0xff] }
 0x823   :  { %2997 = vmatpush1.msra.mxu0 %v7289_v57  ;;  %3068 = vmatpush1.msra.mxu1 %v7292_v11  ;;  %v9534_v57 = vld [vmem:[#allocation27_spill] sm:$0xff]  ;;  %v9535_v11 = vld [vmem:[#allocation28_spill] sm:$0xff] }
 0x824   :  { %2998 = vmatprep.subr.mxu0 %v7295_v12  ;;  %3069 = vmatprep.subr.mxu1 %v7298_v8  ;;  %v9536_v12 = vld [vmem:[#allocation29_spill] sm:$0xff]  ;;  %v9537_v8 = vld [vmem:[#allocation30_spill] sm:$0xff] }
 0x825   :  { %2999 = vmatpush1.msra.mxu0 %v7301_v26  ;;  %3070 = vmatpush1.msra.mxu1 %v7304_v39  ;;  %v9538_v26 = vld [vmem:[#allocation31_spill] sm:$0xff]  ;;  %v9539_v39 = vld [vmem:[#allocation32_spill] sm:$0xff] }
 0x826   :  { %3000 = vmatprep.subr.mxu0 %v7307_v61  ;;  %3071 = vmatprep.subr.mxu1 %v7310_v62  ;;  %v9540_v61 = vld [vmem:[#allocation33_spill] sm:$0xff]  ;;  %v9541_v62 = vld [vmem:[#allocation34_spill] sm:$0xff] }
 0x827   :  { %3001 = vmatpush1.msra.mxu0 %v7313_v20  ;;  %3072 = vmatpush1.msra.mxu1 %v7316_v21  ;;  %v9542_v20 = vld [vmem:[#allocation35_spill] sm:$0xff]  ;;  %v9543_v21 = vld [vmem:[#allocation36_spill] sm:$0xff] }
 0x828   :  { %3002 = vmatprep.subr.mxu0 %v7319_v45  ;;  %3073 = vmatprep.subr.mxu1 %v7322_v48  ;;  %v9544_v45 = vld [vmem:[#allocation37_spill] sm:$0xff]  ;;  %v9545_v48 = vld [vmem:[#allocation38_spill] sm:$0xff] }
 0x829   :  { %3003 = vmatpush1.msra.mxu0 %v7325_v18  ;;  %3074 = vmatpush1.msra.mxu1 %v7328_v50  ;;  %v9546_v18 = vld [vmem:[#allocation39_spill] sm:$0xff]  ;;  %v9547_v50 = vld [vmem:[#allocation40_spill] sm:$0xff] }
 0x82a   :  { %3004 = vmatprep.subr.mxu0 %v7331_v31  ;;  %3075 = vmatprep.subr.mxu1 %v7334_v42  ;;  %v9548_v31 = vld [vmem:[#allocation41_spill] sm:$0xff]  ;;  %v9549_v42 = vld [vmem:[#allocation42_spill] sm:$0xff] }
 0x82b   :  { %3005 = vmatpush1.msra.mxu0 %v9508_v27  ;;  %3038 = vmatprep.mubr.f32.mxu0 %v9509_v38  ;;  %v9570_v27 = vld [vmem:[#allocation63_spill] sm:$0xff] }
 0x82c   :  { %3076 = vmatpush1.msra.mxu1 %v9510_v13  ;;  %3109 = vmatprep.mubr.f32.mxu1 %v9509_v38  ;;  %v9571_v13 = vld [vmem:[#allocation64_spill] sm:$0xff] }
 0x82d   :  { %3039 = vmatmul.mubr.f32.vlgmr.msra.gmra.mxu0 %v7749_v41  ;;  %3110 = vmatmul.mubr.f32.vlgmr.msra.gmra.mxu1 %v7749_v41  ;;  %v9551_v41 = vld [vmem:[#allocation44_spill] sm:$0xff] }
 0x82e   :  { %3144 = vmatprep.subr.mxu0 %v9511_v15  ;;  %3215 = vmatprep.subr.mxu1 %v9512_v0  ;;  %v9572_v15 = vld [vmem:[#allocation65_spill] sm:$0xff]  ;;  %v9573_v0 = vld [vmem:[#allocation66_spill] sm:$0xff] }
 0x82f   :  { %3145 = vmatpush1.msra.mxu0 %v9513_v16  ;;  %3216 = vmatpush1.msra.mxu1 %v9514_v54  ;;  %v9574_v16 = vld [vmem:[#allocation67_spill] sm:$0xff]  ;;  %v9575_v54 = vld [vmem:[#allocation68_spill] sm:$0xff] }
 0x830   :  { %3146 = vmatprep.subr.mxu0 %v9515_v33  ;;  %3217 = vmatprep.subr.mxu1 %v9516_v19  ;;  %v9576_v33 = vld [vmem:[#allocation69_spill] sm:$0xff]  ;;  %v9577_v19 = vld [vmem:[#allocation70_spill] sm:$0xff] }
 0x831   :  { %3147 = vmatpush1.msra.mxu0 %v9517_v35  ;;  %3218 = vmatpush1.msra.mxu1 %v9518_v36  ;;  %v9578_v35 = vld [vmem:[#allocation71_spill] sm:$0xff]  ;;  %v9579_v36 = vld [vmem:[#allocation72_spill] sm:$0xff] }
 0x832   :  { %3148 = vmatprep.subr.mxu0 %v9519_v17  ;;  %3219 = vmatprep.subr.mxu1 %v9520_v37  ;;  %v9580_v17 = vld [vmem:[#allocation73_spill] sm:$0xff]  ;;  %v9581_v37 = vld [vmem:[#allocation74_spill] sm:$0xff] }
 0x833   :  { %3149 = vmatpush1.msra.mxu0 %v9521_v14  ;;  %3220 = vmatpush1.msra.mxu1 %v9522_v30  ;;  %v9582_v14 = vld [vmem:[#allocation75_spill] sm:$0xff]  ;;  %v9583_v30 = vld [vmem:[#allocation76_spill] sm:$0xff] }
 0x834   :  { %3150 = vmatprep.subr.mxu0 %v9523_v44  ;;  %3221 = vmatprep.subr.mxu1 %v9524_v25  ;;  %v9584_v44 = vld [vmem:[#allocation77_spill] sm:$0xff]  ;;  %v9585_v25 = vld [vmem:[#allocation78_spill] sm:$0xff] }
 0x835   :  { %3151 = vmatpush1.msra.mxu0 %v9525_v34  ;;  %3222 = vmatpush1.msra.mxu1 %v9526_v29  ;;  %v9586_v34 = vld [vmem:[#allocation79_spill] sm:$0xff]  ;;  %v9587_v29 = vld [vmem:[#allocation80_spill] sm:$0xff] }
 0x836   :  { %3152 = vmatprep.subr.mxu0 %v9527_v46  ;;  %3223 = vmatprep.subr.mxu1 %v9528_v47  ;;  %v9588_v46 = vld [vmem:[#allocation81_spill] sm:$0xff]  ;;  %v9589_v47 = vld [vmem:[#allocation82_spill] sm:$0xff] }
 0x837   :  { %3153 = vmatpush1.msra.mxu0 %v9529_v49  ;;  %3224 = vmatpush1.msra.mxu1 %v9530_v51  ;;  %v9590_v49 = vld [vmem:[#allocation83_spill] sm:$0xff]  ;;  %v9591_v51 = vld [vmem:[#allocation84_spill] sm:$0xff] }
 0x838   :  { %3154 = vmatprep.subr.mxu0 %v9531_v52  ;;  %3225 = vmatprep.subr.mxu1 %v9532_v55  ;;  %v9592_v52 = vld [vmem:[#allocation85_spill] sm:$0xff]  ;;  %v9593_v55 = vld [vmem:[#allocation86_spill] sm:$0xff] }
 0x839   :  { %3155 = vmatpush1.msra.mxu0 %v9533_v56  ;;  %3226 = vmatpush1.msra.mxu1 %v9534_v57  ;;  %v9594_v56 = vld [vmem:[#allocation87_spill] sm:$0xff]  ;;  %v9595_v57 = vld [vmem:[#allocation88_spill] sm:$0xff] }
 0x83a   :  { %3156 = vmatprep.subr.mxu0 %v9535_v11  ;;  %3227 = vmatprep.subr.mxu1 %v9536_v12  ;;  %v9596_v11 = vld [vmem:[#allocation89_spill] sm:$0xff]  ;;  %v9597_v12 = vld [vmem:[#allocation90_spill] sm:$0xff] }
 0x83b   :  { %3157 = vmatpush1.msra.mxu0 %v9537_v8  ;;  %3228 = vmatpush1.msra.mxu1 %v9538_v26  ;;  %v9598_v8 = vld [vmem:[#allocation91_spill] sm:$0xff]  ;;  %v9599_v26 = vld [vmem:[#allocation92_spill] sm:$0xff] }
 0x83c   :  { %3158 = vmatprep.subr.mxu0 %v9539_v39  ;;  %3229 = vmatprep.subr.mxu1 %v9540_v61  ;;  %v9600_v39 = vld [vmem:[#allocation93_spill] sm:$0xff]  ;;  %v9601_v61 = vld [vmem:[#allocation94_spill] sm:$0xff] }
 0x83d   :  { %3159 = vmatpush1.msra.mxu0 %v9541_v62  ;;  %3230 = vmatpush1.msra.mxu1 %v9542_v20  ;;  %v9602_v62 = vld [vmem:[#allocation95_spill] sm:$0xff]  ;;  %v9603_v20 = vld [vmem:[#allocation96_spill] sm:$0xff] }
 0x83e   :  { %3160 = vmatprep.subr.mxu0 %v9543_v21  ;;  %3231 = vmatprep.subr.mxu1 %v9544_v45  ;;  %v9604_v21 = vld [vmem:[#allocation97_spill] sm:$0xff]  ;;  %v9605_v45 = vld [vmem:[#allocation98_spill] sm:$0xff] }
 0x83f   :  { %3161 = vmatpush1.msra.mxu0 %v9545_v48  ;;  %3232 = vmatpush1.msra.mxu1 %v9546_v18  ;;  %v9606_v48 = vld [vmem:[#allocation99_spill] sm:$0xff]  ;;  %v9607_v18 = vld [vmem:[#allocation100_spill] sm:$0xff] }
 0x840   :  { %3162 = vmatprep.subr.mxu0 %v9547_v50  ;;  %3233 = vmatprep.subr.mxu1 %v9548_v31  ;;  %v9608_v50 = vld [vmem:[#allocation101_spill] sm:$0xff]  ;;  %v9609_v31 = vld [vmem:[#allocation102_spill] sm:$0xff] }
 0x841   :  { %3163 = vmatpush1.msra.mxu0 %v9549_v42  ;;  %3234 = vmatpush1.msra.mxu1 %v9550_v40  ;;  %v9610_v42 = vld [vmem:[#allocation103_spill] sm:$0xff]  ;;  %v9611_v40 = vld [vmem:[#allocation104_spill] sm:$0xff] }
 0x842   :  { %3164 = vmatprep.subr.mxu0 %v9551_v41  ;;  %3235 = vmatprep.subr.mxu1 %v9552_v60  ;;  %v9612_v41 = vld [vmem:[#allocation105_spill] sm:$0xff]  ;;  %v9613_v60 = vld [vmem:[#allocation106_spill] sm:$0xff] }
 0x843   :  { %3165 = vmatpush1.msra.mxu0 %v9553_v22  ;;  %3236 = vmatpush1.msra.mxu1 %v9554_v10  ;;  %v9614_v22 = vld [vmem:[#allocation107_spill] sm:$0xff]  ;;  %v9615_v10 = vld [vmem:[#allocation108_spill] sm:$0xff] }
 0x844   :  { %3166 = vmatprep.subr.mxu0 %v9555_v28  ;;  %3237 = vmatprep.subr.mxu1 %v9556_v32  ;;  %v9616_v28 = vld [vmem:[#allocation109_spill] sm:$0xff]  ;;  %v9617_v32 = vld [vmem:[#allocation110_spill] sm:$0xff] }
 0x845   :  { %3167 = vmatpush1.msra.mxu0 %v9557_v53  ;;  %3238 = vmatpush1.msra.mxu1 %v9558_v59  ;;  %v9618_v53 = vld [vmem:[#allocation111_spill] sm:$0xff]  ;;  %v9619_v59 = vld [vmem:[#allocation112_spill] sm:$0xff] }
 0x846   :  { %3168 = vmatprep.subr.mxu0 %v9559_v3  ;;  %3239 = vmatprep.subr.mxu1 %v9560_v6  ;;  %v9620_v3 = vld [vmem:[#allocation113_spill] sm:$0xff]  ;;  %v9621_v6 = vld [vmem:[#allocation114_spill] sm:$0xff] }
 0x847   :  { %3169 = vmatpush1.msra.mxu0 %v9561_v58  ;;  %3240 = vmatpush1.msra.mxu1 %v9562_v43  ;;  %v9622_v58 = vld [vmem:[#allocation115_spill] sm:$0xff]  ;;  %v9623_v43 = vld [vmem:[#allocation116_spill] sm:$0xff] }
 0x848   :  { %3170 = vmatprep.subr.mxu0 %v9563_v7  ;;  %3241 = vmatprep.subr.mxu1 %v9564_v23  ;;  %v9624_v7 = vld [vmem:[#allocation117_spill] sm:$0xff]  ;;  %v9625_v23 = vld [vmem:[#allocation118_spill] sm:$0xff] }
 0x849   :  { %3171 = vmatpush1.msra.mxu0 %v9565_v63  ;;  %3242 = vmatpush1.msra.mxu1 %v9566_v24  ;;  %v9626_v63 = vld [vmem:[#allocation119_spill] sm:$0xff]  ;;  %v9627_v24 = vld [vmem:[#allocation120_spill] sm:$0xff] }
 0x84a   :  { %3172 = vmatprep.subr.mxu0 %v9567_v4  ;;  %3243 = vmatprep.subr.mxu1 %v9568_v5  ;;  %v9628_v4 = vld [vmem:[#allocation121_spill] sm:$0xff]  ;;  %v9629_v5 = vld [vmem:[#allocation122_spill] sm:$0xff] }
 0x84b   :  { %3173 = vmatpush1.msra.mxu0 %v9569_v1  ;;  %3244 = vmatpush1.msra.mxu1 %v9570_v27  ;;  %v9630_v1 = vld [vmem:[#allocation123_spill] sm:$0xff]  ;;  %v9631_v27 = vld [vmem:[#allocation124_spill] sm:$0xff] }
 0x84c   :  { %3174 = vmatprep.subr.mxu0 %v9571_v13  ;;  %3245 = vmatprep.subr.mxu1 %v9572_v15  ;;  %v9632_v13 = vld [vmem:[#allocation125_spill] sm:$0xff]  ;;  %v9633_v15 = vld [vmem:[#allocation126_spill] sm:$0xff] }
 0x84d   :  { %3175 = vmatpush1.msra.mxu0 %v9573_v0  ;;  %3246 = vmatpush1.msra.mxu1 %v9574_v16  ;;  %v9634_v0 = vld [vmem:[#allocation127_spill] sm:$0xff]  ;;  %v9635_v16 = vld [vmem:[#allocation128_spill] sm:$0xff] }
 0x84e   :  { %3176 = vmatprep.subr.mxu0 %v9575_v54  ;;  %3247 = vmatprep.subr.mxu1 %v9576_v33  ;;  %v9636_v54 = vld [vmem:[#allocation129_spill] sm:$0xff]  ;;  %v9637_v33 = vld [vmem:[#allocation130_spill] sm:$0xff] }
 0x84f   :  { %3177 = vmatpush2.msra.mxu0 %v9577_v19  ;;  %3248 = vmatpush2.msra.mxu1 %v9578_v35  ;;  %v9638_v19 = vld [vmem:[#allocation131_spill] sm:$0xff] }
 0x850   :  { %3178 = vmatprep.subr.mxu0 %v9579_v36  ;;  %3249 = vmatprep.subr.mxu1 %v9580_v17  ;;  %v9639_v36 = vld [vmem:[#allocation16_spill] sm:$0xff] }
 0x851   :  { %3179 = vmatpush2.msra.mxu0 %v9581_v37  ;;  %3250 = vmatpush2.msra.mxu1 %v9582_v14 }
 0x852   :  { %3180 = vmatprep.subr.mxu0 %v9583_v30  ;;  %3251 = vmatprep.subr.mxu1 %v9584_v44  ;;  %v9640_v30 = vld [vmem:[#allocation17_spill] sm:$0xff] }
 0x853   :  { %3181 = vmatpush2.msra.mxu0 %v9585_v25  ;;  %3252 = vmatpush2.msra.mxu1 %v9586_v34 }
 0x854   :  { %3182 = vmatprep.subr.mxu0 %v9587_v29  ;;  %3253 = vmatprep.subr.mxu1 %v9588_v46  ;;  %v9641_v29 = vld [vmem:[#allocation18_spill] sm:$0xff] }
 0x855   :  { %3183 = vmatpush2.msra.mxu0 %v9589_v47  ;;  %3254 = vmatpush2.msra.mxu1 %v9590_v49 }
 0x856   :  { %3184 = vmatprep.subr.mxu0 %v9591_v51  ;;  %3255 = vmatprep.subr.mxu1 %v9592_v52  ;;  %v9642_v52 = vld [vmem:[#allocation19_spill] sm:$0xff] }
 0x857   :  { %3185 = vmatpush2.msra.mxu0 %v9593_v55  ;;  %3256 = vmatpush2.msra.mxu1 %v9594_v56 }
 0x858   :  { %3186 = vmatprep.subr.mxu0 %v9595_v57  ;;  %3257 = vmatprep.subr.mxu1 %v9596_v11 }
 0x859   :  { %3187 = vmatpush2.msra.mxu0 %v9597_v12  ;;  %3258 = vmatpush2.msra.mxu1 %v9598_v8 }
 0x85a   :  { %3188 = vmatprep.subr.mxu0 %v9599_v26  ;;  %3259 = vmatprep.subr.mxu1 %v9600_v39  ;;  %v9643_v39 = vld [vmem:[#allocation171_spill] sm:$0xff] }
 0x85b   :  { %3189 = vmatpush2.msra.mxu0 %v9601_v61  ;;  %3260 = vmatpush2.msra.mxu1 %v9602_v62 }
 0x85c   :  { %3190 = vmatprep.subr.mxu0 %v9603_v20  ;;  %3261 = vmatprep.subr.mxu1 %v9604_v21 }
 0x85d   :  { %3191 = vmatpush2.msra.mxu0 %v9605_v45  ;;  %3262 = vmatpush2.msra.mxu1 %v9606_v48  ;;  %v9644_v48 = vld [vmem:[#allocation173_spill] sm:$0xff] }
 0x85e   :  { %3192 = vmatprep.subr.mxu0 %v9607_v18  ;;  %3263 = vmatprep.subr.mxu1 %v9608_v50 }
 0x85f   :  { %3193 = vmatpush2.msra.mxu0 %v9609_v31  ;;  %3264 = vmatpush2.msra.mxu1 %v9610_v42 }
 0x860   :  { %3194 = vmatprep.subr.mxu0 %v9611_v40  ;;  %3265 = vmatprep.subr.mxu1 %v9612_v41 }
 0x861   :  { %3195 = vmatpush2.msra.mxu0 %v9613_v60  ;;  %3266 = vmatpush2.msra.mxu1 %v9614_v22  ;;  %v9645_v22 = vld [vmem:[#allocation172_spill] sm:$0xff] }
 0x862   :  { %3196 = vmatprep.subr.mxu0 %v9615_v10  ;;  %3267 = vmatprep.subr.mxu1 %v9616_v28 }
 0x863   :  { %3197 = vmatpush2.msra.mxu0 %v9617_v32  ;;  %3268 = vmatpush2.msra.mxu1 %v9618_v53  ;;  %v9646_v53 = vld [vmem:[#allocation174_spill] sm:$0xff] }
 0x864   :  { %3198 = vmatprep.subr.mxu0 %v9619_v59  ;;  %3269 = vmatprep.subr.mxu1 %v9620_v3 }
 0x865   :  { %3199 = vmatpush2.msra.mxu0 %v9621_v6  ;;  %3270 = vmatpush2.msra.mxu1 %v9622_v58 }
 0x866   :  { %3200 = vmatprep.subr.mxu0 %v9623_v43  ;;  %3271 = vmatprep.subr.mxu1 %v9624_v7 }
 0x867   :  { %3201 = vmatpush2.msra.mxu0 %v9625_v23  ;;  %3272 = vmatpush2.msra.mxu1 %v9626_v63 }
 0x868   :  { %3202 = vmatprep.subr.mxu0 %v9627_v24  ;;  %3273 = vmatprep.subr.mxu1 %v9628_v4 }
 0x869   :  { %3203 = vmatpush2.msra.mxu0 %v9629_v5  ;;  %3274 = vmatpush2.msra.mxu1 %v9630_v1 }
 0x86a   :  { %3204 = vmatprep.subr.mxu0 %v9631_v27  ;;  %3275 = vmatprep.subr.mxu1 %v9632_v13 }
 0x86b   :  { %3205 = vmatpush2.msra.mxu0 %v9633_v15  ;;  %3276 = vmatpush2.msra.mxu1 %v9634_v0 }
 0x86c   :  { %3206 = vmatprep.subr.mxu0 %v9635_v16  ;;  %3277 = vmatprep.subr.mxu1 %v9636_v54 }
 0x86d   :  { %3207 = vmatpush2.msra.mxu0 %v9637_v33  ;;  %3278 = vmatpush2.msra.mxu1 %v9638_v19  ;;  %v3325_v33 = vld [vmem:[#allocation10 + $0x78] sm:$0xff]  ;;  %v3324_v19 = vld [vmem:[#allocation10 + $0x70] sm:$0xff] }
 0x86e   :  { %3507 = vmatprep.subr.mxu0 %v9509_v38 }
 0x8cc   :  { %v2874_v35 = vpop.f32.mrf.mxu0  ;;  %v2945_v34 = vpop.f32.mrf.mxu1 }
 0x8cd   :  { %v2875_v17 = vadd.f32 %v2874_v35, %v9639_v36  ;;  %v2946_v46 = vadd.f32 %v2945_v34, %v9641_v29  ;;  %v3323_v35 = vld [vmem:[#allocation10 + $0x68] sm:$0xff]  ;;  %v3316_v34 = vld [vmem:[#allocation10 + $0x30] sm:$0xff] }
 0x8ce   :  { %v2876_v37 = vpop.f32.mrf.mxu0  ;;  %v2947_v47 = vpop.f32.mrf.mxu1 }
 0x8cf   :  { %v3480_v14 = vmul.f32 -1.442695, %v2875_v17  ;;  %v2877_v44 = vadd.f32 %v2876_v37, %v9640_v30  ;;  %v3482_v49 = vmul.f32 -1.442695, %v2946_v46  ;;  %v2948_v55 = vadd.f32 %v2947_v47, %v9642_v52  ;;  %v3321_v17 = vld [vmem:[#allocation10 + $0x58] sm:$0xff]  ;;  %v3320_v37 = vld [vmem:[#allocation10 + $0x50] sm:$0xff] }
 0x8d0   :  { %v3315_v46 = vld [vmem:[#allocation10 + $0x28] sm:$0xff]  ;;  %v3314_v47 = vld [vmem:[#allocation10 + $0x20] sm:$0xff] }
 0x8d1   :  { %3762 = vpow2.f32 %v3480_v14  ;;  %v3481_v25 = vmul.f32 -1.442695, %v2877_v44  ;;  %v3319_v14 = vld [vmem:[#allocation10 + $0x48] sm:$0xff]  ;;  %v3318_v44 = vld [vmem:[#allocation10 + $0x40] sm:$0xff] }
 0x8d3   :  { %3764 = vpow2.f32 %v3481_v25  ;;  %v3317_v25 = vld [vmem:[#allocation10 + $0x38] sm:$0xff] }
 0x8d4   :  { %3766 = vpow2.f32 %v3482_v49  ;;  %v3313_v49 = vld [vmem:[#allocation10 + $0x18] sm:$0xff] }
 0x8de   :  { %v3763_v51 = vpop.eup %3762 }
 0x8df   :  { %v2959_v56 = vadd.f32 1.0, %v3763_v51  ;;  %v3312_v51 = vld [vmem:[#allocation10 + $0x10] sm:$0xff] }
 0x8e0   :  { %v3765_v57 = vpop.eup %3764 }
 0x8e1   :  { %3768 = vrcp.f32 %v2959_v56  ;;  %v2960_v11 = vadd.f32 1.0, %v3765_v57  ;;  %v3767_v12 = vpop.eup %3766  ;;  %v3310_v56 = vld [vmem:[#allocation10] sm:$0xff] }
 0x8e2   :  { %3770 = vtanh.f32 %v2948_v55  ;;  %v2961_v50 = vadd.f32 1.0, %v3767_v12  ;;  %v3311_v55 = vld [vmem:[#allocation10 + $0x8] sm:$0xff] }
 0x8e3   :  { %3772 = vrcp.f32 %v2960_v11 }
 0x8ed   :  { %v3040_v8 = vpop.f32.mrf.mxu0  ;;  %v3111_v60 = vpop.f32.mrf.mxu1 }
 0x8ee   :  { %v3769_v26 = vpop.eup %3768  ;;  %v3116_v61 = vadd.f32 %v3040_v8, %v9643_v39  ;;  %v3118_v10 = vadd.f32 %v3111_v60, %v9645_v22 }
 0x8ef   :  { %v3771_v62 = vpop.eup %3770  ;;  %v3042_v20 = vpop.f32.mrf.mxu0 }
 0x8f0   :  { %v3773_v21 = vpop.eup %3772  ;;  %v3483_v45 = vmul.f32 -1.442695, %v3116_v61  ;;  %v3117_v18 = vadd.f32 %v3042_v20, %v9644_v48  ;;  %v2970_v42 = vmul.f32 %v3771_v62, %v3769_v26  ;;  %v3113_v28 = vpop.f32.mrf.mxu1  ;;  %v3485_v32 = vmul.f32 -1.442695, %v3118_v10 }
 0x8f1   :  { %v2969_v31 = vmul.f32 %v3773_v21, %v7740_v2  ;;  %v3119_v59 = vadd.f32 %v3113_v28, %v9646_v53 }
 0x8f2   :  { %3774 = vpow2.f32 %v3483_v45  ;;  %v3484_v40 = vmul.f32 -1.442695, %v3117_v18 }
 0x8f3   :  { %v7937_v41 = vadd.f32 %v2970_v42, %v2969_v31 }
 0x8f4   :  { %3776 = vpow2.f32 %v3484_v40 }
 0x8f5   :  { %3778 = vrcp.f32 %v2961_v50 }
 0x8f6   :  { %3780 = vtanh.f32 %v7937_v41 }
 0x8f7   :  { %3782 = vpow2.f32 %v3485_v32  ;;  %v3489_v32 = vld [vmem:[%s7977_s7] ss:$0 sm:$0xff] }
 0x8f8   :  { %3784 = vtanh.f32 %v3119_v59 }
 0x8ff   :  { %v3775_v3 = vpop.eup %3774 }
 0x900   :  { %v3129_v6 = vadd.f32 1.0, %v3775_v3 }
 0x901   :  { %v3777_v2 = vpop.eup %3776 }
 0x902   :  { %v3779_v58 = vpop.eup %3778  ;;  %3786 = vrcp.f32 %v3129_v6  ;;  %v3130_v43 = vadd.f32 1.0, %v3777_v2 }
 0x903   :  { %v3781_v7 = vpop.eup %3780 }
 0x904   :  { %3788 = vrcp.f32 %v3130_v43  ;;  %v2973_v23 = vmul.f32 %v3781_v7, %v3779_v58  ;;  %v3783_v63 = vpop.eup %3782 }
 0x905   :  { %v3785_v24 = vpop.eup %3784  ;;  %v3131_v27 = vadd.f32 1.0, %v3783_v63 }
 0x906   :  { %3208 = vmatprep.mubr.f32.mxu0 %v2973_v23  ;;  %3279 = vmatprep.mubr.f32.mxu1 %v2973_v23 }
 0x907   :  { %3790 = vrcp.f32 %v3131_v27 }
 0x90f   :  { %v3787_v4 = vpop.eup %3786 }
 0x910   :  { %v3140_v5 = vmul.f32 %v3787_v4, %v3785_v24 }
 0x911   :  { %v3789_v1 = vpop.eup %3788 }
 0x912   :  { %v3139_v13 = vmul.f32 %v3789_v1, %v7746_v9  ;;  %v3322_v9 = vld [vmem:[#allocation10 + $0x60] sm:$0xff] }
 0x914   :  { %v3141_v15 = vadd.f32 %v3140_v5, %v3139_v13  ;;  %v3791_v0 = vpop.eup %3790 }
 0x916   :  { %3792 = vtanh.f32 %v3141_v15 }
 0x923   :  { %v3793_v16 = vpop.eup %3792 }
 0x924   :  { %v3143_v54 = vmul.f32 %v3793_v16, %v3791_v0 }
 0x926   :  { %3209 = vmatmul.mubr.f32.vlgmr.msra.gmra.mxu0 %v3143_v54  ;;  %3280 = vmatmul.mubr.f32.vlgmr.msra.gmra.mxu1 %v3143_v54 }
 0x927   :  { %3508 = vmatpush3.msra.mxu0 %v3325_v33  ;;  %3539 = vmatprep.mubr.msk.f32.mxu0 %vm4542_vm2, %v9509_v38 }
 0x928   :  { %3509 = vmatprep.subr.mxu0 %v9509_v38 }
 0x929   :  { %3510 = vmatpush3.msra.mxu0 %v3324_v19 }
 0x92a   :  { %3511 = vmatprep.subr.mxu0 %v9509_v38 }
 0x92b   :  { %3512 = vmatpush3.msra.mxu0 %v3323_v35 }
 0x92c   :  { %3513 = vmatprep.subr.mxu0 %v9509_v38 }
 0x92d   :  { %3514 = vmatpush3.msra.mxu0 %v3322_v9 }
 0x92e   :  { %3515 = vmatprep.subr.mxu0 %v9509_v38 }
 0x92f   :  { %3516 = vmatpush3.msra.mxu0 %v3321_v17 }
 0x930   :  { %3517 = vmatprep.subr.mxu0 %v9509_v38 }
 0x931   :  { %3518 = vmatpush3.msra.mxu0 %v3320_v37 }
 0x932   :  { %3519 = vmatprep.subr.mxu0 %v9509_v38 }
 0x933   :  { %3520 = vmatpush3.msra.mxu0 %v3319_v14 }
 0x934   :  { %3521 = vmatprep.subr.mxu0 %v9509_v38 }
 0x935   :  { %3522 = vmatpush3.msra.mxu0 %v3318_v44 }
 0x936   :  { %3523 = vmatprep.subr.mxu0 %v9509_v38 }
 0x937   :  { %3524 = vmatpush3.msra.mxu0 %v3317_v25 }
 0x938   :  { %3525 = vmatprep.subr.mxu0 %v9509_v38 }
 0x939   :  { %3526 = vmatpush3.msra.mxu0 %v3316_v34 }
 0x93a   :  { %3527 = vmatprep.subr.mxu0 %v9509_v38 }
 0x93b   :  { %3528 = vmatpush3.msra.mxu0 %v3315_v46 }
 0x93c   :  { %3529 = vmatprep.subr.mxu0 %v9509_v38 }
 0x93d   :  { %3530 = vmatpush3.msra.mxu0 %v3314_v47 }
 0x93e   :  { %3531 = vmatprep.subr.mxu0 %v9509_v38 }
 0x93f   :  { %3532 = vmatpush3.msra.mxu0 %v3313_v49 }
 0x940   :  { %3533 = vmatprep.subr.mxu0 %v9509_v38 }
 0x941   :  { %3534 = vmatpush3.msra.mxu0 %v3312_v51 }
 0x942   :  { %3535 = vmatprep.subr.mxu0 %v9509_v38 }
 0x943   :  { %3536 = vmatpush3.msra.mxu0 %v3311_v55 }
 0x944   :  { %3537 = vmatprep.subr.mxu0 %v9509_v38 }
 0x945   :  { %3538 = vmatpush3.msra.mxu0 %v3310_v56 }
 0x9e6   :  { %v3210_v57 = vpop.f32.mrf.mxu0  ;;  %v3281_v61 = vpop.f32.mrf.mxu1 }
 0x9e7   :  { %v3211_v11 = vadd.f32 %v3210_v57, %v9639_v36  ;;  %v3282_v62 = vadd.f32 %v3281_v61, %v9641_v29 }
 0x9e8   :  { %v3212_v12 = vpop.f32.mrf.mxu0  ;;  %v3283_v20 = vpop.f32.mrf.mxu1 }
 0x9e9   :  { %v3486_v8 = vmul.f32 -1.442695, %v3211_v11  ;;  %v3213_v26 = vadd.f32 %v3212_v12, %v9640_v30  ;;  %v3488_v21 = vmul.f32 -1.442695, %v3282_v62  ;;  %v3284_v48 = vadd.f32 %v3283_v20, %v9642_v52 }
 0x9eb   :  { %3794 = vpow2.f32 %v3486_v8  ;;  %v3487_v39 = vmul.f32 -1.442695, %v3213_v26 }
 0x9ed   :  { %3796 = vpow2.f32 %v3487_v39 }
 0x9ee   :  { %3798 = vpow2.f32 %v3488_v21 }
 0x9f8   :  { %v3795_v45 = vpop.eup %3794 }
 0x9f9   :  { %v3295_v38 = vadd.f32 1.0, %v3795_v45 }
 0x9fa   :  { %v3797_v18 = vpop.eup %3796 }
 0x9fb   :  { %3800 = vrcp.f32 %v3295_v38  ;;  %v3296_v36 = vadd.f32 1.0, %v3797_v18  ;;  %v3799_v50 = vpop.eup %3798 }
 0x9fc   :  { %3802 = vtanh.f32 %v3284_v48  ;;  %v3297_v40 = vadd.f32 1.0, %v3799_v50 }
 0x9fd   :  { %3804 = vrcp.f32 %v3296_v36 }
 0x9fe   :  { %3806 = vrcp.f32 %v3297_v40 }
 0xa08   :  { %v3801_v30 = vpop.eup %3800 }
 0xa09   :  { %v3803_v31 = vpop.eup %3802 }
 0xa0a   :  { %v3805_v42 = vpop.eup %3804  ;;  %v3306_v29 = vmul.f32 %v3803_v31, %v3801_v30 }
 0xa0b   :  { %v3305_v60 = vmul.f32 %v3805_v42, %v7937_v41  ;;  %v3807_v10 = vpop.eup %3806 }
 0xa0d   :  { %v3307_v22 = vadd.f32 %v3306_v29, %v3305_v60 }
 0xa0f   :  { %3808 = vtanh.f32 %v3307_v22 }
 0xa1c   :  { %v3809_v52 = vpop.eup %3808 }
 0xa1d   :  { %v3309_v28 = vmul.f32 %v3809_v52, %v3807_v10 }
 0xa1f   :  { %3540 = vmatmul.mubr.f32.vlgmr.msra.gmra.mxu0 %v3309_v28 }
 0xadf   :  { %v3399_v53 = vpop.f32.mrf.mxu0 }
 0xae0   :  { %v3400_v59 = vadd.f32 %v3489_v32, %v3399_v53 }
 0xae1   :  { %v3541_v3 = vpop.f32.mrf.mxu0 }
 0xae2   :  { %3403 = vst [vmem:[#allocation11] sm:$0xff] %v3400_v59 }
 0xae3   :  { %4515 = shalt.err (!%p4512_p1)
}
 0xae4   :  { %3413 = dma.vmem_to_hbm [thread:$0]  %s3411_s12, 128, %s7978_s8, [#allocation4]  }
 0xae5   :  { %4530 = dma.done.wait [#allocation4], 128  }
 0xae6   :  { %4531 = vsyncadd [#allocation4], 4294967168 }
 0xae7   :  { %3417 = vsyncpa [#allocation3], 1 }
 0xae8   :  { %3418 = vsyncpa [#allocation6], 1 }
 0xae9   :  { %3419 = vsyncpa [#allocation9], 1 }
 0xaea   :  { %3420 = vsyncpa [#allocation4], 1 }

</bundles_post_ra>
